<compile_context>
chip_gen: v6e
topology: v6e:2x2x1
jax: 0.10.0
libtpu: 0.0.40
codegen_flags: <defaults>
</compile_context>

<pallas_src>
import numpy as np

import jax
import jax.numpy as jnp
from jax.experimental import pallas as pl
from jax.experimental.pallas import tpu as pltpu


# ----------------------------------------------------------------------------
# Fused kernel: one block of B images per grid step.  All activations are kept
# as values (vregs / compiler-managed VMEM), never round-tripped through HBM.
# Layouts:
#   x_ref : (2, B*12, 5*28*cin)  rows = (h-parity, b, pooled-h), lanes = (kh,w,ci)
#   conv1 : lanes = wpar*128 + w1p*8 + c1   (even/odd output width in the halves)
#   conv2 : lanes = wpar*128 + w2p*16 + c2
#   fc    : 128-lane padded (120 / 84 valid)
# ----------------------------------------------------------------------------
def _lenet_kernel(x_ref, m1_ref, b1_ref, m2_ref, b2_ref,
                  wf1_ref, bf1_ref, wf2_ref, bf2_ref, o_ref):
    f32 = jnp.float32
    bf16 = jnp.bfloat16
    B = x_ref.shape[1] // 12

    # ---- conv1 (5x5 valid, cin->8): two big dots, one per output-row parity --
    c1e = jnp.dot(x_ref[0], m1_ref[...], preferred_element_type=f32)  # (B*12,256)
    c1o = jnp.dot(x_ref[1], m1_ref[...], preferred_element_type=f32)  # (B*12,256)
    # maxpool1 2x2: h-pool = max of the two parity slabs,
    #               w-pool = max of the two aligned 128-lane halves.
    hp1 = jnp.maximum(c1e, c1o)
    p1 = jnp.maximum(hp1[:, :128], hp1[:, 128:])                      # (B*12,128)
    p1 = jnp.maximum(p1 + b1_ref[...], 0.0)                           # bias+ReLU
    p1 = p1.reshape(B, 12, 128)

    # ---- conv2 (5x5 valid, 8->16): 5 banded dots, M = B*8 ------------------
    acc2 = None
    for kh in range(5):
        lhs = p1[:, kh:kh + 8, :].reshape(B * 8, 128).astype(bf16)
        t = jnp.dot(lhs, m2_ref[kh], preferred_element_type=f32)      # (B*8,256)
        acc2 = t if acc2 is None else acc2 + t
    # maxpool2 2x2: w-pool across the aligned halves, h-pool over row pairs.
    wp2 = jnp.maximum(acc2[:, :128], acc2[:, 128:])                   # (B*8,128)
    p2 = jnp.max(wp2.reshape(B * 4, 2, 128), axis=1)                  # (B*4,128)
    p2 = jnp.maximum(p2 + b2_ref[...], 0.0)                           # bias+ReLU
    p2 = p2.reshape(B, 4, 128)

    # ---- fc1 + ReLU (PyTorch NCHW-flatten folded into wf1 at prep time) ----
    h1 = None
    for r in range(4):
        t = jnp.dot(p2[:, r, :].astype(bf16), wf1_ref[r],
                    preferred_element_type=f32)                       # (B,128)
        h1 = t if h1 is None else h1 + t
    h1 = jnp.maximum(h1 + bf1_ref[...], 0.0).astype(bf16)

    # ---- fc2 + ReLU, lane-dense (128-padded) store --------------------------
    h2 = jnp.dot(h1, wf2_ref[...], preferred_element_type=f32) + bf2_ref[...]
    o_ref[...] = jnp.maximum(h2, 0.0)                                 # (B,128)


# ----------------------------------------------------------------------------
# One-time parameter repacking (hoisted out of the forward path).
# ----------------------------------------------------------------------------
def prep_params(params):
    w1 = np.asarray(params["conv1_w"], np.float32)   # (8, cin, 5, 5)
    b1 = np.asarray(params["conv1_b"], np.float32)   # (8,)
    w2 = np.asarray(params["conv2_w"], np.float32)   # (16, 8, 5, 5)
    b2 = np.asarray(params["conv2_b"], np.float32)   # (16,)
    f1 = np.asarray(params["fc1_w"], np.float32)     # (120, 256)
    g1 = np.asarray(params["fc1_b"], np.float32)     # (120,)
    f2 = np.asarray(params["fc2_w"], np.float32)     # (84, 120)
    g2 = np.asarray(params["fc2_b"], np.float32)     # (84,)
    cin = w1.shape[1]

    # conv1 banded matrix: rows = im2col lanes (kh, w_in, ci); columns split by
    # output-width parity (even w -> lanes 0..95, odd w -> lanes 128..223).
    K1 = 5 * 28 * cin
    m1f = np.zeros((K1, 256), np.float32)
    for kh in range(5):
        for kw in range(5):
            for w in range(24):
                row0 = kh * 28 * cin + (w + kw) * cin
                col0 = (w % 2) * 128 + (w // 2) * 8
                m1f[row0:row0 + cin, col0:col0 + 8] = w1[:, :, kh, kw].T
    b1t = np.zeros((1, 128), np.float32)
    b1t[0, :96] = np.tile(b1, 12)

    # conv2 banded matrices (one per kh): rows = pooled-conv1 lanes (w1p*8+c1),
    # columns split by output-width parity (even w2 -> 0..63, odd -> 128..191).
    m2f = np.zeros((5, 128, 256), np.float32)
    for kh in range(5):
        for kw in range(5):
            for wo in range(8):
                row0 = (wo + kw) * 8
                col0 = (wo % 2) * 128 + (wo // 2) * 16
                m2f[kh, row0:row0 + 8, col0:col0 + 16] = w2[:, :, kh, kw].T
    b2t = np.zeros((1, 128), np.float32)
    b2t[0, :64] = np.tile(b2, 4)

    # fc1: fold the PyTorch NCHW flatten (idx = c2*16 + h2p*4 + w2p) into a
    # per-pooled-row weight; pad lanes to 128 in and out.
    wf1 = np.zeros((4, 128, 128), np.float32)
    f1r = np.transpose(f1.reshape(120, 16, 4, 4), (2, 3, 1, 0))   # (h2p,w2p,c2,j)
    wf1[:, :64, :120] = f1r.reshape(4, 64, 120)
    bf1 = np.zeros((1, 128), np.float32)
    bf1[0, :120] = g1

    wf2 = np.zeros((128, 128), np.float32)
    wf2[:120, :84] = f2.T
    bf2 = np.zeros((1, 128), np.float32)
    bf2[0, :84] = g2

    bf = jnp.bfloat16
    return (jnp.asarray(m1f, bf), jnp.asarray(b1t),
            jnp.asarray(m2f, bf), jnp.asarray(b2t),
            jnp.asarray(wf1, bf), jnp.asarray(bf1),
            jnp.asarray(wf2, bf), jnp.asarray(bf2))


# ----------------------------------------------------------------------------
# Forward wrapper: batched single fused pallas_call.
# ----------------------------------------------------------------------------
def lenet_forward(x_nchw, prepped, block_b=32):
    N, cin, H, W = x_nchw.shape
    assert H == 28 and W == 28, "feature_dims = 16*4*4 implies 28x28 inputs"
    assert block_b % 8 == 0
    m1f, b1t, m2f, b2t, wf1, bf1, wf2, bf2 = prepped
    K1 = m1f.shape[0]
    assert K1 == 5 * 28 * cin

    # Pick the per-step batch block (large M + amortised step overhead).
    if N >= block_b:
        bb = block_b
    else:
        bb = N + (N % 2)           # single block; bb*12, bb*4 stay mult. of 8
    n_blk = pl.cdiv(N, bb)
    Np = n_blk * bb
    if Np != N:
        pad = jnp.zeros((Np - N, cin, H, W), x_nchw.dtype)
        x_nchw = jnp.concatenate([x_nchw, pad], axis=0)

    # Height-only im2col with the pool1 row-parity split baked in:
    #   xw[p, n*12 + q, kh*28*cin + w*cin + ci] = x[n, ci, 2*q + p + kh, w]
    x2d = jnp.transpose(x_nchw, (0, 2, 3, 1)).reshape(Np, 28, 28 * cin)
    planes = []
    for p in range(2):
        per_kh = [x2d[:, p + kh:p + kh + 24:2, :] for kh in range(5)]
        planes.append(jnp.concatenate(per_kh, axis=-1).reshape(Np * 12, K1))
    xw = jnp.stack(planes, axis=0).astype(jnp.bfloat16)    # (2, Np*12, K1)

    flops = 2 * Np * (2 * 12 * K1 * 256 + 5 * 8 * 128 * 256
                      + 4 * 128 * 128 + 128 * 128)
    bytes_accessed = int(xw.size * 2 + Np * 128 * 4
                         + sum(int(a.size) * a.dtype.itemsize
                               for a in (m1f, b1t, m2f, b2t, wf1, bf1, wf2, bf2)))

    out = pl.pallas_call(
        _lenet_kernel,
        out_shape=jax.ShapeDtypeStruct((Np, 128), jnp.float32),
        grid_spec=pltpu.PrefetchScalarGridSpec(
            num_scalar_prefetch=0,
            grid=(n_blk,),
            in_specs=[
                pl.BlockSpec((2, bb * 12, K1), lambda n: (0, n, 0)),
                pl.BlockSpec(m1f.shape, lambda n: (0, 0)),
                pl.BlockSpec(b1t.shape, lambda n: (0, 0)),
                pl.BlockSpec(m2f.shape, lambda n: (0, 0, 0)),
                pl.BlockSpec(b2t.shape, lambda n: (0, 0)),
                pl.BlockSpec(wf1.shape, lambda n: (0, 0, 0)),
                pl.BlockSpec(bf1.shape, lambda n: (0, 0)),
                pl.BlockSpec(wf2.shape, lambda n: (0, 0)),
                pl.BlockSpec(bf2.shape, lambda n: (0, 0)),
            ],
            out_specs=pl.BlockSpec((bb, 128), lambda n: (n, 0)),
        ),
        compiler_params=pltpu.CompilerParams(
            dimension_semantics=("parallel",)),
        cost_estimate=pl.CostEstimate(
            flops=flops, transcendentals=0, bytes_accessed=bytes_accessed),
    )(xw, m1f, b1t, m2f, b2t, wf1, bf1, wf2, bf2)
    return out[:N, :84]


# ----------------------------------------------------------------------------
# Pure-JAX reference (mirrors torch semantics) and init.
# ----------------------------------------------------------------------------
def _ref_forward(x, p):
    dn = ("NCHW", "OIHW", "NCHW")
    y = jax.lax.conv_general_dilated(x, p["conv1_w"], (1, 1), "VALID",
                                     dimension_numbers=dn)
    y = jnp.maximum(y + p["conv1_b"][None, :, None, None], 0.0)
    y = jax.lax.reduce_window(y, -jnp.inf, jax.lax.max,
                              (1, 1, 2, 2), (1, 1, 2, 2), "VALID")
    y = jax.lax.conv_general_dilated(y, p["conv2_w"], (1, 1), "VALID",
                                     dimension_numbers=dn)
    y = jnp.maximum(y + p["conv2_b"][None, :, None, None], 0.0)
    y = jax.lax.reduce_window(y, -jnp.inf, jax.lax.max,
                              (1, 1, 2, 2), (1, 1, 2, 2), "VALID")
    y = y.reshape(y.shape[0], -1)                      # NCHW flatten (c, h, w)
    y = jnp.maximum(y @ p["fc1_w"].T + p["fc1_b"][None, :], 0.0)
    y = jnp.maximum(y @ p["fc2_w"].T + p["fc2_b"][None, :], 0.0)
    return y


def init_params(key, n_channels):
    ks = jax.random.split(key, 8)

    def u(k, shape, fan_in):
        b = 1.0 / np.sqrt(fan_in)
        return jax.random.uniform(k, shape, jnp.float32, -b, b)

    return {
        "conv1_w": u(ks[0], (8, n_channels, 5, 5), n_channels * 25),
        "conv1_b": u(ks[1], (8,), n_channels * 25),
        "conv2_w": u(ks[2], (16, 8, 5, 5), 8 * 25),
        "conv2_b": u(ks[3], (16,), 8 * 25),
        "fc1_w": u(ks[4], (120, 256), 256),
        "fc1_b": u(ks[5], (120,), 256),
        "fc2_w": u(ks[6], (84, 120), 120),
        "fc2_b": u(ks[7], (84,), 120),
    }


if __name__ == "__main__":
    key = jax.random.PRNGKey(0)
    kx, kp = jax.random.split(key)

    n_channels = 3
    params = init_params(kp, n_channels)
    prepped = prep_params(params)                 # one-time weight repacking
    # 64 images of 28x28x3, processed as 2 grid steps of 32 (feeds 2 TCs).
    x = jax.random.normal(kx, (64, n_channels, 28, 28), jnp.float32)

    fwd = jax.jit(lenet_forward)
    out = jax.block_until_ready(fwd(x, prepped))
    assert out.shape == (64, 84), out.shape

    ref = jax.block_until_ready(_ref_forward(x, params))
    err = float(jnp.max(jnp.abs(out - ref)))
    # bf16 MXU inputs (weights + activations) with f32 accumulation.
    assert jnp.allclose(out, ref, rtol=3e-2, atol=3e-2), err

    print("KERNEL_OK")
</pallas_src>

<mosaic_0001>
module attributes {stable_mosaic.version = 11 : i64} {
  func.func @_lenet_kernel(%arg0: i32, %arg1: memref<2x384x420xbf16, #tpu.memory_space<vmem>>, %arg2: memref<420x256xbf16, #tpu.memory_space<vmem>>, %arg3: memref<1x128xf32, #tpu.memory_space<vmem>>, %arg4: memref<5x128x256xbf16, #tpu.memory_space<vmem>>, %arg5: memref<1x128xf32, #tpu.memory_space<vmem>>, %arg6: memref<4x128x128xbf16, #tpu.memory_space<vmem>>, %arg7: memref<1x128xf32, #tpu.memory_space<vmem>>, %arg8: memref<128x128xbf16, #tpu.memory_space<vmem>>, %arg9: memref<1x128xf32, #tpu.memory_space<vmem>>, %arg10: memref<32x128xf32, #tpu.memory_space<vmem>>) attributes {dimension_semantics = [#tpu.dimension_semantics<parallel>], iteration_bounds = array<i64: 2>, scalar_prefetch = 0 : i64, scratch_operands = 0 : i64, tpu.core_type = #tpu.core_type<tc>, window_params = [{transform_indices = @transform_0, window_bounds = array<i64: 2, 384, 420>}, {pipeline_mode = #tpu.pipeline_mode<synchronous>, transform_indices = @transform_1, window_bounds = array<i64: 420, 256>}, {pipeline_mode = #tpu.pipeline_mode<synchronous>, transform_indices = @transform_2, window_bounds = array<i64: 1, 128>}, {pipeline_mode = #tpu.pipeline_mode<synchronous>, transform_indices = @transform_3, window_bounds = array<i64: 5, 128, 256>}, {pipeline_mode = #tpu.pipeline_mode<synchronous>, transform_indices = @transform_4, window_bounds = array<i64: 1, 128>}, {pipeline_mode = #tpu.pipeline_mode<synchronous>, transform_indices = @transform_5, window_bounds = array<i64: 4, 128, 128>}, {pipeline_mode = #tpu.pipeline_mode<synchronous>, transform_indices = @transform_6, window_bounds = array<i64: 1, 128>}, {pipeline_mode = #tpu.pipeline_mode<synchronous>, transform_indices = @transform_7, window_bounds = array<i64: 128, 128>}, {pipeline_mode = #tpu.pipeline_mode<synchronous>, transform_indices = @transform_8, window_bounds = array<i64: 1, 128>}, {transform_indices = @transform_9, window_bounds = array<i64: 32, 128>}]} {
    %c0 = arith.constant 0 : index
    %c0_0 = arith.constant 0 : index
    %c0_1 = arith.constant 0 : index
    %0 = vector.load %arg1[%c0, %c0_0, %c0_1] : memref<2x384x420xbf16, #tpu.memory_space<vmem>>, vector<1x384x420xbf16>
    %1 = vector.shape_cast %0 : vector<1x384x420xbf16> to vector<384x420xbf16>
    %c0_2 = arith.constant 0 : index
    %c0_3 = arith.constant 0 : index
    %2 = vector.load %arg2[%c0_2, %c0_3] : memref<420x256xbf16, #tpu.memory_space<vmem>>, vector<420x256xbf16>
    %cst = arith.constant dense<0.000000e+00> : vector<384x256xf32>
    %3 = tpu.matmul %1, %2, %cst {dimension_numbers = #tpu.dot_dimension_numbers<[1], [0], [0], [1], [0, 0, 1, 1], [], []>} : vector<384x420xbf16>, vector<420x256xbf16>, vector<384x256xf32> -> vector<384x256xf32>
    %c1 = arith.constant 1 : index
    %c0_4 = arith.constant 0 : index
    %c0_5 = arith.constant 0 : index
    %4 = vector.load %arg1[%c1, %c0_4, %c0_5] : memref<2x384x420xbf16, #tpu.memory_space<vmem>>, vector<1x384x420xbf16>
    %5 = vector.shape_cast %4 : vector<1x384x420xbf16> to vector<384x420xbf16>
    %c0_6 = arith.constant 0 : index
    %c0_7 = arith.constant 0 : index
    %6 = vector.load %arg2[%c0_6, %c0_7] : memref<420x256xbf16, #tpu.memory_space<vmem>>, vector<420x256xbf16>
    %cst_8 = arith.constant dense<0.000000e+00> : vector<384x256xf32>
    %7 = tpu.matmul %5, %6, %cst_8 {dimension_numbers = #tpu.dot_dimension_numbers<[1], [0], [0], [1], [0, 0, 1, 1], [], []>} : vector<384x420xbf16>, vector<420x256xbf16>, vector<384x256xf32> -> vector<384x256xf32>
    %8 = arith.maximumf %3, %7 : vector<384x256xf32>
    %9 = vector.extract_strided_slice %8 {offsets = [0, 0], sizes = [384, 128], strides = [1, 1]} : vector<384x256xf32> to vector<384x128xf32>
    %10 = vector.extract_strided_slice %8 {offsets = [0, 128], sizes = [384, 128], strides = [1, 1]} : vector<384x256xf32> to vector<384x128xf32>
    %11 = arith.maximumf %9, %10 : vector<384x128xf32>
    %c0_9 = arith.constant 0 : index
    %c0_10 = arith.constant 0 : index
    %12 = vector.load %arg3[%c0_9, %c0_10] : memref<1x128xf32, #tpu.memory_space<vmem>>, vector<1x128xf32>
    %13 = vector.broadcast %12 : vector<1x128xf32> to vector<384x128xf32>
    %14 = arith.addf %11, %13 : vector<384x128xf32>
    %cst_11 = arith.constant 0.000000e+00 : f32
    %15 = vector.broadcast %cst_11 : f32 to vector<384x128xf32>
    %16 = arith.maximumf %14, %15 : vector<384x128xf32>
    %17 = vector.shape_cast %16 : vector<384x128xf32> to vector<32x12x128xf32>
    %18 = vector.extract_strided_slice %17 {offsets = [0, 0, 0], sizes = [32, 8, 128], strides = [1, 1, 1]} : vector<32x12x128xf32> to vector<32x8x128xf32>
    %19 = vector.shape_cast %18 : vector<32x8x128xf32> to vector<256x128xf32>
    %20 = arith.truncf %19 : vector<256x128xf32> to vector<256x128xbf16>
    %c0_12 = arith.constant 0 : index
    %c0_13 = arith.constant 0 : index
    %c0_14 = arith.constant 0 : index
    %21 = vector.load %arg4[%c0_12, %c0_13, %c0_14] : memref<5x128x256xbf16, #tpu.memory_space<vmem>>, vector<1x128x256xbf16>
    %22 = vector.shape_cast %21 : vector<1x128x256xbf16> to vector<128x256xbf16>
    %cst_15 = arith.constant dense<0.000000e+00> : vector<256x256xf32>
    %23 = tpu.matmul %20, %22, %cst_15 {dimension_numbers = #tpu.dot_dimension_numbers<[1], [0], [0], [1], [0, 0, 1, 1], [], []>} : vector<256x128xbf16>, vector<128x256xbf16>, vector<256x256xf32> -> vector<256x256xf32>
    %24 = vector.extract_strided_slice %17 {offsets = [0, 1, 0], sizes = [32, 8, 128], strides = [1, 1, 1]} : vector<32x12x128xf32> to vector<32x8x128xf32>
    %25 = vector.shape_cast %24 : vector<32x8x128xf32> to vector<256x128xf32>
    %26 = arith.truncf %25 : vector<256x128xf32> to vector<256x128xbf16>
    %c1_16 = arith.constant 1 : index
    %c0_17 = arith.constant 0 : index
    %c0_18 = arith.constant 0 : index
    %27 = vector.load %arg4[%c1_16, %c0_17, %c0_18] : memref<5x128x256xbf16, #tpu.memory_space<vmem>>, vector<1x128x256xbf16>
    %28 = vector.shape_cast %27 : vector<1x128x256xbf16> to vector<128x256xbf16>
    %cst_19 = arith.constant dense<0.000000e+00> : vector<256x256xf32>
    %29 = tpu.matmul %26, %28, %cst_19 {dimension_numbers = #tpu.dot_dimension_numbers<[1], [0], [0], [1], [0, 0, 1, 1], [], []>} : vector<256x128xbf16>, vector<128x256xbf16>, vector<256x256xf32> -> vector<256x256xf32>
    %30 = arith.addf %23, %29 : vector<256x256xf32>
    %31 = vector.extract_strided_slice %17 {offsets = [0, 2, 0], sizes = [32, 8, 128], strides = [1, 1, 1]} : vector<32x12x128xf32> to vector<32x8x128xf32>
    %32 = vector.shape_cast %31 : vector<32x8x128xf32> to vector<256x128xf32>
    %33 = arith.truncf %32 : vector<256x128xf32> to vector<256x128xbf16>
    %c2 = arith.constant 2 : index
    %c0_20 = arith.constant 0 : index
    %c0_21 = arith.constant 0 : index
    %34 = vector.load %arg4[%c2, %c0_20, %c0_21] : memref<5x128x256xbf16, #tpu.memory_space<vmem>>, vector<1x128x256xbf16>
    %35 = vector.shape_cast %34 : vector<1x128x256xbf16> to vector<128x256xbf16>
    %cst_22 = arith.constant dense<0.000000e+00> : vector<256x256xf32>
    %36 = tpu.matmul %33, %35, %cst_22 {dimension_numbers = #tpu.dot_dimension_numbers<[1], [0], [0], [1], [0, 0, 1, 1], [], []>} : vector<256x128xbf16>, vector<128x256xbf16>, vector<256x256xf32> -> vector<256x256xf32>
    %37 = arith.addf %30, %36 : vector<256x256xf32>
    %38 = vector.extract_strided_slice %17 {offsets = [0, 3, 0], sizes = [32, 8, 128], strides = [1, 1, 1]} : vector<32x12x128xf32> to vector<32x8x128xf32>
    %39 = vector.shape_cast %38 : vector<32x8x128xf32> to vector<256x128xf32>
    %40 = arith.truncf %39 : vector<256x128xf32> to vector<256x128xbf16>
    %c3 = arith.constant 3 : index
    %c0_23 = arith.constant 0 : index
    %c0_24 = arith.constant 0 : index
    %41 = vector.load %arg4[%c3, %c0_23, %c0_24] : memref<5x128x256xbf16, #tpu.memory_space<vmem>>, vector<1x128x256xbf16>
    %42 = vector.shape_cast %41 : vector<1x128x256xbf16> to vector<128x256xbf16>
    %cst_25 = arith.constant dense<0.000000e+00> : vector<256x256xf32>
    %43 = tpu.matmul %40, %42, %cst_25 {dimension_numbers = #tpu.dot_dimension_numbers<[1], [0], [0], [1], [0, 0, 1, 1], [], []>} : vector<256x128xbf16>, vector<128x256xbf16>, vector<256x256xf32> -> vector<256x256xf32>
    %44 = arith.addf %37, %43 : vector<256x256xf32>
    %45 = vector.extract_strided_slice %17 {offsets = [0, 4, 0], sizes = [32, 8, 128], strides = [1, 1, 1]} : vector<32x12x128xf32> to vector<32x8x128xf32>
    %46 = vector.shape_cast %45 : vector<32x8x128xf32> to vector<256x128xf32>
    %47 = arith.truncf %46 : vector<256x128xf32> to vector<256x128xbf16>
    %c4 = arith.constant 4 : index
    %c0_26 = arith.constant 0 : index
    %c0_27 = arith.constant 0 : index
    %48 = vector.load %arg4[%c4, %c0_26, %c0_27] : memref<5x128x256xbf16, #tpu.memory_space<vmem>>, vector<1x128x256xbf16>
    %49 = vector.shape_cast %48 : vector<1x128x256xbf16> to vector<128x256xbf16>
    %cst_28 = arith.constant dense<0.000000e+00> : vector<256x256xf32>
    %50 = tpu.matmul %47, %49, %cst_28 {dimension_numbers = #tpu.dot_dimension_numbers<[1], [0], [0], [1], [0, 0, 1, 1], [], []>} : vector<256x128xbf16>, vector<128x256xbf16>, vector<256x256xf32> -> vector<256x256xf32>
    %51 = arith.addf %44, %50 : vector<256x256xf32>
    %52 = vector.extract_strided_slice %51 {offsets = [0, 0], sizes = [256, 128], strides = [1, 1]} : vector<256x256xf32> to vector<256x128xf32>
    %53 = vector.extract_strided_slice %51 {offsets = [0, 128], sizes = [256, 128], strides = [1, 1]} : vector<256x256xf32> to vector<256x128xf32>
    %54 = arith.maximumf %52, %53 : vector<256x128xf32>
    %55 = vector.shape_cast %54 : vector<256x128xf32> to vector<128x2x128xf32>
    %cst_29 = arith.constant dense<0xFF800000> : vector<128x128xf32>
    %56 = vector.multi_reduction <maximumf>, %55, %cst_29 [1] : vector<128x2x128xf32> to vector<128x128xf32>
    %c0_30 = arith.constant 0 : index
    %c0_31 = arith.constant 0 : index
    %57 = vector.load %arg5[%c0_30, %c0_31] : memref<1x128xf32, #tpu.memory_space<vmem>>, vector<1x128xf32>
    %58 = vector.broadcast %57 : vector<1x128xf32> to vector<128x128xf32>
    %59 = arith.addf %56, %58 : vector<128x128xf32>
    %cst_32 = arith.constant 0.000000e+00 : f32
    %60 = vector.broadcast %cst_32 : f32 to vector<128x128xf32>
    %61 = arith.maximumf %59, %60 : vector<128x128xf32>
    %62 = vector.shape_cast %61 : vector<128x128xf32> to vector<32x4x128xf32>
    %63 = vector.extract_strided_slice %62 {offsets = [0, 0, 0], sizes = [32, 1, 128], strides = [1, 1, 1]} : vector<32x4x128xf32> to vector<32x1x128xf32>
    %64 = vector.shape_cast %63 : vector<32x1x128xf32> to vector<32x128xf32>
    %65 = arith.truncf %64 : vector<32x128xf32> to vector<32x128xbf16>
    %c0_33 = arith.constant 0 : index
    %c0_34 = arith.constant 0 : index
    %c0_35 = arith.constant 0 : index
    %66 = vector.load %arg6[%c0_33, %c0_34, %c0_35] : memref<4x128x128xbf16, #tpu.memory_space<vmem>>, vector<1x128x128xbf16>
    %67 = vector.shape_cast %66 : vector<1x128x128xbf16> to vector<128x128xbf16>
    %cst_36 = arith.constant dense<0.000000e+00> : vector<32x128xf32>
    %68 = tpu.matmul %65, %67, %cst_36 {dimension_numbers = #tpu.dot_dimension_numbers<[1], [0], [0], [1], [0, 0, 1, 1], [], []>} : vector<32x128xbf16>, vector<128x128xbf16>, vector<32x128xf32> -> vector<32x128xf32>
    %69 = vector.extract_strided_slice %62 {offsets = [0, 1, 0], sizes = [32, 1, 128], strides = [1, 1, 1]} : vector<32x4x128xf32> to vector<32x1x128xf32>
    %70 = vector.shape_cast %69 : vector<32x1x128xf32> to vector<32x128xf32>
    %71 = arith.truncf %70 : vector<32x128xf32> to vector<32x128xbf16>
    %c1_37 = arith.constant 1 : index
    %c0_38 = arith.constant 0 : index
    %c0_39 = arith.constant 0 : index
    %72 = vector.load %arg6[%c1_37, %c0_38, %c0_39] : memref<4x128x128xbf16, #tpu.memory_space<vmem>>, vector<1x128x128xbf16>
    %73 = vector.shape_cast %72 : vector<1x128x128xbf16> to vector<128x128xbf16>
    %cst_40 = arith.constant dense<0.000000e+00> : vector<32x128xf32>
    %74 = tpu.matmul %71, %73, %cst_40 {dimension_numbers = #tpu.dot_dimension_numbers<[1], [0], [0], [1], [0, 0, 1, 1], [], []>} : vector<32x128xbf16>, vector<128x128xbf16>, vector<32x128xf32> -> vector<32x128xf32>
    %75 = arith.addf %68, %74 : vector<32x128xf32>
    %76 = vector.extract_strided_slice %62 {offsets = [0, 2, 0], sizes = [32, 1, 128], strides = [1, 1, 1]} : vector<32x4x128xf32> to vector<32x1x128xf32>
    %77 = vector.shape_cast %76 : vector<32x1x128xf32> to vector<32x128xf32>
    %78 = arith.truncf %77 : vector<32x128xf32> to vector<32x128xbf16>
    %c2_41 = arith.constant 2 : index
    %c0_42 = arith.constant 0 : index
    %c0_43 = arith.constant 0 : index
    %79 = vector.load %arg6[%c2_41, %c0_42, %c0_43] : memref<4x128x128xbf16, #tpu.memory_space<vmem>>, vector<1x128x128xbf16>
    %80 = vector.shape_cast %79 : vector<1x128x128xbf16> to vector<128x128xbf16>
    %cst_44 = arith.constant dense<0.000000e+00> : vector<32x128xf32>
    %81 = tpu.matmul %78, %80, %cst_44 {dimension_numbers = #tpu.dot_dimension_numbers<[1], [0], [0], [1], [0, 0, 1, 1], [], []>} : vector<32x128xbf16>, vector<128x128xbf16>, vector<32x128xf32> -> vector<32x128xf32>
    %82 = arith.addf %75, %81 : vector<32x128xf32>
    %83 = vector.extract_strided_slice %62 {offsets = [0, 3, 0], sizes = [32, 1, 128], strides = [1, 1, 1]} : vector<32x4x128xf32> to vector<32x1x128xf32>
    %84 = vector.shape_cast %83 : vector<32x1x128xf32> to vector<32x128xf32>
    %85 = arith.truncf %84 : vector<32x128xf32> to vector<32x128xbf16>
    %c3_45 = arith.constant 3 : index
    %c0_46 = arith.constant 0 : index
    %c0_47 = arith.constant 0 : index
    %86 = vector.load %arg6[%c3_45, %c0_46, %c0_47] : memref<4x128x128xbf16, #tpu.memory_space<vmem>>, vector<1x128x128xbf16>
    %87 = vector.shape_cast %86 : vector<1x128x128xbf16> to vector<128x128xbf16>
    %cst_48 = arith.constant dense<0.000000e+00> : vector<32x128xf32>
    %88 = tpu.matmul %85, %87, %cst_48 {dimension_numbers = #tpu.dot_dimension_numbers<[1], [0], [0], [1], [0, 0, 1, 1], [], []>} : vector<32x128xbf16>, vector<128x128xbf16>, vector<32x128xf32> -> vector<32x128xf32>
    %89 = arith.addf %82, %88 : vector<32x128xf32>
    %c0_49 = arith.constant 0 : index
    %c0_50 = arith.constant 0 : index
    %90 = vector.load %arg7[%c0_49, %c0_50] : memref<1x128xf32, #tpu.memory_space<vmem>>, vector<1x128xf32>
    %91 = vector.broadcast %90 : vector<1x128xf32> to vector<32x128xf32>
    %92 = arith.addf %89, %91 : vector<32x128xf32>
    %cst_51 = arith.constant 0.000000e+00 : f32
    %93 = vector.broadcast %cst_51 : f32 to vector<32x128xf32>
    %94 = arith.maximumf %92, %93 : vector<32x128xf32>
    %95 = arith.truncf %94 : vector<32x128xf32> to vector<32x128xbf16>
    %c0_52 = arith.constant 0 : index
    %c0_53 = arith.constant 0 : index
    %96 = vector.load %arg8[%c0_52, %c0_53] : memref<128x128xbf16, #tpu.memory_space<vmem>>, vector<128x128xbf16>
    %cst_54 = arith.constant dense<0.000000e+00> : vector<32x128xf32>
    %97 = tpu.matmul %95, %96, %cst_54 {dimension_numbers = #tpu.dot_dimension_numbers<[1], [0], [0], [1], [0, 0, 1, 1], [], []>} : vector<32x128xbf16>, vector<128x128xbf16>, vector<32x128xf32> -> vector<32x128xf32>
    %c0_55 = arith.constant 0 : index
    %c0_56 = arith.constant 0 : index
    %98 = vector.load %arg9[%c0_55, %c0_56] : memref<1x128xf32, #tpu.memory_space<vmem>>, vector<1x128xf32>
    %99 = vector.broadcast %98 : vector<1x128xf32> to vector<32x128xf32>
    %100 = arith.addf %97, %99 : vector<32x128xf32>
    %cst_57 = arith.constant 0.000000e+00 : f32
    %101 = vector.broadcast %cst_57 : f32 to vector<32x128xf32>
    %102 = arith.maximumf %100, %101 : vector<32x128xf32>
    %c0_58 = arith.constant 0 : index
    %c0_59 = arith.constant 0 : index
    %103 = vector.load %arg10[%c0_58, %c0_59] : memref<32x128xf32, #tpu.memory_space<vmem>>, vector<32x128xf32>
    tpu.vector_store %arg10[%c0_58, %c0_59], %102 {strides = array<i32>} : memref<32x128xf32, #tpu.memory_space<vmem>>, vector<32x128xf32>,
    return
  }
  func.func @transform_0(%arg0: i32) -> (i32, i32, i32) {
    %c0_i32 = arith.constant 0 : i32
    %c0_i32_0 = arith.constant 0 : i32
    %c0_i32_1 = arith.constant 0 : i32
    return %c0_i32, %arg0, %c0_i32_0 : i32, i32, i32
  }
  func.func @transform_1(%arg0: i32) -> (i32, i32) {
    %c0_i32 = arith.constant 0 : i32
    %c0_i32_0 = arith.constant 0 : i32
    %c0_i32_1 = arith.constant 0 : i32
    return %c0_i32, %c0_i32_0 : i32, i32
  }
  func.func @transform_2(%arg0: i32) -> (i32, i32) {
    %c0_i32 = arith.constant 0 : i32
    %c0_i32_0 = arith.constant 0 : i32
    %c0_i32_1 = arith.constant 0 : i32
    return %c0_i32, %c0_i32_0 : i32, i32
  }
  func.func @transform_3(%arg0: i32) -> (i32, i32, i32) {
    %c0_i32 = arith.constant 0 : i32
    %c0_i32_0 = arith.constant 0 : i32
    %c0_i32_1 = arith.constant 0 : i32
    %c0_i32_2 = arith.constant 0 : i32
    return %c0_i32, %c0_i32_0, %c0_i32_1 : i32, i32, i32
  }
  func.func @transform_4(%arg0: i32) -> (i32, i32) {
    %c0_i32 = arith.constant 0 : i32
    %c0_i32_0 = arith.constant 0 : i32
    %c0_i32_1 = arith.constant 0 : i32
    return %c0_i32, %c0_i32_0 : i32, i32
  }
  func.func @transform_5(%arg0: i32) -> (i32, i32, i32) {
    %c0_i32 = arith.constant 0 : i32
    %c0_i32_0 = arith.constant 0 : i32
    %c0_i32_1 = arith.constant 0 : i32
    %c0_i32_2 = arith.constant 0 : i32
    return %c0_i32, %c0_i32_0, %c0_i32_1 : i32, i32, i32
  }
  func.func @transform_6(%arg0: i32) -> (i32, i32) {
    %c0_i32 = arith.constant 0 : i32
    %c0_i32_0 = arith.constant 0 : i32
    %c0_i32_1 = arith.constant 0 : i32
    return %c0_i32, %c0_i32_0 : i32, i32
  }
  func.func @transform_7(%arg0: i32) -> (i32, i32) {
    %c0_i32 = arith.constant 0 : i32
    %c0_i32_0 = arith.constant 0 : i32
    %c0_i32_1 = arith.constant 0 : i32
    return %c0_i32, %c0_i32_0 : i32, i32
  }
  func.func @transform_8(%arg0: i32) -> (i32, i32) {
    %c0_i32 = arith.constant 0 : i32
    %c0_i32_0 = arith.constant 0 : i32
    %c0_i32_1 = arith.constant 0 : i32
    return %c0_i32, %c0_i32_0 : i32, i32
  }
  func.func @transform_9(%arg0: i32) -> (i32, i32) {
    %c0_i32 = arith.constant 0 : i32
    %c0_i32_0 = arith.constant 0 : i32
    return %arg0, %c0_i32 : i32, i32
  }
}

</mosaic_0001>

<bundles_post_ra>
// kernel: lenet_forward.1
= control target key start
LH: loop header
LB: loop body
LE: loop exit
PB: predicated region body
PF: predicated region fallthrough
CT: control target
= control target key end

     0   :  { %14 = vsyncpa [#allocation4], 0  ;;  %s16111_s0 = inlined_call_operand.vmem [shape: bf16[2,768,420], index: 0, kind: input, shape index: {}]   ;;  %s16112_s1 = inlined_call_operand.vmem [shape: bf16[420,256], index: 1, kind: input, shape index: {}]   ;;  %s16113_s2 = inlined_call_operand.vmem [shape: f32[1,128], index: 2, kind: input, shape index: {}]   ;;  %s16114_s3 = inlined_call_operand.vmem [shape: bf16[5,128,256], index: 3, kind: input, shape index: {}]   ;;  %s16115_s4 = inlined_call_operand.vmem [shape: f32[1,128], index: 4, kind: input, shape index: {}]   ;;  %s16116_s5 = inlined_call_operand.vmem [shape: bf16[4,128,128], index: 5, kind: input, shape index: {}]   ;;  %s16117_s6 = inlined_call_operand.vmem [shape: f32[1,128], index: 6, kind: input, shape index: {}]   ;;  %s16118_s7 = inlined_call_operand.vmem [shape: bf16[128,128], index: 7, kind: input, shape index: {}]   ;;  %s16119_s8 = inlined_call_operand.vmem [shape: f32[1,128], index: 8, kind: input, shape index: {}]   ;;  %s16120_s9 = inlined_call_operand.hbm [shape: f32[64,128], index: 9, kind: output, shape index: {}]  }
   0x1   :  { %16 = vsyncpa [#allocation4 + $0x1], 0  ;;  %s11268_s30 = smov 0   ;;  %s11270_s10 = smov 0  }
   0x2   :  { %s11272_s11 = smov 0   ;;  %s11274_s12 = smov 0  }
   0x3 LB: > { %s9682_s13 = sadd.s32 4294967295, %s11211_s12   ;;  %s9683_s14 = sadd.s32 4294967294, %s11211_s12   ;;  %s11211_s12 = sphi %s11274_s12, %s16874_s12   ;;  %s11207_s11 = sphi %s11272_s11, %s16873_s11   ;;  %s11203_s10 = sphi %s11270_s10, %s16872_s10   ;;  %s11199_s30 = sphi %s11268_s30, %s16871_s30  }
   0x4   : > { %s11291_s15 = sadd.s32 1, %s11211_s12   ;;  %s29_s16 = sadd.s32 1, %s11207_s11 }
   0x5   : > { %s26_s17 = ssub.s32 %s11211_s12, %s11291_s15  ;;  %p36_p0 = scmp.ne.s32.totalorder %s11207_s11, %s11203_s10 }
   0x6   : > { %p27_p1 = scmp.eq.s32.totalorder %s26_s17, 0  ;;  %p37_p2 = scmp.eq.s32.totalorder %s11211_s12, 0 }
   0x7   : > { %p234_p3 = scmp.eq.s32.totalorder %s9682_s13, 1  ;;  %p239_p4 = scmp.ne.s32.totalorder %s11203_s10, %s11199_s30 }
   0x8   : > { %s11304_s18 = scalar_select %p27_p1, %s11207_s11, %s29_s16  }
   0x9   : > { %p38_p5 = por %p37_p2, %p36_p0  ;;  %p11306_p6 = por %p234_p3, %p36_p0 }
   0xa   : > { %p240_p7 = scmp.eq.s32.totalorder %s9683_s14, 1  ;;  %p9685_p9 = scmp.ge.s32.totalorder %s11211_s12, 2 }
   0xc   : > { %p11310_p8 = por %p240_p7, %p239_p4  ;;  %280 = sbr.rel (%p9685_p9) target bundleno = 118 (0x76), region = 48 }
  0x11   : > { %283 = sbr.rel (!%p38_p5) target bundleno = 118 (0x76), region = 52  ;;  %s285_s21 = sand.u32 (%p38_p5), 1, %s11207_s11  }
  0x12   : > { %s10422_s22 = smul.u32 (%p38_p5), 768, %s11211_s12 }
  0x13   : > { %s10573_s23 = smul.u32 (%p38_p5), 1536, %s285_s21 }
  0x14   : > { %s11322_s26 = scalar_lea.vmem (%p38_p5), %s16111_s0, %s10422_s22 }
  0x15   : > { %v304_v0 = vld [vmem:[%s11322_s26] sm:$0xff] (%p38_p5)  ;;  %v306_v1 = vld [vmem:[%s11322_s26 + $0x8] sm:$0xff] (%p38_p5)  ;;  %v308_v2 = vld [vmem:[%s11322_s26 + $0x10] sm:$0xff] (%p38_p5)  ;;  %s11327_s27 = scalar_lea.vmem (%p38_p5), [#allocation2], %s10573_s23 }
  0x16   : > { %305 = vst [vmem:[%s11327_s27] sm:$0xff] %v304_v0  ;;  %307 = vst [vmem:[%s11327_s27 + $0x8] sm:$0xff] %v306_v1  ;;  %v310_v3 = vld [vmem:[%s11322_s26 + $0x18] sm:$0xff]  ;;  %v312_v4 = vld [vmem:[%s11322_s26 + $0x20] sm:$0xff] }
  0x17   : > { %309 = vst [vmem:[%s11327_s27 + $0x10] sm:$0xff] %v308_v2  ;;  %v314_v5 = vld [vmem:[%s11322_s26 + $0x28] sm:$0xff]  ;;  %311 = vst [vmem:[%s11327_s27 + $0x18] sm:$0xff] %v310_v3  ;;  %v316_v6 = vld [vmem:[%s11322_s26 + $0x30] sm:$0xff] }
  0x18   : > { %313 = vst [vmem:[%s11327_s27 + $0x20] sm:$0xff] %v312_v4  ;;  %315 = vst [vmem:[%s11327_s27 + $0x28] sm:$0xff] %v314_v5  ;;  %v318_v7 = vld [vmem:[%s11322_s26 + $0x38] sm:$0xff]  ;;  %v320_v8 = vld [vmem:[%s11322_s26 + $0x40] sm:$0xff] }
  0x19   : > { %317 = vst [vmem:[%s11327_s27 + $0x30] sm:$0xff] %v316_v6  ;;  %319 = vst [vmem:[%s11327_s27 + $0x38] sm:$0xff] %v318_v7  ;;  %v322_v9 = vld [vmem:[%s11322_s26 + $0x48] sm:$0xff]  ;;  %v324_v10 = vld [vmem:[%s11322_s26 + $0x50] sm:$0xff] }
  0x1a   : > { %321 = vst [vmem:[%s11327_s27 + $0x40] sm:$0xff] %v320_v8  ;;  %v326_v11 = vld [vmem:[%s11322_s26 + $0x58] sm:$0xff]  ;;  %323 = vst [vmem:[%s11327_s27 + $0x48] sm:$0xff] %v322_v9  ;;  %v328_v12 = vld [vmem:[%s11322_s26 + $0x60] sm:$0xff] }
  0x1b   : > { %325 = vst [vmem:[%s11327_s27 + $0x50] sm:$0xff] %v324_v10  ;;  %327 = vst [vmem:[%s11327_s27 + $0x58] sm:$0xff] %v326_v11  ;;  %v330_v13 = vld [vmem:[%s11322_s26 + $0x68] sm:$0xff]  ;;  %v332_v14 = vld [vmem:[%s11322_s26 + $0x70] sm:$0xff] }
  0x1c   : > { %329 = vst [vmem:[%s11327_s27 + $0x60] sm:$0xff] %v328_v12  ;;  %331 = vst [vmem:[%s11327_s27 + $0x68] sm:$0xff] %v330_v13  ;;  %v334_v15 = vld [vmem:[%s11322_s26 + $0x78] sm:$0xff]  ;;  %v336_v16 = vld [vmem:[%s11322_s26 + $0x80] sm:$0xff] }
  0x1d   : > { %333 = vst [vmem:[%s11327_s27 + $0x70] sm:$0xff] %v332_v14  ;;  %v338_v17 = vld [vmem:[%s11322_s26 + $0x88] sm:$0xff]  ;;  %335 = vst [vmem:[%s11327_s27 + $0x78] sm:$0xff] %v334_v15  ;;  %v340_v18 = vld [vmem:[%s11322_s26 + $0x90] sm:$0xff] }
  0x1e   : > { %337 = vst [vmem:[%s11327_s27 + $0x80] sm:$0xff] %v336_v16  ;;  %339 = vst [vmem:[%s11327_s27 + $0x88] sm:$0xff] %v338_v17  ;;  %v342_v19 = vld [vmem:[%s11322_s26 + $0x98] sm:$0xff]  ;;  %v344_v20 = vld [vmem:[%s11322_s26 + $0xa0] sm:$0xff] }
  0x1f   : > { %341 = vst [vmem:[%s11327_s27 + $0x90] sm:$0xff] %v340_v18  ;;  %343 = vst [vmem:[%s11327_s27 + $0x98] sm:$0xff] %v342_v19  ;;  %v346_v21 = vld [vmem:[%s11322_s26 + $0xa8] sm:$0xff]  ;;  %v348_v22 = vld [vmem:[%s11322_s26 + $0xb0] sm:$0xff] }
  0x20   : > { %345 = vst [vmem:[%s11327_s27 + $0xa0] sm:$0xff] %v344_v20  ;;  %v350_v23 = vld [vmem:[%s11322_s26 + $0xb8] sm:$0xff]  ;;  %347 = vst [vmem:[%s11327_s27 + $0xa8] sm:$0xff] %v346_v21  ;;  %v352_v24 = vld [vmem:[%s11322_s26 + $0xc0] sm:$0xff] }
  0x21   : > { %349 = vst [vmem:[%s11327_s27 + $0xb0] sm:$0xff] %v348_v22  ;;  %351 = vst [vmem:[%s11327_s27 + $0xb8] sm:$0xff] %v350_v23  ;;  %v354_v25 = vld [vmem:[%s11322_s26 + $0xc8] sm:$0xff]  ;;  %v356_v26 = vld [vmem:[%s11322_s26 + $0xd0] sm:$0xff] }
  0x22   : > { %353 = vst [vmem:[%s11327_s27 + $0xc0] sm:$0xff] %v352_v24  ;;  %355 = vst [vmem:[%s11327_s27 + $0xc8] sm:$0xff] %v354_v25  ;;  %v358_v27 = vld [vmem:[%s11322_s26 + $0xd8] sm:$0xff]  ;;  %v360_v28 = vld [vmem:[%s11322_s26 + $0xe0] sm:$0xff] }
  0x23   : > { %357 = vst [vmem:[%s11327_s27 + $0xd0] sm:$0xff] %v356_v26  ;;  %v362_v29 = vld [vmem:[%s11322_s26 + $0xe8] sm:$0xff]  ;;  %359 = vst [vmem:[%s11327_s27 + $0xd8] sm:$0xff] %v358_v27  ;;  %v364_v30 = vld [vmem:[%s11322_s26 + $0xf0] sm:$0xff] }
  0x24   : > { %361 = vst [vmem:[%s11327_s27 + $0xe0] sm:$0xff] %v360_v28  ;;  %363 = vst [vmem:[%s11327_s27 + $0xe8] sm:$0xff] %v362_v29  ;;  %v366_v31 = vld [vmem:[%s11322_s26 + $0xf8] sm:$0xff]  ;;  %v368_v32 = vld [vmem:[%s11322_s26 + $0x100] sm:$0xff] }
  0x25   : > { %365 = vst [vmem:[%s11327_s27 + $0xf0] sm:$0xff] %v364_v30  ;;  %367 = vst [vmem:[%s11327_s27 + $0xf8] sm:$0xff] %v366_v31  ;;  %v370_v33 = vld [vmem:[%s11322_s26 + $0x108] sm:$0xff]  ;;  %v372_v34 = vld [vmem:[%s11322_s26 + $0x110] sm:$0xff] }
  0x26   : > { %369 = vst [vmem:[%s11327_s27 + $0x100] sm:$0xff] %v368_v32  ;;  %v374_v35 = vld [vmem:[%s11322_s26 + $0x118] sm:$0xff]  ;;  %371 = vst [vmem:[%s11327_s27 + $0x108] sm:$0xff] %v370_v33  ;;  %v376_v36 = vld [vmem:[%s11322_s26 + $0x120] sm:$0xff] }
  0x27   : > { %373 = vst [vmem:[%s11327_s27 + $0x110] sm:$0xff] %v372_v34  ;;  %375 = vst [vmem:[%s11327_s27 + $0x118] sm:$0xff] %v374_v35  ;;  %v378_v37 = vld [vmem:[%s11322_s26 + $0x128] sm:$0xff]  ;;  %v380_v38 = vld [vmem:[%s11322_s26 + $0x130] sm:$0xff] }
  0x28   : > { %377 = vst [vmem:[%s11327_s27 + $0x120] sm:$0xff] %v376_v36  ;;  %379 = vst [vmem:[%s11327_s27 + $0x128] sm:$0xff] %v378_v37  ;;  %v382_v39 = vld [vmem:[%s11322_s26 + $0x138] sm:$0xff]  ;;  %v384_v40 = vld [vmem:[%s11322_s26 + $0x140] sm:$0xff] }
  0x29   : > { %381 = vst [vmem:[%s11327_s27 + $0x130] sm:$0xff] %v380_v38  ;;  %v386_v41 = vld [vmem:[%s11322_s26 + $0x148] sm:$0xff]  ;;  %383 = vst [vmem:[%s11327_s27 + $0x138] sm:$0xff] %v382_v39  ;;  %v388_v42 = vld [vmem:[%s11322_s26 + $0x150] sm:$0xff] }
  0x2a   : > { %385 = vst [vmem:[%s11327_s27 + $0x140] sm:$0xff] %v384_v40  ;;  %387 = vst [vmem:[%s11327_s27 + $0x148] sm:$0xff] %v386_v41  ;;  %v390_v43 = vld [vmem:[%s11322_s26 + $0x158] sm:$0xff]  ;;  %v392_v44 = vld [vmem:[%s11322_s26 + $0x160] sm:$0xff] }
  0x2b   : > { %389 = vst [vmem:[%s11327_s27 + $0x150] sm:$0xff] %v388_v42  ;;  %391 = vst [vmem:[%s11327_s27 + $0x158] sm:$0xff] %v390_v43  ;;  %v394_v45 = vld [vmem:[%s11322_s26 + $0x168] sm:$0xff]  ;;  %v396_v46 = vld [vmem:[%s11322_s26 + $0x170] sm:$0xff] }
  0x2c   : > { %393 = vst [vmem:[%s11327_s27 + $0x160] sm:$0xff] %v392_v44  ;;  %v398_v47 = vld [vmem:[%s11322_s26 + $0x178] sm:$0xff]  ;;  %395 = vst [vmem:[%s11327_s27 + $0x168] sm:$0xff] %v394_v45  ;;  %v400_v48 = vld [vmem:[%s11322_s26 + $0x180] sm:$0xff] }
  0x2d   : > { %397 = vst [vmem:[%s11327_s27 + $0x170] sm:$0xff] %v396_v46  ;;  %399 = vst [vmem:[%s11327_s27 + $0x178] sm:$0xff] %v398_v47  ;;  %v402_v49 = vld [vmem:[%s11322_s26 + $0x188] sm:$0xff]  ;;  %v404_v50 = vld [vmem:[%s11322_s26 + $0x190] sm:$0xff] }
  0x2e   : > { %401 = vst [vmem:[%s11327_s27 + $0x180] sm:$0xff] %v400_v48  ;;  %403 = vst [vmem:[%s11327_s27 + $0x188] sm:$0xff] %v402_v49  ;;  %v406_v51 = vld [vmem:[%s11322_s26 + $0x198] sm:$0xff]  ;;  %v408_v52 = vld [vmem:[%s11322_s26 + $0x1a0] sm:$0xff] }
  0x2f   : > { %405 = vst [vmem:[%s11327_s27 + $0x190] sm:$0xff] %v404_v50  ;;  %v410_v53 = vld [vmem:[%s11322_s26 + $0x1a8] sm:$0xff]  ;;  %407 = vst [vmem:[%s11327_s27 + $0x198] sm:$0xff] %v406_v51  ;;  %v412_v54 = vld [vmem:[%s11322_s26 + $0x1b0] sm:$0xff] }
  0x30   : > { %409 = vst [vmem:[%s11327_s27 + $0x1a0] sm:$0xff] %v408_v52  ;;  %411 = vst [vmem:[%s11327_s27 + $0x1a8] sm:$0xff] %v410_v53  ;;  %v414_v55 = vld [vmem:[%s11322_s26 + $0x1b8] sm:$0xff]  ;;  %v416_v56 = vld [vmem:[%s11322_s26 + $0x1c0] sm:$0xff] }
  0x31   : > { %413 = vst [vmem:[%s11327_s27 + $0x1b0] sm:$0xff] %v412_v54  ;;  %415 = vst [vmem:[%s11327_s27 + $0x1b8] sm:$0xff] %v414_v55  ;;  %v418_v57 = vld [vmem:[%s11322_s26 + $0x1c8] sm:$0xff]  ;;  %v420_v58 = vld [vmem:[%s11322_s26 + $0x1d0] sm:$0xff] }
  0x32   : > { %417 = vst [vmem:[%s11327_s27 + $0x1c0] sm:$0xff] %v416_v56  ;;  %v422_v59 = vld [vmem:[%s11322_s26 + $0x1d8] sm:$0xff]  ;;  %419 = vst [vmem:[%s11327_s27 + $0x1c8] sm:$0xff] %v418_v57  ;;  %v424_v60 = vld [vmem:[%s11322_s26 + $0x1e0] sm:$0xff] }
  0x33   : > { %421 = vst [vmem:[%s11327_s27 + $0x1d0] sm:$0xff] %v420_v58  ;;  %423 = vst [vmem:[%s11327_s27 + $0x1d8] sm:$0xff] %v422_v59  ;;  %v426_v61 = vld [vmem:[%s11322_s26 + $0x1e8] sm:$0xff]  ;;  %v428_v62 = vld [vmem:[%s11322_s26 + $0x1f0] sm:$0xff] }
  0x34   : > { %425 = vst [vmem:[%s11327_s27 + $0x1e0] sm:$0xff] %v424_v60  ;;  %427 = vst [vmem:[%s11327_s27 + $0x1e8] sm:$0xff] %v426_v61  ;;  %v430_v63 = vld [vmem:[%s11322_s26 + $0x1f8] sm:$0xff]  ;;  %v432_v0 = vld [vmem:[%s11322_s26 + $0x200] sm:$0xff] }
  0x35   : > { %429 = vst [vmem:[%s11327_s27 + $0x1f0] sm:$0xff] %v428_v62  ;;  %v434_v1 = vld [vmem:[%s11322_s26 + $0x208] sm:$0xff]  ;;  %431 = vst [vmem:[%s11327_s27 + $0x1f8] sm:$0xff] %v430_v63  ;;  %v436_v2 = vld [vmem:[%s11322_s26 + $0x210] sm:$0xff] }
  0x36   : > { %433 = vst [vmem:[%s11327_s27 + $0x200] sm:$0xff] %v432_v0  ;;  %435 = vst [vmem:[%s11327_s27 + $0x208] sm:$0xff] %v434_v1  ;;  %v438_v3 = vld [vmem:[%s11322_s26 + $0x218] sm:$0xff]  ;;  %v440_v4 = vld [vmem:[%s11322_s26 + $0x220] sm:$0xff] }
  0x37   : > { %437 = vst [vmem:[%s11327_s27 + $0x210] sm:$0xff] %v436_v2  ;;  %439 = vst [vmem:[%s11327_s27 + $0x218] sm:$0xff] %v438_v3  ;;  %v442_v5 = vld [vmem:[%s11322_s26 + $0x228] sm:$0xff]  ;;  %v444_v6 = vld [vmem:[%s11322_s26 + $0x230] sm:$0xff] }
  0x38   : > { %441 = vst [vmem:[%s11327_s27 + $0x220] sm:$0xff] %v440_v4  ;;  %v446_v7 = vld [vmem:[%s11322_s26 + $0x238] sm:$0xff]  ;;  %443 = vst [vmem:[%s11327_s27 + $0x228] sm:$0xff] %v442_v5  ;;  %v448_v8 = vld [vmem:[%s11322_s26 + $0x240] sm:$0xff] }
  0x39   : > { %445 = vst [vmem:[%s11327_s27 + $0x230] sm:$0xff] %v444_v6  ;;  %447 = vst [vmem:[%s11327_s27 + $0x238] sm:$0xff] %v446_v7  ;;  %v450_v9 = vld [vmem:[%s11322_s26 + $0x248] sm:$0xff]  ;;  %v452_v10 = vld [vmem:[%s11322_s26 + $0x250] sm:$0xff] }
  0x3a   : > { %449 = vst [vmem:[%s11327_s27 + $0x240] sm:$0xff] %v448_v8  ;;  %451 = vst [vmem:[%s11327_s27 + $0x248] sm:$0xff] %v450_v9  ;;  %v454_v11 = vld [vmem:[%s11322_s26 + $0x258] sm:$0xff]  ;;  %v456_v12 = vld [vmem:[%s11322_s26 + $0x260] sm:$0xff] }
  0x3b   : > { %453 = vst [vmem:[%s11327_s27 + $0x250] sm:$0xff] %v452_v10  ;;  %v458_v13 = vld [vmem:[%s11322_s26 + $0x268] sm:$0xff]  ;;  %455 = vst [vmem:[%s11327_s27 + $0x258] sm:$0xff] %v454_v11  ;;  %v460_v14 = vld [vmem:[%s11322_s26 + $0x270] sm:$0xff] }
  0x3c   : > { %457 = vst [vmem:[%s11327_s27 + $0x260] sm:$0xff] %v456_v12  ;;  %459 = vst [vmem:[%s11327_s27 + $0x268] sm:$0xff] %v458_v13  ;;  %v462_v15 = vld [vmem:[%s11322_s26 + $0x278] sm:$0xff]  ;;  %v464_v16 = vld [vmem:[%s11322_s26 + $0x280] sm:$0xff] }
  0x3d   : > { %461 = vst [vmem:[%s11327_s27 + $0x270] sm:$0xff] %v460_v14  ;;  %463 = vst [vmem:[%s11327_s27 + $0x278] sm:$0xff] %v462_v15  ;;  %v466_v17 = vld [vmem:[%s11322_s26 + $0x288] sm:$0xff]  ;;  %v468_v18 = vld [vmem:[%s11322_s26 + $0x290] sm:$0xff] }
  0x3e   : > { %465 = vst [vmem:[%s11327_s27 + $0x280] sm:$0xff] %v464_v16  ;;  %v470_v19 = vld [vmem:[%s11322_s26 + $0x298] sm:$0xff]  ;;  %467 = vst [vmem:[%s11327_s27 + $0x288] sm:$0xff] %v466_v17  ;;  %v472_v20 = vld [vmem:[%s11322_s26 + $0x2a0] sm:$0xff] }
  0x3f   : > { %469 = vst [vmem:[%s11327_s27 + $0x290] sm:$0xff] %v468_v18  ;;  %471 = vst [vmem:[%s11327_s27 + $0x298] sm:$0xff] %v470_v19  ;;  %v474_v21 = vld [vmem:[%s11322_s26 + $0x2a8] sm:$0xff]  ;;  %v476_v22 = vld [vmem:[%s11322_s26 + $0x2b0] sm:$0xff] }
  0x40   : > { %473 = vst [vmem:[%s11327_s27 + $0x2a0] sm:$0xff] %v472_v20  ;;  %475 = vst [vmem:[%s11327_s27 + $0x2a8] sm:$0xff] %v474_v21  ;;  %v478_v23 = vld [vmem:[%s11322_s26 + $0x2b8] sm:$0xff]  ;;  %v480_v24 = vld [vmem:[%s11322_s26 + $0x2c0] sm:$0xff] }
  0x41   : > { %477 = vst [vmem:[%s11327_s27 + $0x2b0] sm:$0xff] %v476_v22  ;;  %v482_v25 = vld [vmem:[%s11322_s26 + $0x2c8] sm:$0xff]  ;;  %479 = vst [vmem:[%s11327_s27 + $0x2b8] sm:$0xff] %v478_v23  ;;  %v484_v26 = vld [vmem:[%s11322_s26 + $0x2d0] sm:$0xff] }
  0x42   : > { %481 = vst [vmem:[%s11327_s27 + $0x2c0] sm:$0xff] %v480_v24  ;;  %483 = vst [vmem:[%s11327_s27 + $0x2c8] sm:$0xff] %v482_v25  ;;  %v486_v27 = vld [vmem:[%s11322_s26 + $0x2d8] sm:$0xff]  ;;  %v488_v28 = vld [vmem:[%s11322_s26 + $0x2e0] sm:$0xff] }
  0x43   : > { %485 = vst [vmem:[%s11327_s27 + $0x2d0] sm:$0xff] %v484_v26  ;;  %487 = vst [vmem:[%s11327_s27 + $0x2d8] sm:$0xff] %v486_v27  ;;  %v490_v29 = vld [vmem:[%s11322_s26 + $0x2e8] sm:$0xff]  ;;  %v492_v30 = vld [vmem:[%s11322_s26 + $0x2f0] sm:$0xff] }
  0x44   : > { %489 = vst [vmem:[%s11327_s27 + $0x2e0] sm:$0xff] %v488_v28  ;;  %v494_v31 = vld [vmem:[%s11322_s26 + $0x2f8] sm:$0xff]  ;;  %491 = vst [vmem:[%s11327_s27 + $0x2e8] sm:$0xff] %v490_v29  ;;  %v496_v32 = vld [vmem:[%s11322_s26 + $0x600] sm:$0xff] }
  0x45   : > { %493 = vst [vmem:[%s11327_s27 + $0x2f0] sm:$0xff] %v492_v30  ;;  %495 = vst [vmem:[%s11327_s27 + $0x2f8] sm:$0xff] %v494_v31  ;;  %v498_v33 = vld [vmem:[%s11322_s26 + $0x608] sm:$0xff]  ;;  %v500_v34 = vld [vmem:[%s11322_s26 + $0x610] sm:$0xff] }
  0x46   : > { %497 = vst [vmem:[%s11327_s27 + $0x300] sm:$0xff] %v496_v32  ;;  %499 = vst [vmem:[%s11327_s27 + $0x308] sm:$0xff] %v498_v33  ;;  %v502_v35 = vld [vmem:[%s11322_s26 + $0x618] sm:$0xff]  ;;  %v504_v36 = vld [vmem:[%s11322_s26 + $0x620] sm:$0xff] }
  0x47   : > { %501 = vst [vmem:[%s11327_s27 + $0x310] sm:$0xff] %v500_v34  ;;  %v506_v37 = vld [vmem:[%s11322_s26 + $0x628] sm:$0xff]  ;;  %503 = vst [vmem:[%s11327_s27 + $0x318] sm:$0xff] %v502_v35  ;;  %v508_v38 = vld [vmem:[%s11322_s26 + $0x630] sm:$0xff] }
  0x48   : > { %505 = vst [vmem:[%s11327_s27 + $0x320] sm:$0xff] %v504_v36  ;;  %507 = vst [vmem:[%s11327_s27 + $0x328] sm:$0xff] %v506_v37  ;;  %v510_v39 = vld [vmem:[%s11322_s26 + $0x638] sm:$0xff]  ;;  %v512_v40 = vld [vmem:[%s11322_s26 + $0x640] sm:$0xff] }
  0x49   : > { %509 = vst [vmem:[%s11327_s27 + $0x330] sm:$0xff] %v508_v38  ;;  %511 = vst [vmem:[%s11327_s27 + $0x338] sm:$0xff] %v510_v39  ;;  %v514_v41 = vld [vmem:[%s11322_s26 + $0x648] sm:$0xff]  ;;  %v516_v42 = vld [vmem:[%s11322_s26 + $0x650] sm:$0xff] }
  0x4a   : > { %513 = vst [vmem:[%s11327_s27 + $0x340] sm:$0xff] %v512_v40  ;;  %v518_v43 = vld [vmem:[%s11322_s26 + $0x658] sm:$0xff]  ;;  %515 = vst [vmem:[%s11327_s27 + $0x348] sm:$0xff] %v514_v41  ;;  %v520_v44 = vld [vmem:[%s11322_s26 + $0x660] sm:$0xff] }
  0x4b   : > { %517 = vst [vmem:[%s11327_s27 + $0x350] sm:$0xff] %v516_v42  ;;  %519 = vst [vmem:[%s11327_s27 + $0x358] sm:$0xff] %v518_v43  ;;  %v522_v45 = vld [vmem:[%s11322_s26 + $0x668] sm:$0xff]  ;;  %v524_v46 = vld [vmem:[%s11322_s26 + $0x670] sm:$0xff] }
  0x4c   : > { %521 = vst [vmem:[%s11327_s27 + $0x360] sm:$0xff] %v520_v44  ;;  %523 = vst [vmem:[%s11327_s27 + $0x368] sm:$0xff] %v522_v45  ;;  %v526_v47 = vld [vmem:[%s11322_s26 + $0x678] sm:$0xff]  ;;  %v528_v48 = vld [vmem:[%s11322_s26 + $0x680] sm:$0xff] }
  0x4d   : > { %525 = vst [vmem:[%s11327_s27 + $0x370] sm:$0xff] %v524_v46  ;;  %v530_v49 = vld [vmem:[%s11322_s26 + $0x688] sm:$0xff]  ;;  %527 = vst [vmem:[%s11327_s27 + $0x378] sm:$0xff] %v526_v47  ;;  %v532_v50 = vld [vmem:[%s11322_s26 + $0x690] sm:$0xff] }
  0x4e   : > { %529 = vst [vmem:[%s11327_s27 + $0x380] sm:$0xff] %v528_v48  ;;  %531 = vst [vmem:[%s11327_s27 + $0x388] sm:$0xff] %v530_v49  ;;  %v534_v51 = vld [vmem:[%s11322_s26 + $0x698] sm:$0xff]  ;;  %v536_v52 = vld [vmem:[%s11322_s26 + $0x6a0] sm:$0xff] }
  0x4f   : > { %533 = vst [vmem:[%s11327_s27 + $0x390] sm:$0xff] %v532_v50  ;;  %535 = vst [vmem:[%s11327_s27 + $0x398] sm:$0xff] %v534_v51  ;;  %v538_v53 = vld [vmem:[%s11322_s26 + $0x6a8] sm:$0xff]  ;;  %v540_v54 = vld [vmem:[%s11322_s26 + $0x6b0] sm:$0xff] }
  0x50   : > { %537 = vst [vmem:[%s11327_s27 + $0x3a0] sm:$0xff] %v536_v52  ;;  %v542_v55 = vld [vmem:[%s11322_s26 + $0x6b8] sm:$0xff]  ;;  %539 = vst [vmem:[%s11327_s27 + $0x3a8] sm:$0xff] %v538_v53  ;;  %v544_v56 = vld [vmem:[%s11322_s26 + $0x6c0] sm:$0xff] }
  0x51   : > { %541 = vst [vmem:[%s11327_s27 + $0x3b0] sm:$0xff] %v540_v54  ;;  %543 = vst [vmem:[%s11327_s27 + $0x3b8] sm:$0xff] %v542_v55  ;;  %v546_v57 = vld [vmem:[%s11322_s26 + $0x6c8] sm:$0xff]  ;;  %v548_v58 = vld [vmem:[%s11322_s26 + $0x6d0] sm:$0xff] }
  0x52   : > { %545 = vst [vmem:[%s11327_s27 + $0x3c0] sm:$0xff] %v544_v56  ;;  %547 = vst [vmem:[%s11327_s27 + $0x3c8] sm:$0xff] %v546_v57  ;;  %v550_v59 = vld [vmem:[%s11322_s26 + $0x6d8] sm:$0xff]  ;;  %v552_v60 = vld [vmem:[%s11322_s26 + $0x6e0] sm:$0xff] }
  0x53   : > { %549 = vst [vmem:[%s11327_s27 + $0x3d0] sm:$0xff] %v548_v58  ;;  %v554_v61 = vld [vmem:[%s11322_s26 + $0x6e8] sm:$0xff]  ;;  %551 = vst [vmem:[%s11327_s27 + $0x3d8] sm:$0xff] %v550_v59  ;;  %v556_v62 = vld [vmem:[%s11322_s26 + $0x6f0] sm:$0xff] }
  0x54   : > { %553 = vst [vmem:[%s11327_s27 + $0x3e0] sm:$0xff] %v552_v60  ;;  %555 = vst [vmem:[%s11327_s27 + $0x3e8] sm:$0xff] %v554_v61  ;;  %v558_v63 = vld [vmem:[%s11322_s26 + $0x6f8] sm:$0xff]  ;;  %v560_v0 = vld [vmem:[%s11322_s26 + $0x700] sm:$0xff] }
  0x55   : > { %557 = vst [vmem:[%s11327_s27 + $0x3f0] sm:$0xff] %v556_v62  ;;  %559 = vst [vmem:[%s11327_s27 + $0x3f8] sm:$0xff] %v558_v63  ;;  %v562_v1 = vld [vmem:[%s11322_s26 + $0x708] sm:$0xff]  ;;  %v564_v2 = vld [vmem:[%s11322_s26 + $0x710] sm:$0xff] }
  0x56   : > { %561 = vst [vmem:[%s11327_s27 + $0x400] sm:$0xff] %v560_v0  ;;  %v566_v3 = vld [vmem:[%s11322_s26 + $0x718] sm:$0xff]  ;;  %563 = vst [vmem:[%s11327_s27 + $0x408] sm:$0xff] %v562_v1  ;;  %v568_v4 = vld [vmem:[%s11322_s26 + $0x720] sm:$0xff] }
  0x57   : > { %565 = vst [vmem:[%s11327_s27 + $0x410] sm:$0xff] %v564_v2  ;;  %567 = vst [vmem:[%s11327_s27 + $0x418] sm:$0xff] %v566_v3  ;;  %v570_v5 = vld [vmem:[%s11322_s26 + $0x728] sm:$0xff]  ;;  %v572_v6 = vld [vmem:[%s11322_s26 + $0x730] sm:$0xff] }
  0x58   : > { %569 = vst [vmem:[%s11327_s27 + $0x420] sm:$0xff] %v568_v4  ;;  %571 = vst [vmem:[%s11327_s27 + $0x428] sm:$0xff] %v570_v5  ;;  %v574_v7 = vld [vmem:[%s11322_s26 + $0x738] sm:$0xff]  ;;  %v576_v8 = vld [vmem:[%s11322_s26 + $0x740] sm:$0xff] }
  0x59   : > { %573 = vst [vmem:[%s11327_s27 + $0x430] sm:$0xff] %v572_v6  ;;  %v578_v9 = vld [vmem:[%s11322_s26 + $0x748] sm:$0xff]  ;;  %575 = vst [vmem:[%s11327_s27 + $0x438] sm:$0xff] %v574_v7  ;;  %v580_v10 = vld [vmem:[%s11322_s26 + $0x750] sm:$0xff] }
  0x5a   : > { %577 = vst [vmem:[%s11327_s27 + $0x440] sm:$0xff] %v576_v8  ;;  %579 = vst [vmem:[%s11327_s27 + $0x448] sm:$0xff] %v578_v9  ;;  %v582_v11 = vld [vmem:[%s11322_s26 + $0x758] sm:$0xff]  ;;  %v584_v12 = vld [vmem:[%s11322_s26 + $0x760] sm:$0xff] }
  0x5b   : > { %581 = vst [vmem:[%s11327_s27 + $0x450] sm:$0xff] %v580_v10  ;;  %583 = vst [vmem:[%s11327_s27 + $0x458] sm:$0xff] %v582_v11  ;;  %v586_v13 = vld [vmem:[%s11322_s26 + $0x768] sm:$0xff]  ;;  %v588_v14 = vld [vmem:[%s11322_s26 + $0x770] sm:$0xff] }
  0x5c   : > { %585 = vst [vmem:[%s11327_s27 + $0x460] sm:$0xff] %v584_v12  ;;  %v590_v15 = vld [vmem:[%s11322_s26 + $0x778] sm:$0xff]  ;;  %587 = vst [vmem:[%s11327_s27 + $0x468] sm:$0xff] %v586_v13  ;;  %v592_v16 = vld [vmem:[%s11322_s26 + $0x780] sm:$0xff] }
  0x5d   : > { %589 = vst [vmem:[%s11327_s27 + $0x470] sm:$0xff] %v588_v14  ;;  %591 = vst [vmem:[%s11327_s27 + $0x478] sm:$0xff] %v590_v15  ;;  %v594_v17 = vld [vmem:[%s11322_s26 + $0x788] sm:$0xff]  ;;  %v596_v18 = vld [vmem:[%s11322_s26 + $0x790] sm:$0xff] }
  0x5e   : > { %593 = vst [vmem:[%s11327_s27 + $0x480] sm:$0xff] %v592_v16  ;;  %595 = vst [vmem:[%s11327_s27 + $0x488] sm:$0xff] %v594_v17  ;;  %v598_v19 = vld [vmem:[%s11322_s26 + $0x798] sm:$0xff]  ;;  %v600_v20 = vld [vmem:[%s11322_s26 + $0x7a0] sm:$0xff] }
  0x5f   : > { %597 = vst [vmem:[%s11327_s27 + $0x490] sm:$0xff] %v596_v18  ;;  %v602_v21 = vld [vmem:[%s11322_s26 + $0x7a8] sm:$0xff]  ;;  %599 = vst [vmem:[%s11327_s27 + $0x498] sm:$0xff] %v598_v19  ;;  %v604_v22 = vld [vmem:[%s11322_s26 + $0x7b0] sm:$0xff] }
  0x60   : > { %601 = vst [vmem:[%s11327_s27 + $0x4a0] sm:$0xff] %v600_v20  ;;  %603 = vst [vmem:[%s11327_s27 + $0x4a8] sm:$0xff] %v602_v21  ;;  %v606_v23 = vld [vmem:[%s11322_s26 + $0x7b8] sm:$0xff]  ;;  %v608_v24 = vld [vmem:[%s11322_s26 + $0x7c0] sm:$0xff] }
  0x61   : > { %605 = vst [vmem:[%s11327_s27 + $0x4b0] sm:$0xff] %v604_v22  ;;  %607 = vst [vmem:[%s11327_s27 + $0x4b8] sm:$0xff] %v606_v23  ;;  %v610_v25 = vld [vmem:[%s11322_s26 + $0x7c8] sm:$0xff]  ;;  %v612_v26 = vld [vmem:[%s11322_s26 + $0x7d0] sm:$0xff] }
  0x62   : > { %609 = vst [vmem:[%s11327_s27 + $0x4c0] sm:$0xff] %v608_v24  ;;  %v614_v27 = vld [vmem:[%s11322_s26 + $0x7d8] sm:$0xff]  ;;  %611 = vst [vmem:[%s11327_s27 + $0x4c8] sm:$0xff] %v610_v25  ;;  %v616_v28 = vld [vmem:[%s11322_s26 + $0x7e0] sm:$0xff] }
  0x63   : > { %613 = vst [vmem:[%s11327_s27 + $0x4d0] sm:$0xff] %v612_v26  ;;  %615 = vst [vmem:[%s11327_s27 + $0x4d8] sm:$0xff] %v614_v27  ;;  %v618_v29 = vld [vmem:[%s11322_s26 + $0x7e8] sm:$0xff]  ;;  %v620_v30 = vld [vmem:[%s11322_s26 + $0x7f0] sm:$0xff] }
  0x64   : > { %617 = vst [vmem:[%s11327_s27 + $0x4e0] sm:$0xff] %v616_v28  ;;  %619 = vst [vmem:[%s11327_s27 + $0x4e8] sm:$0xff] %v618_v29  ;;  %v622_v31 = vld [vmem:[%s11322_s26 + $0x7f8] sm:$0xff]  ;;  %v624_v32 = vld [vmem:[%s11322_s26 + $0x800] sm:$0xff] }
  0x65   : > { %621 = vst [vmem:[%s11327_s27 + $0x4f0] sm:$0xff] %v620_v30  ;;  %v626_v33 = vld [vmem:[%s11322_s26 + $0x808] sm:$0xff]  ;;  %623 = vst [vmem:[%s11327_s27 + $0x4f8] sm:$0xff] %v622_v31  ;;  %v628_v34 = vld [vmem:[%s11322_s26 + $0x810] sm:$0xff] }
  0x66   : > { %625 = vst [vmem:[%s11327_s27 + $0x500] sm:$0xff] %v624_v32  ;;  %627 = vst [vmem:[%s11327_s27 + $0x508] sm:$0xff] %v626_v33  ;;  %v630_v35 = vld [vmem:[%s11322_s26 + $0x818] sm:$0xff]  ;;  %v632_v36 = vld [vmem:[%s11322_s26 + $0x820] sm:$0xff] }
  0x67   : > { %629 = vst [vmem:[%s11327_s27 + $0x510] sm:$0xff] %v628_v34  ;;  %631 = vst [vmem:[%s11327_s27 + $0x518] sm:$0xff] %v630_v35  ;;  %v634_v37 = vld [vmem:[%s11322_s26 + $0x828] sm:$0xff]  ;;  %v636_v38 = vld [vmem:[%s11322_s26 + $0x830] sm:$0xff] }
  0x68   : > { %633 = vst [vmem:[%s11327_s27 + $0x520] sm:$0xff] %v632_v36  ;;  %v638_v39 = vld [vmem:[%s11322_s26 + $0x838] sm:$0xff]  ;;  %635 = vst [vmem:[%s11327_s27 + $0x528] sm:$0xff] %v634_v37  ;;  %v640_v40 = vld [vmem:[%s11322_s26 + $0x840] sm:$0xff] }
  0x69   : > { %637 = vst [vmem:[%s11327_s27 + $0x530] sm:$0xff] %v636_v38  ;;  %639 = vst [vmem:[%s11327_s27 + $0x538] sm:$0xff] %v638_v39  ;;  %v642_v41 = vld [vmem:[%s11322_s26 + $0x848] sm:$0xff]  ;;  %v644_v42 = vld [vmem:[%s11322_s26 + $0x850] sm:$0xff] }
  0x6a   : > { %641 = vst [vmem:[%s11327_s27 + $0x540] sm:$0xff] %v640_v40  ;;  %643 = vst [vmem:[%s11327_s27 + $0x548] sm:$0xff] %v642_v41  ;;  %v646_v43 = vld [vmem:[%s11322_s26 + $0x858] sm:$0xff]  ;;  %v648_v44 = vld [vmem:[%s11322_s26 + $0x860] sm:$0xff] }
  0x6b   : > { %645 = vst [vmem:[%s11327_s27 + $0x550] sm:$0xff] %v644_v42  ;;  %v650_v45 = vld [vmem:[%s11322_s26 + $0x868] sm:$0xff]  ;;  %647 = vst [vmem:[%s11327_s27 + $0x558] sm:$0xff] %v646_v43  ;;  %v652_v46 = vld [vmem:[%s11322_s26 + $0x870] sm:$0xff] }
  0x6c   : > { %649 = vst [vmem:[%s11327_s27 + $0x560] sm:$0xff] %v648_v44  ;;  %651 = vst [vmem:[%s11327_s27 + $0x568] sm:$0xff] %v650_v45  ;;  %v654_v47 = vld [vmem:[%s11322_s26 + $0x878] sm:$0xff]  ;;  %v656_v48 = vld [vmem:[%s11322_s26 + $0x880] sm:$0xff] }
  0x6d   : > { %653 = vst [vmem:[%s11327_s27 + $0x570] sm:$0xff] %v652_v46  ;;  %655 = vst [vmem:[%s11327_s27 + $0x578] sm:$0xff] %v654_v47  ;;  %v658_v49 = vld [vmem:[%s11322_s26 + $0x888] sm:$0xff]  ;;  %v660_v50 = vld [vmem:[%s11322_s26 + $0x890] sm:$0xff] }
  0x6e   : > { %657 = vst [vmem:[%s11327_s27 + $0x580] sm:$0xff] %v656_v48  ;;  %v662_v51 = vld [vmem:[%s11322_s26 + $0x898] sm:$0xff]  ;;  %659 = vst [vmem:[%s11327_s27 + $0x588] sm:$0xff] %v658_v49  ;;  %v664_v52 = vld [vmem:[%s11322_s26 + $0x8a0] sm:$0xff] }
  0x6f   : > { %661 = vst [vmem:[%s11327_s27 + $0x590] sm:$0xff] %v660_v50  ;;  %663 = vst [vmem:[%s11327_s27 + $0x598] sm:$0xff] %v662_v51  ;;  %v666_v53 = vld [vmem:[%s11322_s26 + $0x8a8] sm:$0xff]  ;;  %v668_v54 = vld [vmem:[%s11322_s26 + $0x8b0] sm:$0xff] }
  0x70   : > { %665 = vst [vmem:[%s11327_s27 + $0x5a0] sm:$0xff] %v664_v52  ;;  %667 = vst [vmem:[%s11327_s27 + $0x5a8] sm:$0xff] %v666_v53  ;;  %v670_v55 = vld [vmem:[%s11322_s26 + $0x8b8] sm:$0xff]  ;;  %v672_v56 = vld [vmem:[%s11322_s26 + $0x8c0] sm:$0xff] }
  0x71   : > { %669 = vst [vmem:[%s11327_s27 + $0x5b0] sm:$0xff] %v668_v54  ;;  %v674_v57 = vld [vmem:[%s11322_s26 + $0x8c8] sm:$0xff]  ;;  %671 = vst [vmem:[%s11327_s27 + $0x5b8] sm:$0xff] %v670_v55  ;;  %v676_v58 = vld [vmem:[%s11322_s26 + $0x8d0] sm:$0xff] }
  0x72   : > { %673 = vst [vmem:[%s11327_s27 + $0x5c0] sm:$0xff] %v672_v56  ;;  %675 = vst [vmem:[%s11327_s27 + $0x5c8] sm:$0xff] %v674_v57  ;;  %v678_v59 = vld [vmem:[%s11322_s26 + $0x8d8] sm:$0xff]  ;;  %v680_v60 = vld [vmem:[%s11322_s26 + $0x8e0] sm:$0xff] }
  0x73   : > { %677 = vst [vmem:[%s11327_s27 + $0x5d0] sm:$0xff] %v676_v58  ;;  %679 = vst [vmem:[%s11327_s27 + $0x5d8] sm:$0xff] %v678_v59  ;;  %v682_v61 = vld [vmem:[%s11322_s26 + $0x8e8] sm:$0xff]  ;;  %v684_v62 = vld [vmem:[%s11322_s26 + $0x8f0] sm:$0xff] }
  0x74   : > { %681 = vst [vmem:[%s11327_s27 + $0x5e0] sm:$0xff] %v680_v60  ;;  %v686_v63 = vld [vmem:[%s11322_s26 + $0x8f8] sm:$0xff]  ;;  %683 = vst [vmem:[%s11327_s27 + $0x5e8] sm:$0xff] %v682_v61 }
  0x75   : > { %685 = vst [vmem:[%s11327_s27 + $0x5f0] sm:$0xff] %v684_v62  ;;  %687 = vst [vmem:[%s11327_s27 + $0x5f8] sm:$0xff] %v686_v63 }
  0x76 PF: > { %p9688_p10 = scmp.ge.s32.totalorder %s11211_s12, 1  ;;  %p692_p11 = scmp.lt.s32.totalorder %s11211_s12, 3 }
  0x78   : > { %p693_p12 = pnand %p9688_p10, %p692_p11 }
  0x7a   : > { %696 = sbr.rel (%p693_p12) target bundleno = 2095 (0x82f), region = 75 }
  0x7f   : > { %v11715_v0 = vld [vmem:[%s16112_s1 + $0x74] ss:$8 sps:$4 sm:$0xff]   ;;  %v11720_v1 = vld [vmem:[%s16112_s1 + $0x70] ss:$8 sps:$4 sm:$0xff]   ;;  %v11726_v2 = vld [vmem:[%s16112_s1 + $0x64] ss:$8 sps:$4 sm:$0xff]  }
  0x80   : > { %1687 = vmatprep.subr.bf16.mxu0 %v11715_v0  ;;  %v11732_v3 = vld [vmem:[%s16112_s1 + $0x60] ss:$8 sps:$4 sm:$0xff]   ;;  %v11738_v4 = vld [vmem:[%s16112_s1 + $0x54] ss:$8 sps:$4 sm:$0xff]   ;;  %v11749_v6 = vld [vmem:[%s16112_s1 + $0x50] ss:$8 sps:$4 sm:$0xff]  }
  0x81   : > { %1688 = vmatpush1.bf16.msra.mxu0 %v11720_v1  ;;  %v11743_v5 = vld [vmem:[%s16112_s1 + $0x174] ss:$8 sps:$4 sm:$0xff]   ;;  %v11754_v7 = vld [vmem:[%s16112_s1 + $0x44] ss:$8 sps:$4 sm:$0xff]   ;;  %v11759_v8 = vld [vmem:[%s16112_s1 + $0x170] ss:$8 sps:$4 sm:$0xff]  }
  0x82   : > { %1689 = vmatprep.subr.bf16.mxu0 %v11726_v2  ;;  %1960 = vmatprep.subr.bf16.mxu1 %v11743_v5  ;;  %v11766_v9 = vld [vmem:[%s16112_s1 + $0x164] ss:$8 sps:$4 sm:$0xff]   ;;  %v11772_v10 = vld [vmem:[%s16112_s1 + $0x40] ss:$8 sps:$4 sm:$0xff]   ;;  %v11784_v12 = vld [vmem:[%s16112_s1 + $0x154] ss:$8 sps:$4 sm:$0xff]  }
  0x83   : > { %1961 = vmatpush1.bf16.msra.mxu1 %v11759_v8  ;;  %v11778_v11 = vld [vmem:[%s16112_s1 + $0x160] ss:$8 sps:$4 sm:$0xff]   ;;  %v11790_v13 = vld [vmem:[%s16112_s1 + $0x34] ss:$8 sps:$4 sm:$0xff]   ;;  %v11796_v14 = vld [vmem:[%s16112_s1 + $0x150] ss:$8 sps:$4 sm:$0xff]  }
  0x84   : > { %1962 = vmatprep.subr.bf16.mxu1 %v11766_v9  ;;  %v11802_v15 = vld [vmem:[%s16112_s1 + $0x144] ss:$8 sps:$4 sm:$0xff]   ;;  %v11808_v16 = vld [vmem:[%s16112_s1 + $0x30] ss:$8 sps:$4 sm:$0xff]   ;;  %v11820_v18 = vld [vmem:[%s16112_s1 + $0x140] ss:$8 sps:$4 sm:$0xff]  }
  0x85   : > { %1690 = vmatpush1.bf16.msra.mxu0 %v11732_v3  ;;  %v11814_v17 = vld [vmem:[%s16112_s1 + $0x24] ss:$8 sps:$4 sm:$0xff]   ;;  %v11826_v19 = vld [vmem:[%s16112_s1 + $0x134] ss:$8 sps:$4 sm:$0xff]   ;;  %v11832_v20 = vld [vmem:[%s16112_s1 + $0x20] ss:$8 sps:$4 sm:$0xff]  }
  0x86   : > { %1691 = vmatprep.subr.bf16.mxu0 %v11738_v4  ;;  %v11838_v21 = vld [vmem:[%s16112_s1 + $0x14] ss:$8 sps:$4 sm:$0xff]   ;;  %v11844_v22 = vld [vmem:[%s16112_s1 + $0x130] ss:$8 sps:$4 sm:$0xff]   ;;  %v11850_v23 = vld [vmem:[%s16112_s1 + $0x124] ss:$8 sps:$4 sm:$0xff]  }
  0x87   : > { %1963 = vmatpush1.bf16.msra.mxu1 %v11778_v11  ;;  %v11856_v24 = vld [vmem:[%s16112_s1 + $0x10] ss:$8 sps:$4 sm:$0xff]   ;;  %v11862_v25 = vld [vmem:[%s16112_s1 + $0x4] ss:$8 sps:$4 sm:$0xff]   ;;  %s11865_s17 = sand.u32 1, %s11203_s10   ;;  %vm1607_vm0 = vcmask 293888  }
  0x88   : > { %1964 = vmatprep.subr.bf16.mxu1 %v11784_v12  ;;  %v11871_v26 = vld [vmem:[%s16112_s1 + $0x120] ss:$8 sps:$4 sm:$0xff]   ;;  %v11877_v27 = vld [vmem:[%s16112_s1 + $0x114] ss:$8 sps:$4 sm:$0xff]   ;;  %s10574_s27 = smul.u32 1536, %s11865_s17  ;;  %vm1680_vm1 = vcmask 1041408  }
  0x89   : > { %1692 = vmatpush1.bf16.msra.mxu0 %v11749_v6  ;;  %v11883_v28 = vld [vmem:[%s16112_s1] ss:$8 sps:$4 sm:$0xff]   ;;  %v11890_v29 = vld [vmem:[%s16112_s1 + $0xf4] ss:$8 sps:$4 sm:$0xff]   ;;  %v11896_v30 = vld [vmem:[%s16112_s1 + $0x110] ss:$8 sps:$4 sm:$0xff]  }
  0x8a   : > { %1693 = vmatprep.subr.bf16.mxu0 %v11754_v7  ;;  %v11901_v31 = vld [vmem:[%s16112_s1 + $0xf0] ss:$8 sps:$4 sm:$0xff]   ;;  %v11907_v32 = vld [vmem:[%s16112_s1 + $0x104] ss:$8 sps:$4 sm:$0xff]   ;;  %v11923_v35 = vld [vmem:[%s16112_s1 + $0x100] ss:$8 sps:$4 sm:$0xff]  }
  0x8b   : > { %1965 = vmatpush1.bf16.msra.mxu1 %v11796_v14  ;;  %v885_v33 = vld [vmem:[%s16112_s1 + $0x1a0] sm:$0x33]  ;;  %s11925_s21 = scalar_lea.vmem [#allocation2], %s10574_s27  ;;  %v11941_v40 = vld [vmem:[%s16112_s1 + $0xd4] ss:$8 sps:$4 sm:$0xff]   ;;  %vm3843_vm2 = vcmask 1042432  }
  0x8c   : > { %1966 = vmatprep.subr.bf16.mxu1 %v11802_v15  ;;  %v11917_v34 = vld [vmem:[%s16112_s1 + $0xe4] ss:$8 sps:$4 sm:$0xff]   ;;  %v11928_v36 = vcombine.high %v885_v33, %v885_v33  ;;  %v9838_v37 = vcombine.low %v885_v33, %v885_v33  ;;  %v11935_v39 = vld [vmem:[%s16112_s1 + $0xe0] ss:$8 sps:$4 sm:$0xff]   ;;  %v11954_v43 = vld [vmem:[%s16112_s1 + $0x194] ss:$8 sps:$4 sm:$0xff]  }
  0x8d   : > { %1694 = vmatpush1.bf16.msra.mxu0 %v11772_v10  ;;  %v10697_v38 = vld [vmem:[%s11925_s21 + $0xc] ss:$16 sps:$4 sm:$0xff]   ;;  %v10703_v41 = vld [vmem:[%s11925_s21 + $0x4] ss:$16 sps:$4 sm:$0xff]   ;;  %v11960_v44 = vld [vmem:[%s16112_s1 + $0xd0] ss:$8 sps:$4 sm:$0xff]  }
  0x8e   : > { %1695 = vmatprep.subr.bf16.mxu0 %v11790_v13  ;;  %9841 = vmatprep.mubr.msk.bf16.mxu1 %vm1607_vm0, %v10697_v38  ;;  %v11949_v42 = vsel %vm1680_vm1, %v9838_v37, 0  ;;  %v11966_v45 = vld [vmem:[%s16112_s1 + $0xc4] ss:$8 sps:$4 sm:$0xff]   ;;  %v11972_v46 = vld [vmem:[%s16112_s1 + $0x190] ss:$8 sps:$4 sm:$0xff]   ;;  %vm3844_vm3 = vcmask 1046532  }
  0x8f   : > { %1967 = vmatpush1.bf16.msra.mxu1 %v11820_v18  ;;  %1719 = vmatprep.mubr.bf16.mxu0 %v10703_v41  ;;  %v11978_v47 = vld [vmem:[%s16112_s1 + $0x184] ss:$8 sps:$4 sm:$0xff]   ;;  %v11984_v48 = vld [vmem:[%s16112_s1 + $0xc0] ss:$8 sps:$4 sm:$0xff]   ;;  %v11990_v49 = vld [vmem:[%s16112_s1 + $0xb4] ss:$8 sps:$4 sm:$0xff]  }
  0x90   : > { %1968 = vmatprep.subr.bf16.mxu1 %v11826_v19  ;;  %v11996_v50 = vld [vmem:[%s16112_s1 + $0x180] ss:$8 sps:$4 sm:$0xff]   ;;  %v12001_v51 = vld [vmem:[%s16112_s1 + $0xb0] ss:$8 sps:$4 sm:$0xff]   ;;  %v12008_v52 = vld [vmem:[%s16112_s1 + $0xa4] ss:$8 sps:$4 sm:$0xff]  }
  0x91   : > { %1696 = vmatpush1.bf16.msra.mxu0 %v11808_v16  ;;  %v10695_v53 = vld [vmem:[%s11925_s21 + $0x8] ss:$16 sps:$4 sm:$0xff]   ;;  %v10704_v54 = vld [vmem:[%s11925_s21 + $0x2c] ss:$16 sps:$4 sm:$0xff]   ;;  %v10701_v62 = vld [vmem:[%s11925_s21] ss:$16 sps:$4 sm:$0xff]  }
  0x92   : > { %1697 = vmatprep.subr.bf16.mxu0 %v11814_v17  ;;  %v12019_v55 = vld [vmem:[%s16112_s1 + $0xa0] ss:$8 sps:$4 sm:$0xff]   ;;  %v12025_v56 = vld [vmem:[%s16112_s1 + $0x94] ss:$8 sps:$4 sm:$0xff]   ;;  %v12032_v57 = vld [vmem:[%s16112_s1 + $0x90] ss:$8 sps:$4 sm:$0xff]  }
  0x93   : > { %1969 = vmatpush1.bf16.msra.mxu1 %v11844_v22  ;;  %v12039_v58 = vld [vmem:[%s16112_s1 + $0x84] ss:$8 sps:$4 sm:$0xff]   ;;  %v10706_v59 = vld [vmem:[%s11925_s21 + $0x28] ss:$16 sps:$4 sm:$0xff]   ;;  %v10763_v38 = vld [vmem:[%s11925_s21 + $0x140] ss:$16 sps:$4 sm:$0xff]  }
  0x94   : > { %1970 = vmatprep.subr.bf16.mxu1 %v11850_v23  ;;  %v10710_v60 = vld [vmem:[%s11925_s21 + $0x4c] ss:$16 sps:$4 sm:$0xff]   ;;  %v12050_v61 = vld [vmem:[%s16112_s1 + $0x80] ss:$8 sps:$4 sm:$0xff]   ;;  %v10707_v63 = vld [vmem:[%s11925_s21 + $0x24] ss:$16 sps:$4 sm:$0xff]  }
  0x95   : > { %1698 = vmatpush1.bf16.msra.mxu0 %v11832_v20  ;;  %v10764_v33 = vld [vmem:[%s11925_s21 + $0x16c] ss:$16 sps:$4 sm:$0xff]   ;;  %vm5373_vm4 = vcmask 1040384   ;;  %vm5374_vm5 = vcmask 1044484   ;;  %vm12678_vm6 = vmor %vm3843_vm2, %vm3844_vm3  ;;  %vm4713_vm8 = vcmask 1045508   ;;  %vm8525_vm10 = vcmask 1041409  }
  0x96   : > { %1699 = vmatprep.subr.bf16.mxu0 %v11838_v21  ;;  %v10770_v37 = vld [vmem:[%s11925_s21 + $0x18c] ss:$16 sps:$4 sm:$0xff]   ;;  %vm12695_vm7 = vmor %vm5373_vm4, %vm5374_vm5  ;;  %vm8528_vm11 = vcmask 1042434   ;;  %vm8531_vm12 = vcmask 1043459   ;;  %vm8536_vm13 = vcmask 1045509   ;;  %vm8539_vm14 = vcmask 1046534  }
  0x97   : > { %1971 = vmatpush1.bf16.msra.mxu1 %v11871_v26  ;;  %v10776_v41 = vld [vmem:[%s11925_s21 + $0x1ac] ss:$16 sps:$4 sm:$0xff]   ;;  %vm12907_vm9 = vmor %vm1680_vm1, %vm4713_vm8  ;;  %vm8542_vm15 = vcmask 1047559   ;;  %s9689_s25 = sshll.u32 %s11865_s17, 5  ;;  %s10421_s29 = sshll.u32 %s9682_s13, 9 }
  0x98   : > { %1972 = vmatprep.subr.bf16.mxu1 %v11877_v27  ;;  %s733_s26 = scalar_lea.vmem [#allocation3], %s9689_s25  ;;  %s9602_s22 = scalar_lea.sflag [#allocation4], %s11865_s17 }
  0x99   : > { %1700 = vmatpush1.bf16.msra.mxu0 %v11856_v24  ;;  %s9615_s28 = sshll.u32 %s733_s26, 4  ;;  %s11215_s13 = smov [#allocation3]   ;;  %s16063_s28 = int_to_ptr.vmem [resolvable:$true] %s9615_s28 }
  0x9a   : > { %1701 = vmatprep.subr.bf16.mxu0 %v11862_v25  ;;  %s11151_s23 = scalar_lea.vmem %s16063_s28, 512  ;;  %s11155_s27 = sshll.u32 %s11215_s13, 4  ;;  %s11156_s27 = int_to_ptr.vmem [resolvable:$false] %s11155_s27 }
  0x9b   : > { %1973 = vmatpush1.bf16.msra.mxu1 %v11896_v30  ;;  %p11152_p13 = scmp.ne.s32.totalorder %s16063_s28, %s11151_s23  ;;  %s11157_s24 = scalar_lea.vmem %s11156_s27, 1024 }
  0x9c   : > { %1974 = vmatprep.subr.bf16.mxu1 %v11907_v32  ;;  %p11158_p2 = scmp.lt.s32.totalorder %s16063_s28, %s11156_s27  ;;  %p11159_p3 = scmp.lt.s32.totalorder %s11157_s24, %s11151_s23 }
  0x9d   : > { %1702 = vmatpush1.bf16.msra.mxu0 %v11883_v28  ;;  %p11153_p0 = pnand %p11152_p13, %p11306_p6 }
  0x9e   : > { %1703 = vmatprep.subr.bf16.mxu0 %v11890_v29  ;;  %p11160_p4 = por %p11159_p3, %p11158_p2 }
  0x9f   : > { %1975 = vmatpush1.bf16.msra.mxu1 %v11923_v35  ;;  %p11154_p1 = pneg %p11153_p0 }
  0xa0   : > { %9840 = vmatprep.subr.msk.bf16.mxu1 %vm1680_vm1, %v11928_v36 }
  0xa1   : > { %1704 = vmatpush2.bf16.msra.mxu0 %v11901_v31  ;;  %p11161_p5 = pnand %p11160_p4, %p11154_p1 }
  0xa2   : > { %1705 = vmatprep.subr.bf16.mxu0 %v11917_v34 }
  0xa3   : > { %1987 = vmatpush2.bf16.msra.mxu1 %v11949_v42 }
  0xa4   : > { %1988 = vmatprep.subr.bf16.mxu1 %v11954_v43 }
  0xa5   : > { %1706 = vmatpush2.bf16.msra.mxu0 %v11935_v39 }
  0xa6   : > { %1707 = vmatprep.subr.bf16.mxu0 %v11941_v40 }
  0xa7   : > { %1989 = vmatpush2.bf16.msra.mxu1 %v11972_v46 }
  0xa8   : > { %1990 = vmatprep.subr.bf16.mxu1 %v11978_v47 }
  0xa9   : > { %1708 = vmatpush2.bf16.msra.mxu0 %v11960_v44 }
  0xaa   : > { %1709 = vmatprep.subr.bf16.mxu0 %v11966_v45 }
  0xab   : > { %1991 = vmatpush2.bf16.msra.mxu1 %v11996_v50 }
  0xac   : > { %2858 = vmatprep.subr.bf16.mxu1 %v11715_v0  ;;  %v10712_v0 = vld [vmem:[%s11925_s21 + $0x48] ss:$16 sps:$4 sm:$0xff]  }
  0xad   : > { %1710 = vmatpush2.bf16.msra.mxu0 %v11984_v48 }
  0xae   : > { %1711 = vmatprep.subr.bf16.mxu0 %v11990_v49  ;;  %1993 = vmatmul.mubr.bf16.vlgmr.msra.gmra.mxu1 %v10695_v53  ;;  %v10794_v53 = vld [vmem:[%s11925_s21 + $0x20c] ss:$16 sps:$4 sm:$0xff]  }
  0xaf   : > { %2859 = vmatpush1.bf16.msra.mxu1 %v11720_v1  ;;  %9842 = vmatprep.mubr.msk.bf16.mxu1 %vm1607_vm0, %v10704_v54  ;;  %v10716_v1 = vld [vmem:[%s11925_s21 + $0x6c] ss:$16 sps:$4 sm:$0xff]   ;;  %v10787_v54 = vld [vmem:[%s11925_s21 + $0x1c0] ss:$16 sps:$4 sm:$0xff]  }
  0xb0   : > { %2860 = vmatprep.subr.bf16.mxu1 %v11726_v2  ;;  %v10709_v2 = vld [vmem:[%s11925_s21 + $0x20] ss:$16 sps:$4 sm:$0xff]  }
  0xb1   : > { %1712 = vmatpush2.bf16.msra.mxu0 %v12001_v51 }
  0xb2   : > { %1713 = vmatprep.subr.bf16.mxu0 %v12008_v52 }
  0xb3   : > { %2861 = vmatpush1.bf16.msra.mxu1 %v11732_v3  ;;  %v10713_v3 = vld [vmem:[%s11925_s21 + $0x44] ss:$16 sps:$4 sm:$0xff]  }
  0xb4   : > { %2862 = vmatprep.subr.bf16.mxu1 %v11738_v4  ;;  %v10718_v4 = vld [vmem:[%s11925_s21 + $0x68] ss:$16 sps:$4 sm:$0xff]  }
  0xb5   : > { %1714 = vmatpush2.bf16.msra.mxu0 %v12019_v55 }
  0xb6   : > { %1715 = vmatprep.subr.bf16.mxu0 %v12025_v56  ;;  %2003 = vmatmul.mubr.bf16.gmra.mxu1 %v10706_v59  ;;  %v10797_v59 = vld [vmem:[%s11925_s21 + $0x204] ss:$16 sps:$4 sm:$0xff]  }
  0xb7   : > { %9843 = vmatprep.mubr.msk.bf16.mxu1 %vm1607_vm0, %v10710_v60  ;;  %2863 = vmatpush1.bf16.msra.mxu1 %v11749_v6  ;;  %v10715_v6 = vld [vmem:[%s11925_s21 + $0x40] ss:$16 sps:$4 sm:$0xff]   ;;  %v10802_v60 = vld [vmem:[%s11925_s21 + $0x228] ss:$16 sps:$4 sm:$0xff]  }
  0xb8   : > { %2864 = vmatprep.subr.bf16.mxu1 %v11754_v7  ;;  %v10719_v7 = vld [vmem:[%s11925_s21 + $0x64] ss:$16 sps:$4 sm:$0xff]  }
  0xb9   : > { %1716 = vmatpush2.bf16.msra.mxu0 %v12032_v57 }
  0xba   : > { %1717 = vmatprep.subr.bf16.mxu0 %v12039_v58 }
  0xbb   : > { %2865 = vmatpush1.bf16.msra.mxu1 %v11772_v10  ;;  %v10721_v10 = vld [vmem:[%s11925_s21 + $0x60] ss:$16 sps:$4 sm:$0xff]  }
  0xbc   : > { %2866 = vmatprep.subr.bf16.mxu1 %v11790_v13  ;;  %v10734_v13 = vld [vmem:[%s11925_s21 + $0xcc] ss:$16 sps:$4 sm:$0xff]  }
  0xbd   : > { %1718 = vmatpush2.bf16.msra.mxu0 %v12050_v61 }
  0xbe   : > { %3131 = vmatprep.subr.bf16.mxu0 %v11743_v5  ;;  %2013 = vmatmul.mubr.bf16.gmra.mxu1 %v10712_v0  ;;  %v10722_v5 = vld [vmem:[%s11925_s21 + $0x8c] ss:$16 sps:$4 sm:$0xff]   ;;  %v10808_v0 = vld [vmem:[%s11925_s21 + $0x248] ss:$16 sps:$4 sm:$0xff]  }
  0xbf   : > { %9844 = vmatprep.mubr.msk.bf16.mxu1 %vm1607_vm0, %v10716_v1  ;;  %2867 = vmatpush1.bf16.msra.mxu1 %v11808_v16  ;;  %v10736_v16 = vld [vmem:[%s11925_s21 + $0xc8] ss:$16 sps:$4 sm:$0xff]   ;;  %v10812_v1 = vld [vmem:[%s11925_s21 + $0x26c] ss:$16 sps:$4 sm:$0xff]  }
  0xc0   : > { %1720 = vmatmul.mubr.bf16.vlgmr.msra.gmra.mxu0 %v10701_v62  ;;  %2868 = vmatprep.subr.bf16.mxu1 %v11814_v17  ;;  %v10740_v17 = vld [vmem:[%s11925_s21 + $0xec] ss:$16 sps:$4 sm:$0xff]   ;;  %v10799_v62 = vld [vmem:[%s11925_s21 + $0x200] ss:$16 sps:$4 sm:$0xff]  }
  0xc1   : > { %3132 = vmatpush1.bf16.msra.mxu0 %v11759_v8  ;;  %1729 = vmatprep.mubr.bf16.mxu0 %v10707_v63  ;;  %v10724_v8 = vld [vmem:[%s11925_s21 + $0x88] ss:$16 sps:$4 sm:$0xff]   ;;  %v10803_v63 = vld [vmem:[%s11925_s21 + $0x224] ss:$16 sps:$4 sm:$0xff]  }
  0xc2   : > { %3133 = vmatprep.subr.bf16.mxu0 %v11766_v9  ;;  %v10728_v9 = vld [vmem:[%s11925_s21 + $0xac] ss:$16 sps:$4 sm:$0xff]  }
  0xc3   : > { %2869 = vmatpush1.bf16.msra.mxu1 %v11832_v20  ;;  %v10742_v20 = vld [vmem:[%s11925_s21 + $0xe8] ss:$16 sps:$4 sm:$0xff]  }
  0xc4   : > { %2870 = vmatprep.subr.bf16.mxu1 %v11838_v21  ;;  %v10746_v21 = vld [vmem:[%s11925_s21 + $0x10c] ss:$16 sps:$4 sm:$0xff]  }
  0xc5   : > { %3134 = vmatpush1.bf16.msra.mxu0 %v11778_v11  ;;  %v10725_v11 = vld [vmem:[%s11925_s21 + $0x84] ss:$16 sps:$4 sm:$0xff]  }
  0xc6   : > { %3135 = vmatprep.subr.bf16.mxu0 %v11784_v12  ;;  %2023 = vmatmul.mubr.bf16.gmra.mxu1 %v10718_v4  ;;  %v10730_v12 = vld [vmem:[%s11925_s21 + $0xa8] ss:$16 sps:$4 sm:$0xff]  }
  0xc7   : > { %9845 = vmatprep.mubr.msk.bf16.mxu1 %vm1607_vm0, %v10722_v5  ;;  %2871 = vmatpush1.bf16.msra.mxu1 %v11856_v24  ;;  %v10748_v24 = vld [vmem:[%s11925_s21 + $0x108] ss:$16 sps:$4 sm:$0xff]   ;;  %v10818_v5 = vld [vmem:[%s11925_s21 + $0x28c] ss:$16 sps:$4 sm:$0xff]  }
  0xc8   : > { %1730 = vmatmul.mubr.bf16.gmra.mxu0 %v10709_v2  ;;  %2872 = vmatprep.subr.bf16.mxu1 %v11862_v25  ;;  %v10752_v25 = vld [vmem:[%s11925_s21 + $0x12c] ss:$16 sps:$4 sm:$0xff]   ;;  %v10805_v2 = vld [vmem:[%s11925_s21 + $0x220] ss:$16 sps:$4 sm:$0xff]   ;;  %v10814_v4 = vld [vmem:[%s11925_s21 + $0x268] ss:$16 sps:$4 sm:$0xff]  }
  0xc9   : > { %1739 = vmatprep.mubr.bf16.mxu0 %v10713_v3  ;;  %3136 = vmatpush1.bf16.msra.mxu0 %v11796_v14  ;;  %v10727_v14 = vld [vmem:[%s11925_s21 + $0x80] ss:$16 sps:$4 sm:$0xff]   ;;  %v10809_v3 = vld [vmem:[%s11925_s21 + $0x244] ss:$16 sps:$4 sm:$0xff]  }
  0xca   : > { %3137 = vmatprep.subr.bf16.mxu0 %v11802_v15  ;;  %v10731_v15 = vld [vmem:[%s11925_s21 + $0xa4] ss:$16 sps:$4 sm:$0xff]  }
  0xcb   : > { %2873 = vmatpush1.bf16.msra.mxu1 %v11883_v28  ;;  %v10754_v28 = vld [vmem:[%s11925_s21 + $0x128] ss:$16 sps:$4 sm:$0xff]  }
  0xcc   : > { %2874 = vmatprep.subr.bf16.mxu1 %v11890_v29  ;;  %v10758_v29 = vld [vmem:[%s11925_s21 + $0x14c] ss:$16 sps:$4 sm:$0xff]  }
  0xcd   : > { %3138 = vmatpush1.bf16.msra.mxu0 %v11820_v18  ;;  %v10733_v18 = vld [vmem:[%s11925_s21 + $0xa0] ss:$16 sps:$4 sm:$0xff]  }
  0xce   : > { %3139 = vmatprep.subr.bf16.mxu0 %v11826_v19  ;;  %2033 = vmatmul.mubr.bf16.gmra.mxu1 %v10724_v8  ;;  %v10737_v19 = vld [vmem:[%s11925_s21 + $0xc4] ss:$16 sps:$4 sm:$0xff]   ;;  %v10820_v8 = vld [vmem:[%s11925_s21 + $0x288] ss:$16 sps:$4 sm:$0xff]  }
  0xcf   : > { %9846 = vmatprep.mubr.msk.bf16.mxu1 %vm1607_vm0, %v10728_v9  ;;  %2875 = vmatpush2.bf16.msra.mxu1 %v11901_v31  ;;  %v10755_v31 = vld [vmem:[%s11925_s21 + $0x124] ss:$16 sps:$4 sm:$0xff]   ;;  %v10824_v9 = vld [vmem:[%s11925_s21 + $0x2ac] ss:$16 sps:$4 sm:$0xff]  }
  0xd0   : > { %1740 = vmatmul.mubr.bf16.gmra.mxu0 %v10715_v6  ;;  %2876 = vmatprep.subr.bf16.mxu1 %v11917_v34  ;;  %v10757_v34 = vld [vmem:[%s11925_s21 + $0x120] ss:$16 sps:$4 sm:$0xff]  }
  0xd1   : > { %1749 = vmatprep.mubr.bf16.mxu0 %v10719_v7  ;;  %3140 = vmatpush1.bf16.msra.mxu0 %v11844_v22  ;;  %v10739_v22 = vld [vmem:[%s11925_s21 + $0xc0] ss:$16 sps:$4 sm:$0xff]   ;;  %v10815_v7 = vld [vmem:[%s11925_s21 + $0x264] ss:$16 sps:$4 sm:$0xff]  }
  0xd2   : > { %3141 = vmatprep.subr.bf16.mxu0 %v11850_v23  ;;  %v10743_v23 = vld [vmem:[%s11925_s21 + $0xe4] ss:$16 sps:$4 sm:$0xff]   ;;  %v10811_v6 = vld [vmem:[%s11925_s21 + $0x240] ss:$16 sps:$4 sm:$0xff]  }
  0xd3   : > { %2877 = vmatpush2.bf16.msra.mxu1 %v11935_v39  ;;  %v10767_v39 = vld [vmem:[%s11925_s21 + $0x164] ss:$16 sps:$4 sm:$0xff]  }
  0xd4   : > { %2878 = vmatprep.subr.bf16.mxu1 %v11941_v40  ;;  %v10772_v40 = vld [vmem:[%s11925_s21 + $0x188] ss:$16 sps:$4 sm:$0xff]  }
  0xd5   : > { %3142 = vmatpush1.bf16.msra.mxu0 %v11871_v26  ;;  %v10745_v26 = vld [vmem:[%s11925_s21 + $0xe0] ss:$16 sps:$4 sm:$0xff]  }
  0xd6   : > { %3143 = vmatprep.subr.bf16.mxu0 %v11877_v27  ;;  %2043 = vmatmul.mubr.bf16.gmra.mxu1 %v10730_v12  ;;  %v10749_v27 = vld [vmem:[%s11925_s21 + $0x104] ss:$16 sps:$4 sm:$0xff]   ;;  %v10826_v12 = vld [vmem:[%s11925_s21 + $0x2a8] ss:$16 sps:$4 sm:$0xff]  }
  0xd7   : > { %9847 = vmatprep.mubr.msk.bf16.mxu1 %vm1607_vm0, %v10734_v13  ;;  %2879 = vmatpush2.bf16.msra.mxu1 %v11960_v44  ;;  %v10778_v44 = vld [vmem:[%s11925_s21 + $0x1a8] ss:$16 sps:$4 sm:$0xff]   ;;  %v10830_v13 = vld [vmem:[%s11925_s21 + $0x2cc] ss:$16 sps:$4 sm:$0xff]  }
  0xd8   : > { %1750 = vmatmul.mubr.bf16.gmra.mxu0 %v10721_v10  ;;  %2880 = vmatprep.subr.bf16.mxu1 %v11966_v45  ;;  %v10782_v45 = vld [vmem:[%s11925_s21 + $0x1cc] ss:$16 sps:$4 sm:$0xff]   ;;  %v10817_v10 = vld [vmem:[%s11925_s21 + $0x260] ss:$16 sps:$4 sm:$0xff]  }
  0xd9   : > { %1759 = vmatprep.mubr.bf16.mxu0 %v10725_v11  ;;  %3144 = vmatpush1.bf16.msra.mxu0 %v11896_v30  ;;  %v10751_v30 = vld [vmem:[%s11925_s21 + $0x100] ss:$16 sps:$4 sm:$0xff]   ;;  %v10821_v11 = vld [vmem:[%s11925_s21 + $0x284] ss:$16 sps:$4 sm:$0xff]  }
  0xda   : > { %3145 = vmatprep.subr.bf16.mxu0 %v11907_v32  ;;  %v10760_v32 = vld [vmem:[%s11925_s21 + $0x148] ss:$16 sps:$4 sm:$0xff]  }
  0xdb   : > { %2881 = vmatpush2.bf16.msra.mxu1 %v11984_v48  ;;  %v10784_v48 = vld [vmem:[%s11925_s21 + $0x1c8] ss:$16 sps:$4 sm:$0xff]  }
  0xdc   : > { %2882 = vmatprep.subr.bf16.mxu1 %v11990_v49  ;;  %v10788_v49 = vld [vmem:[%s11925_s21 + $0x1ec] ss:$16 sps:$4 sm:$0xff]  }
  0xdd   : > { %3146 = vmatpush1.bf16.msra.mxu0 %v11923_v35  ;;  %v10761_v35 = vld [vmem:[%s11925_s21 + $0x144] ss:$16 sps:$4 sm:$0xff]  }
  0xde   : > { %10057 = vmatprep.subr.msk.bf16.mxu0 %vm1680_vm1, %v11928_v36  ;;  %2053 = vmatmul.mubr.bf16.gmra.mxu1 %v10736_v16  ;;  %v10766_v36 = vld [vmem:[%s11925_s21 + $0x168] ss:$16 sps:$4 sm:$0xff]   ;;  %v10827_v16 = vld [vmem:[%s11925_s21 + $0x2a4] ss:$16 sps:$4 sm:$0xff]  }
  0xdf   : > { %9848 = vmatprep.mubr.msk.bf16.mxu1 %vm1607_vm0, %v10740_v17  ;;  %2883 = vmatpush2.bf16.msra.mxu1 %v12001_v51  ;;  %v10785_v51 = vld [vmem:[%s11925_s21 + $0x1c4] ss:$16 sps:$4 sm:$0xff]   ;;  %v10832_v17 = vld [vmem:[%s11925_s21 + $0x2c8] ss:$16 sps:$4 sm:$0xff]  }
  0xe0   : > { %1760 = vmatmul.mubr.bf16.gmra.mxu0 %v10727_v14  ;;  %2884 = vmatprep.subr.bf16.mxu1 %v12008_v52  ;;  %v10790_v52 = vld [vmem:[%s11925_s21 + $0x1e8] ss:$16 sps:$4 sm:$0xff]   ;;  %v10919_v14 = vld [vmem:[%s16114_s3 + $0xf4] ss:$8 sps:$4 sm:$0xff]  }
  0xe1   : > { %1769 = vmatprep.mubr.bf16.mxu0 %v10731_v15  ;;  %3158 = vmatpush2.bf16.msra.mxu0 %v11949_v42  ;;  %v10769_v42 = vld [vmem:[%s11925_s21 + $0x160] ss:$16 sps:$4 sm:$0xff]  }
  0xe2   : > { %3159 = vmatprep.subr.bf16.mxu0 %v11954_v43  ;;  %v10773_v43 = vld [vmem:[%s11925_s21 + $0x184] ss:$16 sps:$4 sm:$0xff]   ;;  %v10823_v15 = vld [vmem:[%s11925_s21 + $0x280] ss:$16 sps:$4 sm:$0xff]  }
  0xe3   : > { %2885 = vmatpush2.bf16.msra.mxu1 %v12019_v55  ;;  %v10791_v55 = vld [vmem:[%s11925_s21 + $0x1e4] ss:$16 sps:$4 sm:$0xff]  }
  0xe4   : > { %2886 = vmatprep.subr.bf16.mxu1 %v12025_v56  ;;  %v10796_v56 = vld [vmem:[%s11925_s21 + $0x208] ss:$16 sps:$4 sm:$0xff]  }
  0xe5   : > { %3160 = vmatpush2.bf16.msra.mxu0 %v11972_v46  ;;  %v10775_v46 = vld [vmem:[%s11925_s21 + $0x180] ss:$16 sps:$4 sm:$0xff]  }
  0xe6   : > { %3161 = vmatprep.subr.bf16.mxu0 %v11978_v47  ;;  %2063 = vmatmul.mubr.bf16.gmra.mxu1 %v10742_v20  ;;  %v10779_v47 = vld [vmem:[%s11925_s21 + $0x1a4] ss:$16 sps:$4 sm:$0xff]  }
  0xe7   : > { %9849 = vmatprep.mubr.msk.bf16.mxu1 %vm1607_vm0, %v10746_v21  ;;  %2887 = vmatpush2.bf16.msra.mxu1 %v12032_v57  ;;  %v10800_v57 = vld [vmem:[%s11925_s21 + $0x22c] ss:$16 sps:$4 sm:$0xff]   ;;  %v10833_v20 = vld [vmem:[%s11925_s21 + $0x2c4] ss:$16 sps:$4 sm:$0xff]   ;;  %v10838_v21 = vld [vmem:[%s11925_s21 + $0x2e8] ss:$16 sps:$4 sm:$0xff]  }
  0xe8   : > { %1770 = vmatmul.mubr.bf16.gmra.mxu0 %v10733_v18  ;;  %2888 = vmatprep.subr.bf16.mxu1 %v12039_v58  ;;  %v10793_v58 = vld [vmem:[%s11925_s21 + $0x1e0] ss:$16 sps:$4 sm:$0xff]   ;;  %v10836_v18 = vld [vmem:[%s11925_s21 + $0x2ec] ss:$16 sps:$4 sm:$0xff]  }
  0xe9   : > { %1779 = vmatprep.mubr.bf16.mxu0 %v10737_v19  ;;  %3162 = vmatpush2.bf16.msra.mxu0 %v11996_v50  ;;  %v10781_v50 = vld [vmem:[%s11925_s21 + $0x1a0] ss:$16 sps:$4 sm:$0xff]  }
  0xea   : > { %v10829_v19 = vld [vmem:[%s11925_s21 + $0x2a0] ss:$16 sps:$4 sm:$0xff]  }
  0xeb   : > { %2889 = vmatpush2.bf16.msra.mxu1 %v12050_v61  ;;  %v10806_v61 = vld [vmem:[%s11925_s21 + $0x24c] ss:$16 sps:$4 sm:$0xff]  }
  0xec   : > { %4247 = vmatprep.subr.bf16.mxu1 %v10919_v14  ;;  %v10874_v14 = vld [vmem:[%s11925_s21 + $0x3a4] ss:$16 sps:$4 sm:$0xff]  }
  0xee   : > { %2073 = vmatmul.mubr.bf16.gmra.mxu1 %v10748_v24  ;;  %v10839_v24 = vld [vmem:[%s11925_s21 + $0x2e4] ss:$16 sps:$4 sm:$0xff]  }
  0xef   : > { %9850 = vmatprep.mubr.msk.bf16.mxu1 %vm1607_vm0, %v10752_v25  ;;  %v10842_v25 = vld [vmem:[%s11925_s21 + $0x300] ss:$16 sps:$4 sm:$0xff]  }
  0xf0   : > { %1780 = vmatmul.mubr.bf16.gmra.mxu0 %v10739_v22  ;;  %v10844_v22 = vld [vmem:[%s11925_s21 + $0x304] ss:$16 sps:$4 sm:$0xff]  }
  0xf1   : > { %1789 = vmatprep.mubr.bf16.mxu0 %v10743_v23  ;;  %v10835_v23 = vld [vmem:[%s11925_s21 + $0x2c0] ss:$16 sps:$4 sm:$0xff]  }
  0xf6   : > { %2083 = vmatmul.mubr.bf16.gmra.mxu1 %v10754_v28 }
  0xf7   : > { %9851 = vmatprep.mubr.msk.bf16.mxu1 %vm1607_vm0, %v10758_v29  ;;  %v10938_v29 = vld [vmem:[%s16114_s3 + $0xe0] ss:$8 sps:$4 sm:$0xff]  }
  0xf8   : > { %1790 = vmatmul.mubr.bf16.gmra.mxu0 %v10745_v26  ;;  %v10848_v26 = vld [vmem:[%s11925_s21 + $0x324] ss:$16 sps:$4 sm:$0xff]  }
  0xf9   : > { %1799 = vmatprep.mubr.bf16.mxu0 %v10749_v27  ;;  %v10917_v27 = vld [vmem:[%s16114_s3 + $0xf0] ss:$8 sps:$4 sm:$0xff]  }
  0xfe   : > { %2093 = vmatmul.mubr.bf16.gmra.mxu1 %v10760_v32 }
  0xff   : > { %9852 = vmatprep.mubr.msk.bf16.mxu1 %vm1607_vm0, %v10764_v33  ;;  %v10847_v33 = vld [vmem:[%s11925_s21 + $0x30c] ss:$16 sps:$4 sm:$0xff]  }
 0x100   : > { %1800 = vmatmul.mubr.bf16.gmra.mxu0 %v10751_v30  ;;  %v10940_v30 = vld [vmem:[%s16114_s3 + $0xe4] ss:$8 sps:$4 sm:$0xff]  }
 0x101   : > { %1809 = vmatprep.mubr.bf16.mxu0 %v10755_v31  ;;  %v10841_v31 = vld [vmem:[%s11925_s21 + $0x2e0] ss:$16 sps:$4 sm:$0xff]  }
 0x106   : > { %2103 = vmatmul.mubr.bf16.gmra.mxu1 %v10766_v36  ;;  %v10854_v36 = vld [vmem:[%s11925_s21 + $0x344] ss:$16 sps:$4 sm:$0xff]  }
 0x107   : > { %9853 = vmatprep.mubr.msk.bf16.mxu1 %vm1607_vm0, %v10770_v37 }
 0x108   : > { %1810 = vmatmul.mubr.bf16.gmra.mxu0 %v10757_v34 }
 0x109   : > { %1819 = vmatprep.mubr.bf16.mxu0 %v10761_v35  ;;  %v10850_v35 = vld [vmem:[%s11925_s21 + $0x320] ss:$16 sps:$4 sm:$0xff]  }
 0x10e   : > { %2113 = vmatmul.mubr.bf16.gmra.mxu1 %v10772_v40 }
 0x10f   : > { %9854 = vmatprep.mubr.msk.bf16.mxu1 %vm1607_vm0, %v10776_v41  ;;  %v10851_v41 = vld [vmem:[%s11925_s21 + $0x32c] ss:$16 sps:$4 sm:$0xff]  }
 0x110   : > { %1820 = vmatmul.mubr.bf16.gmra.mxu0 %v10763_v38 }
 0x111   : > { %1829 = vmatprep.mubr.bf16.mxu0 %v10767_v39  ;;  %v10845_v39 = vld [vmem:[%s11925_s21 + $0x308] ss:$16 sps:$4 sm:$0xff]  }
 0x116   : > { %2123 = vmatmul.mubr.bf16.gmra.mxu1 %v10778_v44  ;;  %v10860_v44 = vld [vmem:[%s11925_s21 + $0x364] ss:$16 sps:$4 sm:$0xff]  }
 0x117   : > { %9855 = vmatprep.mubr.msk.bf16.mxu1 %vm1607_vm0, %v10782_v45 }
 0x118   : > { %1830 = vmatmul.mubr.bf16.gmra.mxu0 %v10769_v42 }
 0x119   : > { %1839 = vmatprep.mubr.bf16.mxu0 %v10773_v43  ;;  %v10856_v43 = vld [vmem:[%s11925_s21 + $0x340] ss:$16 sps:$4 sm:$0xff]  }
 0x11e   : > { %2133 = vmatmul.mubr.bf16.gmra.mxu1 %v10784_v48 }
 0x11f   : > { %9856 = vmatprep.mubr.msk.bf16.mxu1 %vm1607_vm0, %v10788_v49 }
 0x120   : > { %1840 = vmatmul.mubr.bf16.gmra.mxu0 %v10775_v46 }
 0x121   : > { %1849 = vmatprep.mubr.bf16.mxu0 %v10779_v47 }
 0x126   : > { %2143 = vmatmul.mubr.bf16.gmra.mxu1 %v10790_v52  ;;  %v10853_v52 = vld [vmem:[%s11925_s21 + $0x328] ss:$16 sps:$4 sm:$0xff]  }
 0x127   : > { %9857 = vmatprep.mubr.msk.bf16.mxu1 %vm1607_vm0, %v10794_v53 }
 0x128   : > { %1850 = vmatmul.mubr.bf16.gmra.mxu0 %v10781_v50 }
 0x129   : > { %1859 = vmatprep.mubr.bf16.mxu0 %v10785_v51 }
 0x12e   : > { %2153 = vmatmul.mubr.bf16.gmra.mxu1 %v10796_v56 }
 0x12f   : > { %9858 = vmatprep.mubr.msk.bf16.mxu1 %vm1607_vm0, %v10800_v57 }
 0x130   : > { %1860 = vmatmul.mubr.bf16.gmra.mxu0 %v10787_v54 }
 0x131   : > { %1869 = vmatprep.mubr.bf16.mxu0 %v10791_v55  ;;  %v10857_v55 = vld [vmem:[%s11925_s21 + $0x34c] ss:$16 sps:$4 sm:$0xff]  }
 0x136   : > { %2163 = vmatmul.mubr.bf16.gmra.mxu1 %v10802_v60  ;;  %v10868_v60 = vld [vmem:[%s11925_s21 + $0x384] ss:$16 sps:$4 sm:$0xff]  }
 0x137   : > { %9859 = vmatprep.mubr.msk.bf16.mxu1 %vm1607_vm0, %v10806_v61 }
 0x138   : > { %1870 = vmatmul.mubr.bf16.gmra.mxu0 %v10793_v58  ;;  %v10862_v58 = vld [vmem:[%s11925_s21 + $0x360] ss:$16 sps:$4 sm:$0xff]  }
 0x139   : > { %1879 = vmatprep.mubr.bf16.mxu0 %v10797_v59 }
 0x13e   : > { %2173 = vmatmul.mubr.bf16.gmra.mxu1 %v10808_v0 }
 0x13f   : > { %9860 = vmatprep.mubr.msk.bf16.mxu1 %vm1607_vm0, %v10812_v1 }
 0x140   : > { %1880 = vmatmul.mubr.bf16.gmra.mxu0 %v10799_v62 }
 0x141   : > { %1889 = vmatprep.mubr.bf16.mxu0 %v10803_v63 }
 0x146   : > { %2183 = vmatmul.mubr.bf16.gmra.mxu1 %v10814_v4  ;;  %v10961_v4 = vld [vmem:[%s16114_s3 + $0xd4] ss:$8 sps:$4 sm:$0xff]  }
 0x147   : > { %9861 = vmatprep.mubr.msk.bf16.mxu1 %vm1607_vm0, %v10818_v5 }
 0x148   : > { %1890 = vmatmul.mubr.bf16.gmra.mxu0 %v10805_v2 }
 0x149   : > { %1899 = vmatprep.mubr.bf16.mxu0 %v10809_v3  ;;  %v10959_v3 = vld [vmem:[%s16114_s3 + $0xd0] ss:$8 sps:$4 sm:$0xff]  }
 0x14e   : > { %2193 = vmatmul.mubr.bf16.gmra.mxu1 %v10820_v8 }
 0x14f   : > { %9862 = vmatprep.mubr.msk.bf16.mxu1 %vm1607_vm0, %v10824_v9  ;;  %v10863_v9 = vld [vmem:[%s11925_s21 + $0x36c] ss:$16 sps:$4 sm:$0xff]  }
 0x150   : > { %1900 = vmatmul.mubr.bf16.gmra.mxu0 %v10811_v6  ;;  %v10859_v6 = vld [vmem:[%s11925_s21 + $0x348] ss:$16 sps:$4 sm:$0xff]  }
 0x151   : > { %1909 = vmatprep.mubr.bf16.mxu0 %v10815_v7 }
 0x156   : > { %2203 = vmatmul.mubr.bf16.gmra.mxu1 %v10826_v12  ;;  %v10866_v12 = vld [vmem:[%s11925_s21 + $0x380] ss:$16 sps:$4 sm:$0xff]  }
 0x157   : > { %9863 = vmatprep.mubr.msk.bf16.mxu1 %vm1607_vm0, %v10830_v13 }
 0x158   : > { %1910 = vmatmul.mubr.bf16.gmra.mxu0 %v10817_v10 }
 0x159   : > { %1919 = vmatprep.mubr.bf16.mxu0 %v10821_v11 }
 0x15e   : > { %2213 = vmatmul.mubr.bf16.gmra.mxu1 %v10832_v17 }
 0x15f   : > { %9864 = vmatprep.mubr.msk.bf16.mxu1 %vm1607_vm0, %v10836_v18 }
 0x160   : > { %1920 = vmatmul.mubr.bf16.gmra.mxu0 %v10823_v15 }
 0x161   : > { %1929 = vmatprep.mubr.bf16.mxu0 %v10827_v16 }
 0x166   : > { %2223 = vmatmul.mubr.bf16.gmra.mxu1 %v10838_v21 }
 0x167   : > { %2890 = vmatprep.mubr.bf16.mxu1 %v10844_v22  ;;  %v10865_v22 = vld [vmem:[%s11925_s21 + $0x368] ss:$16 sps:$4 sm:$0xff]  }
 0x168   : > { %1930 = vmatmul.mubr.bf16.gmra.mxu0 %v10829_v19 }
 0x169   : > { %1939 = vmatprep.mubr.bf16.mxu0 %v10833_v20 }
 0x16e   : > { %v1994_v28 = vpop.f32.mrf.mxu1  ;;  %2891 = vmatmul.mubr.bf16.vlgmr.msra.gmra.mxu1 %v10842_v25  ;;  %v10869_v25 = vld [vmem:[%s11925_s21 + $0x38c] ss:$16 sps:$4 sm:$0xff]  }
 0x16f   : > { %2900 = vmatprep.mubr.bf16.mxu1 %v10848_v26  ;;  %4248 = vmatpush1.bf16.msra.mxu1 %v10917_v27 }
 0x170   : > { %1940 = vmatmul.mubr.bf16.gmra.mxu0 %v10835_v23  ;;  %v1996_v32 = vpop.f32.mrf.mxu1  ;;  %4249 = vmatprep.subr.bf16.mxu1 %v10940_v30  ;;  %v10880_v30 = vld [vmem:[%s11925_s21 + $0x3c4] ss:$16 sps:$4 sm:$0xff]  }
 0x171   : > { %1949 = vmatprep.mubr.bf16.mxu0 %v10839_v24 }
 0x172   : > { %v1998_v34 = vpop.f32.mrf.mxu1 }
 0x173   : > { %4250 = vmatpush1.bf16.msra.mxu1 %v10938_v29 }
 0x174   : > { %v2000_v37 = vpop.f32.mrf.mxu1  ;;  %4251 = vmatprep.subr.bf16.mxu1 %v10961_v4  ;;  %v10884_v4 = vld [vmem:[%s11925_s21 + $0x3e0] ss:$16 sps:$4 sm:$0xff]  }
 0x176   : > { %v2004_v38 = vpop.f32.mrf.mxu1  ;;  %2901 = vmatmul.mubr.bf16.gmra.mxu1 %v10850_v35 }
 0x177   : > { %2910 = vmatprep.mubr.bf16.mxu1 %v10854_v36  ;;  %4252 = vmatpush1.bf16.msra.mxu1 %v10959_v3 }
 0x178   : > { %1950 = vmatmul.mubr.bf16.gmra.mxu0 %v10841_v31  ;;  %v2006_v40 = vpop.f32.mrf.mxu1 }
 0x179   : > { %10058 = vmatprep.mubr.msk.bf16.mxu0 %vm1607_vm0, %v10847_v33 }
 0x17a   : > { %v2008_v42 = vpop.f32.mrf.mxu1 }
 0x17c   : > { %v2010_v46 = vpop.f32.mrf.mxu1 }
 0x17e   : > { %v2014_v49 = vpop.f32.mrf.mxu1  ;;  %2911 = vmatmul.mubr.bf16.gmra.mxu1 %v10856_v43 }
 0x17f   : > { %2920 = vmatprep.mubr.bf16.mxu1 %v10860_v44  ;;  %v10878_v44 = vld [vmem:[%s11925_s21 + $0x3c0] ss:$16 sps:$4 sm:$0xff]  }
 0x180   : > { %v1721_v45 = vpop.f32.mrf.mxu0  ;;  %3164 = vmatmul.mubr.bf16.vlgmr.msra.gmra.mxu0 %v10845_v39  ;;  %v2016_v53 = vpop.f32.mrf.mxu1 }
 0x181   : > { %v12239_v47 = vadd.f32 %v1994_v28, %v1721_v45  ;;  %10059 = vmatprep.mubr.msk.bf16.mxu0 %vm1607_vm0, %v10851_v41  ;;  %v10872_v28 = vld [vmem:[%s11925_s21 + $0x3a0] ss:$16 sps:$4 sm:$0xff]   ;;  %v10875_v41 = vld [vmem:[%s11925_s21 + $0x3ac] ss:$16 sps:$4 sm:$0xff]  }
 0x182   : > { %v1723_v48 = vpop.f32.mrf.mxu0  ;;  %v2018_v57 = vpop.f32.mrf.mxu1 }
 0x183   : > { %v12242_v50 = vadd.f32 %v1996_v32, %v1723_v48 }
 0x184   : > { %v1725_v51 = vpop.f32.mrf.mxu0  ;;  %v2020_v62 = vpop.f32.mrf.mxu1 }
 0x185   : > { %v12245_v54 = vadd.f32 %v1998_v34, %v1725_v51 }
 0x186   : > { %v1727_v56 = vpop.f32.mrf.mxu0  ;;  %v2024_v1 = vpop.f32.mrf.mxu1  ;;  %2921 = vmatmul.mubr.bf16.gmra.mxu1 %v10862_v58 }
 0x187   : > { %v12249_v59 = vadd.f32 %v2000_v37, %v1727_v56  ;;  %2930 = vmatprep.mubr.bf16.mxu1 %v10868_v60  ;;  %v10980_v56 = vld [vmem:[%s16114_s3 + $0xc0] ss:$8 sps:$4 sm:$0xff]  }
 0x188   : > { %v1731_v61 = vpop.f32.mrf.mxu0  ;;  %3174 = vmatmul.mubr.bf16.gmra.mxu0 %v10853_v52  ;;  %v2026_v7 = vpop.f32.mrf.mxu1  ;;  %v10877_v60 = vld [vmem:[%s11925_s21 + $0x3a8] ss:$16 sps:$4 sm:$0xff]  }
 0x189   : > { %v12252_v63 = vadd.f32 %v2004_v38, %v1731_v61  ;;  %10060 = vmatprep.mubr.msk.bf16.mxu0 %vm1607_vm0, %v10857_v55  ;;  %v10871_v38 = vld [vmem:[%s11925_s21 + $0x388] ss:$16 sps:$4 sm:$0xff]  }
 0x18a   : > { %v1733_v0 = vpop.f32.mrf.mxu0  ;;  %v2028_v11 = vpop.f32.mrf.mxu1 }
 0x18b   : > { %v12255_v2 = vadd.f32 %v2006_v40, %v1733_v0  ;;  %v10881_v0 = vld [vmem:[%s11925_s21 + $0x3cc] ss:$16 sps:$4 sm:$0xff]  }
 0x18c   : > { %v1735_v5 = vpop.f32.mrf.mxu0  ;;  %v2030_v16 = vpop.f32.mrf.mxu1 }
 0x18d   : > { %v12264_v8 = vadd.f32 %v2008_v42, %v1735_v5 }
 0x18e   : > { %v1737_v10 = vpop.f32.mrf.mxu0  ;;  %v2034_v19 = vpop.f32.mrf.mxu1  ;;  %2931 = vmatmul.mubr.bf16.gmra.mxu1 %v10866_v12 }
 0x18f   : > { %v12268_v13 = vadd.f32 %v2010_v46, %v1737_v10  ;;  %2940 = vmatprep.mubr.bf16.mxu1 %v10874_v14  ;;  %v10886_v46 = vld [vmem:[%s11925_s21 + $0x3e4] ss:$16 sps:$4 sm:$0xff]  }
 0x190   : > { %v1741_v15 = vpop.f32.mrf.mxu0  ;;  %3184 = vmatmul.mubr.bf16.gmra.mxu0 %v10859_v6  ;;  %v2036_v23 = vpop.f32.mrf.mxu1  ;;  %v10892_v6 = vld [vmem:[%s11925_s21 + $0x404] ss:$16 sps:$4 sm:$0xff]  }
 0x191   : > { %v12271_v17 = vadd.f32 %v2014_v49, %v1741_v15  ;;  %10061 = vmatprep.mubr.msk.bf16.mxu0 %vm1607_vm0, %v10863_v9 }
 0x192   : > { %v1743_v18 = vpop.f32.mrf.mxu0  ;;  %v2038_v27 = vpop.f32.mrf.mxu1 }
 0x193   : > { %v12274_v20 = vadd.f32 %v2016_v53, %v1743_v18 }
 0x194   : > { %v1745_v21 = vpop.f32.mrf.mxu0  ;;  %v2040_v32 = vpop.f32.mrf.mxu1 }
 0x195   : > { %v12277_v24 = vadd.f32 %v2018_v57, %v1745_v21  ;;  %v10982_v57 = vld [vmem:[%s16114_s3 + $0xc4] ss:$8 sps:$4 sm:$0xff]  }
 0x196   : > { %v1747_v26 = vpop.f32.mrf.mxu0  ;;  %v2044_v35 = vpop.f32.mrf.mxu1  ;;  %2941 = vmatmul.mubr.bf16.gmra.mxu1 %v10872_v28  ;;  %4253 = vmatprep.subr.bf16.mxu1 %v10982_v57  ;;  %v10887_v21 = vld [vmem:[%s11925_s21 + $0x3ec] ss:$16 sps:$4 sm:$0xff]   ;;  %v10998_v57 = vld [vmem:[%s16114_s3 + $0x70] ss:$8 sps:$4 sm:$0xff]  }
 0x197   : > { %v12281_v29 = vadd.f32 %v2020_v62, %v1747_v26  ;;  %2950 = vmatprep.mubr.bf16.mxu1 %v10880_v30  ;;  %4254 = vmatpush1.bf16.msra.mxu1 %v10980_v56 }
 0x198   : > { %v1751_v31 = vpop.f32.mrf.mxu0  ;;  %3194 = vmatmul.mubr.bf16.gmra.mxu0 %v10865_v22  ;;  %v2046_v39 = vpop.f32.mrf.mxu1 }
 0x199   : > { %v12284_v33 = vadd.f32 %v2024_v1, %v1751_v31  ;;  %10062 = vmatprep.mubr.msk.bf16.mxu0 %vm1607_vm0, %v10869_v25  ;;  %v10890_v25 = vld [vmem:[%s11925_s21 + $0x400] ss:$16 sps:$4 sm:$0xff]  }
 0x19a   : > { %v1753_v34 = vpop.f32.mrf.mxu0  ;;  %v2048_v43 = vpop.f32.mrf.mxu1 }
 0x19b   : > { %v12287_v36 = vadd.f32 %v2026_v7, %v1753_v34 }
 0x19c   : > { %v1755_v37 = vpop.f32.mrf.mxu0  ;;  %v2050_v49 = vpop.f32.mrf.mxu1 }
 0x19d   : > { %v12290_v40 = vadd.f32 %v2028_v11, %v1755_v37 }
 0x19e   : > { %v1757_v42 = vpop.f32.mrf.mxu0  ;;  %v2054_v53 = vpop.f32.mrf.mxu1  ;;  %2951 = vmatmul.mubr.bf16.gmra.mxu1 %v10878_v44 }
 0x19f   : > { %v12294_v45 = vadd.f32 %v2030_v16, %v1757_v42  ;;  %2960 = vmatprep.mubr.bf16.mxu1 %v10886_v46  ;;  %v10883_v16 = vld [vmem:[%s11925_s21 + $0x3c8] ss:$16 sps:$4 sm:$0xff]   ;;  %v10893_v42 = vld [vmem:[%s11925_s21 + $0x40c] ss:$16 sps:$4 sm:$0xff]   ;;  %v10896_v46 = vld [vmem:[%s11925_s21 + $0x420] ss:$16 sps:$4 sm:$0xff]  }
 0x1a0   : > { %v1761_v48 = vpop.f32.mrf.mxu0  ;;  %3204 = vmatmul.mubr.bf16.gmra.mxu0 %v10871_v38  ;;  %v2056_v61 = vpop.f32.mrf.mxu1  ;;  %v10889_v38 = vld [vmem:[%s11925_s21 + $0x3e8] ss:$16 sps:$4 sm:$0xff]  }
 0x1a1   : > { %v12297_v51 = vadd.f32 %v2034_v19, %v1761_v48  ;;  %10063 = vmatprep.mubr.msk.bf16.mxu0 %vm1607_vm0, %v10875_v41 }
 0x1a2   : > { %v1763_v52 = vpop.f32.mrf.mxu0  ;;  %v2058_v3 = vpop.f32.mrf.mxu1 }
 0x1a3   : > { %v12300_v55 = vadd.f32 %v2036_v23, %v1763_v52  ;;  %v11000_v52 = vld [vmem:[%s16114_s3 + $0x74] ss:$8 sps:$4 sm:$0xff]  }
 0x1a4   : > { %v1765_v58 = vpop.f32.mrf.mxu0  ;;  %v2060_v9 = vpop.f32.mrf.mxu1  ;;  %4520 = vmatprep.subr.bf16.mxu0 %v11000_v52  ;;  %v11010_v52 = vld [vmem:[%s16114_s3 + $0x40] ss:$8 sps:$4 sm:$0xff]  }
 0x1a5   : > { %v12309_v62 = vadd.f32 %v2038_v27, %v1765_v58  ;;  %v10898_v27 = vld [vmem:[%s11925_s21 + $0x424] ss:$16 sps:$4 sm:$0xff]   ;;  %4521 = vmatpush1.bf16.msra.mxu0 %v10998_v57  ;;  %v10905_v57 = vld [vmem:[%s11925_s21 + $0x44c] ss:$16 sps:$4 sm:$0xff]  }
 0x1a6   : > { %v1767_v1 = vpop.f32.mrf.mxu0  ;;  %v2064_v12 = vpop.f32.mrf.mxu1  ;;  %2961 = vmatmul.mubr.bf16.gmra.mxu1 %v10884_v4  ;;  %v11006_v4 = vld [vmem:[%s16114_s3 + $0x64] ss:$8 sps:$4 sm:$0xff]  }
 0x1a7   : > { %v12313_v5 = vadd.f32 %v2040_v32, %v1767_v1  ;;  %2970 = vmatprep.mubr.bf16.mxu1 %v10892_v6  ;;  %v11001_v1 = vld [vmem:[%s16114_s3 + $0xb0] ss:$8 sps:$4 sm:$0xff]   ;;  %4522 = vmatprep.subr.bf16.mxu0 %v11006_v4  ;;  %v10916_v4 = vld [vmem:[%s11925_s21 + $0x484] ss:$16 sps:$4 sm:$0xff]  }
 0x1a8   : > { %v1771_v7 = vpop.f32.mrf.mxu0  ;;  %3214 = vmatmul.mubr.bf16.gmra.mxu0 %v10877_v60  ;;  %v2066_v18 = vpop.f32.mrf.mxu1 }
 0x1a9   : > { %v12316_v10 = vadd.f32 %v2044_v35, %v1771_v7  ;;  %10064 = vmatprep.mubr.msk.bf16.mxu0 %vm1607_vm0, %v10881_v0  ;;  %v10895_v7 = vld [vmem:[%s11925_s21 + $0x408] ss:$16 sps:$4 sm:$0xff]  }
 0x1aa   : > { %v1773_v11 = vpop.f32.mrf.mxu0  ;;  %v2068_v23 = vpop.f32.mrf.mxu1 }
 0x1ab   : > { %v12319_v14 = vadd.f32 %v2046_v39, %v1773_v11  ;;  %v11004_v11 = vld [vmem:[%s16114_s3 + $0x60] ss:$8 sps:$4 sm:$0xff]  }
 0x1ac   : > { %v1775_v15 = vpop.f32.mrf.mxu0  ;;  %v2070_v30 = vpop.f32.mrf.mxu1  ;;  %4523 = vmatpush1.bf16.msra.mxu0 %v11004_v11  ;;  %v11015_v11 = vld [vmem:[%s16114_s3 + $0x34] ss:$8 sps:$4 sm:$0xff]  }
 0x1ad   : > { %v12322_v19 = vadd.f32 %v2048_v43, %v1775_v15  ;;  %v10899_v15 = vld [vmem:[%s11925_s21 + $0x42c] ss:$16 sps:$4 sm:$0xff]  }
 0x1ae   : > { %v1777_v22 = vpop.f32.mrf.mxu0  ;;  %v2074_v34 = vpop.f32.mrf.mxu1  ;;  %2971 = vmatmul.mubr.bf16.gmra.mxu1 %v10890_v25  ;;  %v10910_v25 = vld [vmem:[%s11925_s21 + $0x464] ss:$16 sps:$4 sm:$0xff]  }
 0x1af   : > { %v12326_v26 = vadd.f32 %v2050_v49, %v1777_v22  ;;  %2980 = vmatprep.mubr.bf16.mxu1 %v10898_v27  ;;  %v10904_v49 = vld [vmem:[%s11925_s21 + $0x444] ss:$16 sps:$4 sm:$0xff]  }
 0x1b0   : > { %v1781_v28 = vpop.f32.mrf.mxu0  ;;  %3224 = vmatmul.mubr.bf16.gmra.mxu0 %v10883_v16  ;;  %v2076_v39 = vpop.f32.mrf.mxu1  ;;  %v11009_v27 = vld [vmem:[%s16114_s3 + $0x54] ss:$8 sps:$4 sm:$0xff]  }
 0x1b1   : > { %v12329_v31 = vadd.f32 %v2054_v53, %v1781_v28  ;;  %10065 = vmatprep.mubr.msk.bf16.mxu0 %vm1607_vm0, %v10887_v21  ;;  %v10902_v21 = vld [vmem:[%s11925_s21 + $0x440] ss:$16 sps:$4 sm:$0xff]   ;;  %4524 = vmatprep.subr.bf16.mxu0 %v11009_v27  ;;  %v10907_v27 = vld [vmem:[%s11925_s21 + $0x448] ss:$16 sps:$4 sm:$0xff]  }
 0x1b2   : > { %v1783_v32 = vpop.f32.mrf.mxu0  ;;  %v2078_v44 = vpop.f32.mrf.mxu1 }
 0x1b3   : > { %v12332_v35 = vadd.f32 %v2056_v61, %v1783_v32  ;;  %v11007_v32 = vld [vmem:[%s16114_s3 + $0x50] ss:$8 sps:$4 sm:$0xff]  }
 0x1b4   : > { %v1785_v37 = vpop.f32.mrf.mxu0  ;;  %v2080_v56 = vpop.f32.mrf.mxu1  ;;  %4525 = vmatpush1.bf16.msra.mxu0 %v11007_v32  ;;  %v10911_v32 = vld [vmem:[%s11925_s21 + $0x46c] ss:$16 sps:$4 sm:$0xff]  }
 0x1b5   : > { %v12335_v41 = vadd.f32 %v2058_v3, %v1785_v37  ;;  %v11003_v3 = vld [vmem:[%s16114_s3 + $0xb4] ss:$8 sps:$4 sm:$0xff]  }
 0x1b6   : > { %v1787_v43 = vpop.f32.mrf.mxu0  ;;  %v2084_v61 = vpop.f32.mrf.mxu1  ;;  %2981 = vmatmul.mubr.bf16.gmra.mxu1 %v10896_v46  ;;  %4255 = vmatprep.subr.bf16.mxu1 %v11003_v3 }
 0x1b7   : > { %v12339_v48 = vadd.f32 %v2060_v9, %v1787_v43  ;;  %2990 = vmatprep.mubr.bf16.mxu1 %v10904_v49  ;;  %4256 = vmatpush1.bf16.msra.mxu1 %v11001_v1  ;;  %v11012_v43 = vld [vmem:[%s16114_s3 + $0x44] ss:$8 sps:$4 sm:$0xff]   ;;  %v10901_v49 = vld [vmem:[%s11925_s21 + $0x428] ss:$16 sps:$4 sm:$0xff]  }
 0x1b8   : > { %v1791_v53 = vpop.f32.mrf.mxu0  ;;  %3234 = vmatmul.mubr.bf16.gmra.mxu0 %v10889_v38  ;;  %v2086_v9 = vpop.f32.mrf.mxu1  ;;  %4526 = vmatprep.subr.bf16.mxu0 %v11012_v43 }
 0x1b9   : > { %v12348_v58 = vadd.f32 %v2064_v12, %v1791_v53  ;;  %10066 = vmatprep.mubr.msk.bf16.mxu0 %vm1607_vm0, %v10893_v42  ;;  %4527 = vmatpush1.bf16.msra.mxu0 %v11010_v52 }
 0x1ba   : > { %v1793_v60 = vpop.f32.mrf.mxu0  ;;  %4528 = vmatprep.subr.bf16.mxu0 %v11015_v11 }
 0x1bb   : > { %v12351_v0 = vadd.f32 %v2066_v18, %v1793_v60  ;;  %v2088_v18 = vpop.f32.mrf.mxu1 }
 0x1bc   : > { %v1795_v6 = vpop.f32.mrf.mxu0 }
 0x1bd   : > { %v12366_v12 = vadd.f32 %v2068_v23, %v1795_v6  ;;  %v2090_v23 = vpop.f32.mrf.mxu1 }
 0x1be   : > { %v1797_v16 = vpop.f32.mrf.mxu0  ;;  %2991 = vmatmul.mubr.bf16.gmra.mxu1 %v10902_v21 }
 0x1bf   : > { %v12370_v22 = vadd.f32 %v2070_v30, %v1797_v16  ;;  %v2094_v38 = vpop.f32.mrf.mxu1  ;;  %3000 = vmatprep.mubr.bf16.mxu1 %v10910_v25 }
 0x1c0   : > { %v1801_v28 = vpop.f32.mrf.mxu0  ;;  %3244 = vmatmul.mubr.bf16.gmra.mxu0 %v10895_v7 }
 0x1c1   : > { %16281 = vst [vmem:[#allocation6_spill] sm:$0xff] %v12370_v22  ;;  %v12379_v37 = vadd.f32 %v2074_v34, %v1801_v28  ;;  %10067 = vmatprep.mubr.msk.bf16.mxu0 %vm1607_vm0, %v10899_v15  ;;  %v2096_v34 = vpop.f32.mrf.mxu1  ;;  %v11013_v15 = vld [vmem:[%s16114_s3 + $0x30] ss:$8 sps:$4 sm:$0xff]  }
 0x1c2   : > { %v1803_v30 = vpop.f32.mrf.mxu0  ;;  %4529 = vmatpush1.bf16.msra.mxu0 %v11013_v15 }
 0x1c3   : > { %16282 = vst [vmem:[#allocation7_spill] sm:$0xff] %v12379_v37  ;;  %v12382_v42 = vadd.f32 %v2076_v39, %v1803_v30  ;;  %v2098_v1 = vpop.f32.mrf.mxu1  ;;  %v10908_v39 = vld [vmem:[%s11925_s21 + $0x460] ss:$16 sps:$4 sm:$0xff]   ;;  %v11018_v30 = vld [vmem:[%s16114_s3 + $0x24] ss:$8 sps:$4 sm:$0xff]  }
 0x1c4   : > { %v1805_v46 = vpop.f32.mrf.mxu0  ;;  %4530 = vmatprep.subr.bf16.mxu0 %v11018_v30 }
 0x1c5   : > { %16283 = vst [vmem:[#allocation8_spill] sm:$0xff] %v12382_v42  ;;  %v12391_v53 = vadd.f32 %v2078_v44, %v1805_v46  ;;  %v2100_v7 = vpop.f32.mrf.mxu1 }
 0x1c6   : > { %v1807_v60 = vpop.f32.mrf.mxu0  ;;  %3001 = vmatmul.mubr.bf16.gmra.mxu1 %v10908_v39 }
 0x1c7   : > { %16284 = vst [vmem:[#allocation9_spill] sm:$0xff] %v12391_v53  ;;  %v12395_v3 = vadd.f32 %v2080_v56, %v1807_v60  ;;  %v2104_v16 = vpop.f32.mrf.mxu1  ;;  %3010 = vmatprep.mubr.bf16.mxu1 %v10916_v4  ;;  %v11021_v4 = vld [vmem:[%s16114_s3 + $0x14] ss:$8 sps:$4 sm:$0xff]  }
 0x1c8   : > { %v1811_v6 = vpop.f32.mrf.mxu0  ;;  %3254 = vmatmul.mubr.bf16.gmra.mxu0 %v10901_v49  ;;  %v10914_v49 = vld [vmem:[%s11925_s21 + $0x480] ss:$16 sps:$4 sm:$0xff]  }
 0x1c9   : > { %16285 = vst [vmem:[#allocation10_spill] sm:$0xff] %v12395_v3  ;;  %v12401_v44 = vadd.f32 %v2084_v61, %v1811_v6  ;;  %10068 = vmatprep.mubr.msk.bf16.mxu0 %vm1607_vm0, %v10905_v57  ;;  %v2106_v61 = vpop.f32.mrf.mxu1  ;;  %v10925_v57 = vld [vmem:[%s11925_s21 + $0x4a4] ss:$16 sps:$4 sm:$0xff]  }
 0x1ca   : > { %v1813_v56 = vpop.f32.mrf.mxu0 }
 0x1cb   : > { %16286 = vst [vmem:[#allocation11_spill] sm:$0xff] %v12401_v44  ;;  %v12407_v21 = vadd.f32 %v2086_v9, %v1813_v56  ;;  %v2108_v46 = vpop.f32.mrf.mxu1  ;;  %v11016_v9 = vld [vmem:[%s16114_s3 + $0x20] ss:$8 sps:$4 sm:$0xff]  }
 0x1cc   : > { %v1815_v25 = vpop.f32.mrf.mxu0  ;;  %4531 = vmatpush1.bf16.msra.mxu0 %v11016_v9  ;;  %v11022_v56 = vld [vmem:[%s16114_s3 + $0xa0] ss:$8 sps:$4 sm:$0xff]  }
 0x1cd   : > { %16287 = vst [vmem:[#allocation12_spill] sm:$0xff] %v12407_v21  ;;  %v12410_v28 = vadd.f32 %v2088_v18, %v1815_v25  ;;  %v2110_v18 = vpop.f32.mrf.mxu1  ;;  %4532 = vmatprep.subr.bf16.mxu0 %v11021_v4  ;;  %v11030_v4 = vld [vmem:[%s16114_s3 + $0x94] ss:$8 sps:$4 sm:$0xff]  }
 0x1ce   : > { %v1817_v43 = vpop.f32.mrf.mxu0  ;;  %3011 = vmatmul.mubr.bf16.gmra.mxu1 %v10914_v49 }
 0x1cf   : > { %16288 = vst [vmem:[#allocation13_spill] sm:$0xff] %v12410_v28  ;;  %v12420_v52 = vadd.f32 %v2090_v23, %v1817_v43  ;;  %v2114_v11 = vpop.f32.mrf.mxu1  ;;  %v11019_v23 = vld [vmem:[%s16114_s3 + $0x10] ss:$8 sps:$4 sm:$0xff]   ;;  %3020 = vmatprep.mubr.bf16.mxu1 %v10925_v57  ;;  %v10920_v43 = vld [vmem:[%s11925_s21 + $0x48c] ss:$16 sps:$4 sm:$0xff]  }
 0x1d0   : > { %v1821_v60 = vpop.f32.mrf.mxu0  ;;  %3264 = vmatmul.mubr.bf16.gmra.mxu0 %v10907_v27  ;;  %v10913_v27 = vld [vmem:[%s11925_s21 + $0x468] ss:$16 sps:$4 sm:$0xff]   ;;  %v10923_v57 = vld [vmem:[%s11925_s21 + $0x4a0] ss:$16 sps:$4 sm:$0xff]  }
 0x1d1   : > { %16289 = vst [vmem:[#allocation14_spill] sm:$0xff] %v12420_v52  ;;  %v12423_v39 = vadd.f32 %v2094_v38, %v1821_v60  ;;  %10069 = vmatprep.mubr.msk.bf16.mxu0 %vm1607_vm0, %v10911_v32  ;;  %v11024_v38 = vld [vmem:[%s16114_s3 + $0xa4] ss:$8 sps:$4 sm:$0xff]   ;;  %v2116_v32 = vpop.f32.mrf.mxu1  ;;  %4533 = vmatpush1.bf16.msra.mxu0 %v11019_v23  ;;  %v11025_v60 = vld [vmem:[%s16114_s3] ss:$8 sps:$4 sm:$0xff]  }
 0x1d2   : > { %v1823_v6 = vpop.f32.mrf.mxu0  ;;  %4257 = vmatprep.subr.bf16.mxu1 %v11024_v38  ;;  %v11028_v23 = vld [vmem:[%s16114_s3 + $0x90] ss:$8 sps:$4 sm:$0xff]  }
 0x1d3   : > { %16290 = vst [vmem:[#allocation15_spill] sm:$0xff] %v12423_v39  ;;  %v12435_v15 = vadd.f32 %v2096_v34, %v1823_v6  ;;  %4258 = vmatpush1.bf16.msra.mxu1 %v11022_v56  ;;  %v11027_v34 = vld [vmem:[%s16114_s3 + $0x4] ss:$8 sps:$4 sm:$0xff]   ;;  %v2118_v9 = vpop.f32.mrf.mxu1 }
 0x1d4   : > { %v1825_v25 = vpop.f32.mrf.mxu0  ;;  %v10931_v6 = vld [vmem:[%s11925_s21 + $0x4c4] ss:$16 sps:$4 sm:$0xff]   ;;  %4534 = vmatprep.subr.bf16.mxu0 %v11027_v34  ;;  %4259 = vmatprep.subr.bf16.mxu1 %v11030_v4  ;;  %v10922_v4 = vld [vmem:[%s11925_s21 + $0x488] ss:$16 sps:$4 sm:$0xff]  }
 0x1d5   : > { %16291 = vst [vmem:[#allocation16_spill] sm:$0xff] %v12435_v15  ;;  %v12441_v30 = vadd.f32 %v2098_v1, %v1825_v25  ;;  %v2120_v56 = vpop.f32.mrf.mxu1  ;;  %4535 = vmatpush1.bf16.msra.mxu0 %v11025_v60 }
 0x1d6   : > { %v1827_v49 = vpop.f32.mrf.mxu0  ;;  %3021 = vmatmul.mubr.bf16.gmra.mxu1 %v10923_v57 }
 0x1d7   : > { %16292 = vst [vmem:[#allocation17_spill] sm:$0xff] %v12441_v30  ;;  %v12454_v1 = vadd.f32 %v2100_v7, %v1827_v49  ;;  %v2124_v7 = vpop.f32.mrf.mxu1  ;;  %3030 = vmatprep.mubr.bf16.mxu1 %v10931_v6  ;;  %4260 = vmatpush1.bf16.msra.mxu1 %v11028_v23  ;;  %v10937_v23 = vld [vmem:[%s11925_s21 + $0x4e4] ss:$16 sps:$4 sm:$0xff]  }
 0x1d8   : > { %v1831_v38 = vpop.f32.mrf.mxu0  ;;  %3274 = vmatmul.mubr.bf16.gmra.mxu0 %v10913_v27  ;;  %v11033_v27 = vld [vmem:[%s16114_s3 + $0x84] ss:$8 sps:$4 sm:$0xff]  }
 0x1d9   : > { %16293 = vst [vmem:[#allocation18_spill] sm:$0xff] %v12454_v1  ;;  %v12460_v25 = vadd.f32 %v2104_v16, %v1831_v38  ;;  %10070 = vmatprep.mubr.msk.bf16.mxu0 %vm1607_vm0, %v10920_v43  ;;  %v2126_v16 = vpop.f32.mrf.mxu1  ;;  %v11031_v43 = vld [vmem:[%s16114_s3 + $0x80] ss:$8 sps:$4 sm:$0xff]   ;;  %v10926_v38 = vld [vmem:[%s11925_s21 + $0x4ac] ss:$16 sps:$4 sm:$0xff]   ;;  %4261 = vmatprep.subr.bf16.mxu1 %v11033_v27 }
 0x1da   : > { %v1833_v30 = vpop.f32.mrf.mxu0 }
 0x1db   : > { %16294 = vst [vmem:[#allocation19_spill] sm:$0xff] %v12460_v25  ;;  %v12463_v34 = vadd.f32 %v2106_v61, %v1833_v30  ;;  %v2128_v61 = vpop.f32.mrf.mxu1  ;;  %v10929_v30 = vld [vmem:[%s11925_s21 + $0x4c0] ss:$16 sps:$4 sm:$0xff]   ;;  %4262 = vmatpush1.bf16.msra.mxu1 %v11031_v43  ;;  %v10932_v43 = vld [vmem:[%s11925_s21 + $0x4cc] ss:$16 sps:$4 sm:$0xff]  }
 0x1dc   : > { %v1835_v49 = vpop.f32.mrf.mxu0 }
 0x1dd   : > { %16295 = vst [vmem:[#allocation20_spill] sm:$0xff] %v12463_v34  ;;  %v12472_v60 = vadd.f32 %v2108_v46, %v1835_v49  ;;  %v2130_v25 = vpop.f32.mrf.mxu1 }
 0x1de   : > { %v1837_v57 = vpop.f32.mrf.mxu0  ;;  %3031 = vmatmul.mubr.bf16.gmra.mxu1 %v10929_v30 }
 0x1df   : > { %16296 = vst [vmem:[#allocation21_spill] sm:$0xff] %v12472_v60  ;;  %v12476_v6 = vadd.f32 %v2110_v18, %v1837_v57  ;;  %v2134_v27 = vpop.f32.mrf.mxu1  ;;  %3040 = vmatprep.mubr.bf16.mxu1 %v10937_v23  ;;  %v10928_v57 = vld [vmem:[%s11925_s21 + $0x4a8] ss:$16 sps:$4 sm:$0xff]  }
 0x1e0   : > { %v1841_v34 = vpop.f32.mrf.mxu0  ;;  %3284 = vmatmul.mubr.bf16.gmra.mxu0 %v10922_v4 }
 0x1e1   : > { %16297 = vst [vmem:[#allocation22_spill] sm:$0xff] %v12476_v6  ;;  %v12479_v1 = vadd.f32 %v2114_v11, %v1841_v34  ;;  %10071 = vmatprep.mubr.msk.bf16.mxu0 %vm1607_vm0, %v10926_v38  ;;  %v2136_v6 = vpop.f32.mrf.mxu1  ;;  %v10935_v11 = vld [vmem:[%s11925_s21 + $0x4e0] ss:$16 sps:$4 sm:$0xff]   ;;  %v10946_v38 = vld [vmem:[%s11925_s21 + $0x504] ss:$16 sps:$4 sm:$0xff]  }
 0x1e2   : > { %v1843_v46 = vpop.f32.mrf.mxu0 }
 0x1e3   : > { %16298 = vst [vmem:[#allocation23_spill] sm:$0xff] %v12479_v1  ;;  %v12482_v49 = vadd.f32 %v2116_v32, %v1843_v46  ;;  %v2138_v15 = vpop.f32.mrf.mxu1 }
 0x1e4   : > { %v1845_v18 = vpop.f32.mrf.mxu0 }
 0x1e5   : > { %16299 = vst [vmem:[#allocation24_spill] sm:$0xff] %v12482_v49  ;;  %v12485_v60 = vadd.f32 %v2118_v9, %v1845_v18  ;;  %v2140_v32 = vpop.f32.mrf.mxu1 }
 0x1e6   : > { %v1847_v4 = vpop.f32.mrf.mxu0  ;;  %3041 = vmatmul.mubr.bf16.gmra.mxu1 %v10935_v11 }
 0x1e7   : > { %16300 = vst [vmem:[#allocation25_spill] sm:$0xff] %v12485_v60  ;;  %v12489_v34 = vadd.f32 %v2120_v56, %v1847_v4  ;;  %v2144_v23 = vpop.f32.mrf.mxu1  ;;  %3050 = vmatprep.mubr.bf16.mxu1 %v10946_v38  ;;  %v10934_v56 = vld [vmem:[%s11925_s21 + $0x4c8] ss:$16 sps:$4 sm:$0xff]   ;;  %v10941_v60 = vld [vmem:[%s11925_s21 + $0x4ec] ss:$16 sps:$4 sm:$0xff]  }
 0x1e8   : > { %v1851_v1 = vpop.f32.mrf.mxu0  ;;  %3294 = vmatmul.mubr.bf16.gmra.mxu0 %v10928_v57 }
 0x1e9   : > { %16301 = vst [vmem:[#allocation26_spill] sm:$0xff] %v12489_v34  ;;  %v12492_v30 = vadd.f32 %v2124_v7, %v1851_v1  ;;  %10072 = vmatprep.mubr.msk.bf16.mxu0 %vm1607_vm0, %v10932_v43  ;;  %v2146_v4 = vpop.f32.mrf.mxu1  ;;  %v10944_v1 = vld [vmem:[%s11925_s21 + $0x500] ss:$16 sps:$4 sm:$0xff]   ;;  %v10952_v43 = vld [vmem:[%s11925_s21 + $0x524] ss:$16 sps:$4 sm:$0xff]  }
 0x1ea   : > { %v1853_v9 = vpop.f32.mrf.mxu0 }
 0x1eb   : > { %16302 = vst [vmem:[#allocation27_spill] sm:$0xff] %v12492_v30  ;;  %v12495_v46 = vadd.f32 %v2126_v16, %v1853_v9  ;;  %v2148_v49 = vpop.f32.mrf.mxu1 }
 0x1ec   : > { %v1855_v18 = vpop.f32.mrf.mxu0 }
 0x1ed   : > { %16303 = vst [vmem:[#allocation28_spill] sm:$0xff] %v12495_v46  ;;  %v12498_v34 = vadd.f32 %v2128_v61, %v1855_v18  ;;  %v2150_v16 = vpop.f32.mrf.mxu1 }
 0x1ee   : > { %v1857_v57 = vpop.f32.mrf.mxu0  ;;  %3051 = vmatmul.mubr.bf16.gmra.mxu1 %v10944_v1 }
 0x1ef   : > { %16304 = vst [vmem:[#allocation29_spill] sm:$0xff] %v12498_v34  ;;  %v12502_v7 = vadd.f32 %v2130_v25, %v1857_v57  ;;  %v2154_v38 = vpop.f32.mrf.mxu1  ;;  %3060 = vmatprep.mubr.bf16.mxu1 %v10952_v43  ;;  %v10943_v25 = vld [vmem:[%s11925_s21 + $0x4e8] ss:$16 sps:$4 sm:$0xff]   ;;  %v10947_v34 = vld [vmem:[%s11925_s21 + $0x50c] ss:$16 sps:$4 sm:$0xff]  }
 0x1f0   : > { %v1861_v30 = vpop.f32.mrf.mxu0  ;;  %3304 = vmatmul.mubr.bf16.gmra.mxu0 %v10934_v56 }
 0x1f1   : > { %16305 = vst [vmem:[#allocation30_spill] sm:$0xff] %v12502_v7  ;;  %v12505_v11 = vadd.f32 %v2134_v27, %v1861_v30  ;;  %10073 = vmatprep.mubr.msk.bf16.mxu0 %vm1607_vm0, %v10941_v60  ;;  %v2156_v57 = vpop.f32.mrf.mxu1  ;;  %v10950_v27 = vld [vmem:[%s11925_s21 + $0x520] ss:$16 sps:$4 sm:$0xff]   ;;  %v10958_v60 = vld [vmem:[%s11925_s21 + $0x544] ss:$16 sps:$4 sm:$0xff]  }
 0x1f2   : > { %v1863_v61 = vpop.f32.mrf.mxu0 }
 0x1f3   : > { %16306 = vst [vmem:[#allocation31_spill] sm:$0xff] %v12505_v11  ;;  %v12508_v9 = vadd.f32 %v2136_v6, %v1863_v61  ;;  %v2158_v46 = vpop.f32.mrf.mxu1 }
 0x1f4   : > { %v1865_v18 = vpop.f32.mrf.mxu0 }
 0x1f5   : > { %16307 = vst [vmem:[#allocation32_spill] sm:$0xff] %v12508_v9  ;;  %v12511_v7 = vadd.f32 %v2138_v15, %v1865_v18  ;;  %v2160_v6 = vpop.f32.mrf.mxu1 }
 0x1f6   : > { %v1867_v56 = vpop.f32.mrf.mxu0  ;;  %3061 = vmatmul.mubr.bf16.gmra.mxu1 %v10950_v27 }
 0x1f7   : > { %16308 = vst [vmem:[#allocation33_spill] sm:$0xff] %v12511_v7  ;;  %v12515_v30 = vadd.f32 %v2140_v32, %v1867_v56  ;;  %v2164_v43 = vpop.f32.mrf.mxu1  ;;  %3070 = vmatprep.mubr.bf16.mxu1 %v10958_v60  ;;  %v10949_v32 = vld [vmem:[%s11925_s21 + $0x508] ss:$16 sps:$4 sm:$0xff]   ;;  %v10953_v7 = vld [vmem:[%s11925_s21 + $0x52c] ss:$16 sps:$4 sm:$0xff]  }
 0x1f8   : > { %v1871_v11 = vpop.f32.mrf.mxu0  ;;  %3314 = vmatmul.mubr.bf16.gmra.mxu0 %v10943_v25 }
 0x1f9   : > { %16309 = vst [vmem:[#allocation34_spill] sm:$0xff] %v12515_v30  ;;  %v12518_v1 = vadd.f32 %v2144_v23, %v1871_v11  ;;  %10074 = vmatprep.mubr.msk.bf16.mxu0 %vm1607_vm0, %v10947_v34  ;;  %v2166_v56 = vpop.f32.mrf.mxu1  ;;  %v10956_v23 = vld [vmem:[%s11925_s21 + $0x540] ss:$16 sps:$4 sm:$0xff]   ;;  %v10967_v34 = vld [vmem:[%s11925_s21 + $0x564] ss:$16 sps:$4 sm:$0xff]  }
 0x1fa   : > { %v1873_v15 = vpop.f32.mrf.mxu0 }
 0x1fb   : > { %16310 = vst [vmem:[#allocation35_spill] sm:$0xff] %v12518_v1  ;;  %v12521_v61 = vadd.f32 %v2146_v4, %v1873_v15  ;;  %v2168_v9 = vpop.f32.mrf.mxu1 }
 0x1fc   : > { %v1875_v18 = vpop.f32.mrf.mxu0 }
 0x1fd   : > { %16311 = vst [vmem:[#allocation36_spill] sm:$0xff] %v12521_v61  ;;  %v12524_v30 = vadd.f32 %v2148_v49, %v1875_v18  ;;  %v2170_v4 = vpop.f32.mrf.mxu1 }
 0x1fe   : > { %v1877_v25 = vpop.f32.mrf.mxu0  ;;  %3071 = vmatmul.mubr.bf16.gmra.mxu1 %v10956_v23 }
 0x1ff   : > { %16312 = vst [vmem:[#allocation37_spill] sm:$0xff] %v12524_v30  ;;  %v12528_v11 = vadd.f32 %v2150_v16, %v1877_v25  ;;  %v2174_v60 = vpop.f32.mrf.mxu1  ;;  %3080 = vmatprep.mubr.bf16.mxu1 %v10967_v34  ;;  %v10955_v16 = vld [vmem:[%s11925_s21 + $0x528] ss:$16 sps:$4 sm:$0xff]   ;;  %v10962_v30 = vld [vmem:[%s11925_s21 + $0x54c] ss:$16 sps:$4 sm:$0xff]  }
 0x200   : > { %v1881_v1 = vpop.f32.mrf.mxu0  ;;  %3324 = vmatmul.mubr.bf16.gmra.mxu0 %v10949_v32 }
 0x201   : > { %16313 = vst [vmem:[#allocation38_spill] sm:$0xff] %v12528_v11  ;;  %v12531_v27 = vadd.f32 %v2154_v38, %v1881_v1  ;;  %10075 = vmatprep.mubr.msk.bf16.mxu0 %vm1607_vm0, %v10953_v7  ;;  %v2176_v25 = vpop.f32.mrf.mxu1  ;;  %v10965_v38 = vld [vmem:[%s11925_s21 + $0x560] ss:$16 sps:$4 sm:$0xff]   ;;  %v10973_v7 = vld [vmem:[%s11925_s21 + $0x584] ss:$16 sps:$4 sm:$0xff]  }
 0x202   : > { %v1883_v49 = vpop.f32.mrf.mxu0 }
 0x203   : > { %16314 = vst [vmem:[#allocation39_spill] sm:$0xff] %v12531_v27  ;;  %v12534_v15 = vadd.f32 %v2156_v57, %v1883_v49  ;;  %v2178_v61 = vpop.f32.mrf.mxu1 }
 0x204   : > { %v1885_v18 = vpop.f32.mrf.mxu0 }
 0x205   : > { %16315 = vst [vmem:[#allocation40_spill] sm:$0xff] %v12534_v15  ;;  %v12537_v11 = vadd.f32 %v2158_v46, %v1885_v18  ;;  %v2180_v57 = vpop.f32.mrf.mxu1 }
 0x206   : > { %v1887_v32 = vpop.f32.mrf.mxu0  ;;  %3081 = vmatmul.mubr.bf16.gmra.mxu1 %v10965_v38 }
 0x207   : > { %16316 = vst [vmem:[#allocation41_spill] sm:$0xff] %v12537_v11  ;;  %v12541_v1 = vadd.f32 %v2160_v6, %v1887_v32  ;;  %v2184_v34 = vpop.f32.mrf.mxu1  ;;  %3090 = vmatprep.mubr.bf16.mxu1 %v10973_v7  ;;  %v10964_v6 = vld [vmem:[%s11925_s21 + $0x548] ss:$16 sps:$4 sm:$0xff]   ;;  %v10968_v11 = vld [vmem:[%s11925_s21 + $0x56c] ss:$16 sps:$4 sm:$0xff]  }
 0x208   : > { %v1891_v27 = vpop.f32.mrf.mxu0  ;;  %3334 = vmatmul.mubr.bf16.gmra.mxu0 %v10955_v16 }
 0x209   : > { %16317 = vst [vmem:[#allocation42_spill] sm:$0xff] %v12541_v1  ;;  %v12544_v23 = vadd.f32 %v2164_v43, %v1891_v27  ;;  %10076 = vmatprep.mubr.msk.bf16.mxu0 %vm1607_vm0, %v10962_v30  ;;  %v2186_v32 = vpop.f32.mrf.mxu1  ;;  %v10971_v43 = vld [vmem:[%s11925_s21 + $0x580] ss:$16 sps:$4 sm:$0xff]   ;;  %v10979_v30 = vld [vmem:[%s11925_s21 + $0x5a4] ss:$16 sps:$4 sm:$0xff]  }
 0x20a   : > { %v1893_v46 = vpop.f32.mrf.mxu0 }
 0x20b   : > { %16318 = vst [vmem:[#allocation43_spill] sm:$0xff] %v12544_v23  ;;  %v12547_v49 = vadd.f32 %v2166_v56, %v1893_v46  ;;  %v2188_v15 = vpop.f32.mrf.mxu1 }
 0x20c   : > { %v1895_v18 = vpop.f32.mrf.mxu0 }
 0x20d   : > { %16319 = vst [vmem:[#allocation44_spill] sm:$0xff] %v12547_v49  ;;  %v12550_v1 = vadd.f32 %v2168_v9, %v1895_v18  ;;  %v2190_v56 = vpop.f32.mrf.mxu1 }
 0x20e   : > { %v1897_v16 = vpop.f32.mrf.mxu0  ;;  %3091 = vmatmul.mubr.bf16.gmra.mxu1 %v10971_v43 }
 0x20f   : > { %16320 = vst [vmem:[#allocation45_spill] sm:$0xff] %v12550_v1  ;;  %v12554_v27 = vadd.f32 %v2170_v4, %v1897_v16  ;;  %v2194_v7 = vpop.f32.mrf.mxu1  ;;  %3100 = vmatprep.mubr.bf16.mxu1 %v10979_v30  ;;  %v10970_v4 = vld [vmem:[%s11925_s21 + $0x568] ss:$16 sps:$4 sm:$0xff]   ;;  %v10974_v1 = vld [vmem:[%s11925_s21 + $0x58c] ss:$16 sps:$4 sm:$0xff]  }
 0x210   : > { %v1901_v23 = vpop.f32.mrf.mxu0  ;;  %3344 = vmatmul.mubr.bf16.gmra.mxu0 %v10964_v6 }
 0x211   : > { %16321 = vst [vmem:[#allocation46_spill] sm:$0xff] %v12554_v27  ;;  %v12557_v38 = vadd.f32 %v2174_v60, %v1901_v23  ;;  %10077 = vmatprep.mubr.msk.bf16.mxu0 %vm1607_vm0, %v10968_v11  ;;  %v2196_v16 = vpop.f32.mrf.mxu1  ;;  %v10977_v60 = vld [vmem:[%s11925_s21 + $0x5a0] ss:$16 sps:$4 sm:$0xff]   ;;  %v10988_v11 = vld [vmem:[%s11925_s21 + $0x5c4] ss:$16 sps:$4 sm:$0xff]  }
 0x212   : > { %v1903_v9 = vpop.f32.mrf.mxu0 }
 0x213   : > { %16322 = vst [vmem:[#allocation47_spill] sm:$0xff] %v12557_v38  ;;  %v12560_v46 = vadd.f32 %v2176_v25, %v1903_v9  ;;  %v2198_v49 = vpop.f32.mrf.mxu1 }
 0x214   : > { %v1905_v18 = vpop.f32.mrf.mxu0 }
 0x215   : > { %16323 = vst [vmem:[#allocation48_spill] sm:$0xff] %v12560_v46  ;;  %v12563_v27 = vadd.f32 %v2178_v61, %v1905_v18  ;;  %v12570_v25 = vpop.f32.mrf.mxu1  ;;  %v10976_v18 = vld [vmem:[%s11925_s21 + $0x588] ss:$16 sps:$4 sm:$0xff]  }
 0x216   : > { %v1907_v6 = vpop.f32.mrf.mxu0  ;;  %16326 = vst [vmem:[#allocation51_spill] sm:$0xff] %v12570_v25  ;;  %3101 = vmatmul.mubr.bf16.gmra.mxu1 %v10977_v60  ;;  %v10994_v25 = vld [vmem:[%s11925_s21 + $0x5e4] ss:$16 sps:$4 sm:$0xff]  }
 0x217   : > { %16324 = vst [vmem:[#allocation49_spill] sm:$0xff] %v12563_v27  ;;  %v12567_v23 = vadd.f32 %v2180_v57, %v1907_v6  ;;  %v2204_v30 = vpop.f32.mrf.mxu1  ;;  %3110 = vmatprep.mubr.bf16.mxu1 %v10988_v11 }
 0x218   : > { %v1911_v38 = vpop.f32.mrf.mxu0  ;;  %3354 = vmatmul.mubr.bf16.gmra.mxu0 %v10970_v4  ;;  %v10983_v4 = vld [vmem:[%s11925_s21 + $0x5ac] ss:$16 sps:$4 sm:$0xff]  }
 0x219   : > { %16325 = vst [vmem:[#allocation50_spill] sm:$0xff] %v12567_v23  ;;  %v12572_v43 = vadd.f32 %v2184_v34, %v1911_v38  ;;  %10078 = vmatprep.mubr.msk.bf16.mxu0 %vm1607_vm0, %v10974_v1  ;;  %v2206_v6 = vpop.f32.mrf.mxu1  ;;  %v10986_v34 = vld [vmem:[%s11925_s21 + $0x5c0] ss:$16 sps:$4 sm:$0xff]  }
 0x21a   : > { %v1913_v61 = vpop.f32.mrf.mxu0 }
 0x21b   : > { %16327 = vst [vmem:[#allocation52_spill] sm:$0xff] %v12572_v43  ;;  %v12575_v9 = vadd.f32 %v2186_v32, %v1913_v61  ;;  %v2208_v46 = vpop.f32.mrf.mxu1 }
 0x21c   : > { %v1915_v57 = vpop.f32.mrf.mxu0 }
 0x21d   : > { %16328 = vst [vmem:[#allocation53_spill] sm:$0xff] %v12575_v9  ;;  %v12578_v23 = vadd.f32 %v2188_v15, %v1915_v57  ;;  %v12585_v60 = vpop.f32.mrf.mxu1  ;;  %v10985_v57 = vld [vmem:[%s11925_s21 + $0x5a8] ss:$16 sps:$4 sm:$0xff]  }
 0x21e   : > { %v1917_v27 = vpop.f32.mrf.mxu0  ;;  %16331 = vst [vmem:[#allocation56_spill] sm:$0xff] %v12585_v60  ;;  %3111 = vmatmul.mubr.bf16.gmra.mxu1 %v10986_v34  ;;  %v10992_v60 = vld [vmem:[%s11925_s21 + $0x5e0] ss:$16 sps:$4 sm:$0xff]  }
 0x21f   : > { %16329 = vst [vmem:[#allocation54_spill] sm:$0xff] %v12578_v23  ;;  %v12582_v38 = vadd.f32 %v2190_v56, %v1917_v27  ;;  %v2214_v11 = vpop.f32.mrf.mxu1  ;;  %3120 = vmatprep.mubr.bf16.mxu1 %v10994_v25  ;;  %v11036_v27 = vld [vmem:[%s16114_s3 + $0x174] ss:$8 sps:$4 sm:$0xff]  }
 0x220   : > { %v1921_v1 = vpop.f32.mrf.mxu0  ;;  %3364 = vmatmul.mubr.bf16.gmra.mxu0 %v10976_v18  ;;  %5116 = vmatprep.subr.bf16.mxu1 %v11036_v27  ;;  %v16121_v27 = vmov 0  }
 0x221   : > { %16330 = vst [vmem:[#allocation55_spill] sm:$0xff] %v12582_v38  ;;  %v12587_v32 = vadd.f32 %v2194_v7, %v1921_v1  ;;  %10079 = vmatprep.mubr.msk.bf16.mxu0 %vm1607_vm0, %v10983_v4  ;;  %v2216_v18 = vpop.f32.mrf.mxu1  ;;  %v10989_v7 = vld [vmem:[%s11925_s21 + $0x5cc] ss:$16 sps:$4 sm:$0xff]  }
 0x222   : > { %v1923_v15 = vpop.f32.mrf.mxu0 }
 0x223   : > { %16332 = vst [vmem:[#allocation57_spill] sm:$0xff] %v12587_v32  ;;  %v12590_v61 = vadd.f32 %v2196_v16, %v1923_v15  ;;  %v2218_v4 = vpop.f32.mrf.mxu1 }
 0x224   : > { %v1925_v56 = vpop.f32.mrf.mxu0 }
 0x225   : > { %16333 = vst [vmem:[#allocation58_spill] sm:$0xff] %v12590_v61  ;;  %v12596_v38 = vadd.f32 %v2198_v49, %v1925_v56  ;;  %v12602_v25 = vpop.f32.mrf.mxu1 }
 0x226   : > { %v12599_v1 = vpop.f32.mrf.mxu0  ;;  %16336 = vst [vmem:[#allocation61_spill] sm:$0xff] %v12602_v25  ;;  %3121 = vmatmul.mubr.bf16.gmra.mxu1 %v10992_v60 }
 0x227   : > { %16334 = vst [vmem:[#allocation59_spill] sm:$0xff] %v12596_v38  ;;  %16335 = vst [vmem:[#allocation60_spill] sm:$0xff] %v12599_v1  ;;  %v2224_v61 = vpop.f32.mrf.mxu1  ;;  %4279 = vmatprep.mubr.bf16.mxu1 %v16121_v27  ;;  %v10991_v38 = vld [vmem:[%s11925_s21 + $0x5c8] ss:$16 sps:$4 sm:$0xff]  }
 0x228   : > { %v1931_v16 = vpop.f32.mrf.mxu0  ;;  %3374 = vmatmul.mubr.bf16.gmra.mxu0 %v10985_v57  ;;  %v10995_v57 = vld [vmem:[%s11925_s21 + $0x5ec] ss:$16 sps:$4 sm:$0xff]  }
 0x229   : > { %v12604_v34 = vadd.f32 %v2204_v30, %v1931_v16  ;;  %10080 = vmatprep.mubr.msk.bf16.mxu0 %vm1607_vm0, %v10989_v7  ;;  %v2226_v32 = vpop.f32.mrf.mxu1 }
 0x22a   : > { %v1933_v15 = vpop.f32.mrf.mxu0 }
 0x22b   : > { %16337 = vst [vmem:[#allocation62_spill] sm:$0xff] %v12604_v34  ;;  %v12607_v49 = vadd.f32 %v2206_v6, %v1933_v15  ;;  %v2228_v30 = vpop.f32.mrf.mxu1  ;;  %v10997_v34 = vld [vmem:[%s11925_s21 + $0x5e8] ss:$16 sps:$4 sm:$0xff]   ;;  %s16068_s21 = scalar_lea.hbm %s16120_s9, %s10421_s29 }
 0x22c   : > { %v1935_v56 = vpop.f32.mrf.mxu0 }
 0x22d   : > { %16338 = vst [vmem:[#allocation63_spill] sm:$0xff] %v12607_v49  ;;  %v12611_v1 = vadd.f32 %v2208_v46, %v1935_v56  ;;  %v12616_v7 = vpop.f32.mrf.mxu1 }
 0x22e   : > { %v12614_v25 = vpop.f32.mrf.mxu0  ;;  %16341 = vst [vmem:[#allocation66_spill] sm:$0xff] %v12616_v7 }
 0x22f   : > { %16339 = vst [vmem:[#allocation64_spill] sm:$0xff] %v12611_v1  ;;  %16340 = vst [vmem:[#allocation65_spill] sm:$0xff] %v12614_v25  ;;  %v2892_v15 = vpop.f32.mrf.mxu1 }
 0x230   : > { %v1941_v16 = vpop.f32.mrf.mxu0  ;;  %3384 = vmatmul.mubr.bf16.gmra.mxu0 %v10991_v38 }
 0x231   : > { %v12618_v60 = vadd.f32 %v2214_v11, %v1941_v16  ;;  %10081 = vmatprep.mubr.msk.bf16.mxu0 %vm1607_vm0, %v10995_v57  ;;  %v2894_v46 = vpop.f32.mrf.mxu1  ;;  %v16347_v11 = vmov 0  }
 0x232   : > { %v1943_v6 = vpop.f32.mrf.mxu0 }
 0x233   : > { %16342 = vst [vmem:[#allocation67_spill] sm:$0xff] %v12618_v60  ;;  %v12621_v27 = vadd.f32 %v2216_v18, %v1943_v6  ;;  %v2896_v25 = vpop.f32.mrf.mxu1 }
 0x234   : > { %v1945_v49 = vpop.f32.mrf.mxu0 }
 0x235   : > { %16343 = vst [vmem:[#allocation68_spill] sm:$0xff] %v12621_v27  ;;  %v12624_v56 = vadd.f32 %v2218_v4, %v1945_v49  ;;  %v2898_v38 = vpop.f32.mrf.mxu1 }
 0x236   : > { %v12626_v1 = vpop.f32.mrf.mxu0 }
 0x237   : > { %16344 = vst [vmem:[#allocation69_spill] sm:$0xff] %v12624_v56  ;;  %16345 = vst [vmem:[#allocation70_spill] sm:$0xff] %v12626_v1  ;;  %v2902_v16 = vpop.f32.mrf.mxu1 }
 0x238   : > { %v1951_v23 = vpop.f32.mrf.mxu0  ;;  %3394 = vmatmul.mubr.bf16.gmra.mxu0 %v10997_v34 }
 0x239   : > { %v12628_v7 = vadd.f32 %v2224_v61, %v1951_v23  ;;  %4552 = vmatprep.mubr.bf16.mxu0 %v16347_v11  ;;  %v2904_v6 = vpop.f32.mrf.mxu1 }
 0x23a   : > { %v1953_v57 = vpop.f32.mrf.mxu0 }
 0x23b   : > { %16346 = vst [vmem:[#allocation71_spill] sm:$0xff] %v12628_v7  ;;  %v12631_v60 = vadd.f32 %v2226_v32, %v1953_v57  ;;  %v2906_v49 = vpop.f32.mrf.mxu1 }
 0x23c   : > { %v1955_v18 = vpop.f32.mrf.mxu0 }
 0x23d   : > { %16348 = vst [vmem:[#allocation72_spill] sm:$0xff] %v12631_v60  ;;  %v12633_v27 = vadd.f32 %v2228_v30, %v1955_v18  ;;  %v2908_v1 = vpop.f32.mrf.mxu1  ;;  %v12642_v30 = vld [vmem:[%s16113_s2] ss:$0 sm:$0xff] }
 0x23e   : > { %v12635_v4 = vpop.f32.mrf.mxu0 }
 0x23f   : > { %16349 = vst [vmem:[#allocation73_spill] sm:$0xff] %v12633_v27  ;;  %16350 = vst [vmem:[#allocation74_spill] sm:$0xff] %v12635_v4  ;;  %v2912_v43 = vpop.f32.mrf.mxu1 }
 0x240   : > { %v3165_v56 = vpop.f32.mrf.mxu0 }
 0x241   : > { %v3166_v9 = vadd.f32 %v3165_v56, %v2892_v15  ;;  %v2914_v7 = vpop.f32.mrf.mxu1 }
 0x242   : > { %v3167_v34 = vpop.f32.mrf.mxu0 }
 0x243   : > { %v3168_v23 = vadd.f32 %v3167_v34, %v2894_v46  ;;  %v3404_v39 = vmax.f32 %v12239_v47, %v3166_v9  ;;  %v12644_v27 = vpop.f32.mrf.mxu1 }
 0x244   : > { %v3169_v61 = vpop.f32.mrf.mxu0 }
 0x245   : > { %v3405_v32 = vmax.f32 %v12242_v50, %v3168_v23  ;;  %v3170_v57 = vadd.f32 %v3169_v61, %v2896_v25  ;;  %v12646_v4 = vpop.f32.mrf.mxu1 }
 0x246   : > { %v3171_v18 = vpop.f32.mrf.mxu0 }
 0x247   : > { %v3500_v60 = vmax.f32 %v3404_v39, %v3405_v32  ;;  %v3172_v15 = vadd.f32 %v3171_v18, %v2898_v38  ;;  %v3406_v47 = vmax.f32 %v12245_v54, %v3170_v57  ;;  %v12651_v34 = vpop.f32.mrf.mxu1 }
 0x248   : > { %v3175_v56 = vpop.f32.mrf.mxu0 }
 0x249   : > { %v3555_v46 = vadd.f32 %v12642_v30, %v3500_v60  ;;  %v3407_v50 = vmax.f32 %v12249_v59, %v3172_v15  ;;  %v3176_v9 = vadd.f32 %v3175_v56, %v2902_v16  ;;  %v12655_v39 = vpop.f32.mrf.mxu1 }
 0x24a   : > { %v3177_v25 = vpop.f32.mrf.mxu0 }
 0x24b   : > { %v12653_v23 = vmax.f32 %v3555_v46, 0.0  ;;  %v3501_v61 = vmax.f32 %v3406_v47, %v3407_v50  ;;  %v3178_v52 = vadd.f32 %v3177_v25, %v2904_v6  ;;  %v3408_v59 = vmax.f32 %v12252_v63, %v3176_v9  ;;  %v12664_v57 = vpop.f32.mrf.mxu1 }
 0x24c   : > { %v3179_v28 = vpop.f32.mrf.mxu0 }
 0x24d   : > { %v12659_v38 = vcombine.high %v12653_v23, %v12653_v23  ;;  %v3556_v54 = vadd.f32 %v12642_v30, %v3501_v61  ;;  %v3409_v60 = vmax.f32 %v12255_v2, %v3178_v52  ;;  %v3180_v16 = vadd.f32 %v3179_v28, %v2906_v49  ;;  %v12671_v25 = vpop.f32.mrf.mxu1 }
 0x24e   : > { %v3181_v32 = vpop.f32.mrf.mxu0  ;;  %v10083_v6 = vrot.slane %v12653_v23, 9  ;;  %v10227_v9 = vrot.slane %v12653_v23, 11 }
 0x24f   : > { %16351 = vst [vmem:[#allocation75_spill] sm:$0xff] %v12659_v38  ;;  %v3182_v18 = vadd.f32 %v3181_v32, %v2908_v1  ;;  %v3848_v15 = vrot.slane %v12659_v38, 5  ;;  %v12669_v46 = vmax.f32 %v3556_v54, 0.0  ;;  %v3502_v47 = vmax.f32 %v3408_v59, %v3409_v60 }
 0x250   : > { %v3185_v50 = vpop.f32.mrf.mxu0  ;;  %v5378_v63 = vrot.slane %v12659_v38, 7  ;;  %v3410_v2 = vmax.f32 %v12264_v8, %v3180_v16  ;;  %v3747_v8 = vcombine.low %v12653_v23, %v12659_v38 }
 0x251   : > { %16352 = vst [vmem:[#allocation76_spill] sm:$0xff] %v12669_v46  ;;  %v3411_v28 = vmax.f32 %v12268_v13, %v3182_v18  ;;  %v3186_v52 = vadd.f32 %v3185_v50, %v2912_v43  ;;  %v3850_v49 = vrot.slane %v3848_v15, 4  ;;  %v12685_v61 = vcombine.high %v12669_v46, %v12669_v46  ;;  %v12690_v13 = vpop.f32.mrf.mxu1 }
 0x252   : > { %v3851_v54 = vrot.slane %v12669_v46, 5  ;;  %v3187_v59 = vpop.f32.mrf.mxu0  ;;  %v3557_v43 = vadd.f32 %v12642_v30, %v3502_v47  ;;  %v5381_v50 = vrot.slane %v12669_v46, 7  ;;  %v3849_v44 = vsel %vm12678_vm6, %v10083_v6, %v3848_v15 }
 0x253   : > { %v3503_v60 = vmax.f32 %v3410_v2, %v3411_v28  ;;  %v3188_v16 = vadd.f32 %v3187_v59, %v2914_v7  ;;  %v12701_v21 = vpop.f32.mrf.mxu1  ;;  %v5380_v7 = vrot.slane %v5378_v63, 4  ;;  %v3412_v59 = vmax.f32 %v12271_v17, %v3186_v52 }
 0x254   : > { %v3189_v56 = vpop.f32.mrf.mxu0  ;;  %v3852_v47 = vsel %vm12678_vm6, %v3850_v49, %v3851_v54  ;;  %v12707_v2 = vmax.f32 %v3557_v43, 0.0  ;;  %v10084_v37 = vrot.slane %v12685_v61, 9  ;;  %v12719_v15 = vsel %vm12695_vm7, %v10227_v9, %v5378_v63 }
 0x255   : > { %v3558_v28 = vadd.f32 %v12642_v30, %v3503_v60  ;;  %v3413_v18 = vmax.f32 %v12274_v20, %v3188_v16  ;;  %v3190_v53 = vadd.f32 %v3189_v56, %v12644_v27  ;;  %v12715_v6 = vpop.f32.mrf.mxu1  ;;  %v4070_v52 = vcombine.low %v3849_v44, %v3852_v47 }
 0x256   : > { %16357 = vst [vmem:[#allocation77_spill] sm:$0xff] %v12707_v2  ;;  %v3191_v42 = vpop.f32.mrf.mxu0  ;;  %v12723_v49 = vcombine.high %v12707_v2, %v12707_v2  ;;  %v3748_v56 = vcombine.low %v12685_v61, %v12707_v2  ;;  %v3855_v43 = vrot.slane %v12707_v2, 5  ;;  %v12735_v63 = vsel %vm12695_vm7, %v5380_v7, %v5381_v50 }
 0x257   : > { %v12725_v17 = vmax.f32 %v3558_v28, 0.0  ;;  %v3504_v20 = vmax.f32 %v3412_v59, %v3413_v18  ;;  %v3192_v54 = vadd.f32 %v3191_v42, %v12646_v4  ;;  %v12731_v60 = vpop.f32.mrf.mxu1  ;;  %v3414_v16 = vmax.f32 %v12277_v24, %v3190_v53 }
 0x258   : > { %16358 = vst [vmem:[#allocation78_spill] sm:$0xff] %v12723_v49  ;;  %v3195_v27 = vpop.f32.mrf.mxu0  ;;  %v3858_v4 = vrot.slane %v12723_v49, 5  ;;  %v3811_v47 = vpack.c.bf16 %v3748_v56, %v3747_v8  ;;  %v3857_v59 = vrot.slane %v3855_v43, 4 }
 0x259   : > { %16359 = vst [vmem:[#allocation79_spill] sm:$0xff] %v12725_v17  ;;  %v12739_v9 = vcombine.high %v12725_v17, %v12725_v17  ;;  %v3559_v44 = vadd.f32 %v12642_v30, %v3504_v20  ;;  %v3196_v42 = vadd.f32 %v3195_v27, %v12651_v34  ;;  %v3415_v18 = vmax.f32 %v12281_v29, %v3192_v54  ;;  %v12746_v3 = vpop.f32.mrf.mxu1 }
 0x25a   : > { %v3197_v28 = vpop.f32.mrf.mxu0  ;;  %v3856_v20 = vsel %vm12678_vm6, %v10084_v37, %v3855_v43  ;;  %4553 = vmatmul.mubr.bf16.vlgmr.msra.gmra.mxu0 %v3811_v47  ;;  %v3859_v29 = vsel %vm12678_vm6, %v3857_v59, %v3858_v4  ;;  %v10085_v37 = vrot.slane %v12725_v17, 9  ;;  %v5385_v59 = vrot.slane %v12707_v2, 7 }
 0x25b   : > { %16360 = vst [vmem:[#allocation80_spill] sm:$0xff] %v12739_v9  ;;  %v12748_v50 = vmax.f32 %v3559_v44, 0.0  ;;  %v3198_v7 = vadd.f32 %v3197_v28, %v12655_v39  ;;  %v3505_v27 = vmax.f32 %v3414_v16, %v3415_v18  ;;  %v3416_v22 = vmax.f32 %v12284_v33, %v3196_v42  ;;  %v12757_v53 = vpop.f32.mrf.mxu1  ;;  %4562 = vmatprep.mubr.bf16.mxu0 %v16347_v11  ;;  %v11039_v28 = vld [vmem:[%s16114_s3 + $0x164] ss:$8 sps:$4 sm:$0xff]  }
 0x25c   : > { %v3199_v24 = vpop.f32.mrf.mxu0  ;;  %v3862_v8 = vrot.slane %v12739_v9, 5  ;;  %v4071_v56 = vcombine.low %v3856_v20, %v3859_v29 }
 0x25d   : > { %16361 = vst [vmem:[#allocation81_spill] sm:$0xff] %v12748_v50  ;;  %v3417_v54 = vmax.f32 %v12287_v36, %v3198_v7  ;;  %v3200_v39 = vadd.f32 %v3199_v24, %v12664_v57  ;;  %v3560_v33 = vadd.f32 %v12642_v30, %v3505_v27  ;;  %v12767_v44 = vcombine.high %v12748_v50, %v12748_v50  ;;  %v12769_v42 = vpop.f32.mrf.mxu1  ;;  %v11034_v36 = vld [vmem:[%s16114_s3 + $0x170] ss:$8 sps:$4 sm:$0xff]  }
 0x25e   : > { %v3201_v43 = vpop.f32.mrf.mxu0  ;;  %v3864_v4 = vrot.slane %v3862_v8, 4  ;;  %v3865_v16 = vrot.slane %v12748_v50, 5  ;;  %v4134_v47 = vpack.c.bf16 %v4071_v56, %v4070_v52  ;;  %v3749_v24 = vcombine.low %v12725_v17, %v12739_v9 }
 0x25f   : > { %16362 = vst [vmem:[#allocation82_spill] sm:$0xff] %v12767_v44  ;;  %v3506_v57 = vmax.f32 %v3416_v22, %v3417_v54  ;;  %v3202_v18 = vadd.f32 %v3201_v43, %v12671_v25  ;;  %v12780_v7 = vmax.f32 %v3560_v33, 0.0  ;;  %v3418_v20 = vmax.f32 %v12290_v40, %v3200_v39  ;;  %v12785_v29 = vpop.f32.mrf.mxu1 }
 0x260   : > { %v3205_v27 = vpop.f32.mrf.mxu0  ;;  %v3863_v22 = vsel %vm12678_vm6, %v10085_v37, %v3862_v8  ;;  %4280 = vmatmul.mubr.bf16.vlgmr.msra.gmra.mxu1 %v4134_v47  ;;  %v3866_v56 = vsel %vm12678_vm6, %v3864_v4, %v3865_v16  ;;  %v10086_v8 = vrot.slane %v12767_v44, 9 }
 0x261   : > { %16363 = vst [vmem:[#allocation83_spill] sm:$0xff] %v12780_v7  ;;  %v3561_v25 = vadd.f32 %v12642_v30, %v3506_v57  ;;  %v3419_v52 = vmax.f32 %v12294_v45, %v3202_v18  ;;  %v3206_v54 = vadd.f32 %v3205_v27, %v12690_v13  ;;  %v3750_v39 = vcombine.low %v12767_v44, %v12780_v7  ;;  %v12803_v37 = vpop.f32.mrf.mxu1  ;;  %v11037_v13 = vld [vmem:[%s16114_s3 + $0x160] ss:$8 sps:$4 sm:$0xff]   ;;  %v11042_v57 = vld [vmem:[%s16114_s3 + $0x154] ss:$8 sps:$4 sm:$0xff]  }
 0x262   : > { %v3207_v40 = vpop.f32.mrf.mxu0  ;;  %4289 = vmatprep.mubr.bf16.mxu1 %v16347_v11  ;;  %v12799_v33 = vcombine.high %v12780_v7, %v12780_v7  ;;  %v3869_v45 = vrot.slane %v12780_v7, 5  ;;  %5117 = vmatpush1.bf16.msra.mxu1 %v11034_v36  ;;  %v5387_v18 = vrot.slane %v5385_v59, 4 }
 0x263   : > { %v12808_v43 = vmax.f32 %v3561_v25, 0.0  ;;  %v3507_v4 = vmax.f32 %v3418_v20, %v3419_v52  ;;  %v3208_v16 = vadd.f32 %v3207_v40, %v12701_v21  ;;  %5118 = vmatprep.subr.bf16.mxu1 %v11039_v28  ;;  %v3420_v47 = vmax.f32 %v12297_v51, %v3206_v54  ;;  %v12816_v44 = vpop.f32.mrf.mxu1  ;;  %v11040_v40 = vld [vmem:[%s16114_s3 + $0x150] ss:$8 sps:$4 sm:$0xff]  }
 0x264   : > { %v3209_v27 = vpop.f32.mrf.mxu0  ;;  %v3812_v34 = vpack.c.bf16 %v3750_v39, %v3749_v24  ;;  %v3871_v36 = vrot.slane %v3869_v45, 4  ;;  %v3872_v17 = vrot.slane %v12799_v33, 5  ;;  %v4072_v52 = vcombine.low %v3863_v22, %v3866_v56  ;;  %v11045_v56 = vld [vmem:[%s16114_s3 + $0x144] ss:$8 sps:$4 sm:$0xff]  }
 0x265   : > { %v12820_v20 = vcombine.high %v12808_v43, %v12808_v43  ;;  %v3562_v21 = vadd.f32 %v12642_v30, %v3507_v4  ;;  %v3421_v28 = vmax.f32 %v12300_v55, %v3208_v16  ;;  %v3210_v25 = vadd.f32 %v3209_v27, %v12715_v6  ;;  %v12827_v54 = vpop.f32.mrf.mxu1 }
 0x266   : > { %4563 = vmatmul.mubr.bf16.gmra.mxu0 %v3812_v34  ;;  %v3211_v51 = vpop.f32.mrf.mxu0  ;;  %v3873_v24 = vsel %vm12678_vm6, %v3871_v36, %v3872_v17  ;;  %5119 = vmatpush1.bf16.msra.mxu1 %v11037_v13  ;;  %v16365_v39 = vrot.slane %v12685_v61, 11  ;;  %v5388_v6 = vrot.slane %v12723_v49, 7  ;;  %v3870_v22 = vsel %vm12678_vm6, %v10086_v8, %v3869_v45 }
 0x267   : > { %16364 = vst [vmem:[#allocation84_spill] sm:$0xff] %v12820_v20  ;;  %v12837_v34 = vmax.f32 %v3562_v21, 0.0  ;;  %v3508_v4 = vmax.f32 %v3420_v47, %v3421_v28  ;;  %v3212_v17 = vadd.f32 %v3211_v51, %v12731_v60  ;;  %4572 = vmatprep.mubr.bf16.mxu0 %v16347_v11  ;;  %5120 = vmatprep.subr.bf16.mxu1 %v11042_v57  ;;  %v12847_v27 = vpop.f32.mrf.mxu1  ;;  %v10087_v47 = vrot.slane %v12808_v43, 9 }
 0x268   : > { %v5386_v55 = vsel %vm12695_vm7, %v16365_v39, %v5385_v59  ;;  %v3422_v13 = vmax.f32 %v12309_v62, %v3210_v25  ;;  %v3215_v59 = vpop.f32.mrf.mxu0  ;;  %v4073_v16 = vcombine.low %v3870_v22, %v3873_v24  ;;  %v3876_v60 = vrot.slane %v12820_v20, 5  ;;  %v11043_v24 = vld [vmem:[%s16114_s3 + $0x140] ss:$8 sps:$4 sm:$0xff]  }
 0x269   : > { %v3563_v36 = vadd.f32 %v12642_v30, %v3508_v4  ;;  %v3423_v8 = vmax.f32 %v12313_v5, %v3212_v17  ;;  %v3216_v45 = vadd.f32 %v3215_v59, %v12746_v3  ;;  %v5389_v57 = vsel %vm12695_vm7, %v5387_v18, %v5388_v6  ;;  %v12856_v62 = vpop.f32.mrf.mxu1 }
 0x26a   : > { %v3217_v21 = vpop.f32.mrf.mxu0  ;;  %v4135_v28 = vpack.c.bf16 %v4073_v16, %v4072_v52  ;;  %v3878_v25 = vrot.slane %v3876_v60, 4  ;;  %v3879_v51 = vrot.slane %v12837_v34, 5  ;;  %5121 = vmatpush1.bf16.msra.mxu1 %v11040_v40  ;;  %v5600_v5 = vcombine.low %v12719_v15, %v12735_v63  ;;  %v11048_v40 = vld [vmem:[%s16114_s3 + $0x134] ss:$8 sps:$4 sm:$0xff]  }
 0x26b   : > { %v12864_v39 = vmax.f32 %v3563_v36, 0.0  ;;  %v3509_v3 = vmax.f32 %v3422_v13, %v3423_v8  ;;  %v3218_v18 = vadd.f32 %v3217_v21, %v12757_v53  ;;  %v12869_v52 = vcombine.high %v12837_v34, %v12837_v34  ;;  %5122 = vmatprep.subr.bf16.mxu1 %v11045_v56  ;;  %v12877_v63 = vpop.f32.mrf.mxu1  ;;  %v16589_v21 = vld [vmem:[#allocation77_spill] sm:$0xff] }
 0x26c   : > { %v3424_v6 = vmax.f32 %v12316_v10, %v3216_v45  ;;  %4290 = vmatmul.mubr.bf16.gmra.mxu1 %v4135_v28  ;;  %v3219_v4 = vpop.f32.mrf.mxu0  ;;  %v3751_v15 = vcombine.low %v12808_v43, %v12820_v20  ;;  %v3877_v53 = vsel %vm12678_vm6, %v10087_v47, %v3876_v60  ;;  %v5601_v17 = vcombine.low %v5386_v55, %v5389_v57 }
 0x26d   : > { %16366 = vst [vmem:[#allocation85_spill] sm:$0xff] %v12864_v39  ;;  %v3564_v22 = vadd.f32 %v12642_v30, %v3509_v3  ;;  %v3425_v56 = vmax.f32 %v12319_v14, %v3218_v18  ;;  %v3220_v13 = vadd.f32 %v3219_v4, %v12769_v42  ;;  %v3752_v10 = vcombine.low %v12869_v52, %v12864_v39  ;;  %v12894_v60 = vpop.f32.mrf.mxu1  ;;  %v11046_v14 = vld [vmem:[%s16114_s3 + $0x130] ss:$8 sps:$4 sm:$0xff]  }
 0x26e   : > { %4299 = vmatprep.mubr.bf16.mxu1 %v16347_v11  ;;  %v3221_v59 = vpop.f32.mrf.mxu0  ;;  %v12889_v16 = vcombine.high %v12864_v39, %v12864_v39  ;;  %v3880_v47 = vsel %vm12678_vm6, %v3878_v25, %v3879_v51  ;;  %v3883_v55 = vrot.slane %v12864_v39, 5  ;;  %5123 = vmatpush1.bf16.msra.mxu1 %v11043_v24  ;;  %v12899_v42 = vpack.c.bf16 %v5601_v17, %v5600_v5 }
 0x26f   : > { %v12901_v36 = vmax.f32 %v3564_v22, 0.0  ;;  %v3510_v8 = vmax.f32 %v3424_v6, %v3425_v56  ;;  %v3222_v45 = vadd.f32 %v3221_v59, %v12785_v29  ;;  %v10088_v57 = vrot.slane %v12869_v52, 9  ;;  %5124 = vmatprep.subr.bf16.mxu1 %v11048_v40  ;;  %v12913_v3 = vpop.f32.mrf.mxu1 }
 0x270   : > { %16367 = vst [vmem:[#allocation86_spill] sm:$0xff] %v12889_v16  ;;  %v3426_v28 = vmax.f32 %v12322_v19, %v3220_v13  ;;  %v3225_v25 = vpop.f32.mrf.mxu0  ;;  %v3813_v51 = vpack.c.bf16 %v3752_v10, %v3751_v15  ;;  %v3885_v24 = vrot.slane %v3883_v55, 4  ;;  %v3886_v5 = vrot.slane %v12889_v16, 5 }
 0x271   : > { %v12917_v29 = vcombine.high %v12901_v36, %v12901_v36  ;;  %v3565_v18 = vadd.f32 %v12642_v30, %v3510_v8  ;;  %v3427_v40 = vmax.f32 %v12326_v26, %v3222_v45  ;;  %v3226_v6 = vadd.f32 %v3225_v25, %v12803_v37  ;;  %v12924_v17 = vpop.f32.mrf.mxu1 }
 0x272   : > { %4573 = vmatmul.mubr.bf16.gmra.mxu0 %v3813_v51  ;;  %v3227_v4 = vpop.f32.mrf.mxu0  ;;  %v3887_v19 = vsel %vm12678_vm6, %v3885_v24, %v3886_v5  ;;  %v4074_v15 = vcombine.low %v3877_v53, %v3880_v47  ;;  %5125 = vmatpush1.bf16.msra.mxu1 %v11046_v14  ;;  %v16370_v22 = vrot.slane %v12659_v38, 6  ;;  %v16371_v56 = vrot.slane %v12653_v23, 10 }
 0x273   : > { %v12936_v10 = vmax.f32 %v3565_v18, 0.0  ;;  %v3511_v59 = vmax.f32 %v3426_v28, %v3427_v40  ;;  %v3228_v8 = vadd.f32 %v3227_v4, %v12816_v44  ;;  %v3884_v53 = vsel %vm12678_vm6, %v10088_v57, %v3883_v55  ;;  %4582 = vmatprep.mubr.bf16.mxu0 %v16347_v11  ;;  %v12943_v45 = vpop.f32.mrf.mxu1  ;;  %v11051_v55 = vld [vmem:[%s16114_s3 + $0x124] ss:$8 sps:$4 sm:$0xff]   ;;  %v11049_v4 = vld [vmem:[%s16114_s3 + $0x120] ss:$8 sps:$4 sm:$0xff]  }
 0x274   : > { %v12932_v13 = vsel %vm12907_vm9, %v16371_v56, %v16370_v22  ;;  %v16372_v26 = vmov %v16370_v22  ;;  %v3428_v47 = vmax.f32 %v12329_v31, %v3226_v6  ;;  %v3229_v23 = vpop.f32.mrf.mxu0  ;;  %v4075_v14 = vcombine.low %v3884_v53, %v3887_v19  ;;  %5126 = vmatprep.subr.bf16.mxu1 %v11051_v55 }
 0x275   : > { %v4719_v37 = vrot.slane %v16372_v26, 4  ;;  %v10089_v25 = vrot.slane %v12901_v36, 9  ;;  %v3890_v51 = vrot.slane %v12917_v29, 5  ;;  %v3566_v24 = vadd.f32 %v12642_v30, %v3511_v59  ;;  %v12954_v18 = vpop.f32.mrf.mxu1  ;;  %v11052_v59 = vld [vmem:[%s16114_s3 + $0x1f0] ss:$8 sps:$4 sm:$0xff]  }
 0x276   : > { %v3429_v28 = vmax.f32 %v12332_v35, %v3228_v8  ;;  %v3230_v44 = vadd.f32 %v3229_v23, %v12827_v54  ;;  %v4724_v31 = vrot.slane %v12707_v2, 6  ;;  %v3231_v57 = vpop.f32.mrf.mxu0  ;;  %v4136_v5 = vpack.c.bf16 %v4075_v14, %v4074_v15  ;;  %v11054_v35 = vld [vmem:[%s16114_s3 + $0x1f4] ss:$8 sps:$4 sm:$0xff]   ;;  %5127 = vmatpush1.bf16.msra.mxu1 %v11049_v4  ;;  %v11079_v2 = vld [vmem:[%s16114_s3 + $0x180] ss:$8 sps:$4 sm:$0xff]  }
 0x277   : > { %v3892_v40 = vrot.slane %v3890_v51, 4  ;;  %v3893_v6 = vrot.slane %v12936_v10, 5  ;;  %v16373_v54 = vrot.slane %v12669_v46, 6  ;;  %v12969_v15 = vmax.f32 %v3566_v24, 0.0  ;;  %v12982_v23 = vpop.f32.mrf.mxu1  ;;  %5777 = vmatprep.subr.bf16.mxu0 %v11054_v35 }
 0x278   : > { %v3512_v22 = vmax.f32 %v3428_v47, %v3429_v28  ;;  %v3232_v56 = vadd.f32 %v3231_v57, %v12847_v27  ;;  %v12974_v26 = vcombine.high %v12936_v10, %v12936_v10  ;;  %v3430_v8 = vmax.f32 %v12335_v41, %v3230_v44  ;;  %4300 = vmatmul.mubr.bf16.gmra.mxu1 %v4136_v5  ;;  %v3235_v53 = vpop.f32.mrf.mxu0 }
 0x279   : > { %v12967_v19 = vsel %vm12907_vm9, %v4719_v37, %v16373_v54  ;;  %v3753_v37 = vcombine.low %v12901_v36, %v12917_v29  ;;  %v3894_v27 = vsel %vm12678_vm6, %v3892_v40, %v3893_v6  ;;  %v10164_v47 = vrot.slane %v12685_v61, 10  ;;  %4309 = vmatprep.mubr.bf16.mxu1 %v16347_v11  ;;  %v12998_v5 = vpop.f32.mrf.mxu1  ;;  %5778 = vmatpush1.bf16.msra.mxu0 %v11052_v59 }
 0x27a   : > { %v3567_v14 = vadd.f32 %v12642_v30, %v3512_v22  ;;  %v3431_v24 = vmax.f32 %v12339_v48, %v3232_v56  ;;  %v3236_v28 = vadd.f32 %v3235_v53, %v12856_v62  ;;  %v3754_v41 = vcombine.low %v12974_v26, %v12969_v15  ;;  %v3237_v44 = vpop.f32.mrf.mxu0  ;;  %v11057_v48 = vld [vmem:[%s16114_s3 + $0x1e4] ss:$8 sps:$4 sm:$0xff]   ;;  %v11055_v22 = vld [vmem:[%s16114_s3 + $0x1e0] ss:$8 sps:$4 sm:$0xff]  }
 0x27b   : > { %v12995_v55 = vcombine.high %v12969_v15, %v12969_v15  ;;  %v3897_v57 = vrot.slane %v12969_v15, 5  ;;  %v4726_v61 = vrot.slane %v4724_v31, 4  ;;  %v4727_v62 = vrot.slane %v12723_v49, 6  ;;  %v13013_v46 = vpop.f32.mrf.mxu1  ;;  %5779 = vmatprep.subr.bf16.mxu0 %v11057_v48  ;;  %v16391_v49 = vld [vmem:[#allocation15_spill] sm:$0xff] }
 0x27c   : > { %v13004_v40 = vmax.f32 %v3567_v14, 0.0  ;;  %v3513_v6 = vmax.f32 %v3430_v8, %v3431_v24  ;;  %v3238_v35 = vadd.f32 %v3237_v44, %v12877_v63  ;;  %v10090_v54 = vrot.slane %v12974_v26, 9  ;;  %v3239_v56 = vpop.f32.mrf.mxu0  ;;  %v11063_v44 = vld [vmem:[%s16114_s3 + $0x1d4] ss:$8 sps:$4 sm:$0xff]  }
 0x27d   : > { %v3432_v4 = vmax.f32 %v12348_v58, %v3236_v28  ;;  %v3814_v59 = vpack.c.bf16 %v3754_v41, %v3753_v37  ;;  %v3899_v53 = vrot.slane %v3897_v57, 4  ;;  %v3900_v38 = vrot.slane %v12995_v55, 5  ;;  %v13026_v41 = vpop.f32.mrf.mxu1  ;;  %5780 = vmatpush1.bf16.msra.mxu0 %v11055_v22 }
 0x27e   : > { %v13017_v8 = vcombine.high %v13004_v40, %v13004_v40  ;;  %v3568_v63 = vadd.f32 %v12642_v30, %v3513_v6  ;;  %v3433_v14 = vmax.f32 %v12351_v0, %v3238_v35  ;;  %v3240_v24 = vadd.f32 %v3239_v56, %v12894_v60  ;;  %v3241_v58 = vpop.f32.mrf.mxu0  ;;  %5781 = vmatprep.subr.bf16.mxu0 %v11063_v44  ;;  %v11058_v44 = vld [vmem:[%s16114_s3 + $0x110] ss:$8 sps:$4 sm:$0xff]  }
 0x27f   : > { %4583 = vmatmul.mubr.bf16.gmra.mxu0 %v3814_v59  ;;  %v3891_v37 = vsel %vm12678_vm6, %v10089_v25, %v3890_v51  ;;  %v3901_v28 = vsel %vm12678_vm6, %v3899_v53, %v3900_v38  ;;  %v4725_v48 = vsel %vm12907_vm9, %v10164_v47, %v4724_v31  ;;  %v4728_v0 = vsel %vm12907_vm9, %v4726_v61, %v4727_v62  ;;  %v11061_v51 = vld [vmem:[%s16114_s3 + $0x1d0] ss:$8 sps:$4 sm:$0xff]   ;;  %v13044_v56 = vpop.f32.mrf.mxu1 }
 0x280   : > { %16374 = vst [vmem:[#allocation87_spill] sm:$0xff] %v13017_v8  ;;  %v13035_v60 = vmax.f32 %v3568_v63, 0.0  ;;  %v3514_v6 = vmax.f32 %v3432_v4, %v3433_v14  ;;  %v3242_v25 = vadd.f32 %v3241_v58, %v12913_v3  ;;  %v3898_v38 = vsel %vm12678_vm6, %v10090_v54, %v3897_v57  ;;  %4592 = vmatprep.mubr.bf16.mxu0 %v16347_v11  ;;  %v3245_v35 = vpop.f32.mrf.mxu0  ;;  %v16375_v54 = vld [vmem:[#allocation6_spill] sm:$0xff] }
 0x281   : > { %v4076_v31 = vcombine.low %v3891_v37, %v3894_v27  ;;  %v4077_v47 = vcombine.low %v3898_v38, %v3901_v28  ;;  %v3904_v61 = vrot.slane %v13017_v8, 5  ;;  %v4940_v62 = vcombine.low %v4725_v48, %v4728_v0  ;;  %v13051_v63 = vpop.f32.mrf.mxu1  ;;  %v11066_v58 = vld [vmem:[%s16114_s3 + $0x1c4] ss:$8 sps:$4 sm:$0xff]   ;;  %v11060_v48 = vld [vmem:[%s16114_s3 + $0x114] ss:$8 sps:$4 sm:$0xff]   ;;  %5782 = vmatpush1.bf16.msra.mxu0 %v11061_v51 }
 0x282   : > { %v3569_v3 = vadd.f32 %v12642_v30, %v3514_v6  ;;  %v3434_v57 = vmax.f32 %v12366_v12, %v3240_v24  ;;  %v3435_v4 = vmax.f32 %v16375_v54, %v3242_v25  ;;  %v3246_v22 = vadd.f32 %v3245_v35, %v12924_v17  ;;  %v3247_v59 = vpop.f32.mrf.mxu0  ;;  %v16376_v0 = vld [vmem:[#allocation7_spill] sm:$0xff]  ;;  %5783 = vmatprep.subr.bf16.mxu0 %v11066_v58 }
 0x283   : > { %v4137_v53 = vpack.c.bf16 %v4077_v47, %v4076_v31  ;;  %v3906_v27 = vrot.slane %v3904_v61, 4  ;;  %v3907_v14 = vrot.slane %v13035_v60, 5  ;;  %v4939_v12 = vcombine.low %v12932_v13, %v12967_v19  ;;  %v13075_v6 = vpop.f32.mrf.mxu1  ;;  %v11064_v25 = vld [vmem:[%s16114_s3 + $0x1c0] ss:$8 sps:$4 sm:$0xff]   ;;  %v16377_v31 = vld [vmem:[#allocation8_spill] sm:$0xff]  ;;  %5128 = vmatprep.subr.bf16.mxu1 %v11060_v48 }
 0x284   : > { %v13061_v24 = vmax.f32 %v3569_v3, 0.0  ;;  %v3515_v37 = vmax.f32 %v3434_v57, %v3435_v4  ;;  %v3248_v17 = vadd.f32 %v3247_v59, %v12943_v45  ;;  %v13066_v28 = vcombine.high %v13035_v60, %v13035_v60  ;;  %v3249_v19 = vpop.f32.mrf.mxu0  ;;  %5129 = vmatpush1.bf16.msra.mxu1 %v11058_v44 }
 0x285   : > { %v3436_v13 = vmax.f32 %v16376_v0, %v3246_v22  ;;  %4310 = vmatmul.mubr.bf16.gmra.mxu1 %v4137_v53  ;;  %v10091_v45 = vrot.slane %v13004_v40, 9  ;;  %v13081_v38 = vpack.c.bf16 %v4940_v62, %v4939_v12  ;;  %v3250_v51 = vadd.f32 %v3249_v19, %v12954_v18  ;;  %v13098_v59 = vpop.f32.mrf.mxu1  ;;  %v11069_v18 = vld [vmem:[%s16114_s3 + $0x1b4] ss:$8 sps:$4 sm:$0xff]   ;;  %5784 = vmatpush1.bf16.msra.mxu0 %v11064_v25  ;;  %v16381_v25 = vld [vmem:[#allocation10_spill] sm:$0xff] }
 0x286   : > { %v3570_v35 = vadd.f32 %v12642_v30, %v3515_v37  ;;  %v3437_v47 = vmax.f32 %v16377_v31, %v3248_v17  ;;  %v3756_v3 = vcombine.low %v13066_v28, %v13061_v24  ;;  %4319 = vmatprep.mubr.bf16.mxu1 %v16347_v11  ;;  %v3251_v57 = vpop.f32.mrf.mxu0  ;;  %v3755_v54 = vcombine.low %v13004_v40, %v13017_v8 }
 0x287   : > { %v13093_v4 = vcombine.high %v13061_v24, %v13061_v24  ;;  %v3908_v62 = vsel %vm12678_vm6, %v3906_v27, %v3907_v14  ;;  %v3911_v22 = vrot.slane %v13061_v24, 5  ;;  %v3252_v12 = vadd.f32 %v3251_v57, %v12982_v23  ;;  %v11067_v27 = vld [vmem:[%s16114_s3 + $0x1b0] ss:$8 sps:$4 sm:$0xff]   ;;  %5785 = vmatprep.subr.bf16.mxu0 %v11069_v18  ;;  %v11072_v23 = vld [vmem:[%s16114_s3 + $0x1a4] ss:$8 sps:$4 sm:$0xff]  }
 0x288   : > { %v13103_v53 = vmax.f32 %v3570_v35, 0.0  ;;  %v3516_v58 = vmax.f32 %v3436_v13, %v3437_v47  ;;  %v10092_v37 = vrot.slane %v13066_v28, 9  ;;  %v16379_v14 = vld [vmem:[#allocation9_spill] sm:$0xff]  ;;  %v3255_v48 = vpop.f32.mrf.mxu0  ;;  %v3815_v0 = vpack.c.bf16 %v3756_v3, %v3755_v54  ;;  %v13112_v35 = vpop.f32.mrf.mxu1  ;;  %v11073_v3 = vld [vmem:[%s16114_s3 + $0x100] ss:$8 sps:$4 sm:$0xff]  }
 0x289   : > { %v3438_v17 = vmax.f32 %v16379_v14, %v3250_v51  ;;  %v3913_v19 = vrot.slane %v3911_v22, 4  ;;  %v3914_v31 = vrot.slane %v13093_v4, 5  ;;  %v3439_v47 = vmax.f32 %v16381_v25, %v3252_v12  ;;  %v11075_v57 = vld [vmem:[%s16114_s3 + $0x104] ss:$8 sps:$4 sm:$0xff]   ;;  %5786 = vmatpush1.bf16.msra.mxu0 %v11067_v27 }
 0x28a   : > { %16378 = vst [vmem:[#allocation6_spill] sm:$0xff] %v13103_v53  ;;  %v13119_v44 = vcombine.high %v13103_v53, %v13103_v53  ;;  %v3571_v13 = vadd.f32 %v12642_v30, %v3516_v58  ;;  %v3256_v51 = vadd.f32 %v3255_v48, %v12998_v5  ;;  %4593 = vmatmul.mubr.bf16.gmra.mxu0 %v3815_v0  ;;  %v3257_v54 = vpop.f32.mrf.mxu0  ;;  %v13136_v12 = vpop.f32.mrf.mxu1 }
 0x28b   : > { %v3905_v18 = vsel %vm12678_vm6, %v10091_v45, %v3904_v61  ;;  %v3915_v58 = vsel %vm12678_vm6, %v3913_v19, %v3914_v31  ;;  %v3517_v14 = vmax.f32 %v3438_v17, %v3439_v47  ;;  %v3258_v48 = vadd.f32 %v3257_v54, %v13013_v46  ;;  %4602 = vmatprep.mubr.bf16.mxu0 %v16347_v11  ;;  %v11070_v61 = vld [vmem:[%s16114_s3 + $0x1a0] ss:$8 sps:$4 sm:$0xff]  }
 0x28c   : > { %16380 = vst [vmem:[#allocation7_spill] sm:$0xff] %v13119_v44  ;;  %v13138_v5 = vmax.f32 %v3571_v13, 0.0  ;;  %v3912_v25 = vsel %vm12678_vm6, %v10092_v37, %v3911_v22  ;;  %v3259_v45 = vpop.f32.mrf.mxu0  ;;  %v4078_v0 = vcombine.low %v3905_v18, %v3908_v62  ;;  %v13147_v31 = vpop.f32.mrf.mxu1  ;;  %v3918_v13 = vrot.slane %v13119_v44, 5  ;;  %5787 = vmatprep.subr.bf16.mxu0 %v11072_v23  ;;  %5130 = vmatprep.subr.bf16.mxu1 %v11075_v57  ;;  %v16383_v17 = vld [vmem:[#allocation11_spill] sm:$0xff]  ;;  %v16384_v37 = vld [vmem:[#allocation12_spill] sm:$0xff] }
 0x28d   : > { %v4079_v19 = vcombine.low %v3912_v25, %v3915_v58  ;;  %v3572_v46 = vadd.f32 %v12642_v30, %v3517_v14  ;;  %v3440_v22 = vmax.f32 %v16383_v17, %v3256_v51  ;;  %v3441_v47 = vmax.f32 %v16384_v37, %v3258_v48  ;;  %5131 = vmatpush1.bf16.msra.mxu1 %v11073_v3  ;;  %v11078_v62 = vld [vmem:[%s16114_s3 + $0x194] ss:$8 sps:$4 sm:$0xff]   ;;  %v11076_v3 = vld [vmem:[%s16114_s3 + $0x190] ss:$8 sps:$4 sm:$0xff]  }
 0x28e   : > { %16382 = vst [vmem:[#allocation8_spill] sm:$0xff] %v13138_v5  ;;  %v3260_v27 = vadd.f32 %v3259_v45, %v13026_v41  ;;  %v3261_v54 = vpop.f32.mrf.mxu0  ;;  %v13157_v58 = vpop.f32.mrf.mxu1  ;;  %v3920_v25 = vrot.slane %v3918_v13, 4  ;;  %v3921_v23 = vrot.slane %v13138_v5, 5  ;;  %v13165_v41 = vcombine.high %v13138_v5, %v13138_v5  ;;  %5788 = vmatpush1.bf16.msra.mxu0 %v11070_v61  ;;  %v16387_v48 = vld [vmem:[#allocation13_spill] sm:$0xff]  ;;  %v16388_v61 = vld [vmem:[#allocation14_spill] sm:$0xff] }
 0x28f   : > { %v4138_v18 = vpack.c.bf16 %v4079_v19, %v4078_v0  ;;  %v13160_v57 = vmax.f32 %v3572_v46, 0.0  ;;  %v3518_v14 = vmax.f32 %v3440_v22, %v3441_v47  ;;  %v3262_v51 = vadd.f32 %v3261_v54, %v13044_v56  ;;  %5789 = vmatprep.subr.bf16.mxu0 %v11078_v62  ;;  %v11081_v56 = vld [vmem:[%s16114_s3 + $0x184] ss:$8 sps:$4 sm:$0xff]  }
 0x290   : > { %16386 = vst [vmem:[#allocation10_spill] sm:$0xff] %v13165_v41  ;;  %v3442_v45 = vmax.f32 %v16387_v48, %v3260_v27  ;;  %v3265_v0 = vpop.f32.mrf.mxu0  ;;  %v13171_v19 = vpop.f32.mrf.mxu1  ;;  %v10093_v46 = vrot.slane %v13103_v53, 9  ;;  %v3757_v54 = vcombine.low %v13103_v53, %v13119_v44 }
 0x291   : > { %16385 = vst [vmem:[#allocation9_spill] sm:$0xff] %v13160_v57  ;;  %4320 = vmatmul.mubr.bf16.gmra.mxu1 %v4138_v18  ;;  %v3573_v17 = vadd.f32 %v12642_v30, %v3518_v14  ;;  %v3443_v22 = vmax.f32 %v16388_v61, %v3262_v51  ;;  %v3266_v37 = vadd.f32 %v3265_v0, %v13051_v63  ;;  %v3925_v14 = vrot.slane %v13160_v57, 5 }
 0x292   : > { %v3758_v47 = vcombine.low %v13165_v41, %v13160_v57  ;;  %4329 = vmatprep.mubr.bf16.mxu1 %v16347_v11  ;;  %v3267_v27 = vpop.f32.mrf.mxu0  ;;  %v13187_v62 = vcombine.high %v13160_v57, %v13160_v57  ;;  %v3922_v18 = vsel %vm12678_vm6, %v3920_v25, %v3921_v23  ;;  %v13192_v51 = vpop.f32.mrf.mxu1  ;;  %v10094_v61 = vrot.slane %v13165_v41, 9  ;;  %5790 = vmatpush1.bf16.msra.mxu0 %v11076_v3 }
 0x293   : > { %v13194_v63 = vmax.f32 %v3573_v17, 0.0  ;;  %v3519_v48 = vmax.f32 %v3442_v45, %v3443_v22  ;;  %v3268_v0 = vadd.f32 %v3267_v27, %v13075_v6  ;;  %v3444_v53 = vmax.f32 %v16391_v49, %v3266_v37  ;;  %5791 = vmatprep.subr.bf16.mxu0 %v11081_v56  ;;  %v16393_v45 = vld [vmem:[#allocation16_spill] sm:$0xff] }
 0x294   : > { %16389 = vst [vmem:[#allocation11_spill] sm:$0xff] %v13187_v62  ;;  %v3269_v5 = vpop.f32.mrf.mxu0  ;;  %v3816_v25 = vpack.c.bf16 %v3758_v47, %v3757_v54  ;;  %v3927_v23 = vrot.slane %v3925_v14, 4  ;;  %v3928_v57 = vrot.slane %v13187_v62, 5  ;;  %v13203_v44 = vpop.f32.mrf.mxu1  ;;  %v3919_v37 = vsel %vm12678_vm6, %v10093_v46, %v3918_v13 }
 0x295   : > { %16390 = vst [vmem:[#allocation12_spill] sm:$0xff] %v13194_v63  ;;  %v13207_v6 = vcombine.high %v13194_v63, %v13194_v63  ;;  %v3574_v3 = vadd.f32 %v12642_v30, %v3519_v48  ;;  %v3445_v17 = vmax.f32 %v16393_v45, %v3268_v0  ;;  %v3270_v22 = vadd.f32 %v3269_v5, %v13098_v59 }
 0x296   : > { %4603 = vmatmul.mubr.bf16.gmra.mxu0 %v3816_v25  ;;  %v3271_v49 = vpop.f32.mrf.mxu0  ;;  %v3929_v47 = vsel %vm12678_vm6, %v3927_v23, %v3928_v57  ;;  %v13216_v27 = vpop.f32.mrf.mxu1  ;;  %v3926_v48 = vsel %vm12678_vm6, %v10094_v61, %v3925_v14  ;;  %v4080_v5 = vcombine.low %v3919_v37, %v3922_v18  ;;  %v16395_v25 = vld [vmem:[#allocation17_spill] sm:$0xff] }
 0x297   : > { %16392 = vst [vmem:[#allocation13_spill] sm:$0xff] %v13207_v6  ;;  %v13218_v56 = vmax.f32 %v3574_v3, 0.0  ;;  %v3520_v54 = vmax.f32 %v3444_v53, %v3445_v17  ;;  %v3272_v41 = vadd.f32 %v3271_v49, %v13112_v35  ;;  %4612 = vmatprep.mubr.bf16.mxu0 %v16347_v11  ;;  %5792 = vmatpush1.bf16.msra.mxu0 %v11079_v2  ;;  %v3932_v57 = vrot.slane %v13207_v6, 5  ;;  %v16396_v53 = vld [vmem:[#allocation18_spill] sm:$0xff] }
 0x298   : > { %v3275_v59 = vpop.f32.mrf.mxu0  ;;  %v4081_v0 = vcombine.low %v3926_v48, %v3929_v47  ;;  %v13224_v13 = vpop.f32.mrf.mxu1  ;;  %v3446_v23 = vmax.f32 %v16395_v25, %v3270_v22  ;;  %v16399_v22 = vld [vmem:[#allocation19_spill] sm:$0xff]  ;;  %v10095_v48 = vrot.slane %v13194_v63, 9 }
 0x299   : > { %16394 = vst [vmem:[#allocation14_spill] sm:$0xff] %v13218_v56  ;;  %v3575_v46 = vadd.f32 %v12642_v30, %v3520_v54  ;;  %v3447_v3 = vmax.f32 %v16396_v53, %v3272_v41  ;;  %v3276_v35 = vadd.f32 %v3275_v59, %v13136_v12  ;;  %v3934_v2 = vrot.slane %v3932_v57, 4  ;;  %v11084_v59 = vld [vmem:[%s16114_s3 + $0x274] ss:$8 sps:$4 sm:$0xff]  }
 0x29a   : > { %v3277_v45 = vpop.f32.mrf.mxu0  ;;  %v4139_v14 = vpack.c.bf16 %v4081_v0, %v4080_v5  ;;  %v13231_v61 = vpop.f32.mrf.mxu1  ;;  %v3935_v18 = vrot.slane %v13218_v56, 5  ;;  %v13239_v47 = vcombine.high %v13218_v56, %v13218_v56  ;;  %v16400_v0 = vld [vmem:[#allocation20_spill] sm:$0xff]  ;;  %v3759_v53 = vcombine.low %v13194_v63, %v13207_v6  ;;  %6211 = vmatprep.subr.bf16.mxu1 %v11084_v59  ;;  %v16405_v59 = vld [vmem:[#allocation22_spill] sm:$0xff] }
 0x29b   : > { %v13234_v17 = vmax.f32 %v3575_v46, 0.0  ;;  %v3521_v49 = vmax.f32 %v3446_v23, %v3447_v3  ;;  %v3278_v37 = vadd.f32 %v3277_v45, %v13147_v31  ;;  %v3448_v41 = vmax.f32 %v16399_v22, %v3276_v35  ;;  %v16403_v22 = vld [vmem:[#allocation21_spill] sm:$0xff] }
 0x29c   : > { %16398 = vst [vmem:[#allocation16_spill] sm:$0xff] %v13239_v47  ;;  %4330 = vmatmul.mubr.bf16.gmra.mxu1 %v4139_v14  ;;  %v3279_v12 = vpop.f32.mrf.mxu0  ;;  %v13242_v54 = vpop.f32.mrf.mxu1 }
 0x29d   : > { %16397 = vst [vmem:[#allocation15_spill] sm:$0xff] %v13234_v17  ;;  %v3576_v5 = vadd.f32 %v12642_v30, %v3521_v49  ;;  %v3449_v31 = vmax.f32 %v16400_v0, %v3278_v37  ;;  %v3280_v46 = vadd.f32 %v3279_v12, %v13157_v58  ;;  %v3760_v25 = vcombine.low %v13239_v47, %v13234_v17 }
 0x29e   : > { %4339 = vmatprep.mubr.bf16.mxu1 %v16347_v11  ;;  %v3281_v23 = vpop.f32.mrf.mxu0  ;;  %v13258_v3 = vcombine.high %v13234_v17, %v13234_v17  ;;  %v3936_v30 = vsel %vm12678_vm6, %v3934_v2, %v3935_v18  ;;  %v3939_v35 = vrot.slane %v13234_v17, 5  ;;  %v13263_v45 = vpop.f32.mrf.mxu1  ;;  %v10096_v37 = vrot.slane %v13239_v47, 9 }
 0x29f   : > { %v13265_v58 = vmax.f32 %v3576_v5, 0.0  ;;  %v3522_v14 = vmax.f32 %v3448_v41, %v3449_v31  ;;  %v3282_v49 = vadd.f32 %v3281_v23, %v13171_v19  ;;  %v3450_v12 = vmax.f32 %v16403_v22, %v3280_v46  ;;  %v13280_v41 = vld [vmem:[%s16113_s2] ss:$0 sm:$0xff] }
 0x2a0   : > { %16401 = vst [vmem:[#allocation17_spill] sm:$0xff] %v13258_v3  ;;  %v3285_v0 = vpop.f32.mrf.mxu0  ;;  %v3817_v63 = vpack.c.bf16 %v3760_v25, %v3759_v53  ;;  %v3941_v56 = vrot.slane %v3939_v35, 4  ;;  %v3942_v6 = vrot.slane %v13258_v3, 5  ;;  %v13271_v2 = vpop.f32.mrf.mxu1  ;;  %v3933_v25 = vsel %vm12678_vm6, %v10095_v48, %v3932_v57 }
 0x2a1   : > { %16402 = vst [vmem:[#allocation18_spill] sm:$0xff] %v13265_v58  ;;  %v13275_v18 = vcombine.high %v13265_v58, %v13265_v58  ;;  %v3577_v19 = vadd.f32 %v13280_v41, %v3522_v14  ;;  %v3451_v5 = vmax.f32 %v16405_v59, %v3282_v49  ;;  %v3286_v31 = vadd.f32 %v3285_v0, %v13192_v51 }
 0x2a2   : > { %4613 = vmatmul.mubr.bf16.gmra.mxu0 %v3817_v63  ;;  %v3287_v46 = vpop.f32.mrf.mxu0  ;;  %v3943_v23 = vsel %vm12678_vm6, %v3941_v56, %v3942_v6  ;;  %v13289_v53 = vpop.f32.mrf.mxu1  ;;  %v3940_v14 = vsel %vm12678_vm6, %v10096_v37, %v3939_v35  ;;  %v4082_v63 = vcombine.low %v3933_v25, %v3936_v30  ;;  %v16407_v56 = vld [vmem:[#allocation23_spill] sm:$0xff] }
 0x2a3   : > { %16404 = vst [vmem:[#allocation19_spill] sm:$0xff] %v13275_v18  ;;  %v13291_v22 = vmax.f32 %v3577_v19, 0.0  ;;  %v3523_v47 = vmax.f32 %v3450_v12, %v3451_v5  ;;  %v3288_v3 = vadd.f32 %v3287_v46, %v13203_v44  ;;  %4622 = vmatprep.mubr.bf16.mxu0 %v16347_v11  ;;  %v4083_v49 = vcombine.low %v3940_v14, %v3943_v23  ;;  %v16408_v19 = vld [vmem:[#allocation24_spill] sm:$0xff] }
 0x2a4   : > { %v3289_v51 = vpop.f32.mrf.mxu0  ;;  %v13297_v0 = vpop.f32.mrf.mxu1  ;;  %v3946_v57 = vrot.slane %v13275_v18, 5  ;;  %v3452_v48 = vmax.f32 %v16407_v56, %v3286_v31  ;;  %v16411_v31 = vld [vmem:[#allocation25_spill] sm:$0xff] }
 0x2a5   : > { %16406 = vst [vmem:[#allocation20_spill] sm:$0xff] %v13291_v22  ;;  %v3578_v6 = vadd.f32 %v13280_v41, %v3523_v47  ;;  %v3453_v12 = vmax.f32 %v16408_v19, %v3288_v3  ;;  %v3290_v44 = vadd.f32 %v3289_v51, %v13216_v27  ;;  %v4140_v5 = vpack.c.bf16 %v4083_v49, %v4082_v63  ;;  %v16412_v49 = vld [vmem:[#allocation26_spill] sm:$0xff] }
 0x2a6   : > { %v3291_v59 = vpop.f32.mrf.mxu0  ;;  %v13304_v35 = vpop.f32.mrf.mxu1  ;;  %v3948_v37 = vrot.slane %v3946_v57, 4  ;;  %v3949_v30 = vrot.slane %v13291_v22, 5  ;;  %v13312_v47 = vcombine.high %v13291_v22, %v13291_v22  ;;  %v10097_v51 = vrot.slane %v13265_v58, 9 }
 0x2a7   : > { %v13307_v46 = vmax.f32 %v3578_v6, 0.0  ;;  %v3524_v25 = vmax.f32 %v3452_v48, %v3453_v12  ;;  %v3292_v23 = vadd.f32 %v3291_v59, %v13224_v13  ;;  %v3454_v3 = vmax.f32 %v16411_v31, %v3290_v44  ;;  %4340 = vmatmul.mubr.bf16.gmra.mxu1 %v4140_v5 }
 0x2a8   : > { %16410 = vst [vmem:[#allocation22_spill] sm:$0xff] %v13312_v47  ;;  %v3295_v27 = vpop.f32.mrf.mxu0  ;;  %v13315_v14 = vpop.f32.mrf.mxu1  ;;  %4349 = vmatprep.mubr.bf16.mxu1 %v16347_v11  ;;  %v3761_v19 = vcombine.low %v13265_v58, %v13275_v18  ;;  %v3950_v44 = vsel %vm12678_vm6, %v3948_v37, %v3949_v30  ;;  %v10098_v31 = vrot.slane %v13312_v47, 9 }
 0x2a9   : > { %16409 = vst [vmem:[#allocation21_spill] sm:$0xff] %v13307_v46  ;;  %v3579_v63 = vadd.f32 %v13280_v41, %v3524_v25  ;;  %v3455_v6 = vmax.f32 %v16412_v49, %v3292_v23  ;;  %v3296_v56 = vadd.f32 %v3295_v27, %v13231_v61  ;;  %v3762_v13 = vcombine.low %v13312_v47, %v13307_v46  ;;  %v16415_v27 = vld [vmem:[#allocation27_spill] sm:$0xff] }
 0x2aa   : > { %v3297_v48 = vpop.f32.mrf.mxu0  ;;  %v13328_v12 = vcombine.high %v13307_v46, %v13307_v46  ;;  %v3953_v59 = vrot.slane %v13307_v46, 5  ;;  %v13333_v5 = vpop.f32.mrf.mxu1 }
 0x2ab   : > { %v13335_v61 = vmax.f32 %v3579_v63, 0.0  ;;  %v3525_v25 = vmax.f32 %v3454_v3, %v3455_v6  ;;  %v3298_v23 = vadd.f32 %v3297_v48, %v13242_v54  ;;  %v3456_v49 = vmax.f32 %v16415_v27, %v3296_v56  ;;  %v16417_v3 = vld [vmem:[#allocation28_spill] sm:$0xff] }
 0x2ac   : > { %16413 = vst [vmem:[#allocation23_spill] sm:$0xff] %v13328_v12  ;;  %v3299_v22 = vpop.f32.mrf.mxu0  ;;  %v3818_v58 = vpack.c.bf16 %v3762_v13, %v3761_v19  ;;  %v3955_v18 = vrot.slane %v3953_v59, 4  ;;  %v3956_v17 = vrot.slane %v13328_v12, 5  ;;  %v13341_v62 = vpop.f32.mrf.mxu1  ;;  %v3947_v56 = vsel %vm12678_vm6, %v10097_v51, %v3946_v57 }
 0x2ad   : > { %16414 = vst [vmem:[#allocation24_spill] sm:$0xff] %v13335_v61  ;;  %v13345_v37 = vcombine.high %v13335_v61, %v13335_v61  ;;  %v3580_v30 = vadd.f32 %v13280_v41, %v3525_v25  ;;  %v3457_v63 = vmax.f32 %v16417_v3, %v3298_v23  ;;  %v3300_v54 = vadd.f32 %v3299_v22, %v13263_v45 }
 0x2ae   : > { %4623 = vmatmul.mubr.bf16.gmra.mxu0 %v3818_v58  ;;  %v3301_v6 = vpop.f32.mrf.mxu0  ;;  %v3957_v13 = vsel %vm12678_vm6, %v3955_v18, %v3956_v17  ;;  %v13354_v48 = vpop.f32.mrf.mxu1  ;;  %v3954_v25 = vsel %vm12678_vm6, %v10098_v31, %v3953_v59  ;;  %v4084_v58 = vcombine.low %v3947_v56, %v3950_v44  ;;  %v16419_v18 = vld [vmem:[#allocation29_spill] sm:$0xff] }
 0x2af   : > { %16416 = vst [vmem:[#allocation25_spill] sm:$0xff] %v13345_v37  ;;  %v13356_v19 = vmax.f32 %v3580_v30, 0.0  ;;  %v3526_v27 = vmax.f32 %v3456_v49, %v3457_v63  ;;  %v3302_v47 = vadd.f32 %v3301_v6, %v13271_v2  ;;  %4632 = vmatprep.mubr.bf16.mxu0 %v16347_v11  ;;  %v4085_v22 = vcombine.low %v3954_v25, %v3957_v13  ;;  %v16420_v30 = vld [vmem:[#allocation30_spill] sm:$0xff] }
 0x2b0   : > { %v3305_v45 = vpop.f32.mrf.mxu0  ;;  %v13362_v23 = vpop.f32.mrf.mxu1  ;;  %v3960_v57 = vrot.slane %v13345_v37, 5  ;;  %v3458_v51 = vmax.f32 %v16419_v18, %v3300_v54  ;;  %v16423_v54 = vld [vmem:[#allocation31_spill] sm:$0xff] }
 0x2b1   : > { %16418 = vst [vmem:[#allocation26_spill] sm:$0xff] %v13356_v19  ;;  %v3581_v17 = vadd.f32 %v13280_v41, %v3526_v27  ;;  %v3459_v49 = vmax.f32 %v16420_v30, %v3302_v47  ;;  %v3306_v2 = vadd.f32 %v3305_v45, %v13289_v53  ;;  %v4141_v63 = vpack.c.bf16 %v4085_v22, %v4084_v58  ;;  %v16424_v22 = vld [vmem:[#allocation32_spill] sm:$0xff] }
 0x2b2   : > { %v3307_v3 = vpop.f32.mrf.mxu0  ;;  %v13369_v59 = vpop.f32.mrf.mxu1  ;;  %v3962_v31 = vrot.slane %v3960_v57, 4  ;;  %v3963_v44 = vrot.slane %v13356_v19, 5  ;;  %v13377_v27 = vcombine.high %v13356_v19, %v13356_v19  ;;  %v10099_v45 = vrot.slane %v13335_v61, 9 }
 0x2b3   : > { %v13372_v6 = vmax.f32 %v3581_v17, 0.0  ;;  %v3527_v56 = vmax.f32 %v3458_v51, %v3459_v49  ;;  %v3308_v13 = vadd.f32 %v3307_v3, %v13297_v0  ;;  %v3460_v47 = vmax.f32 %v16423_v54, %v3306_v2  ;;  %4350 = vmatmul.mubr.bf16.gmra.mxu1 %v4141_v63 }
 0x2b4   : > { %16422 = vst [vmem:[#allocation28_spill] sm:$0xff] %v13377_v27  ;;  %v3309_v53 = vpop.f32.mrf.mxu0  ;;  %v13380_v25 = vpop.f32.mrf.mxu1  ;;  %4359 = vmatprep.mubr.bf16.mxu1 %v16347_v11  ;;  %v3763_v30 = vcombine.low %v13335_v61, %v13345_v37  ;;  %v3964_v2 = vsel %vm12678_vm6, %v3962_v31, %v3963_v44  ;;  %v10100_v54 = vrot.slane %v13377_v27, 9 }
 0x2b5   : > { %16421 = vst [vmem:[#allocation27_spill] sm:$0xff] %v13372_v6  ;;  %v3582_v58 = vadd.f32 %v13280_v41, %v3527_v56  ;;  %v3461_v17 = vmax.f32 %v16424_v22, %v3308_v13  ;;  %v3310_v18 = vadd.f32 %v3309_v53, %v13304_v35  ;;  %v3764_v0 = vcombine.low %v13377_v27, %v13372_v6  ;;  %v16427_v53 = vld [vmem:[#allocation33_spill] sm:$0xff] }
 0x2b6   : > { %v3311_v51 = vpop.f32.mrf.mxu0  ;;  %v13393_v49 = vcombine.high %v13372_v6, %v13372_v6  ;;  %v3967_v3 = vrot.slane %v13372_v6, 5  ;;  %v13398_v63 = vpop.f32.mrf.mxu1 }
 0x2b7   : > { %v13400_v35 = vmax.f32 %v3582_v58, 0.0  ;;  %v3528_v56 = vmax.f32 %v3460_v47, %v3461_v17  ;;  %v3312_v13 = vadd.f32 %v3311_v51, %v13315_v14  ;;  %v3462_v22 = vmax.f32 %v16427_v53, %v3310_v18  ;;  %v16429_v47 = vld [vmem:[#allocation34_spill] sm:$0xff] }
 0x2b8   : > { %16425 = vst [vmem:[#allocation29_spill] sm:$0xff] %v13393_v49  ;;  %v3315_v61 = vpop.f32.mrf.mxu0  ;;  %v3819_v19 = vpack.c.bf16 %v3764_v0, %v3763_v30  ;;  %v3969_v37 = vrot.slane %v3967_v3, 4  ;;  %v3970_v12 = vrot.slane %v13393_v49, 5  ;;  %v13406_v46 = vpop.f32.mrf.mxu1  ;;  %v3961_v18 = vsel %vm12678_vm6, %v10099_v45, %v3960_v57 }
 0x2b9   : > { %16426 = vst [vmem:[#allocation30_spill] sm:$0xff] %v13400_v35  ;;  %v13410_v31 = vcombine.high %v13400_v35, %v13400_v35  ;;  %v3583_v44 = vadd.f32 %v13280_v41, %v3528_v56  ;;  %v3463_v58 = vmax.f32 %v16429_v47, %v3312_v13  ;;  %v3316_v14 = vadd.f32 %v3315_v61, %v13333_v5 }
 0x2ba   : > { %4633 = vmatmul.mubr.bf16.gmra.mxu0 %v3819_v19  ;;  %v3317_v17 = vpop.f32.mrf.mxu0  ;;  %v3971_v0 = vsel %vm12678_vm6, %v3969_v37, %v3970_v12  ;;  %v13419_v51 = vpop.f32.mrf.mxu1  ;;  %v3968_v56 = vsel %vm12678_vm6, %v10100_v54, %v3967_v3  ;;  %v4086_v61 = vcombine.low %v3961_v18, %v3964_v2  ;;  %v16431_v37 = vld [vmem:[#allocation35_spill] sm:$0xff] }
 0x2bb   : > { %16428 = vst [vmem:[#allocation31_spill] sm:$0xff] %v13410_v31  ;;  %v13421_v30 = vmax.f32 %v3583_v44, 0.0  ;;  %v3529_v53 = vmax.f32 %v3462_v22, %v3463_v58  ;;  %v3318_v27 = vadd.f32 %v3317_v17, %v13341_v62  ;;  %4642 = vmatprep.mubr.bf16.mxu0 %v16347_v11  ;;  %v4087_v19 = vcombine.low %v3968_v56, %v3971_v0  ;;  %v16432_v44 = vld [vmem:[#allocation36_spill] sm:$0xff] }
 0x2bc   : > { %v3319_v5 = vpop.f32.mrf.mxu0  ;;  %v13427_v13 = vpop.f32.mrf.mxu1  ;;  %v3974_v57 = vrot.slane %v13410_v31, 5  ;;  %v3464_v45 = vmax.f32 %v16431_v37, %v3316_v14  ;;  %v16435_v14 = vld [vmem:[#allocation37_spill] sm:$0xff] }
 0x2bd   : > { %16430 = vst [vmem:[#allocation32_spill] sm:$0xff] %v13421_v30  ;;  %v3584_v12 = vadd.f32 %v13280_v41, %v3529_v53  ;;  %v3465_v22 = vmax.f32 %v16432_v44, %v3318_v27  ;;  %v3320_v62 = vadd.f32 %v3319_v5, %v13354_v48  ;;  %v4142_v58 = vpack.c.bf16 %v4087_v19, %v4086_v61  ;;  %v16436_v19 = vld [vmem:[#allocation38_spill] sm:$0xff] }
 0x2be   : > { %v3321_v47 = vpop.f32.mrf.mxu0  ;;  %v13434_v3 = vpop.f32.mrf.mxu1  ;;  %v3976_v54 = vrot.slane %v3974_v57, 4  ;;  %v3977_v2 = vrot.slane %v13421_v30, 5  ;;  %v13442_v53 = vcombine.high %v13421_v30, %v13421_v30  ;;  %v10101_v5 = vrot.slane %v13400_v35, 9 }
 0x2bf   : > { %v13437_v17 = vmax.f32 %v3584_v12, 0.0  ;;  %v3530_v18 = vmax.f32 %v3464_v45, %v3465_v22  ;;  %v3322_v0 = vadd.f32 %v3321_v47, %v13362_v23  ;;  %v3466_v27 = vmax.f32 %v16435_v14, %v3320_v62  ;;  %4360 = vmatmul.mubr.bf16.gmra.mxu1 %v4142_v58 }
 0x2c0   : > { %16434 = vst [vmem:[#allocation34_spill] sm:$0xff] %v13442_v53  ;;  %v3325_v48 = vpop.f32.mrf.mxu0  ;;  %v13445_v56 = vpop.f32.mrf.mxu1  ;;  %4369 = vmatprep.mubr.bf16.mxu1 %v16347_v11  ;;  %v3765_v44 = vcombine.low %v13400_v35, %v13410_v31  ;;  %v3978_v62 = vsel %vm12678_vm6, %v3976_v54, %v3977_v2  ;;  %v10102_v14 = vrot.slane %v13442_v53, 9 }
 0x2c1   : > { %16433 = vst [vmem:[#allocation33_spill] sm:$0xff] %v13437_v17  ;;  %v3585_v61 = vadd.f32 %v13280_v41, %v3530_v18  ;;  %v3467_v12 = vmax.f32 %v16436_v19, %v3322_v0  ;;  %v3326_v37 = vadd.f32 %v3325_v48, %v13369_v59  ;;  %v3766_v23 = vcombine.low %v13442_v53, %v13437_v17  ;;  %v16439_v48 = vld [vmem:[#allocation39_spill] sm:$0xff] }
 0x2c2   : > { %v3327_v45 = vpop.f32.mrf.mxu0  ;;  %v13458_v22 = vcombine.high %v13437_v17, %v13437_v17  ;;  %v3981_v47 = vrot.slane %v13437_v17, 5  ;;  %v13463_v58 = vpop.f32.mrf.mxu1 }
 0x2c3   : > { %v13465_v59 = vmax.f32 %v3585_v61, 0.0  ;;  %v3531_v18 = vmax.f32 %v3466_v27, %v3467_v12  ;;  %v3328_v0 = vadd.f32 %v3327_v45, %v13380_v25  ;;  %v3468_v19 = vmax.f32 %v16439_v48, %v3326_v37  ;;  %v16441_v27 = vld [vmem:[#allocation40_spill] sm:$0xff] }
 0x2c4   : > { %16437 = vst [vmem:[#allocation35_spill] sm:$0xff] %v13458_v22  ;;  %v3329_v30 = vpop.f32.mrf.mxu0  ;;  %v3820_v35 = vpack.c.bf16 %v3766_v23, %v3765_v44  ;;  %v3983_v31 = vrot.slane %v3981_v47, 4  ;;  %v3984_v49 = vrot.slane %v13458_v22, 5  ;;  %v13471_v6 = vpop.f32.mrf.mxu1  ;;  %v3975_v37 = vsel %vm12678_vm6, %v10101_v5, %v3974_v57 }
 0x2c5   : > { %16438 = vst [vmem:[#allocation36_spill] sm:$0xff] %v13465_v59  ;;  %v13475_v54 = vcombine.high %v13465_v59, %v13465_v59  ;;  %v3586_v2 = vadd.f32 %v13280_v41, %v3531_v18  ;;  %v3469_v61 = vmax.f32 %v16441_v27, %v3328_v0  ;;  %v3330_v25 = vadd.f32 %v3329_v30, %v13398_v63 }
 0x2c6   : > { %4643 = vmatmul.mubr.bf16.gmra.mxu0 %v3820_v35  ;;  %v3331_v12 = vpop.f32.mrf.mxu0  ;;  %v3985_v23 = vsel %vm12678_vm6, %v3983_v31, %v3984_v49  ;;  %v13484_v45 = vpop.f32.mrf.mxu1  ;;  %v3982_v18 = vsel %vm12678_vm6, %v10102_v14, %v3981_v47  ;;  %v4088_v35 = vcombine.low %v3975_v37, %v3978_v62  ;;  %v16443_v31 = vld [vmem:[#allocation41_spill] sm:$0xff] }
 0x2c7   : > { %16440 = vst [vmem:[#allocation37_spill] sm:$0xff] %v13475_v54  ;;  %v13486_v44 = vmax.f32 %v3586_v2, 0.0  ;;  %v3532_v48 = vmax.f32 %v3468_v19, %v3469_v61  ;;  %v3332_v53 = vadd.f32 %v3331_v12, %v13406_v46  ;;  %4652 = vmatprep.mubr.bf16.mxu0 %v16347_v11  ;;  %v4089_v30 = vcombine.low %v3982_v18, %v3985_v23  ;;  %v16444_v2 = vld [vmem:[#allocation42_spill] sm:$0xff] }
 0x2c8   : > { %v3335_v63 = vpop.f32.mrf.mxu0  ;;  %v13492_v0 = vpop.f32.mrf.mxu1  ;;  %v3988_v57 = vrot.slane %v13475_v54, 5  ;;  %v3470_v5 = vmax.f32 %v16443_v31, %v3330_v25  ;;  %v16447_v25 = vld [vmem:[#allocation43_spill] sm:$0xff] }
 0x2c9   : > { %16442 = vst [vmem:[#allocation38_spill] sm:$0xff] %v13486_v44  ;;  %v3587_v49 = vadd.f32 %v13280_v41, %v3532_v48  ;;  %v3471_v19 = vmax.f32 %v16444_v2, %v3332_v53  ;;  %v3336_v46 = vadd.f32 %v3335_v63, %v13419_v51  ;;  %v4143_v61 = vpack.c.bf16 %v4089_v30, %v4088_v35  ;;  %v16448_v30 = vld [vmem:[#allocation44_spill] sm:$0xff] }
 0x2ca   : > { %v3337_v27 = vpop.f32.mrf.mxu0  ;;  %v13499_v47 = vpop.f32.mrf.mxu1  ;;  %v3990_v14 = vrot.slane %v3988_v57, 4  ;;  %v3991_v62 = vrot.slane %v13486_v44, 5  ;;  %v13507_v48 = vcombine.high %v13486_v44, %v13486_v44  ;;  %v10103_v63 = vrot.slane %v13465_v59, 9 }
 0x2cb   : > { %v13502_v12 = vmax.f32 %v3587_v49, 0.0  ;;  %v3533_v37 = vmax.f32 %v3470_v5, %v3471_v19  ;;  %v3338_v23 = vadd.f32 %v3337_v27, %v13427_v13  ;;  %v3472_v53 = vmax.f32 %v16447_v25, %v3336_v46  ;;  %4370 = vmatmul.mubr.bf16.gmra.mxu1 %v4143_v61 }
 0x2cc   : > { %16446 = vst [vmem:[#allocation40_spill] sm:$0xff] %v13507_v48  ;;  %v3339_v51 = vpop.f32.mrf.mxu0  ;;  %v13510_v18 = vpop.f32.mrf.mxu1  ;;  %4379 = vmatprep.mubr.bf16.mxu1 %v16347_v11  ;;  %v3767_v2 = vcombine.low %v13465_v59, %v13475_v54  ;;  %v3992_v46 = vsel %vm12678_vm6, %v3990_v14, %v3991_v62  ;;  %v10104_v25 = vrot.slane %v13507_v48, 9 }
 0x2cd   : > { %16445 = vst [vmem:[#allocation39_spill] sm:$0xff] %v13502_v12  ;;  %v3588_v35 = vadd.f32 %v13280_v41, %v3533_v37  ;;  %v3473_v49 = vmax.f32 %v16448_v30, %v3338_v23  ;;  %v3340_v31 = vadd.f32 %v3339_v51, %v13434_v3  ;;  %v3768_v13 = vcombine.low %v13507_v48, %v13502_v12  ;;  %v16451_v51 = vld [vmem:[#allocation45_spill] sm:$0xff] }
 0x2ce   : > { %v3341_v5 = vpop.f32.mrf.mxu0  ;;  %v13523_v19 = vcombine.high %v13502_v12, %v13502_v12  ;;  %v3995_v27 = vrot.slane %v13502_v12, 5  ;;  %v13528_v61 = vpop.f32.mrf.mxu1 }
 0x2cf   : > { %v13530_v3 = vmax.f32 %v3588_v35, 0.0  ;;  %v3534_v37 = vmax.f32 %v3472_v53, %v3473_v49  ;;  %v3342_v23 = vadd.f32 %v3341_v5, %v13445_v56  ;;  %v3474_v30 = vmax.f32 %v16451_v51, %v3340_v31  ;;  %v16453_v53 = vld [vmem:[#allocation46_spill] sm:$0xff] }
 0x2d0   : > { %16449 = vst [vmem:[#allocation41_spill] sm:$0xff] %v13523_v19  ;;  %v3345_v59 = vpop.f32.mrf.mxu0  ;;  %v3821_v44 = vpack.c.bf16 %v3768_v13, %v3767_v2  ;;  %v3997_v54 = vrot.slane %v3995_v27, 4  ;;  %v3998_v22 = vrot.slane %v13523_v19, 5  ;;  %v13536_v17 = vpop.f32.mrf.mxu1  ;;  %v3989_v31 = vsel %vm12678_vm6, %v10103_v63, %v3988_v57 }
 0x2d1   : > { %16450 = vst [vmem:[#allocation42_spill] sm:$0xff] %v13530_v3  ;;  %v13540_v14 = vcombine.high %v13530_v3, %v13530_v3  ;;  %v3589_v62 = vadd.f32 %v13280_v41, %v3534_v37  ;;  %v3475_v35 = vmax.f32 %v16453_v53, %v3342_v23  ;;  %v3346_v56 = vadd.f32 %v3345_v59, %v13463_v58 }
 0x2d2   : > { %4653 = vmatmul.mubr.bf16.gmra.mxu0 %v3821_v44  ;;  %v3347_v49 = vpop.f32.mrf.mxu0  ;;  %v3999_v13 = vsel %vm12678_vm6, %v3997_v54, %v3998_v22  ;;  %v13549_v5 = vpop.f32.mrf.mxu1  ;;  %v3996_v37 = vsel %vm12678_vm6, %v10104_v25, %v3995_v27  ;;  %v4090_v59 = vcombine.low %v3989_v31, %v3992_v46  ;;  %v16455_v54 = vld [vmem:[#allocation47_spill] sm:$0xff] }
 0x2d3   : > { %16452 = vst [vmem:[#allocation43_spill] sm:$0xff] %v13540_v14  ;;  %v13551_v2 = vmax.f32 %v3589_v62, 0.0  ;;  %v3535_v51 = vmax.f32 %v3474_v30, %v3475_v35  ;;  %v3348_v48 = vadd.f32 %v3347_v49, %v13471_v6  ;;  %4662 = vmatprep.mubr.bf16.mxu0 %v16347_v11  ;;  %v4091_v44 = vcombine.low %v3996_v37, %v3999_v13  ;;  %v16456_v62 = vld [vmem:[#allocation48_spill] sm:$0xff] }
 0x2d4   : > { %v3349_v58 = vpop.f32.mrf.mxu0  ;;  %v13557_v23 = vpop.f32.mrf.mxu1  ;;  %v4002_v57 = vrot.slane %v13540_v14, 5  ;;  %v3476_v63 = vmax.f32 %v16455_v54, %v3346_v56  ;;  %v16459_v56 = vld [vmem:[#allocation49_spill] sm:$0xff] }
 0x2d5   : > { %16454 = vst [vmem:[#allocation44_spill] sm:$0xff] %v13551_v2  ;;  %v3590_v22 = vadd.f32 %v13280_v41, %v3535_v51  ;;  %v3477_v30 = vmax.f32 %v16456_v62, %v3348_v48  ;;  %v3350_v6 = vadd.f32 %v3349_v58, %v13484_v45  ;;  %v4144_v35 = vpack.c.bf16 %v4091_v44, %v4090_v59  ;;  %v16460_v44 = vld [vmem:[#allocation50_spill] sm:$0xff] }
 0x2d6   : > { %v3351_v53 = vpop.f32.mrf.mxu0  ;;  %v13564_v27 = vpop.f32.mrf.mxu1  ;;  %v4004_v25 = vrot.slane %v4002_v57, 4  ;;  %v4005_v46 = vrot.slane %v13551_v2, 5  ;;  %v13572_v51 = vcombine.high %v13551_v2, %v13551_v2  ;;  %v10105_v58 = vrot.slane %v13530_v3, 9 }
 0x2d7   : > { %v13567_v49 = vmax.f32 %v3590_v22, 0.0  ;;  %v3536_v31 = vmax.f32 %v3476_v63, %v3477_v30  ;;  %v3352_v13 = vadd.f32 %v3351_v53, %v13492_v0  ;;  %v3478_v48 = vmax.f32 %v16459_v56, %v3350_v6  ;;  %4380 = vmatmul.mubr.bf16.gmra.mxu1 %v4144_v35 }
 0x2d8   : > { %16458 = vst [vmem:[#allocation46_spill] sm:$0xff] %v13572_v51  ;;  %v3355_v45 = vpop.f32.mrf.mxu0  ;;  %v13575_v37 = vpop.f32.mrf.mxu1  ;;  %4389 = vmatprep.mubr.bf16.mxu1 %v16347_v11  ;;  %v3769_v62 = vcombine.low %v13530_v3, %v13540_v14  ;;  %v4006_v6 = vsel %vm12678_vm6, %v4004_v25, %v4005_v46  ;;  %v10106_v56 = vrot.slane %v13572_v51, 9 }
 0x2d9   : > { %16457 = vst [vmem:[#allocation45_spill] sm:$0xff] %v13567_v49  ;;  %v3591_v59 = vadd.f32 %v13280_v41, %v3536_v31  ;;  %v3479_v22 = vmax.f32 %v16460_v44, %v3352_v13  ;;  %v3356_v54 = vadd.f32 %v3355_v45, %v13499_v47  ;;  %v3770_v0 = vcombine.low %v13572_v51, %v13567_v49  ;;  %v16463_v45 = vld [vmem:[#allocation52_spill] sm:$0xff] }
 0x2da   : > { %v3357_v63 = vpop.f32.mrf.mxu0  ;;  %v13588_v30 = vcombine.high %v13567_v49, %v13567_v49  ;;  %v4009_v53 = vrot.slane %v13567_v49, 5  ;;  %v13593_v35 = vpop.f32.mrf.mxu1 }
 0x2db   : > { %v13595_v47 = vmax.f32 %v3591_v59, 0.0  ;;  %v3537_v31 = vmax.f32 %v3478_v48, %v3479_v22  ;;  %v3358_v13 = vadd.f32 %v3357_v63, %v13510_v18  ;;  %v3480_v44 = vmax.f32 %v16463_v45, %v3356_v54  ;;  %v16465_v48 = vld [vmem:[#allocation53_spill] sm:$0xff] }
 0x2dc   : > { %16461 = vst [vmem:[#allocation47_spill] sm:$0xff] %v13588_v30  ;;  %v3359_v2 = vpop.f32.mrf.mxu0  ;;  %v3822_v3 = vpack.c.bf16 %v3770_v0, %v3769_v62  ;;  %v4011_v14 = vrot.slane %v4009_v53, 4  ;;  %v4012_v19 = vrot.slane %v13588_v30, 5  ;;  %v13601_v12 = vpop.f32.mrf.mxu1  ;;  %v4003_v54 = vsel %vm12678_vm6, %v10105_v58, %v4002_v57 }
 0x2dd   : > { %16462 = vst [vmem:[#allocation48_spill] sm:$0xff] %v13595_v47  ;;  %v13605_v25 = vcombine.high %v13595_v47, %v13595_v47  ;;  %v3592_v46 = vadd.f32 %v13280_v41, %v3537_v31  ;;  %v3481_v59 = vmax.f32 %v16465_v48, %v3358_v13  ;;  %v3360_v18 = vadd.f32 %v3359_v2, %v13528_v61 }
 0x2de   : > { %4663 = vmatmul.mubr.bf16.gmra.mxu0 %v3822_v3  ;;  %v3361_v22 = vpop.f32.mrf.mxu0  ;;  %v4013_v0 = vsel %vm12678_vm6, %v4011_v14, %v4012_v19  ;;  %v13614_v63 = vpop.f32.mrf.mxu1  ;;  %v4010_v31 = vsel %vm12678_vm6, %v10106_v56, %v4009_v53  ;;  %v4092_v3 = vcombine.low %v4003_v54, %v4006_v6  ;;  %v16467_v14 = vld [vmem:[#allocation54_spill] sm:$0xff] }
 0x2df   : > { %16464 = vst [vmem:[#allocation49_spill] sm:$0xff] %v13605_v25  ;;  %v13616_v62 = vmax.f32 %v3592_v46, 0.0  ;;  %v3538_v45 = vmax.f32 %v3480_v44, %v3481_v59  ;;  %v3362_v51 = vadd.f32 %v3361_v22, %v13536_v17  ;;  %4672 = vmatprep.mubr.bf16.mxu0 %v16347_v11  ;;  %v4093_v2 = vcombine.low %v4010_v31, %v4013_v0  ;;  %v16468_v46 = vld [vmem:[#allocation55_spill] sm:$0xff] }
 0x2e0   : > { %v3365_v61 = vpop.f32.mrf.mxu0  ;;  %v13622_v13 = vpop.f32.mrf.mxu1  ;;  %v4016_v57 = vrot.slane %v13605_v25, 5  ;;  %v3482_v58 = vmax.f32 %v16467_v14, %v3360_v18  ;;  %v16469_v18 = vld [vmem:[#allocation60_spill] sm:$0xff] }
 0x2e1   : > { %16466 = vst [vmem:[#allocation50_spill] sm:$0xff] %v13616_v62  ;;  %v3593_v19 = vadd.f32 %v13280_v41, %v3538_v45  ;;  %v3483_v44 = vmax.f32 %v16468_v46, %v3362_v51  ;;  %v3366_v17 = vadd.f32 %v3365_v61, %v13549_v5  ;;  %v4145_v59 = vpack.c.bf16 %v4093_v2, %v4092_v3  ;;  %v16470_v51 = vld [vmem:[#allocation51_spill] sm:$0xff]  ;;  %v16471_v5 = vld [vmem:[#allocation57_spill] sm:$0xff] }
 0x2e2   : > { %v3367_v48 = vpop.f32.mrf.mxu0  ;;  %v13629_v53 = vpop.f32.mrf.mxu1  ;;  %v4018_v56 = vrot.slane %v4016_v57, 4  ;;  %v4019_v6 = vrot.slane %v13616_v62, 5  ;;  %v13637_v45 = vcombine.high %v13616_v62, %v13616_v62  ;;  %v2201_v31 = vadd.f32 %v16470_v51, %v16469_v18 }
 0x2e3   : > { %v13632_v22 = vmax.f32 %v3593_v19, 0.0  ;;  %v3539_v54 = vmax.f32 %v3482_v58, %v3483_v44  ;;  %v3368_v0 = vadd.f32 %v3367_v48, %v13557_v23  ;;  %v3484_v61 = vmax.f32 %v16471_v5, %v3366_v17  ;;  %4390 = vmatmul.mubr.bf16.gmra.mxu1 %v4145_v59  ;;  %v16472_v19 = vld [vmem:[#allocation58_spill] sm:$0xff] }
 0x2e4   : > { %v3369_v3 = vpop.f32.mrf.mxu0  ;;  %v10107_v2 = vrot.slane %v13595_v47, 9  ;;  %4399 = vmatprep.mubr.bf16.mxu1 %v16347_v11  ;;  %v3771_v48 = vcombine.low %v13595_v47, %v13605_v25  ;;  %v3114_v17 = vpop.f32.mrf.mxu1  ;;  %v10108_v5 = vrot.slane %v13637_v45, 9 }
 0x2e5   : > { %v3594_v14 = vadd.f32 %v13280_v41, %v3539_v54  ;;  %v3485_v46 = vmax.f32 %v16472_v19, %v3368_v0  ;;  %v3370_v58 = vadd.f32 %v3369_v3, %v13564_v27  ;;  %v3772_v23 = vcombine.low %v13637_v45, %v13632_v22  ;;  %v16474_v3 = vld [vmem:[#allocation59_spill] sm:$0xff] }
 0x2e6   : > { %v3371_v44 = vpop.f32.mrf.mxu0  ;;  %v13653_v59 = vcombine.high %v13632_v22, %v13632_v22  ;;  %v4020_v54 = vsel %vm12678_vm6, %v4018_v56, %v4019_v6  ;;  %v4023_v0 = vrot.slane %v13632_v22, 5 }
 0x2e7   : > { %v13658_v27 = vmax.f32 %v3594_v14, 0.0  ;;  %v3540_v18 = vmax.f32 %v3484_v61, %v3485_v46  ;;  %v3372_v51 = vadd.f32 %v3371_v44, %v13575_v37  ;;  %v3486_v19 = vmax.f32 %v16474_v3, %v3370_v58  ;;  %v3116_v58 = vpop.f32.mrf.mxu1 }
 0x2e8   : > { %v3375_v47 = vpop.f32.mrf.mxu0  ;;  %v3823_v62 = vpack.c.bf16 %v3772_v23, %v3771_v48  ;;  %v4025_v25 = vrot.slane %v4023_v0, 4  ;;  %v4026_v30 = vrot.slane %v13653_v59, 5  ;;  %v4017_v14 = vsel %vm12678_vm6, %v10107_v2, %v4016_v57  ;;  %v16477_v2 = vld [vmem:[#allocation62_spill] sm:$0xff] }
 0x2e9   : > { %16473 = vst [vmem:[#allocation52_spill] sm:$0xff] %v13658_v27  ;;  %v13666_v49 = vcombine.high %v13658_v27, %v13658_v27  ;;  %v3595_v56 = vadd.f32 %v13280_v41, %v3540_v18  ;;  %v3487_v6 = vmax.f32 %v2201_v31, %v3372_v51  ;;  %v3376_v61 = vadd.f32 %v3375_v47, %v13593_v35 }
 0x2ea   : > { %4673 = vmatmul.mubr.bf16.gmra.mxu0 %v3823_v62  ;;  %v3377_v37 = vpop.f32.mrf.mxu0  ;;  %v4027_v46 = vsel %vm12678_vm6, %v4025_v25, %v4026_v30  ;;  %v4024_v18 = vsel %vm12678_vm6, %v10108_v5, %v4023_v0  ;;  %v4094_v47 = vcombine.low %v4017_v14, %v4020_v54  ;;  %v16478_v25 = vld [vmem:[#allocation63_spill] sm:$0xff]  ;;  %v3118_v5 = vpop.f32.mrf.mxu1 }
 0x2eb   : > { %16475 = vst [vmem:[#allocation53_spill] sm:$0xff] %v13666_v49  ;;  %v13674_v23 = vmax.f32 %v3595_v56, 0.0  ;;  %v3541_v44 = vmax.f32 %v3486_v19, %v3487_v6  ;;  %v3378_v48 = vadd.f32 %v3377_v37, %v13601_v12  ;;  %4682 = vmatprep.mubr.bf16.mxu0 %v16347_v11  ;;  %v4095_v62 = vcombine.low %v4024_v18, %v4027_v46  ;;  %v16479_v19 = vld [vmem:[#allocation65_spill] sm:$0xff]  ;;  %v16480_v12 = vld [vmem:[#allocation56_spill] sm:$0xff] }
 0x2ec   : > { %v3379_v35 = vpop.f32.mrf.mxu0  ;;  %v4030_v31 = vrot.slane %v13666_v49, 5  ;;  %v3488_v30 = vmax.f32 %v16477_v2, %v3376_v61  ;;  %v2211_v56 = vadd.f32 %v16480_v12, %v16479_v19 }
 0x2ed   : > { %16476 = vst [vmem:[#allocation54_spill] sm:$0xff] %v13674_v23  ;;  %v3596_v57 = vadd.f32 %v13280_v41, %v3541_v44  ;;  %v3489_v51 = vmax.f32 %v16478_v25, %v3378_v48  ;;  %v3380_v3 = vadd.f32 %v3379_v35, %v13614_v63  ;;  %v4146_v0 = vpack.c.bf16 %v4095_v62, %v4094_v47  ;;  %v16482_v48 = vld [vmem:[#allocation64_spill] sm:$0xff] }
 0x2ee   : > { %v3381_v6 = vpop.f32.mrf.mxu0  ;;  %v4032_v37 = vrot.slane %v4030_v31, 4  ;;  %v4033_v54 = vrot.slane %v13674_v23, 5  ;;  %v13693_v61 = vcombine.high %v13674_v23, %v13674_v23  ;;  %v10109_v35 = vrot.slane %v13658_v27, 9 }
 0x2ef   : > { %v13688_v14 = vmax.f32 %v3596_v57, 0.0  ;;  %v3542_v46 = vmax.f32 %v3488_v30, %v3489_v51  ;;  %v3382_v44 = vadd.f32 %v3381_v6, %v13622_v13  ;;  %v3490_v63 = vmax.f32 %v16482_v48, %v3380_v3  ;;  %4400 = vmatmul.mubr.bf16.gmra.mxu1 %v4146_v0  ;;  %v3122_v30 = vpop.f32.mrf.mxu1  ;;  %v16485_v0 = vld [vmem:[#allocation67_spill] sm:$0xff] }
 0x2f0   : > { %16481 = vst [vmem:[#allocation55_spill] sm:$0xff] %v13693_v61  ;;  %v3385_v18 = vpop.f32.mrf.mxu0  ;;  %4409 = vmatprep.mubr.bf16.mxu1 %v16347_v11  ;;  %v3773_v25 = vcombine.low %v13658_v27, %v13666_v49  ;;  %v4034_v3 = vsel %vm12678_vm6, %v4032_v37, %v4033_v54  ;;  %v10110_v6 = vrot.slane %v13693_v61, 9  ;;  %v16486_v54 = vld [vmem:[#allocation68_spill] sm:$0xff] }
 0x2f1   : > { %v3597_v47 = vadd.f32 %v13280_v41, %v3542_v46  ;;  %v3491_v62 = vmax.f32 %v2211_v56, %v3382_v44  ;;  %v3386_v2 = vadd.f32 %v3385_v18, %v13629_v53  ;;  %v3774_v57 = vcombine.low %v13693_v61, %v13688_v14 }
 0x2f2   : > { %v3387_v13 = vpop.f32.mrf.mxu0  ;;  %v13706_v51 = vcombine.high %v13688_v14, %v13688_v14  ;;  %v4037_v19 = vrot.slane %v13688_v14, 5 }
 0x2f3   : > { %v13711_v53 = vmax.f32 %v3597_v47, 0.0  ;;  %v3543_v12 = vmax.f32 %v3490_v63, %v3491_v62  ;;  %v3388_v56 = vadd.f32 %v3387_v13, %v3114_v17  ;;  %v3492_v46 = vmax.f32 %v16485_v0, %v3386_v2  ;;  %v16487_v63 = vld [vmem:[#allocation70_spill] sm:$0xff]  ;;  %v16488_v17 = vld [vmem:[#allocation61_spill] sm:$0xff]  ;;  %v3124_v13 = vpop.f32.mrf.mxu1 }
 0x2f4   : > { %16483 = vst [vmem:[#allocation60_spill] sm:$0xff] %v13706_v51  ;;  %v3389_v44 = vpop.f32.mrf.mxu0  ;;  %v3824_v48 = vpack.c.bf16 %v3774_v57, %v3773_v25  ;;  %v4039_v18 = vrot.slane %v4037_v19, 4  ;;  %v4040_v23 = vrot.slane %v13706_v51, 5  ;;  %v2221_v62 = vadd.f32 %v16488_v17, %v16487_v63 }
 0x2f5   : > { %16484 = vst [vmem:[#allocation51_spill] sm:$0xff] %v13711_v53  ;;  %v13718_v27 = vcombine.high %v13711_v53, %v13711_v53  ;;  %v3598_v37 = vadd.f32 %v13280_v41, %v3543_v12  ;;  %v3493_v47 = vmax.f32 %v16486_v54, %v3388_v56  ;;  %v3390_v49 = vadd.f32 %v3389_v44, %v3116_v58 }
 0x2f6   : > { %4683 = vmatmul.mubr.bf16.gmra.mxu0 %v3824_v48  ;;  %v3391_v2 = vpop.f32.mrf.mxu0  ;;  %v4031_v57 = vsel %vm12678_vm6, %v10109_v35, %v4030_v31  ;;  %v4041_v25 = vsel %vm12678_vm6, %v4039_v18, %v4040_v23  ;;  %v4038_v12 = vsel %vm12678_vm6, %v10110_v6, %v4037_v19  ;;  %v16489_v31 = vld [vmem:[#allocation69_spill] sm:$0xff]  ;;  %v3126_v18 = vpop.f32.mrf.mxu1 }
 0x2f7   : > { %v13728_v0 = vmax.f32 %v3598_v37, 0.0  ;;  %v3544_v61 = vmax.f32 %v3492_v46, %v3493_v47  ;;  %v3392_v51 = vadd.f32 %v3391_v2, %v3118_v5  ;;  %4692 = vmatprep.mubr.bf16.mxu0 %v16347_v11  ;;  %v4096_v56 = vcombine.low %v4031_v57, %v4034_v3  ;;  %v16490_v2 = vld [vmem:[#allocation74_spill] sm:$0xff] }
 0x2f8   : > { %v3395_v58 = vpop.f32.mrf.mxu0  ;;  %v4097_v44 = vcombine.low %v4038_v12, %v4041_v25  ;;  %v4044_v48 = vrot.slane %v13718_v27, 5  ;;  %v3494_v35 = vmax.f32 %v16489_v31, %v3390_v49  ;;  %v16492_v49 = vld [vmem:[#allocation71_spill] sm:$0xff]  ;;  %v16493_v25 = vld [vmem:[#allocation72_spill] sm:$0xff] }
 0x2f9   : > { %v3599_v54 = vadd.f32 %v13280_v41, %v3544_v61  ;;  %v3495_v63 = vmax.f32 %v2221_v62, %v3392_v51  ;;  %v3396_v23 = vadd.f32 %v3395_v58, %v3122_v30  ;;  %v13738_v5 = vcombine.high %v13728_v0, %v13728_v0  ;;  %v16491_v61 = vld [vmem:[#allocation66_spill] sm:$0xff] }
 0x2fa   : > { %v3397_v37 = vpop.f32.mrf.mxu0  ;;  %v4147_v46 = vpack.c.bf16 %v4097_v44, %v4096_v56  ;;  %v4046_v19 = vrot.slane %v4044_v48, 4  ;;  %v4047_v17 = vrot.slane %v13728_v0, 5  ;;  %v2231_v57 = vadd.f32 %v16491_v61, %v16490_v2 }
 0x2fb   : > { %v13740_v6 = vmax.f32 %v3599_v54, 0.0  ;;  %v3545_v3 = vmax.f32 %v3494_v35, %v3495_v63  ;;  %v3398_v47 = vadd.f32 %v3397_v37, %v3124_v13  ;;  %v3496_v51 = vmax.f32 %v16492_v49, %v3396_v23  ;;  %v3128_v13 = vpop.f32.mrf.mxu1 }
 0x2fc   : > { %4410 = vmatmul.mubr.bf16.gmra.mxu1 %v4147_v46  ;;  %v3399_v30 = vpop.f32.mrf.mxu0  ;;  %v3775_v54 = vcombine.low %v13711_v53, %v13718_v27  ;;  %v10111_v35 = vrot.slane %v13711_v53, 9  ;;  %v4048_v46 = vsel %vm12678_vm6, %v4046_v19, %v4047_v17 }
 0x2fd   : > { %v3600_v62 = vadd.f32 %v13280_v41, %v3545_v3  ;;  %v3497_v12 = vmax.f32 %v16493_v25, %v3398_v47  ;;  %v3400_v58 = vadd.f32 %v3399_v30, %v3126_v18  ;;  %v3776_v56 = vcombine.low %v13738_v5, %v13740_v6  ;;  %4419 = vmatprep.mubr.bf16.mxu1 %v16347_v11  ;;  %v16494_v25 = vld [vmem:[#allocation73_spill] sm:$0xff] }
 0x2fe   : > { %v3401_v44 = vpop.f32.mrf.mxu0  ;;  %v13755_v31 = vcombine.high %v13740_v6, %v13740_v6  ;;  %v4051_v63 = vrot.slane %v13740_v6, 5  ;;  %v10112_v47 = vrot.slane %v13738_v5, 9 }
 0x2ff   : > { %v13759_v23 = vmax.f32 %v3600_v62, 0.0  ;;  %v3546_v18 = vmax.f32 %v3496_v51, %v3497_v12  ;;  %v3402_v37 = vadd.f32 %v3401_v44, %v3128_v13  ;;  %v3825_v3 = vpack.c.bf16 %v3776_v56, %v3775_v54 }
 0x300   : > { %v4053_v2 = vrot.slane %v4051_v63, 4  ;;  %v4054_v61 = vrot.slane %v13755_v31, 5  ;;  %v3498_v62 = vmax.f32 %v16494_v25, %v3400_v58  ;;  %v4045_v51 = vsel %vm12678_vm6, %v10111_v35, %v4044_v48 }
 0x301   : > { %v13767_v49 = vcombine.high %v13759_v23, %v13759_v23  ;;  %v3601_v30 = vadd.f32 %v13280_v41, %v3546_v18  ;;  %v3499_v53 = vmax.f32 %v2231_v57, %v3402_v37  ;;  %4693 = vmatmul.mubr.bf16.gmra.mxu0 %v3825_v3  ;;  %v4052_v19 = vsel %vm12678_vm6, %v10112_v47, %v4051_v63 }
 0x302   : > { %v4055_v17 = vsel %vm12678_vm6, %v4053_v2, %v4054_v61  ;;  %v4098_v13 = vcombine.low %v4045_v51, %v4048_v46  ;;  %4702 = vmatprep.mubr.bf16.mxu0 %v16347_v11  ;;  %v10113_v47 = vrot.slane %v13759_v23, 9  ;;  %v5392_v51 = vrot.slane %v12739_v9, 7 }
 0x303   : > { %v13777_v12 = vmax.f32 %v3601_v30, 0.0  ;;  %v3547_v56 = vmax.f32 %v3498_v62, %v3499_v53  ;;  %v4099_v44 = vcombine.low %v4052_v19, %v4055_v17  ;;  %v4058_v58 = vrot.slane %v13767_v49, 5 }
 0x304   : > { %v5399_v53 = vrot.slane %v12780_v7, 7  ;;  %v3777_v37 = vcombine.low %v13759_v23, %v13767_v49 }
 0x305   : > { %v3602_v57 = vadd.f32 %v13280_v41, %v3547_v56  ;;  %v4148_v54 = vpack.c.bf16 %v4099_v44, %v4098_v13  ;;  %v13784_v48 = vcombine.high %v13777_v12, %v13777_v12  ;;  %v4060_v63 = vrot.slane %v4058_v58, 4 }
 0x306   : > { %v4061_v18 = vrot.slane %v13777_v12, 5  ;;  %v5401_v19 = vrot.slane %v5399_v53, 4  ;;  %v4059_v17 = vsel %vm12678_vm6, %v10113_v47, %v4058_v58  ;;  %v5402_v44 = vrot.slane %v12799_v33, 7  ;;  %v16495_v47 = vld [vmem:[#allocation82_spill] sm:$0xff] }
 0x307   : > { %v13786_v35 = vmax.f32 %v3602_v57, 0.0  ;;  %4420 = vmatmul.mubr.bf16.gmra.mxu1 %v4148_v54  ;;  %v10114_v2 = vrot.slane %v13784_v48, 9  ;;  %v5395_v58 = vrot.slane %v12748_v50, 7 }
 0x308   : > { %4429 = vmatprep.mubr.bf16.mxu1 %v16347_v11  ;;  %v4062_v30 = vsel %vm12678_vm6, %v4060_v63, %v4061_v18  ;;  %v4731_v63 = vrot.slane %v12739_v9, 6  ;;  %v4738_v18 = vrot.slane %v12780_v7, 6  ;;  %v5403_v1 = vsel %vm12695_vm7, %v5401_v19, %v5402_v44 }
 0x309   : > { %v3778_v41 = vcombine.low %v13784_v48, %v13786_v35  ;;  %v13797_v46 = vcombine.high %v13786_v35, %v13786_v35  ;;  %v4065_v3 = vrot.slane %v13786_v35, 5  ;;  %v4100_v57 = vcombine.low %v4059_v17, %v4062_v30 }
 0x30a   : > { %v4740_v30 = vrot.slane %v4738_v18, 4  ;;  %v5406_v19 = vrot.slane %v12820_v20, 7  ;;  %v4745_v9 = vrot.slane %v12820_v20, 6  ;;  %v5409_v20 = vrot.slane %v12837_v34, 7 }
 0x30b   : > { %v3826_v61 = vpack.c.bf16 %v3778_v41, %v3777_v37  ;;  %v4067_v25 = vrot.slane %v4065_v3, 4  ;;  %v4068_v62 = vrot.slane %v13797_v46, 5  ;;  %v4066_v56 = vsel %vm12678_vm6, %v10114_v2, %v4065_v3 }
 0x30c   : > { %v5394_v41 = vrot.slane %v5392_v51, 4  ;;  %v4733_v3 = vrot.slane %v4731_v63, 4  ;;  %v4734_v2 = vrot.slane %v12748_v50, 6  ;;  %v10232_v50 = vrot.slane %v12869_v52, 11 }
 0x30d   : > { %4703 = vmatmul.mubr.bf16.gmra.mxu0 %v3826_v61  ;;  %v4069_v13 = vsel %vm12678_vm6, %v4067_v25, %v4068_v62  ;;  %v10230_v61 = vrot.slane %v16495_v47, 11  ;;  %v4741_v25 = vrot.slane %v12799_v33, 6  ;;  %v16496_v62 = vld [vmem:[#allocation79_spill] sm:$0xff] }
 0x30e   : > { %v4101_v54 = vcombine.low %v4066_v56, %v4069_v13  ;;  %5809 = vmatprep.mubr.bf16.mxu0 %v16347_v11  ;;  %v10229_v17 = vrot.slane %v16496_v62, 11  ;;  %v5413_v56 = vrot.slane %v12864_v39, 7  ;;  %v4752_v13 = vrot.slane %v12864_v39, 6 }
 0x30f   : > { %v10165_v39 = vrot.slane %v16496_v62, 10  ;;  %v5408_v62 = vrot.slane %v5406_v19, 4 }
 0x310   : > { %v4149_v37 = vpack.c.bf16 %v4101_v54, %v4100_v57  ;;  %v5400_v57 = vsel %vm12695_vm7, %v10230_v61, %v5399_v53  ;;  %v5393_v44 = vsel %vm12695_vm7, %v10229_v17, %v5392_v51  ;;  %v5396_v54 = vsel %vm12695_vm7, %v5394_v41, %v5395_v58  ;;  %v11082_v51 = vld [vmem:[%s16114_s3 + $0x270] ss:$8 sps:$4 sm:$0xff]  }
 0x311   : > { %v4735_v53 = vsel %vm12907_vm9, %v4733_v3, %v4734_v2  ;;  %v10166_v61 = vrot.slane %v16495_v47, 10  ;;  %v5415_v41 = vrot.slane %v5413_v56, 4  ;;  %v5416_v58 = vrot.slane %v12889_v16, 7  ;;  %v11087_v47 = vld [vmem:[%s16114_s3 + $0x264] ss:$8 sps:$4 sm:$0xff]  }
 0x312   : > { %4430 = vmatmul.mubr.bf16.gmra.mxu1 %v4149_v37  ;;  %v5603_v37 = vcombine.low %v5400_v57, %v5403_v1  ;;  %v4754_v1 = vrot.slane %v4752_v13, 4  ;;  %v4755_v17 = vrot.slane %v12889_v16, 6  ;;  %v5602_v57 = vcombine.low %v5393_v44, %v5396_v54 }
 0x313   : > { %5148 = vmatprep.mubr.bf16.mxu1 %v16347_v11  ;;  %v4732_v3 = vsel %vm12907_vm9, %v10165_v39, %v4731_v63  ;;  %v4739_v2 = vsel %vm12907_vm9, %v10166_v61, %v4738_v18  ;;  %v5417_v7 = vsel %vm12695_vm7, %v5415_v41, %v5416_v58  ;;  %v10168_v39 = vrot.slane %v12869_v52, 10 }
 0x314   : > { %v5665_v16 = vpack.c.bf16 %v5603_v37, %v5602_v57  ;;  %v4941_v44 = vcombine.low %v4732_v3, %v4735_v53  ;;  %v4756_v63 = vsel %vm12907_vm9, %v4754_v1, %v4755_v17  ;;  %v5427_v18 = vrot.slane %v12969_v15, 7  ;;  %v11088_v3 = vld [vmem:[%s16114_s3 + $0x250] ss:$8 sps:$4 sm:$0xff]  }
 0x315   : > { %5810 = vmatmul.mubr.bf16.vlgmr.msra.gmra.mxu0 %v12899_v42  ;;  %v4742_v42 = vsel %vm12907_vm9, %v4740_v30, %v4741_v25  ;;  %v4747_v30 = vrot.slane %v4745_v9, 4  ;;  %v4748_v25 = vrot.slane %v12837_v34, 6  ;;  %v10231_v53 = vrot.slane %v12808_v43, 11 }
 0x316   : > { %5819 = vmatprep.mubr.bf16.mxu0 %v16347_v11  ;;  %v4942_v54 = vcombine.low %v4739_v2, %v4742_v42  ;;  %v5410_v61 = vsel %vm12695_vm7, %v5408_v62, %v5409_v20  ;;  %v5414_v42 = vsel %vm12695_vm7, %v10232_v50, %v5413_v56  ;;  %v5420_v52 = vrot.slane %v12917_v29, 7 }
 0x317   : > { %v10167_v41 = vrot.slane %v12808_v43, 10  ;;  %v4749_v58 = vsel %vm12907_vm9, %v4747_v30, %v4748_v25  ;;  %v4753_v1 = vsel %vm12907_vm9, %v10168_v39, %v4752_v13  ;;  %v4766_v20 = vrot.slane %v12969_v15, 6 }
 0x318   : > { %v5004_v50 = vpack.c.bf16 %v4942_v54, %v4941_v44  ;;  %v5407_v56 = vsel %vm12695_vm7, %v10231_v53, %v5406_v19  ;;  %v5605_v57 = vcombine.low %v5414_v42, %v5417_v7  ;;  %v4944_v62 = vcombine.low %v4753_v1, %v4756_v63 }
 0x319   : > { %v4746_v43 = vsel %vm12907_vm9, %v10167_v41, %v4745_v9  ;;  %v4759_v13 = vrot.slane %v12917_v29, 6  ;;  %v5604_v30 = vcombine.low %v5407_v56, %v5410_v61  ;;  %v5422_v44 = vrot.slane %v5420_v52, 4  ;;  %v11093_v9 = vld [vmem:[%s16114_s3 + $0x244] ss:$8 sps:$4 sm:$0xff]  }
 0x31a   : > { %5149 = vmatmul.mubr.bf16.vlgmr.msra.gmra.mxu1 %v13081_v38  ;;  %v11085_v38 = vld [vmem:[%s16114_s3 + $0x260] ss:$8 sps:$4 sm:$0xff]   ;;  %v4554_v37 = vpop.f32.mrf.mxu0  ;;  %v4943_v25 = vcombine.low %v4746_v43, %v4749_v58  ;;  %v5423_v7 = vrot.slane %v12936_v10, 7  ;;  %v4768_v54 = vrot.slane %v4766_v20, 4  ;;  %v4769_v39 = vrot.slane %v12995_v55, 6 }
 0x31b   : > { %6212 = vmatpush1.bf16.msra.mxu1 %v11082_v51  ;;  %5158 = vmatprep.mubr.bf16.mxu1 %v16347_v11  ;;  %v11090_v51 = vld [vmem:[%s16114_s3 + $0x254] ss:$8 sps:$4 sm:$0xff]   ;;  %v5434_v63 = vrot.slane %v13017_v8, 7  ;;  %v5666_v53 = vpack.c.bf16 %v5605_v57, %v5604_v30  ;;  %v10234_v42 = vrot.slane %v12974_v26, 11  ;;  %v4761_v58 = vrot.slane %v4759_v13, 4 }
 0x31c   : > { %6213 = vmatprep.subr.bf16.mxu1 %v11087_v47  ;;  %v4556_v17 = vpop.f32.mrf.mxu0  ;;  %v5430_v47 = vrot.slane %v12995_v55, 7  ;;  %v5005_v61 = vpack.c.bf16 %v4944_v62, %v4943_v25  ;;  %v4762_v1 = vrot.slane %v12936_v10, 6  ;;  %v5441_v56 = vrot.slane %v13061_v24, 7 }
 0x31d   : > { %5820 = vmatmul.mubr.bf16.gmra.mxu0 %v5665_v16  ;;  %v5429_v16 = vrot.slane %v5427_v18, 4  ;;  %v10233_v62 = vrot.slane %v12901_v36, 11  ;;  %v5424_v43 = vsel %vm12695_vm7, %v5422_v44, %v5423_v7  ;;  %v10170_v30 = vrot.slane %v12974_v26, 10 }
 0x31e   : > { %5829 = vmatprep.mubr.bf16.mxu0 %v16347_v11  ;;  %v4558_v2 = vpop.f32.mrf.mxu0  ;;  %v5436_v25 = vrot.slane %v5434_v63, 4  ;;  %v4763_v26 = vsel %vm12907_vm9, %v4761_v58, %v4762_v1 }
 0x31f   : > { %6214 = vmatpush1.bf16.msra.mxu1 %v11085_v38 }
 0x320   : > { %6215 = vmatprep.subr.bf16.mxu1 %v11090_v51  ;;  %v4281_v19 = vpop.f32.mrf.mxu1  ;;  %v5431_v51 = vsel %vm12695_vm7, %v5429_v16, %v5430_v47  ;;  %v5428_v16 = vsel %vm12695_vm7, %v10234_v42, %v5427_v18  ;;  %v11096_v47 = vld [vmem:[%s16114_s3 + $0x234] ss:$8 sps:$4 sm:$0xff]   ;;  %v5421_v18 = vsel %vm12695_vm7, %v10233_v62, %v5420_v52  ;;  %v4780_v62 = vrot.slane %v13061_v24, 6 }
 0x321   : > { %v13899_v38 = vadd.f32 %v4554_v37, %v4281_v19  ;;  %v11091_v37 = vld [vmem:[%s16114_s3 + $0x240] ss:$8 sps:$4 sm:$0xff]   ;;  %v5437_v19 = vrot.slane %v13035_v60, 7  ;;  %v5607_v7 = vcombine.low %v5428_v16, %v5431_v51  ;;  %v10235_v51 = vrot.slane %v13004_v40, 11 }
 0x322   : > { %5159 = vmatmul.mubr.bf16.gmra.mxu1 %v5004_v50  ;;  %v4283_v41 = vpop.f32.mrf.mxu1  ;;  %v13910_v50 = vpop.f32.mrf.mxu0 }
 0x323   : > { %16497 = vst [vmem:[#allocation57_spill] sm:$0xff] %v13899_v38  ;;  %5168 = vmatprep.mubr.bf16.mxu1 %v16347_v11  ;;  %6216 = vmatpush1.bf16.msra.mxu1 %v11088_v3  ;;  %16498 = vst [vmem:[#allocation58_spill] sm:$0xff] %v13910_v50  ;;  %v13912_v57 = vadd.f32 %v4556_v17, %v4283_v41  ;;  %v4770_v17 = vsel %vm12907_vm9, %v4768_v54, %v4769_v39  ;;  %v5443_v39 = vrot.slane %v5441_v56, 4 }
 0x324   : > { %6217 = vmatprep.subr.bf16.mxu1 %v11093_v9  ;;  %v4285_v3 = vpop.f32.mrf.mxu1  ;;  %v10169_v9 = vrot.slane %v12901_v36, 10  ;;  %v4767_v54 = vsel %vm12907_vm9, %v10170_v30, %v4766_v20  ;;  %v4773_v36 = vrot.slane %v13017_v8, 6  ;;  %v11099_v20 = vld [vmem:[%s16114_s3 + $0x224] ss:$8 sps:$4 sm:$0xff]   ;;  %v5438_v1 = vsel %vm12695_vm7, %v5436_v25, %v5437_v19 }
 0x325   : > { %16499 = vst [vmem:[#allocation59_spill] sm:$0xff] %v13912_v57  ;;  %5830 = vmatmul.mubr.bf16.gmra.mxu0 %v5666_v53  ;;  %v13926_v41 = vadd.f32 %v4558_v2, %v4285_v3  ;;  %v5444_v53 = vrot.slane %v13093_v4, 7  ;;  %v11094_v2 = vld [vmem:[%s16114_s3 + $0x230] ss:$8 sps:$4 sm:$0xff]   ;;  %v5606_v3 = vcombine.low %v5421_v18, %v5424_v43  ;;  %v4946_v52 = vcombine.low %v4767_v54, %v4770_v17  ;;  %v16502_v17 = vld [vmem:[#allocation7_spill] sm:$0xff]  ;;  %v16511_v57 = vld [vmem:[#allocation10_spill] sm:$0xff] }
 0x326   : > { %v4564_v44 = vpop.f32.mrf.mxu0  ;;  %5839 = vmatprep.mubr.bf16.mxu0 %v16347_v11  ;;  %v4760_v58 = vsel %vm12907_vm9, %v10169_v9, %v4759_v13  ;;  %v13951_v43 = vpop.f32.mrf.mxu1  ;;  %v16239_v18 = vrot.slane %v16502_v17, 7  ;;  %v10171_v19 = vrot.slane %v13004_v40, 10  ;;  %v16503_v9 = vld [vmem:[#allocation9_spill] sm:$0xff] }
 0x327   : > { %16500 = vst [vmem:[#allocation62_spill] sm:$0xff] %v13926_v41  ;;  %6218 = vmatpush1.bf16.msra.mxu1 %v11091_v37  ;;  %v10236_v37 = vrot.slane %v13066_v28, 11  ;;  %16501 = vst [vmem:[#allocation63_spill] sm:$0xff] %v13951_v43  ;;  %v5667_v16 = vpack.c.bf16 %v5607_v7, %v5606_v3  ;;  %v4945_v30 = vcombine.low %v4760_v58, %v4763_v26  ;;  %v5455_v54 = vrot.slane %v16503_v9, 7  ;;  %v11100_v43 = vld [vmem:[%s16114_s3 + $0x210] ss:$8 sps:$4 sm:$0xff]  }
 0x328   : > { %v4566_v42 = vpop.f32.mrf.mxu0  ;;  %6219 = vmatprep.subr.bf16.mxu1 %v11096_v47  ;;  %v5435_v47 = vsel %vm12695_vm7, %v10235_v51, %v5434_v63  ;;  %v5445_v25 = vsel %vm12695_vm7, %v5443_v39, %v5444_v53  ;;  %v4775_v51 = vrot.slane %v4773_v36, 4  ;;  %v4776_v58 = vrot.slane %v13035_v60, 6 }
 0x329   : > { %v5442_v13 = vsel %vm12695_vm7, %v10236_v37, %v5441_v56  ;;  %v5006_v26 = vpack.c.bf16 %v4946_v52, %v4945_v30  ;;  %v5608_v3 = vcombine.low %v5435_v47, %v5438_v1  ;;  %v11102_v56 = vld [vmem:[%s16114_s3 + $0x214] ss:$8 sps:$4 sm:$0xff]   ;;  %v10172_v39 = vrot.slane %v13066_v28, 10 }
 0x32a   : > { %5169 = vmatmul.mubr.bf16.gmra.mxu1 %v5005_v61  ;;  %v11097_v61 = vld [vmem:[%s16114_s3 + $0x220] ss:$8 sps:$4 sm:$0xff]   ;;  %v4568_v63 = vpop.f32.mrf.mxu0  ;;  %v4782_v53 = vrot.slane %v4780_v62, 4  ;;  %v5609_v52 = vcombine.low %v5442_v13, %v5445_v25  ;;  %v5450_v1 = vrot.slane %v16239_v18, 4  ;;  %v4787_v47 = vrot.slane %v16502_v17, 6 }
 0x32b   : > { %5178 = vmatprep.mubr.bf16.mxu1 %v16347_v11  ;;  %6220 = vmatpush1.bf16.msra.mxu1 %v11094_v2  ;;  %v4783_v2 = vrot.slane %v13093_v4, 6  ;;  %v4794_v28 = vrot.slane %v16503_v9, 6  ;;  %v4774_v18 = vsel %vm12907_vm9, %v10171_v19, %v4773_v36  ;;  %v10238_v36 = vrot.slane %v16511_v57, 11  ;;  %v16512_v19 = vld [vmem:[#allocation15_spill] sm:$0xff]  ;;  %v16515_v9 = vld [vmem:[#allocation17_spill] sm:$0xff] }
 0x32c   : > { %v4291_v7 = vpop.f32.mrf.mxu1  ;;  %6221 = vmatprep.subr.bf16.mxu1 %v11099_v20  ;;  %v16505_v20 = vld [vmem:[#allocation8_spill] sm:$0xff]  ;;  %v13986_v13 = vpop.f32.mrf.mxu0  ;;  %v5469_v38 = vrot.slane %v16512_v19, 7 }
 0x32d   : > { %v13970_v40 = vadd.f32 %v4564_v44, %v4291_v7  ;;  %5840 = vmatmul.mubr.bf16.gmra.mxu0 %v5667_v16  ;;  %v5451_v30 = vrot.slane %v16505_v20, 7  ;;  %v5457_v44 = vrot.slane %v5455_v54, 4  ;;  %v16507_v16 = vld [vmem:[#allocation11_spill] sm:$0xff]  ;;  %16508 = vst [vmem:[#allocation64_spill] sm:$0xff] %v13986_v13  ;;  %v4784_v13 = vsel %vm12907_vm9, %v4782_v53, %v4783_v2  ;;  %v16513_v2 = vld [vmem:[#allocation13_spill] sm:$0xff] }
 0x32e   : > { %v4293_v37 = vpop.f32.mrf.mxu1  ;;  %5849 = vmatprep.mubr.bf16.mxu0 %v16347_v11  ;;  %v5458_v7 = vrot.slane %v16507_v16, 7  ;;  %v4797_v53 = vrot.slane %v16507_v16, 6 }
 0x32f   : > { %16504 = vst [vmem:[#allocation65_spill] sm:$0xff] %v13970_v40  ;;  %v13979_v50 = vadd.f32 %v4566_v42, %v4293_v37  ;;  %6222 = vmatpush1.bf16.msra.mxu1 %v11097_v61  ;;  %v4777_v42 = vsel %vm12907_vm9, %v4775_v51, %v4776_v58  ;;  %v4781_v37 = vsel %vm12907_vm9, %v10172_v39, %v4780_v62  ;;  %v11105_v61 = vld [vmem:[%s16114_s3 + $0x204] ss:$8 sps:$4 sm:$0xff]   ;;  %v4790_v39 = vrot.slane %v16505_v20, 6 }
 0x330   : > { %v4295_v25 = vpop.f32.mrf.mxu1  ;;  %6223 = vmatprep.subr.bf16.mxu1 %v11102_v56  ;;  %v5668_v58 = vpack.c.bf16 %v5609_v52, %v5608_v3  ;;  %v5452_v62 = vsel %vm12695_vm7, %v5450_v1, %v5451_v30  ;;  %v4789_v56 = vrot.slane %v4787_v47, 4  ;;  %v4947_v52 = vcombine.low %v4774_v18, %v4777_v42 }
 0x331   : > { %16506 = vst [vmem:[#allocation56_spill] sm:$0xff] %v13979_v50  ;;  %v16509_v50 = vld [vmem:[#allocation6_spill] sm:$0xff]  ;;  %v13998_v41 = vadd.f32 %v4568_v63, %v4295_v25  ;;  %v5459_v63 = vsel %vm12695_vm7, %v5457_v44, %v5458_v7  ;;  %v4796_v25 = vrot.slane %v4794_v28, 4  ;;  %v4948_v1 = vcombine.low %v4781_v37, %v4784_v13 }
 0x332   : > { %v10237_v40 = vrot.slane %v16509_v50, 11  ;;  %v4574_v51 = vpop.f32.mrf.mxu0  ;;  %5179 = vmatmul.mubr.bf16.gmra.mxu1 %v5006_v26  ;;  %v11103_v26 = vld [vmem:[%s16114_s3 + $0x200] ss:$8 sps:$4 sm:$0xff]   ;;  %v16514_v30 = vrot.slane %v16502_v17, 7  ;;  %v5456_v7 = vsel %vm12695_vm7, %v10238_v36, %v5455_v54  ;;  %v5471_v20 = vrot.slane %v5469_v38, 4  ;;  %v14022_v16 = vpop.f32.mrf.mxu1 }
 0x333   : > { %16510 = vst [vmem:[#allocation67_spill] sm:$0xff] %v13998_v41  ;;  %5188 = vmatprep.mubr.bf16.mxu1 %v16347_v11  ;;  %v5462_v41 = vrot.slane %v16513_v2, 7  ;;  %6224 = vmatpush1.bf16.msra.mxu1 %v11100_v43  ;;  %v5472_v43 = vrot.slane %v16515_v9, 7  ;;  %16516 = vst [vmem:[#allocation68_spill] sm:$0xff] %v14022_v16  ;;  %v5611_v18 = vcombine.low %v5456_v7, %v5459_v63  ;;  %v10173_v13 = vrot.slane %v16509_v50, 10 }
 0x334   : > { %v4576_v3 = vpop.f32.mrf.mxu0  ;;  %6225 = vmatprep.subr.bf16.mxu1 %v11105_v61  ;;  %v5449_v44 = vsel %vm12695_vm7, %v10237_v40, %v16514_v30  ;;  %v10174_v42 = vrot.slane %v16511_v57, 10  ;;  %v4791_v37 = vsel %vm12907_vm9, %v4789_v56, %v4790_v39  ;;  %v4798_v40 = vsel %vm12907_vm9, %v4796_v25, %v4797_v53  ;;  %v16517_v61 = vld [vmem:[#allocation14_spill] sm:$0xff]  ;;  %v16519_v56 = vld [vmem:[#allocation16_spill] sm:$0xff] }
 0x335   : > { %5850 = vmatmul.mubr.bf16.gmra.mxu0 %v5668_v58  ;;  %v5610_v8 = vcombine.low %v5449_v44, %v5452_v62  ;;  %v5464_v54 = vrot.slane %v5462_v41, 4  ;;  %v5465_v36 = vrot.slane %v16517_v61, 7  ;;  %v5007_v16 = vpack.c.bf16 %v4948_v1, %v4947_v52 }
 0x336   : > { %5859 = vmatprep.mubr.bf16.mxu0 %v16347_v11  ;;  %v4578_v58 = vpop.f32.mrf.mxu0  ;;  %v4788_v62 = vsel %vm12907_vm9, %v10173_v13, %v4787_v47  ;;  %v4795_v50 = vsel %vm12907_vm9, %v10174_v42, %v4794_v28  ;;  %v4801_v57 = vrot.slane %v16513_v2, 6  ;;  %v10240_v39 = vrot.slane %v16519_v56, 11  ;;  %v16520_v47 = vld [vmem:[#allocation12_spill] sm:$0xff] }
 0x337   : > { %6226 = vmatpush1.bf16.msra.mxu1 %v11103_v26  ;;  %v5473_v25 = vsel %vm12695_vm7, %v5471_v20, %v5472_v43  ;;  %v4808_v53 = vrot.slane %v16512_v19, 6  ;;  %v5669_v52 = vpack.c.bf16 %v5611_v18, %v5610_v8  ;;  %v4949_v1 = vcombine.low %v4788_v62, %v4791_v37  ;;  %v16522_v20 = vld [vmem:[#allocation21_spill] sm:$0xff] }
 0x338   : > { %v4301_v30 = vpop.f32.mrf.mxu1  ;;  %v4950_v44 = vcombine.low %v4795_v50, %v4798_v40  ;;  %v10239_v7 = vrot.slane %v16520_v47, 11  ;;  %v5466_v28 = vsel %vm12695_vm7, %v5464_v54, %v5465_v36  ;;  %v5483_v43 = vrot.slane %v16522_v20, 7  ;;  %v14052_v42 = vpop.f32.mrf.mxu0  ;;  %v16525_v36 = vld [vmem:[#allocation19_spill] sm:$0xff] }
 0x339   : > { %v14037_v63 = vadd.f32 %v4574_v51, %v4301_v30  ;;  %v5470_v51 = vsel %vm12695_vm7, %v10240_v39, %v5469_v38  ;;  %16523 = vst [vmem:[#allocation69_spill] sm:$0xff] %v14052_v42  ;;  %v4803_v37 = vrot.slane %v4801_v57, 4  ;;  %v4810_v30 = vrot.slane %v4808_v53, 4 }
 0x33a   : > { %v4303_v26 = vpop.f32.mrf.mxu1  ;;  %5189 = vmatmul.mubr.bf16.gmra.mxu1 %v5007_v16  ;;  %v5463_v8 = vsel %vm12695_vm7, %v10239_v7, %v5462_v41  ;;  %v5613_v18 = vcombine.low %v5470_v51, %v5473_v25  ;;  %v4811_v54 = vrot.slane %v16515_v9, 6  ;;  %v5476_v38 = vrot.slane %v16525_v36, 7 }
 0x33b   : > { %16518 = vst [vmem:[#allocation70_spill] sm:$0xff] %v14037_v63  ;;  %v14044_v13 = vadd.f32 %v4576_v3, %v4303_v26  ;;  %5198 = vmatprep.mubr.bf16.mxu1 %v16347_v11  ;;  %v4804_v3 = vrot.slane %v16517_v61, 6  ;;  %v5612_v50 = vcombine.low %v5463_v8, %v5466_v28  ;;  %v10175_v39 = vrot.slane %v16520_v47, 10  ;;  %v16527_v8 = vld [vmem:[#allocation18_spill] sm:$0xff] }
 0x33c   : > { %v4305_v16 = vpop.f32.mrf.mxu1  ;;  %v4815_v41 = vrot.slane %v16525_v36, 6  ;;  %v4822_v25 = vrot.slane %v16522_v20, 6  ;;  %v5008_v26 = vpack.c.bf16 %v4950_v44, %v4949_v1  ;;  %v5485_v7 = vrot.slane %v5483_v43, 4  ;;  %v16528_v1 = vld [vmem:[#allocation20_spill] sm:$0xff] }
 0x33d   : > { %16521 = vst [vmem:[#allocation61_spill] sm:$0xff] %v14044_v13  ;;  %v14057_v40 = vadd.f32 %v4578_v58, %v4305_v16  ;;  %5860 = vmatmul.mubr.bf16.gmra.mxu0 %v5669_v52  ;;  %v10176_v58 = vrot.slane %v16519_v56, 10  ;;  %v16526_v52 = vld [vmem:[#allocation23_spill] sm:$0xff]  ;;  %v5670_v42 = vpack.c.bf16 %v5613_v18, %v5612_v50  ;;  %v4805_v28 = vsel %vm12907_vm9, %v4803_v37, %v4804_v3  ;;  %v16531_v3 = vld [vmem:[#allocation22_spill] sm:$0xff] }
 0x33e   : > { %5869 = vmatprep.mubr.bf16.mxu0 %v16347_v11  ;;  %v5486_v51 = vrot.slane %v16526_v52, 7  ;;  %v10241_v47 = vrot.slane %v16527_v8, 11  ;;  %v4812_v13 = vsel %vm12907_vm9, %v4810_v30, %v4811_v54  ;;  %v5478_v63 = vrot.slane %v5476_v38, 4  ;;  %v14076_v36 = vpop.f32.mrf.mxu1 }
 0x33f   : > { %16524 = vst [vmem:[#allocation74_spill] sm:$0xff] %v14057_v40  ;;  %v4584_v62 = vpop.f32.mrf.mxu0  ;;  %v4802_v40 = vsel %vm12907_vm9, %v10175_v39, %v4801_v57  ;;  %v5479_v44 = vrot.slane %v16528_v1, 7  ;;  %v4818_v56 = vrot.slane %v16528_v1, 6  ;;  %16529 = vst [vmem:[#allocation66_spill] sm:$0xff] %v14076_v36  ;;  %v4817_v18 = vrot.slane %v4815_v41, 4  ;;  %v16530_v39 = vld [vmem:[#allocation25_spill] sm:$0xff] }
 0x340   : > { %v4824_v50 = vrot.slane %v4822_v25, 4  ;;  %v4825_v57 = vrot.slane %v16526_v52, 6  ;;  %v5490_v20 = vrot.slane %v16530_v39, 7  ;;  %v4809_v37 = vsel %vm12907_vm9, %v10176_v58, %v4808_v53  ;;  %v16532_v1 = vld [vmem:[#allocation27_spill] sm:$0xff] }
 0x341   : > { %v4586_v16 = vpop.f32.mrf.mxu0  ;;  %v10242_v30 = vrot.slane %v16531_v3, 11  ;;  %v5487_v54 = vsel %vm12695_vm7, %v5485_v7, %v5486_v51  ;;  %v5497_v2 = vrot.slane %v16532_v1, 7  ;;  %v4951_v61 = vcombine.low %v4802_v40, %v4805_v28  ;;  %v16535_v28 = vld [vmem:[#allocation26_spill] sm:$0xff] }
 0x342   : > { %5199 = vmatmul.mubr.bf16.gmra.mxu1 %v5008_v26  ;;  %v4952_v19 = vcombine.low %v4809_v37, %v4812_v13  ;;  %v5477_v52 = vsel %vm12695_vm7, %v10241_v47, %v5476_v38  ;;  %v10177_v9 = vrot.slane %v16527_v8, 10  ;;  %v5480_v53 = vsel %vm12695_vm7, %v5478_v63, %v5479_v44  ;;  %v16536_v47 = vld [vmem:[#allocation29_spill] sm:$0xff] }
 0x343   : > { %5208 = vmatprep.mubr.bf16.mxu1 %v16347_v11  ;;  %v4588_v36 = vpop.f32.mrf.mxu0  ;;  %v5484_v58 = vsel %vm12695_vm7, %v10242_v30, %v5483_v43  ;;  %v10178_v7 = vrot.slane %v16531_v3, 10  ;;  %v4819_v40 = vsel %vm12907_vm9, %v4817_v18, %v4818_v56  ;;  %v4826_v38 = vsel %vm12907_vm9, %v4824_v50, %v4825_v57 }
 0x344   : > { %v5615_v13 = vcombine.low %v5484_v58, %v5487_v54  ;;  %v5493_v63 = vrot.slane %v16535_v28, 7  ;;  %v5499_v8 = vrot.slane %v5497_v2, 4  ;;  %v5500_v43 = vrot.slane %v16536_v47, 7 }
 0x345   : > { %v4311_v26 = vpop.f32.mrf.mxu1  ;;  %5870 = vmatmul.mubr.bf16.gmra.mxu0 %v5670_v42  ;;  %v14106_v44 = vpop.f32.mrf.mxu0  ;;  %v5009_v3 = vpack.c.bf16 %v4952_v19, %v4951_v61  ;;  %v5614_v30 = vcombine.low %v5477_v52, %v5480_v53  ;;  %v4829_v54 = vrot.slane %v16530_v39, 6  ;;  %v4816_v56 = vsel %vm12907_vm9, %v10177_v9, %v4815_v41  ;;  %v16541_v41 = vld [vmem:[#allocation33_spill] sm:$0xff]  ;;  %v16548_v39 = vld [vmem:[#allocation34_spill] sm:$0xff] }
 0x346   : > { %v14090_v17 = vadd.f32 %v4584_v62, %v4311_v26  ;;  %5879 = vmatprep.mubr.bf16.mxu0 %v16347_v11  ;;  %v5492_v62 = vrot.slane %v5490_v20, 4  ;;  %16537 = vst [vmem:[#allocation73_spill] sm:$0xff] %v14106_v44  ;;  %v4836_v18 = vrot.slane %v16532_v1, 6  ;;  %v4953_v58 = vcombine.low %v4816_v56, %v4819_v40  ;;  %v16539_v44 = vld [vmem:[#allocation24_spill] sm:$0xff] }
 0x347   : > { %v4313_v51 = vpop.f32.mrf.mxu1  ;;  %v5671_v57 = vpack.c.bf16 %v5615_v13, %v5614_v30  ;;  %v10243_v19 = vrot.slane %v16539_v44, 11  ;;  %v5501_v9 = vsel %vm12695_vm7, %v5499_v8, %v5500_v43  ;;  %v10179_v13 = vrot.slane %v16539_v44, 10 }
 0x348   : > { %16533 = vst [vmem:[#allocation71_spill] sm:$0xff] %v14090_v17  ;;  %v14102_v42 = vadd.f32 %v4586_v16, %v4313_v51  ;;  %v4823_v16 = vsel %vm12907_vm9, %v10178_v7, %v4822_v25  ;;  %v5494_v61 = vsel %vm12695_vm7, %v5492_v62, %v5493_v63  ;;  %v5511_v25 = vrot.slane %v16541_v41, 7  ;;  %v16546_v17 = vld [vmem:[#allocation32_spill] sm:$0xff] }
 0x349   : > { %v4315_v37 = vpop.f32.mrf.mxu1  ;;  %v4954_v51 = vcombine.low %v4823_v16, %v4826_v38  ;;  %v5491_v7 = vsel %vm12695_vm7, %v10243_v19, %v5490_v20  ;;  %v4831_v40 = vrot.slane %v4829_v54, 4  ;;  %v4832_v38 = vrot.slane %v16535_v28, 6  ;;  %v16544_v19 = vld [vmem:[#allocation35_spill] sm:$0xff] }
 0x34a   : > { %16534 = vst [vmem:[#allocation72_spill] sm:$0xff] %v14102_v42  ;;  %v14109_v26 = vadd.f32 %v4588_v36, %v4315_v37  ;;  %v4594_v50 = vpop.f32.mrf.mxu0  ;;  %5209 = vmatmul.mubr.bf16.gmra.mxu1 %v5009_v3  ;;  %v16540_v36 = vld [vmem:[#allocation28_spill] sm:$0xff]  ;;  %v4838_v63 = vrot.slane %v4836_v18, 4  ;;  %v4839_v37 = vrot.slane %v16536_v47, 6  ;;  %v16542_v3 = vld [vmem:[#allocation31_spill] sm:$0xff]  ;;  %v5616_v20 = vcombine.low %v5491_v7, %v5494_v61 }
 0x34b   : > { %5218 = vmatprep.mubr.bf16.mxu1 %v16347_v11  ;;  %v10244_v52 = vrot.slane %v16540_v36, 11  ;;  %v5504_v8 = vrot.slane %v16542_v3, 7  ;;  %v14132_v43 = vpop.f32.mrf.mxu1  ;;  %v5010_v30 = vpack.c.bf16 %v4954_v51, %v4953_v58  ;;  %v4843_v44 = vrot.slane %v16542_v3, 6  ;;  %v16545_v58 = vld [vmem:[#allocation30_spill] sm:$0xff] }
 0x34c   : > { %16538 = vst [vmem:[#allocation82_spill] sm:$0xff] %v14109_v26  ;;  %v4596_v53 = vpop.f32.mrf.mxu0  ;;  %16543 = vst [vmem:[#allocation79_spill] sm:$0xff] %v14132_v43  ;;  %v4830_v16 = vsel %vm12907_vm9, %v10179_v13, %v4829_v54  ;;  %v4833_v43 = vsel %vm12907_vm9, %v4831_v40, %v4832_v38  ;;  %v10245_v51 = vrot.slane %v16545_v58, 11  ;;  %v5507_v61 = vrot.slane %v16546_v17, 7 }
 0x34d   : > { %5880 = vmatmul.mubr.bf16.gmra.mxu0 %v5671_v57  ;;  %v5498_v62 = vsel %vm12695_vm7, %v10244_v52, %v5497_v2  ;;  %v10180_v57 = vrot.slane %v16540_v36, 10  ;;  %v5513_v2 = vrot.slane %v5511_v25, 4  ;;  %v5514_v52 = vrot.slane %v16544_v19, 7 }
 0x34e   : > { %5889 = vmatprep.mubr.bf16.mxu0 %v16347_v11  ;;  %v5617_v56 = vcombine.low %v5498_v62, %v5501_v9  ;;  %v4598_v26 = vpop.f32.mrf.mxu0  ;;  %v4850_v9 = vrot.slane %v16541_v41, 6  ;;  %v4840_v36 = vsel %vm12907_vm9, %v4838_v63, %v4839_v37  ;;  %v5506_v13 = vrot.slane %v5504_v8, 4 }
 0x34f   : > { %v4837_v54 = vsel %vm12907_vm9, %v10180_v57, %v4836_v18  ;;  %v10246_v40 = vrot.slane %v16548_v39, 11  ;;  %v4845_v38 = vrot.slane %v4843_v44, 4  ;;  %v4846_v28 = vrot.slane %v16546_v17, 6  ;;  %v16550_v18 = vld [vmem:[#allocation37_spill] sm:$0xff]  ;;  %v16551_v57 = vld [vmem:[#allocation39_spill] sm:$0xff] }
 0x350   : > { %v5672_v3 = vpack.c.bf16 %v5617_v56, %v5616_v20  ;;  %v5525_v63 = vrot.slane %v16551_v57, 7  ;;  %v14160_v37 = vpop.f32.mrf.mxu0  ;;  %v4955_v20 = vcombine.low %v4830_v16, %v4833_v43  ;;  %v4956_v56 = vcombine.low %v4837_v54, %v4840_v36  ;;  %v16554_v36 = vld [vmem:[#allocation38_spill] sm:$0xff] }
 0x351   : > { %v4321_v42 = vpop.f32.mrf.mxu1  ;;  %16552 = vst [vmem:[#allocation16_spill] sm:$0xff] %v14160_v37  ;;  %v4853_v41 = vrot.slane %v16544_v19, 6  ;;  %v10181_v16 = vrot.slane %v16545_v58, 10 }
 0x352   : > { %v14145_v7 = vadd.f32 %v4594_v50, %v4321_v42  ;;  %5219 = vmatmul.mubr.bf16.gmra.mxu1 %v5010_v30  ;;  %v5515_v42 = vsel %vm12695_vm7, %v5513_v2, %v5514_v52  ;;  %v5518_v50 = vrot.slane %v16550_v18, 7  ;;  %v5508_v2 = vsel %vm12695_vm7, %v5506_v13, %v5507_v61 }
 0x353   : > { %v4323_v62 = vpop.f32.mrf.mxu1  ;;  %5228 = vmatprep.mubr.bf16.mxu1 %v16347_v11  ;;  %v5512_v52 = vsel %vm12695_vm7, %v10246_v40, %v5511_v25  ;;  %v5011_v37 = vpack.c.bf16 %v4956_v56, %v4955_v20  ;;  %v4844_v58 = vsel %vm12907_vm9, %v10181_v16, %v4843_v44 }
 0x354   : > { %16547 = vst [vmem:[#allocation6_spill] sm:$0xff] %v14145_v7  ;;  %v14153_v1 = vadd.f32 %v4596_v53, %v4323_v62  ;;  %v4852_v7 = vrot.slane %v4850_v9, 4  ;;  %v5505_v53 = vsel %vm12695_vm7, %v10245_v51, %v5504_v8  ;;  %v5619_v43 = vcombine.low %v5512_v52, %v5515_v42 }
 0x355   : > { %v4325_v30 = vpop.f32.mrf.mxu1  ;;  %5890 = vmatmul.mubr.bf16.gmra.mxu0 %v5672_v3  ;;  %v10182_v3 = vrot.slane %v16548_v39, 10  ;;  %v5520_v54 = vrot.slane %v5518_v50, 4  ;;  %v5521_v8 = vrot.slane %v16554_v36, 7  ;;  %v5527_v51 = vrot.slane %v5525_v63, 4 }
 0x356   : > { %16549 = vst [vmem:[#allocation10_spill] sm:$0xff] %v14153_v1  ;;  %v14163_v17 = vadd.f32 %v4598_v26, %v4325_v30  ;;  %v4604_v62 = vpop.f32.mrf.mxu0  ;;  %5899 = vmatprep.mubr.bf16.mxu0 %v16347_v11  ;;  %v4847_v26 = vsel %vm12907_vm9, %v4845_v38, %v4846_v28  ;;  %v16555_v30 = vld [vmem:[#allocation41_spill] sm:$0xff]  ;;  %v5618_v25 = vcombine.low %v5505_v53, %v5508_v2  ;;  %v4857_v42 = vrot.slane %v16550_v18, 6  ;;  %v16556_v28 = vld [vmem:[#allocation36_spill] sm:$0xff] }
 0x357   : > { %v5528_v61 = vrot.slane %v16555_v30, 7  ;;  %v4854_v40 = vsel %vm12907_vm9, %v4852_v7, %v4853_v41  ;;  %v4851_v39 = vsel %vm12907_vm9, %v10182_v3, %v4850_v9  ;;  %v10247_v38 = vrot.slane %v16556_v28, 11  ;;  %v16558_v53 = vld [vmem:[#allocation40_spill] sm:$0xff]  ;;  %v16559_v41 = vld [vmem:[#allocation45_spill] sm:$0xff] }
 0x358   : > { %16553 = vst [vmem:[#allocation12_spill] sm:$0xff] %v14163_v17  ;;  %v4606_v13 = vpop.f32.mrf.mxu0  ;;  %v4864_v52 = vrot.slane %v16551_v57, 6  ;;  %v14187_v17 = vpop.f32.mrf.mxu1  ;;  %v5673_v20 = vpack.c.bf16 %v5619_v43, %v5618_v25  ;;  %v4957_v56 = vcombine.low %v4844_v58, %v4847_v26  ;;  %v10248_v2 = vrot.slane %v16558_v53, 11 }
 0x359   : > { %16557 = vst [vmem:[#allocation18_spill] sm:$0xff] %v14187_v17  ;;  %v5539_v7 = vrot.slane %v16559_v41, 7  ;;  %v4958_v1 = vcombine.low %v4851_v39, %v4854_v40  ;;  %v5519_v44 = vsel %vm12695_vm7, %v10247_v38, %v5518_v50  ;;  %v5522_v9 = vsel %vm12695_vm7, %v5520_v54, %v5521_v8  ;;  %v16561_v54 = vld [vmem:[#allocation43_spill] sm:$0xff] }
 0x35a   : > { %5229 = vmatmul.mubr.bf16.gmra.mxu1 %v5011_v37  ;;  %v5529_v16 = vsel %vm12695_vm7, %v5527_v51, %v5528_v61  ;;  %v4608_v3 = vpop.f32.mrf.mxu0  ;;  %v5526_v43 = vsel %vm12695_vm7, %v10248_v2, %v5525_v63  ;;  %v10183_v26 = vrot.slane %v16556_v28, 10  ;;  %v4859_v25 = vrot.slane %v4857_v42, 4  ;;  %v16562_v2 = vld [vmem:[#allocation47_spill] sm:$0xff] }
 0x35b   : > { %5238 = vmatprep.mubr.bf16.mxu1 %v16347_v11  ;;  %v4860_v58 = vrot.slane %v16554_v36, 6  ;;  %v4866_v50 = vrot.slane %v4864_v52, 4  ;;  %v4867_v39 = vrot.slane %v16555_v30, 6  ;;  %v5532_v8 = vrot.slane %v16561_v54, 7 }
 0x35c   : > { %v4331_v37 = vpop.f32.mrf.mxu1  ;;  %v5621_v51 = vcombine.low %v5526_v43, %v5529_v16  ;;  %v10184_v61 = vrot.slane %v16558_v53, 10  ;;  %v5541_v63 = vrot.slane %v5539_v7, 4  ;;  %v5542_v28 = vrot.slane %v16562_v2, 7  ;;  %v16565_v43 = vld [vmem:[#allocation42_spill] sm:$0xff] }
 0x35d   : > { %v14202_v40 = vadd.f32 %v4604_v62, %v4331_v37  ;;  %5900 = vmatmul.mubr.bf16.gmra.mxu0 %v5673_v20  ;;  %v5012_v18 = vpack.c.bf16 %v4958_v1, %v4957_v56  ;;  %v5620_v62 = vcombine.low %v5519_v44, %v5522_v9  ;;  %v4878_v20 = vrot.slane %v16559_v41, 6  ;;  %v14212_v37 = vpop.f32.mrf.mxu0  ;;  %v16567_v44 = vld [vmem:[#allocation44_spill] sm:$0xff] }
 0x35e   : > { %v4333_v38 = vpop.f32.mrf.mxu1  ;;  %5909 = vmatprep.mubr.bf16.mxu0 %v16347_v11  ;;  %16564 = vst [vmem:[#allocation24_spill] sm:$0xff] %v14212_v37  ;;  %v4858_v36 = vsel %vm12907_vm9, %v10183_v26, %v4857_v42  ;;  %v4861_v16 = vsel %vm12907_vm9, %v4859_v25, %v4860_v58  ;;  %v4865_v53 = vsel %vm12907_vm9, %v10184_v61, %v4864_v52  ;;  %v10249_v57 = vrot.slane %v16565_v43, 11  ;;  %v16568_v42 = vld [vmem:[#allocation46_spill] sm:$0xff] }
 0x35f   : > { %16560 = vst [vmem:[#allocation22_spill] sm:$0xff] %v14202_v40  ;;  %v14209_v17 = vadd.f32 %v4606_v13, %v4333_v38  ;;  %v4868_v1 = vsel %vm12907_vm9, %v4866_v50, %v4867_v39  ;;  %v5534_v56 = vrot.slane %v5532_v8, 4  ;;  %v5535_v9 = vrot.slane %v16567_v44, 7 }
 0x360   : > { %v4335_v40 = vpop.f32.mrf.mxu1  ;;  %v5674_v37 = vpack.c.bf16 %v5621_v51, %v5620_v62  ;;  %v10250_v26 = vrot.slane %v16568_v42, 11  ;;  %v5543_v25 = vsel %vm12695_vm7, %v5541_v63, %v5542_v28  ;;  %v4871_v52 = vrot.slane %v16561_v54, 6 }
 0x361   : > { %16563 = vst [vmem:[#allocation29_spill] sm:$0xff] %v14209_v17  ;;  %v14221_v13 = vadd.f32 %v4608_v3, %v4335_v40  ;;  %v4880_v3 = vrot.slane %v4878_v20, 4  ;;  %v4881_v58 = vrot.slane %v16562_v2, 6  ;;  %v16569_v40 = vld [vmem:[#allocation49_spill] sm:$0xff]  ;;  %v5553_v39 = vrot.slane %v13632_v22, 7 }
 0x362   : > { %v4614_v38 = vpop.f32.mrf.mxu0  ;;  %5239 = vmatmul.mubr.bf16.gmra.mxu1 %v5012_v18  ;;  %v5546_v50 = vrot.slane %v16569_v40, 7  ;;  %v4960_v18 = vcombine.low %v4865_v53, %v4868_v1  ;;  %v5533_v51 = vsel %vm12695_vm7, %v10249_v57, %v5532_v8  ;;  %v5536_v63 = vsel %vm12695_vm7, %v5534_v56, %v5535_v9  ;;  %v14242_v54 = vpop.f32.mrf.mxu1  ;;  %v16571_v57 = vld [vmem:[#allocation50_spill] sm:$0xff] }
 0x363   : > { %16566 = vst [vmem:[#allocation28_spill] sm:$0xff] %v14221_v13  ;;  %5248 = vmatprep.mubr.bf16.mxu1 %v16347_v11  ;;  %v4959_v13 = vcombine.low %v4858_v36, %v4861_v16  ;;  %v5540_v28 = vsel %vm12695_vm7, %v10250_v26, %v5539_v7  ;;  %v10185_v62 = vrot.slane %v16565_v43, 10  ;;  %v4874_v17 = vrot.slane %v16567_v44, 6  ;;  %16570 = vst [vmem:[#allocation35_spill] sm:$0xff] %v14242_v54 }
 0x364   : > { %v4616_v61 = vpop.f32.mrf.mxu0  ;;  %v5623_v36 = vcombine.low %v5540_v28, %v5543_v25  ;;  %v4873_v16 = vrot.slane %v4871_v52, 4  ;;  %v10186_v53 = vrot.slane %v16568_v42, 10  ;;  %v5549_v8 = vrot.slane %v16571_v57, 7 }
 0x365   : > { %5910 = vmatmul.mubr.bf16.gmra.mxu0 %v5674_v37  ;;  %v4882_v37 = vsel %vm12907_vm9, %v4880_v3, %v4881_v58  ;;  %v5548_v1 = vrot.slane %v5546_v50, 4  ;;  %v5555_v56 = vrot.slane %v5553_v39, 4  ;;  %v5556_v7 = vrot.slane %v13653_v59, 7  ;;  %v16573_v58 = vld [vmem:[#allocation48_spill] sm:$0xff] }
 0x366   : > { %5919 = vmatprep.mubr.bf16.mxu0 %v16347_v11  ;;  %v4618_v43 = vpop.f32.mrf.mxu0  ;;  %v5013_v26 = vpack.c.bf16 %v4960_v18, %v4959_v13  ;;  %v5622_v44 = vcombine.low %v5533_v51, %v5536_v63  ;;  %v4885_v54 = vrot.slane %v16569_v40, 6  ;;  %v4892_v25 = vrot.slane %v13632_v22, 6 }
 0x367   : > { %v4341_v9 = vpop.f32.mrf.mxu1  ;;  %v4872_v42 = vsel %vm12907_vm9, %v10185_v62, %v4871_v52  ;;  %v4879_v3 = vsel %vm12907_vm9, %v10186_v53, %v4878_v20  ;;  %v10251_v41 = vrot.slane %v16573_v58, 11  ;;  %v4875_v13 = vsel %vm12907_vm9, %v4873_v16, %v4874_v17 }
 0x368   : > { %v14252_v28 = vadd.f32 %v4614_v38, %v4341_v9  ;;  %v5675_v30 = vpack.c.bf16 %v5623_v36, %v5622_v44  ;;  %v4962_v18 = vcombine.low %v4879_v3, %v4882_v37  ;;  %v10252_v51 = vrot.slane %v13637_v45, 11  ;;  %v14270_v62 = vpop.f32.mrf.mxu0  ;;  %v16577_v37 = vld [vmem:[#allocation53_spill] sm:$0xff] }
 0x369   : > { %v4343_v2 = vpop.f32.mrf.mxu1  ;;  %v5550_v38 = vsel %vm12695_vm7, %v5548_v1, %v5549_v8  ;;  %v5557_v20 = vsel %vm12695_vm7, %v5555_v56, %v5556_v7  ;;  %v4888_v52 = vrot.slane %v16571_v57, 6  ;;  %16575 = vst [vmem:[#allocation36_spill] sm:$0xff] %v14270_v62  ;;  %v4887_v36 = vrot.slane %v4885_v54, 4 }
 0x36a   : > { %16572 = vst [vmem:[#allocation30_spill] sm:$0xff] %v14252_v28  ;;  %5249 = vmatmul.mubr.bf16.gmra.mxu1 %v5013_v26  ;;  %v14262_v63 = vadd.f32 %v4616_v61, %v4343_v2  ;;  %v4894_v17 = vrot.slane %v4892_v25, 4  ;;  %v4895_v16 = vrot.slane %v13653_v59, 6  ;;  %v5567_v2 = vrot.slane %v13688_v14, 7 }
 0x36b   : > { %5258 = vmatprep.mubr.bf16.mxu1 %v16347_v11  ;;  %v4345_v44 = vpop.f32.mrf.mxu1  ;;  %v4961_v53 = vcombine.low %v4872_v42, %v4875_v13  ;;  %v5560_v8 = vrot.slane %v16577_v37, 7  ;;  %v5547_v56 = vsel %vm12695_vm7, %v10251_v41, %v5546_v50  ;;  %v5554_v7 = vsel %vm12695_vm7, %v10252_v51, %v5553_v39  ;;  %v16579_v50 = vld [vmem:[#allocation52_spill] sm:$0xff]  ;;  %v16580_v51 = vld [vmem:[#allocation54_spill] sm:$0xff] }
 0x36c   : > { %16574 = vst [vmem:[#allocation34_spill] sm:$0xff] %v14262_v63  ;;  %v14274_v61 = vadd.f32 %v4618_v43, %v4345_v44  ;;  %v10187_v9 = vrot.slane %v16573_v58, 10  ;;  %v5624_v3 = vcombine.low %v5547_v56, %v5550_v38  ;;  %v5625_v62 = vcombine.low %v5554_v7, %v5557_v20 }
 0x36d   : > { %5920 = vmatmul.mubr.bf16.gmra.mxu0 %v5675_v30  ;;  %v5014_v26 = vpack.c.bf16 %v4962_v18, %v4961_v53  ;;  %v10188_v43 = vrot.slane %v13637_v45, 10  ;;  %v4889_v42 = vsel %vm12907_vm9, %v4887_v36, %v4888_v52  ;;  %v4896_v13 = vsel %vm12907_vm9, %v4894_v17, %v4895_v16  ;;  %v14292_v38 = vpop.f32.mrf.mxu1 }
 0x36e   : > { %16576 = vst [vmem:[#allocation40_spill] sm:$0xff] %v14274_v61  ;;  %v4624_v1 = vpop.f32.mrf.mxu0  ;;  %5929 = vmatprep.mubr.bf16.mxu0 %v16347_v11  ;;  %v5569_v44 = vrot.slane %v5567_v2, 4  ;;  %v16578_v61 = vld [vmem:[#allocation60_spill] sm:$0xff]  ;;  %v10253_v63 = vrot.slane %v16579_v50, 11  ;;  %v5562_v39 = vrot.slane %v5560_v8, 4  ;;  %v5563_v58 = vrot.slane %v16580_v51, 7 }
 0x36f   : > { %v5570_v41 = vrot.slane %v16578_v61, 7  ;;  %v4906_v18 = vrot.slane %v13688_v14, 6  ;;  %16581 = vst [vmem:[#allocation42_spill] sm:$0xff] %v14292_v38  ;;  %v4886_v45 = vsel %vm12907_vm9, %v10187_v9, %v4885_v54  ;;  %v4893_v20 = vsel %vm12907_vm9, %v10188_v43, %v4892_v25  ;;  %v16582_v38 = vld [vmem:[#allocation55_spill] sm:$0xff] }
 0x370   : > { %v4626_v30 = vpop.f32.mrf.mxu0  ;;  %v4899_v52 = vrot.slane %v16577_v37, 6  ;;  %v5676_v36 = vpack.c.bf16 %v5625_v62, %v5624_v3  ;;  %v4963_v17 = vcombine.low %v4886_v45, %v4889_v42  ;;  %v4964_v16 = vcombine.low %v4893_v20, %v4896_v13 }
 0x371   : > { %v5561_v53 = vsel %vm12695_vm7, %v10253_v63, %v5560_v8  ;;  %v5571_v54 = vsel %vm12695_vm7, %v5569_v44, %v5570_v41  ;;  %v5574_v9 = vrot.slane %v13718_v27, 7  ;;  %v5581_v25 = vrot.slane %v13740_v6, 7 }
 0x372   : > { %5259 = vmatmul.mubr.bf16.gmra.mxu1 %v5014_v26  ;;  %v4628_v56 = vpop.f32.mrf.mxu0  ;;  %v10254_v26 = vrot.slane %v16582_v38, 11  ;;  %v5564_v62 = vsel %vm12695_vm7, %v5562_v39, %v5563_v58  ;;  %v4908_v3 = vrot.slane %v4906_v18, 4  ;;  %v4909_v63 = vrot.slane %v16578_v61, 6 }
 0x373   : > { %5268 = vmatprep.mubr.bf16.mxu1 %v16347_v11  ;;  %v4351_v7 = vpop.f32.mrf.mxu1  ;;  %v10189_v13 = vrot.slane %v16579_v50, 10  ;;  %v4901_v44 = vrot.slane %v4899_v52, 4  ;;  %v4902_v41 = vrot.slane %v16580_v51, 6  ;;  %v5015_v45 = vpack.c.bf16 %v4964_v16, %v4963_v17 }
 0x374   : > { %v14307_v43 = vadd.f32 %v4624_v1, %v4351_v7  ;;  %v5568_v42 = vsel %vm12695_vm7, %v10254_v26, %v5567_v2  ;;  %v10190_v39 = vrot.slane %v16582_v38, 10  ;;  %v14320_v58 = vpop.f32.mrf.mxu0  ;;  %v5626_v7 = vcombine.low %v5561_v53, %v5564_v62  ;;  %v16586_v62 = vld [vmem:[#allocation51_spill] sm:$0xff] }
 0x375   : > { %5930 = vmatmul.mubr.bf16.gmra.mxu0 %v5676_v36  ;;  %v4353_v8 = vpop.f32.mrf.mxu1  ;;  %v5627_v20 = vcombine.low %v5568_v42, %v5571_v54  ;;  %16584 = vst [vmem:[#allocation49_spill] sm:$0xff] %v14320_v58  ;;  %v5583_v28 = vrot.slane %v5581_v25, 4  ;;  %v5584_v37 = vrot.slane %v13755_v31, 7  ;;  %v4910_v50 = vsel %vm12907_vm9, %v4908_v3, %v4909_v63 }
 0x376   : > { %16583 = vst [vmem:[#allocation46_spill] sm:$0xff] %v14307_v43  ;;  %5939 = vmatprep.mubr.bf16.mxu0 %v16347_v11  ;;  %v14317_v1 = vadd.f32 %v4626_v30, %v4353_v8  ;;  %v5576_v43 = vrot.slane %v5574_v9, 4  ;;  %v5577_v30 = vrot.slane %v13728_v0, 7  ;;  %v4920_v17 = vrot.slane %v13740_v6, 6 }
 0x377   : > { %v4355_v36 = vpop.f32.mrf.mxu1  ;;  %v4903_v38 = vsel %vm12907_vm9, %v4901_v44, %v4902_v41  ;;  %v4913_v53 = vrot.slane %v13718_v27, 6  ;;  %v5677_v26 = vpack.c.bf16 %v5627_v20, %v5626_v7  ;;  %v4907_v54 = vsel %vm12907_vm9, %v10190_v39, %v4906_v18 }
 0x378   : > { %v14323_v2 = vadd.f32 %v4628_v56, %v4355_v36  ;;  %v4900_v56 = vsel %vm12907_vm9, %v10189_v13, %v4899_v52  ;;  %v10255_v3 = vrot.slane %v16586_v62, 11  ;;  %v4966_v8 = vcombine.low %v4907_v54, %v4910_v50 }
 0x379   : > { %v10256_v42 = vrot.slane %v13738_v5, 11  ;;  %v5585_v44 = vsel %vm12695_vm7, %v5583_v28, %v5584_v37  ;;  %v5595_v41 = vrot.slane %v13786_v35, 7  ;;  %v5578_v20 = vsel %vm12695_vm7, %v5576_v43, %v5577_v30  ;;  %v14345_v18 = vpop.f32.mrf.mxu1 }
 0x37a   : > { %16585 = vst [vmem:[#allocation50_spill] sm:$0xff] %v14323_v2  ;;  %v4634_v16 = vpop.f32.mrf.mxu0  ;;  %5269 = vmatmul.mubr.bf16.gmra.mxu1 %v5015_v45  ;;  %v4965_v45 = vcombine.low %v4900_v56, %v4903_v38  ;;  %v4922_v52 = vrot.slane %v4920_v17, 4  ;;  %v4923_v13 = vrot.slane %v13755_v31, 6  ;;  %16587 = vst [vmem:[#allocation48_spill] sm:$0xff] %v14345_v18  ;;  %v4915_v36 = vrot.slane %v4913_v53, 4 }
 0x37b   : > { %5278 = vmatprep.mubr.bf16.mxu1 %v16347_v11  ;;  %v5582_v39 = vsel %vm12695_vm7, %v10256_v42, %v5581_v25  ;;  %v4916_v28 = vrot.slane %v13728_v0, 6  ;;  %v5588_v37 = vrot.slane %v13767_v49, 7  ;;  %v5575_v7 = vsel %vm12695_vm7, %v10255_v3, %v5574_v9 }
 0x37c   : > { %v4636_v63 = vpop.f32.mrf.mxu0  ;;  %v5629_v50 = vcombine.low %v5582_v39, %v5585_v44  ;;  %v5016_v38 = vpack.c.bf16 %v4966_v8, %v4965_v45  ;;  %v5597_v56 = vrot.slane %v5595_v41, 4  ;;  %v5598_v54 = vrot.slane %v13797_v46, 7 }
 0x37d   : > { %5940 = vmatmul.mubr.bf16.gmra.mxu0 %v5677_v26  ;;  %v5628_v26 = vcombine.low %v5575_v7, %v5578_v20  ;;  %v10192_v25 = vrot.slane %v13738_v5, 10  ;;  %v4924_v42 = vsel %vm12907_vm9, %v4922_v52, %v4923_v13  ;;  %v4934_v58 = vrot.slane %v13786_v35, 6 }
 0x37e   : > { %5949 = vmatprep.mubr.bf16.mxu0 %v16347_v11  ;;  %v4638_v43 = vpop.f32.mrf.mxu0  ;;  %v10191_v9 = vrot.slane %v16586_v62, 10  ;;  %v4917_v3 = vsel %vm12907_vm9, %v4915_v36, %v4916_v28  ;;  %v5590_v8 = vrot.slane %v5588_v37, 4  ;;  %v5591_v44 = vrot.slane %v13777_v12, 7 }
 0x37f   : > { %v4361_v30 = vpop.f32.mrf.mxu1  ;;  %v4921_v5 = vsel %vm12907_vm9, %v10192_v25, %v4920_v17  ;;  %v4927_v20 = vrot.slane %v13767_v49, 6  ;;  %v10258_v62 = vrot.slane %v13784_v48, 11  ;;  %v5599_v36 = vsel %vm12695_vm7, %v5597_v56, %v5598_v54 }
 0x380   : > { %v14355_v2 = vadd.f32 %v4634_v16, %v4361_v30  ;;  %v5678_v16 = vpack.c.bf16 %v5629_v50, %v5628_v26  ;;  %v4640_v52 = vpop.f32.mrf.mxu0  ;;  %v4968_v39 = vcombine.low %v4921_v5, %v4924_v42  ;;  %v4937_v7 = vrot.slane %v13797_v46, 6 }
 0x381   : > { %v4363_v18 = vpop.f32.mrf.mxu1  ;;  %v5592_v26 = vsel %vm12695_vm7, %v5590_v8, %v5591_v44  ;;  %v4930_v25 = vrot.slane %v13777_v12, 6  ;;  %v10194_v5 = vrot.slane %v13784_v48, 10 }
 0x382   : > { %5279 = vmatmul.mubr.bf16.gmra.mxu1 %v5016_v38  ;;  %v14365_v45 = vadd.f32 %v4636_v63, %v4363_v18  ;;  %v4914_v63 = vsel %vm12907_vm9, %v10191_v9, %v4913_v53  ;;  %v4936_v18 = vrot.slane %v4934_v58, 4  ;;  %v10257_v38 = vrot.slane %v13759_v23, 11 }
 0x383   : > { %5288 = vmatprep.mubr.bf16.mxu1 %v16347_v11  ;;  %v4365_v13 = vpop.f32.mrf.mxu1  ;;  %v4967_v30 = vcombine.low %v4914_v63, %v4917_v3  ;;  %v4929_v53 = vrot.slane %v4927_v20, 4 }
 0x384   : > { %v14374_v28 = vadd.f32 %v4638_v43, %v4365_v13  ;;  %v5596_v43 = vsel %vm12695_vm7, %v10258_v62, %v5595_v41  ;;  %v5589_v3 = vsel %vm12695_vm7, %v10257_v38, %v5588_v37  ;;  %v4938_v8 = vsel %vm12907_vm9, %v4936_v18, %v4937_v7 }
 0x385   : > { %5950 = vmatmul.mubr.bf16.gmra.mxu0 %v5678_v16  ;;  %v4367_v17 = vpop.f32.mrf.mxu1  ;;  %v5631_v54 = vcombine.low %v5596_v43, %v5599_v36  ;;  %v5017_v9 = vpack.c.bf16 %v4968_v39, %v4967_v30  ;;  %v5630_v16 = vcombine.low %v5589_v3, %v5592_v26  ;;  %v10193_v41 = vrot.slane %v13759_v23, 10  ;;  %v16588_v43 = vld [vmem:[#allocation78_spill] sm:$0xff] }
 0x386   : > { %v4644_v50 = vpop.f32.mrf.mxu0  ;;  %5959 = vmatprep.mubr.bf16.mxu0 %v16347_v11  ;;  %v14385_v56 = vadd.f32 %v4640_v52, %v4367_v17  ;;  %v4931_v52 = vsel %vm12907_vm9, %v4929_v53, %v4930_v25  ;;  %v4935_v13 = vsel %vm12907_vm9, %v10194_v5, %v4934_v58  ;;  %v16591_v53 = vld [vmem:[#allocation75_spill] sm:$0xff] }
 0x387   : > { %v5679_v44 = vpack.c.bf16 %v5631_v54, %v5630_v16  ;;  %v4970_v39 = vcombine.low %v4935_v13, %v4938_v8  ;;  %v4928_v48 = vsel %vm12907_vm9, %v10193_v41, %v4927_v20  ;;  %v6035_v20 = vcombine.low %v16589_v21, %v16588_v43  ;;  %v16590_v54 = vld [vmem:[#allocation76_spill] sm:$0xff]  ;;  %v16596_v43 = vld [vmem:[#allocation85_spill] sm:$0xff] }
 0x388   : > { %v4646_v42 = vpop.f32.mrf.mxu0  ;;  %v4969_v63 = vcombine.low %v4928_v48, %v4931_v52  ;;  %v6034_v25 = vcombine.low %v16591_v53, %v16590_v54  ;;  %v16592_v52 = vld [vmem:[#allocation83_spill] sm:$0xff]  ;;  %v16593_v48 = vld [vmem:[#allocation81_spill] sm:$0xff]  ;;  %v16597_v54 = vld [vmem:[#allocation84_spill] sm:$0xff] }
 0x389   : > { %v6037_v13 = vcombine.low %v16592_v52, %v12799_v33  ;;  %v6038_v53 = vcombine.low %v16597_v54, %v12837_v34  ;;  %v6040_v34 = vcombine.low %v12917_v29, %v12936_v10  ;;  %v16598_v10 = vld [vmem:[#allocation87_spill] sm:$0xff] }
 0x38a   : > { %5289 = vmatmul.mubr.bf16.gmra.mxu1 %v5017_v9  ;;  %v4648_v32 = vpop.f32.mrf.mxu0  ;;  %v5018_v17 = vpack.c.bf16 %v4970_v39, %v4969_v63  ;;  %v6098_v3 = vpack.c.bf16 %v6035_v20, %v6034_v25 }
 0x38b   : > { %5298 = vmatprep.mubr.bf16.mxu1 %v16347_v11  ;;  %v4371_v37 = vpop.f32.mrf.mxu1 }
 0x38c   : > { %v14399_v62 = vadd.f32 %v4644_v50, %v4371_v37  ;;  %v4650_v23 = vpop.f32.mrf.mxu0 }
 0x38d   : > { %5960 = vmatmul.mubr.bf16.gmra.mxu0 %v5679_v44  ;;  %v4373_v36 = vpop.f32.mrf.mxu1 }
 0x38e   : > { %v14403_v18 = vadd.f32 %v4646_v42, %v4373_v36  ;;  %v16594_v36 = vld [vmem:[#allocation80_spill] sm:$0xff] }
 0x38f   : > { %v4375_v7 = vpop.f32.mrf.mxu1  ;;  %v6036_v63 = vcombine.low %v16594_v36, %v16593_v48 }
 0x390   : > { %v14405_v30 = vadd.f32 %v4648_v32, %v4375_v7 }
 0x391   : > { %v4377_v38 = vpop.f32.mrf.mxu1 }
 0x392   : > { %v4654_v58 = vpop.f32.mrf.mxu0  ;;  %5299 = vmatmul.mubr.bf16.gmra.mxu1 %v5018_v17  ;;  %v14407_v26 = vadd.f32 %v4650_v23, %v4377_v38  ;;  %v6099_v17 = vpack.c.bf16 %v6037_v13, %v6036_v63 }
 0x393   : > { %6243 = vmatprep.mubr.bf16.mxu1 %v16347_v11 }
 0x394   : > { %v4656_v50 = vpop.f32.mrf.mxu0 }
 0x396   : > { %v4658_v42 = vpop.f32.mrf.mxu0 }
 0x397   : > { %v4381_v9 = vpop.f32.mrf.mxu1 }
 0x398   : > { %v14414_v16 = vadd.f32 %v4654_v58, %v4381_v9  ;;  %v4660_v44 = vpop.f32.mrf.mxu0 }
 0x399   : > { %v4383_v5 = vpop.f32.mrf.mxu1 }
 0x39a   : > { %6244 = vmatmul.mubr.bf16.vlgmr.msra.gmra.mxu1 %v6098_v3  ;;  %v14416_v8 = vadd.f32 %v4656_v50, %v4383_v5  ;;  %v16595_v50 = vld [vmem:[#allocation86_spill] sm:$0xff] }
 0x39b   : > { %6253 = vmatprep.mubr.bf16.mxu1 %v16347_v11  ;;  %v4385_v41 = vpop.f32.mrf.mxu1  ;;  %v6039_v21 = vcombine.low %v16596_v43, %v16595_v50  ;;  %v6043_v50 = vcombine.low %v13061_v24, %v13093_v4  ;;  %v6042_v43 = vcombine.low %v16598_v10, %v13035_v60 }
 0x39c   : > { %v14421_v32 = vadd.f32 %v4658_v42, %v4385_v41 }
 0x39d   : > { %v4387_v37 = vpop.f32.mrf.mxu1  ;;  %v6100_v3 = vpack.c.bf16 %v6039_v21, %v6038_v53  ;;  %v6102_v54 = vpack.c.bf16 %v6043_v50, %v6042_v43  ;;  %v16605_v43 = vld [vmem:[#allocation14_spill] sm:$0xff] }
 0x39e   : > { %v4664_v39 = vpop.f32.mrf.mxu0  ;;  %v14425_v23 = vadd.f32 %v4660_v44, %v4387_v37  ;;  %v6041_v37 = vcombine.low %v12969_v15, %v12995_v55 }
 0x3a0   : > { %v4666_v7 = vpop.f32.mrf.mxu0  ;;  %v6101_v36 = vpack.c.bf16 %v6041_v37, %v6040_v34 }
 0x3a2   : > { %6254 = vmatmul.mubr.bf16.gmra.mxu1 %v6099_v17  ;;  %v4668_v38 = vpop.f32.mrf.mxu0 }
 0x3a3   : > { %6263 = vmatprep.mubr.bf16.mxu1 %v16347_v11  ;;  %v4391_v58 = vpop.f32.mrf.mxu1 }
 0x3a4   : > { %v14430_v33 = vadd.f32 %v4664_v39, %v4391_v58  ;;  %v4670_v42 = vpop.f32.mrf.mxu0 }
 0x3a5   : > { %v4393_v20 = vpop.f32.mrf.mxu1 }
 0x3a6   : > { %v14434_v25 = vadd.f32 %v4666_v7, %v4393_v20 }
 0x3a7   : > { %v4395_v9 = vpop.f32.mrf.mxu1 }
 0x3a8   : > { %v14436_v5 = vadd.f32 %v4668_v38, %v4395_v9  ;;  %v16599_v9 = vld [vmem:[#allocation11_spill] sm:$0xff] }
 0x3a9   : > { %v4397_v44 = vpop.f32.mrf.mxu1 }
 0x3aa   : > { %v4674_v41 = vpop.f32.mrf.mxu0  ;;  %6264 = vmatmul.mubr.bf16.gmra.mxu1 %v6100_v3  ;;  %v14438_v52 = vadd.f32 %v4670_v42, %v4397_v44  ;;  %v16600_v3 = vld [vmem:[#allocation9_spill] sm:$0xff] }
 0x3ab   : > { %6273 = vmatprep.mubr.bf16.mxu1 %v16347_v11  ;;  %v6045_v44 = vcombine.low %v16600_v3, %v16599_v9 }
 0x3ac   : > { %v4676_v13 = vpop.f32.mrf.mxu0 }
 0x3ae   : > { %v4678_v39 = vpop.f32.mrf.mxu0 }
 0x3af   : > { %v4401_v48 = vpop.f32.mrf.mxu1 }
 0x3b0   : > { %v14445_v63 = vadd.f32 %v4674_v41, %v4401_v48  ;;  %v4680_v38 = vpop.f32.mrf.mxu0  ;;  %v16601_v41 = vld [vmem:[#allocation8_spill] sm:$0xff] }
 0x3b1   : > { %v4403_v7 = vpop.f32.mrf.mxu1 }
 0x3b2   : > { %6274 = vmatmul.mubr.bf16.gmra.mxu1 %v6101_v36  ;;  %v14447_v17 = vadd.f32 %v4676_v13, %v4403_v7  ;;  %v16602_v13 = vld [vmem:[#allocation7_spill] sm:$0xff] }
 0x3b3   : > { %6283 = vmatprep.mubr.bf16.mxu1 %v16347_v11  ;;  %v4405_v58 = vpop.f32.mrf.mxu1  ;;  %v6044_v37 = vcombine.low %v16602_v13, %v16601_v41 }
 0x3b4   : > { %v14452_v15 = vadd.f32 %v4678_v39, %v4405_v58 }
 0x3b5   : > { %v4407_v55 = vpop.f32.mrf.mxu1  ;;  %v6103_v48 = vpack.c.bf16 %v6045_v44, %v6044_v37 }
 0x3b6   : > { %v4684_v29 = vpop.f32.mrf.mxu0  ;;  %v14456_v21 = vadd.f32 %v4680_v38, %v4407_v55  ;;  %v16603_v55 = vld [vmem:[#allocation17_spill] sm:$0xff] }
 0x3b8   : > { %v4686_v20 = vpop.f32.mrf.mxu0 }
 0x3ba   : > { %6284 = vmatmul.mubr.bf16.gmra.mxu1 %v6102_v54  ;;  %v4688_v53 = vpop.f32.mrf.mxu0  ;;  %v16606_v54 = vld [vmem:[#allocation13_spill] sm:$0xff] }
 0x3bb   : > { %6293 = vmatprep.mubr.bf16.mxu1 %v16347_v11 }
 0x3bc   : > { %v4411_v42 = vpop.f32.mrf.mxu1  ;;  %v4690_v60 = vpop.f32.mrf.mxu0 }
 0x3bd   : > { %v14461_v24 = vadd.f32 %v4684_v29, %v4411_v42  ;;  %v16604_v29 = vld [vmem:[#allocation15_spill] sm:$0xff] }
 0x3be   : > { %v4413_v4 = vpop.f32.mrf.mxu1  ;;  %v6047_v10 = vcombine.low %v16604_v29, %v16603_v55 }
 0x3bf   : > { %v14465_v34 = vadd.f32 %v4686_v20, %v4413_v4  ;;  %v6046_v20 = vcombine.low %v16606_v54, %v16605_v43  ;;  %v16611_v43 = vld [vmem:[#allocation19_spill] sm:$0xff] }
 0x3c0   : > { %v4415_v39 = vpop.f32.mrf.mxu1 }
 0x3c1   : > { %v14467_v36 = vadd.f32 %v4688_v53, %v4415_v39  ;;  %v4694_v38 = vpop.f32.mrf.mxu0  ;;  %v6104_v53 = vpack.c.bf16 %v6047_v10, %v6046_v20  ;;  %v16608_v39 = vld [vmem:[#allocation21_spill] sm:$0xff] }
 0x3c2   : > { %v4417_v7 = vpop.f32.mrf.mxu1  ;;  %6294 = vmatmul.mubr.bf16.gmra.mxu1 %v6103_v48 }
 0x3c3   : > { %v14469_v58 = vadd.f32 %v4690_v60, %v4417_v7  ;;  %6303 = vmatprep.mubr.bf16.mxu1 %v16347_v11  ;;  %v4696_v50 = vpop.f32.mrf.mxu0  ;;  %v16607_v60 = vld [vmem:[#allocation23_spill] sm:$0xff] }
 0x3c4   : > { %v6049_v48 = vcombine.low %v16608_v39, %v16607_v60  ;;  %v16614_v39 = vld [vmem:[#allocation26_spill] sm:$0xff] }
 0x3c5   : > { %v4698_v42 = vpop.f32.mrf.mxu0 }
 0x3c7   : > { %v4421_v9 = vpop.f32.mrf.mxu1  ;;  %v4700_v41 = vpop.f32.mrf.mxu0 }
 0x3c8   : > { %v14476_v3 = vadd.f32 %v4694_v38, %v4421_v9  ;;  %v16610_v38 = vld [vmem:[#allocation20_spill] sm:$0xff] }
 0x3c9   : > { %v4423_v44 = vpop.f32.mrf.mxu1  ;;  %v6048_v10 = vcombine.low %v16611_v43, %v16610_v38 }
 0x3ca   : > { %v14478_v4 = vadd.f32 %v4696_v50, %v4423_v44  ;;  %6304 = vmatmul.mubr.bf16.gmra.mxu1 %v6104_v53  ;;  %v16613_v44 = vld [vmem:[#allocation27_spill] sm:$0xff] }
 0x3cb   : > { %v4425_v13 = vpop.f32.mrf.mxu1  ;;  %6313 = vmatprep.mubr.bf16.mxu1 %v16347_v11  ;;  %v6105_v50 = vpack.c.bf16 %v6049_v48, %v6048_v10 }
 0x3cc   : > { %v14481_v37 = vadd.f32 %v4698_v42, %v4425_v13  ;;  %v6051_v13 = vcombine.low %v16613_v44, %v16536_v47  ;;  %v16620_v44 = vld [vmem:[#allocation59_spill] sm:$0xff] }
 0x3cd   : > { %v4427_v7 = vpop.f32.mrf.mxu1  ;;  %v4704_v55 = vpop.f32.mrf.mxu0 }
 0x3ce   : > { %v14485_v29 = vadd.f32 %v4700_v41, %v4427_v7  ;;  %v16615_v7 = vld [vmem:[#allocation25_spill] sm:$0xff] }
 0x3cf   : > { %v4706_v54 = vpop.f32.mrf.mxu0 }
 0x3d0   : > { %16609 = vst [vmem:[#allocation60_spill] sm:$0xff] %v14485_v29  ;;  %v6050_v29 = vcombine.low %v16615_v7, %v16614_v39  ;;  %v16623_v7 = vld [vmem:[#allocation31_spill] sm:$0xff] }
 0x3d1   : > { %v4708_v42 = vpop.f32.mrf.mxu0 }
 0x3d2   : > { %v4431_v20 = vpop.f32.mrf.mxu1  ;;  %6314 = vmatmul.mubr.bf16.gmra.mxu1 %v6105_v50  ;;  %v6106_v10 = vpack.c.bf16 %v6051_v13, %v6050_v29  ;;  %v16624_v13 = vld [vmem:[#allocation62_spill] sm:$0xff] }
 0x3d3   : > { %v14489_v9 = vadd.f32 %v4704_v55, %v4431_v20  ;;  %6323 = vmatprep.mubr.bf16.mxu1 %v16347_v11  ;;  %v4710_v48 = vpop.f32.mrf.mxu0  ;;  %v16617_v20 = vld [vmem:[#allocation57_spill] sm:$0xff] }
 0x3d4   : > { %v4433_v53 = vpop.f32.mrf.mxu1 }
 0x3d5   : > { %16612 = vst [vmem:[#allocation52_spill] sm:$0xff] %v14489_v9  ;;  %v14494_v60 = vadd.f32 %v4706_v54, %v4433_v53  ;;  %v16619_v54 = vld [vmem:[#allocation33_spill] sm:$0xff] }
 0x3d6   : > { %v4435_v41 = vpop.f32.mrf.mxu1  ;;  %v6053_v53 = vcombine.low %v16619_v54, %v16544_v19  ;;  %v16630_v54 = vld [vmem:[#allocation39_spill] sm:$0xff] }
 0x3d7   : > { %v14498_v38 = vadd.f32 %v4708_v42, %v4435_v41  ;;  %v16622_v41 = vld [vmem:[#allocation32_spill] sm:$0xff] }
 0x3d8   : > { %v4437_v43 = vpop.f32.mrf.mxu1  ;;  %v6052_v29 = vcombine.low %v16623_v7, %v16622_v41  ;;  %v16634_v7 = vld [vmem:[#allocation37_spill] sm:$0xff] }
 0x3d9   : > { %v14500_v55 = vadd.f32 %v4710_v48, %v4437_v43 }
 0x3da   : > { %v5150_v50 = vpop.f32.mrf.mxu1  ;;  %6324 = vmatmul.mubr.bf16.gmra.mxu1 %v6106_v10  ;;  %v6107_v10 = vpack.c.bf16 %v6053_v53, %v6052_v29 }
 0x3db   : > { %16616 = vst [vmem:[#allocation54_spill] sm:$0xff] %v14500_v55  ;;  %v14503_v9 = vadd.f32 %v5150_v50, %v16617_v20  ;;  %6333 = vmatprep.mubr.bf16.mxu1 %v16347_v11  ;;  %v16627_v20 = vld [vmem:[#allocation65_spill] sm:$0xff] }
 0x3dc   : > { %v5152_v47 = vpop.f32.mrf.mxu1 }
 0x3dd   : > { %16618 = vst [vmem:[#allocation55_spill] sm:$0xff] %v14503_v9  ;;  %v14509_v39 = vadd.f32 %v5152_v47, %v16620_v44  ;;  %v16629_v47 = vld [vmem:[#allocation41_spill] sm:$0xff] }
 0x3de   : > { %v5154_v42 = vpop.f32.mrf.mxu1  ;;  %v6055_v44 = vcombine.low %v16630_v54, %v16629_v47 }
 0x3df   : > { %16621 = vst [vmem:[#allocation51_spill] sm:$0xff] %v14509_v39  ;;  %v14514_v48 = vadd.f32 %v5154_v42, %v16624_v13  ;;  %v16631_v39 = vld [vmem:[#allocation56_spill] sm:$0xff]  ;;  %v16633_v42 = vld [vmem:[#allocation38_spill] sm:$0xff] }
 0x3e0   : > { %v14516_v43 = vpop.f32.mrf.mxu1  ;;  %v6054_v13 = vcombine.low %v16634_v7, %v16633_v42 }
 0x3e1   : > { %16625 = vst [vmem:[#allocation78_spill] sm:$0xff] %v14514_v48  ;;  %16626 = vst [vmem:[#allocation77_spill] sm:$0xff] %v14516_v43  ;;  %v16635_v48 = vld [vmem:[#allocation67_spill] sm:$0xff] }
 0x3e2   : > { %v5160_v50 = vpop.f32.mrf.mxu1  ;;  %6334 = vmatmul.mubr.bf16.gmra.mxu1 %v6107_v10  ;;  %v6108_v10 = vpack.c.bf16 %v6055_v44, %v6054_v13 }
 0x3e3   : > { %v14519_v9 = vadd.f32 %v5160_v50, %v16627_v20  ;;  %6343 = vmatprep.mubr.bf16.mxu1 %v16347_v11  ;;  %v16637_v20 = vld [vmem:[#allocation70_spill] sm:$0xff] }
 0x3e4   : > { %v5162_v19 = vpop.f32.mrf.mxu1 }
 0x3e5   : > { %16628 = vst [vmem:[#allocation76_spill] sm:$0xff] %v14519_v9  ;;  %v14525_v55 = vadd.f32 %v5162_v19, %v16631_v39  ;;  %v16639_v39 = vld [vmem:[#allocation47_spill] sm:$0xff]  ;;  %v16640_v19 = vld [vmem:[#allocation45_spill] sm:$0xff] }
 0x3e6   : > { %v5164_v41 = vpop.f32.mrf.mxu1  ;;  %v6057_v54 = vcombine.low %v16640_v19, %v16639_v39 }
 0x3e7   : > { %16632 = vst [vmem:[#allocation75_spill] sm:$0xff] %v14525_v55  ;;  %v14530_v53 = vadd.f32 %v5164_v41, %v16635_v48  ;;  %v16641_v55 = vld [vmem:[#allocation61_spill] sm:$0xff]  ;;  %v16642_v48 = vld [vmem:[#allocation44_spill] sm:$0xff]  ;;  %v16643_v41 = vld [vmem:[#allocation43_spill] sm:$0xff] }
 0x3e8   : > { %v14532_v29 = vpop.f32.mrf.mxu1  ;;  %v6056_v7 = vcombine.low %v16643_v41, %v16642_v48 }
 0x3e9   : > { %16636 = vst [vmem:[#allocation83_spill] sm:$0xff] %v14530_v53  ;;  %v16644_v53 = vld [vmem:[#allocation74_spill] sm:$0xff] }
 0x3ea   : > { %v5170_v50 = vpop.f32.mrf.mxu1  ;;  %6344 = vmatmul.mubr.bf16.gmra.mxu1 %v6108_v10  ;;  %v6109_v10 = vpack.c.bf16 %v6057_v54, %v6056_v7 }
 0x3eb   : > { %v14535_v9 = vadd.f32 %v5170_v50, %v16637_v20  ;;  %6353 = vmatprep.mubr.bf16.mxu1 %v16347_v11  ;;  %v16645_v20 = vld [vmem:[#allocation71_spill] sm:$0xff] }
 0x3ec   : > { %v5172_v47 = vpop.f32.mrf.mxu1 }
 0x3ed   : > { %16638 = vst [vmem:[#allocation81_spill] sm:$0xff] %v14535_v9  ;;  %v14541_v43 = vadd.f32 %v5172_v47, %v16641_v55  ;;  %v6059_v55 = vcombine.low %v13632_v22, %v13653_v59  ;;  %v16646_v47 = vld [vmem:[#allocation72_spill] sm:$0xff]  ;;  %v6061_v59 = vcombine.low %v13688_v14, %v16578_v61  ;;  %v6063_v61 = vcombine.low %v13740_v6, %v13755_v31  ;;  %v16660_v6 = vld [vmem:[#allocation30_spill] sm:$0xff] }
 0x3ee   : > { %v5174_v42 = vpop.f32.mrf.mxu1 }
 0x3ef   : > { %v14546_v44 = vadd.f32 %v5174_v42, %v16644_v53  ;;  %v6058_v53 = vcombine.low %v16569_v40, %v16571_v57  ;;  %v16647_v42 = vld [vmem:[#allocation82_spill] sm:$0xff]  ;;  %v16651_v57 = vld [vmem:[#allocation53_spill] sm:$0xff] }
 0x3f0   : > { %v14548_v13 = vpop.f32.mrf.mxu1 }
 0x3f1   : > { %v6110_v7 = vpack.c.bf16 %v6059_v55, %v6058_v53 }
 0x3f2   : > { %v5180_v50 = vpop.f32.mrf.mxu1  ;;  %6354 = vmatmul.mubr.bf16.gmra.mxu1 %v6109_v10 }
 0x3f3   : > { %v14551_v9 = vadd.f32 %v5180_v50, %v16645_v20  ;;  %6363 = vmatprep.mubr.bf16.mxu1 %v16347_v11  ;;  %v16648_v50 = vld [vmem:[#allocation6_spill] sm:$0xff] }
 0x3f4   : > { %v5182_v39 = vpop.f32.mrf.mxu1 }
 0x3f5   : > { %v14557_v19 = vadd.f32 %v5182_v39, %v16646_v47  ;;  %v16650_v39 = vld [vmem:[#allocation10_spill] sm:$0xff] }
 0x3f6   : > { %v5184_v48 = vpop.f32.mrf.mxu1 }
 0x3f7   : > { %v14562_v54 = vadd.f32 %v5184_v48, %v16647_v42  ;;  %v6060_v48 = vcombine.low %v16651_v57, %v16580_v51  ;;  %v16652_v42 = vld [vmem:[#allocation12_spill] sm:$0xff]  ;;  %v16657_v57 = vld [vmem:[#allocation35_spill] sm:$0xff] }
 0x3f8   : > { %v14564_v41 = vpop.f32.mrf.mxu1 }
 0x3fa   : > { %v5190_v10 = vpop.f32.mrf.mxu1  ;;  %6364 = vmatmul.mubr.bf16.gmra.mxu1 %v6110_v7  ;;  %v6111_v7 = vpack.c.bf16 %v6061_v59, %v6060_v48  ;;  %v16658_v59 = vld [vmem:[#allocation24_spill] sm:$0xff] }
 0x3fb   : > { %v14567_v20 = vadd.f32 %v5190_v10, %v16648_v50  ;;  %6373 = vmatprep.mubr.bf16.mxu1 %v16347_v11  ;;  %v16654_v50 = vld [vmem:[#allocation22_spill] sm:$0xff]  ;;  %v4611_v48 = vadd.f32 %v16658_v59, %v16657_v57  ;;  %v16663_v57 = vld [vmem:[#allocation36_spill] sm:$0xff] }
 0x3fc   : > { %v5192_v22 = vpop.f32.mrf.mxu1 }
 0x3fd   : > { %16649 = vst [vmem:[#allocation80_spill] sm:$0xff] %v14567_v20  ;;  %v14573_v47 = vadd.f32 %v5192_v22, %v16650_v39  ;;  %v16656_v22 = vld [vmem:[#allocation29_spill] sm:$0xff] }
 0x3fe   : > { %v5194_v40 = vpop.f32.mrf.mxu1 }
 0x3ff   : > { %v14578_v55 = vadd.f32 %v5194_v40, %v16652_v42  ;;  %v6062_v40 = vcombine.low %v13718_v27, %v13728_v0  ;;  %v16659_v42 = vld [vmem:[#allocation28_spill] sm:$0xff]  ;;  %v6065_v27 = vcombine.low %v13786_v35, %v13797_v46  ;;  %v16661_v0 = vld [vmem:[#allocation34_spill] sm:$0xff] }
 0x400   : > { %v14580_v53 = vpop.f32.mrf.mxu1  ;;  %v16665_v35 = vld [vmem:[#allocation46_spill] sm:$0xff] }
 0x401   : > { %16653 = vst [vmem:[#allocation86_spill] sm:$0xff] %v14578_v55 }
 0x402   : > { %v5200_v10 = vpop.f32.mrf.mxu1  ;;  %6374 = vmatmul.mubr.bf16.gmra.mxu1 %v6111_v7 }
 0x403   : > { %v14583_v20 = vadd.f32 %v5200_v10, %v16654_v50  ;;  %6383 = vmatprep.mubr.bf16.mxu1 %v16347_v11  ;;  %v6112_v50 = vpack.c.bf16 %v6063_v61, %v6062_v40  ;;  %v6064_v61 = vcombine.low %v13767_v49, %v13777_v12  ;;  %v16662_v40 = vld [vmem:[#allocation42_spill] sm:$0xff]  ;;  %v14624_v49 = vpop.f32.mrf.mxu0 }
 0x404   : > { %v5202_v14 = vpop.f32.mrf.mxu1  ;;  %v4621_v59 = vadd.f32 %v16663_v57, %v16662_v40  ;;  %v16667_v40 = vld [vmem:[#allocation49_spill] sm:$0xff]  ;;  %v16668_v57 = vld [vmem:[#allocation50_spill] sm:$0xff] }
 0x405   : > { %16655 = vst [vmem:[#allocation85_spill] sm:$0xff] %v14583_v20  ;;  %v14589_v39 = vadd.f32 %v5202_v14, %v16656_v22 }
 0x406   : > { %v5204_v51 = vpop.f32.mrf.mxu1 }
 0x407   : > { %v14596_v7 = vadd.f32 %v5204_v51, %v16659_v42 }
 0x408   : > { %v5206_v10 = vpop.f32.mrf.mxu1 }
 0x409   : > { %v14598_v20 = vadd.f32 %v5206_v10, %v4611_v48  ;;  %v16664_v48 = vld [vmem:[#allocation40_spill] sm:$0xff]  ;;  %v6113_v10 = vpack.c.bf16 %v6065_v27, %v6064_v61 }
 0x40a   : > { %v5210_v55 = vpop.f32.mrf.mxu1  ;;  %6384 = vmatmul.mubr.bf16.gmra.mxu1 %v6112_v50 }
 0x40b   : > { %v14601_v31 = vadd.f32 %v5210_v55, %v16660_v6  ;;  %6393 = vmatprep.mubr.bf16.mxu1 %v16347_v11 }
 0x40c   : > { %v5212_v14 = vpop.f32.mrf.mxu1 }
 0x40d   : > { %v14607_v22 = vadd.f32 %v5212_v14, %v16661_v0  ;;  %v16666_v0 = vld [vmem:[#allocation48_spill] sm:$0xff] }
 0x40e   : > { %v5214_v51 = vpop.f32.mrf.mxu1 }
 0x40f   : > { %v14614_v42 = vadd.f32 %v5214_v51, %v16664_v48  ;;  %v4631_v51 = vadd.f32 %v16667_v40, %v16666_v0 }
 0x410   : > { %v5216_v55 = vpop.f32.mrf.mxu1 }
 0x411   : > { %v14616_v11 = vadd.f32 %v5216_v55, %v4621_v59  ;;  %v14633_v59 = vpop.f32.mrf.mxu0 }
 0x412   : > { %v5220_v50 = vpop.f32.mrf.mxu1  ;;  %6394 = vmatmul.mubr.bf16.gmra.mxu1 %v6113_v10 }
 0x413   : > { %v14619_v46 = vadd.f32 %v5220_v50, %v16665_v35  ;;  %v14641_v35 = vpop.f32.mrf.mxu0 }
 0x414   : > { %v5222_v6 = vpop.f32.mrf.mxu1 }
 0x415   : > { %v14622_v14 = vadd.f32 %v5222_v6, %v14317_v1 }
 0x416   : > { %v5224_v12 = vpop.f32.mrf.mxu1 }
 0x417   : > { %v14629_v48 = vadd.f32 %v5224_v12, %v16668_v57 }
 0x418   : > { %v5226_v27 = vpop.f32.mrf.mxu1 }
 0x419   : > { %v14631_v61 = vadd.f32 %v5226_v27, %v4631_v51  ;;  %v14649_v51 = vpop.f32.mrf.mxu0 }
 0x41a   : > { %v5230_v55 = vpop.f32.mrf.mxu1 }
 0x41b   : > { %v14636_v10 = vadd.f32 %v5230_v55, %v14355_v2  ;;  %v14657_v55 = vpop.f32.mrf.mxu0 }
 0x41c   : > { %v5232_v1 = vpop.f32.mrf.mxu1 }
 0x41d   : > { %v14639_v50 = vadd.f32 %v5232_v1, %v14365_v45 }
 0x41e   : > { %v5234_v6 = vpop.f32.mrf.mxu1 }
 0x41f   : > { %v14644_v0 = vadd.f32 %v5234_v6, %v14374_v28 }
 0x420   : > { %v5236_v12 = vpop.f32.mrf.mxu1 }
 0x421   : > { %16669 = vst [vmem:[#allocation84_spill] sm:$0xff] %v14644_v0  ;;  %v14647_v40 = vadd.f32 %v5236_v12, %v14385_v56  ;;  %v14665_v12 = vpop.f32.mrf.mxu0 }
 0x422   : > { %v5240_v57 = vpop.f32.mrf.mxu1 }
 0x423   : > { %16670 = vst [vmem:[#allocation87_spill] sm:$0xff] %v14647_v40  ;;  %v14652_v2 = vadd.f32 %v5240_v57, %v14399_v62 }
 0x424   : > { %v5242_v27 = vpop.f32.mrf.mxu1 }
 0x425   : > { %16671 = vst [vmem:[#allocation11_spill] sm:$0xff] %v14652_v2  ;;  %v14655_v45 = vadd.f32 %v5242_v27, %v14403_v18  ;;  %v14673_v27 = vpop.f32.mrf.mxu0 }
 0x426   : > { %v5244_v1 = vpop.f32.mrf.mxu1 }
 0x427   : > { %16672 = vst [vmem:[#allocation9_spill] sm:$0xff] %v14655_v45  ;;  %v14660_v28 = vadd.f32 %v5244_v1, %v14405_v30 }
 0x428   : > { %v5246_v6 = vpop.f32.mrf.mxu1 }
 0x429   : > { %16673 = vst [vmem:[#allocation8_spill] sm:$0xff] %v14660_v28  ;;  %v14663_v56 = vadd.f32 %v5246_v6, %v14407_v26  ;;  %v14681_v6 = vpop.f32.mrf.mxu0 }
 0x42a   : > { %v5250_v40 = vpop.f32.mrf.mxu1 }
 0x42b   : > { %16674 = vst [vmem:[#allocation7_spill] sm:$0xff] %v14663_v56  ;;  %v14668_v62 = vadd.f32 %v5250_v40, %v14414_v16 }
 0x42c   : > { %v5252_v57 = vpop.f32.mrf.mxu1 }
 0x42d   : > { %16675 = vst [vmem:[#allocation17_spill] sm:$0xff] %v14668_v62  ;;  %v14671_v18 = vadd.f32 %v5252_v57, %v14416_v8  ;;  %v14689_v57 = vpop.f32.mrf.mxu0 }
 0x42e   : > { %v5254_v45 = vpop.f32.mrf.mxu1 }
 0x42f   : > { %16676 = vst [vmem:[#allocation15_spill] sm:$0xff] %v14671_v18  ;;  %v14676_v30 = vadd.f32 %v5254_v45, %v14421_v32 }
 0x430   : > { %v5256_v1 = vpop.f32.mrf.mxu1 }
 0x431   : > { %16677 = vst [vmem:[#allocation14_spill] sm:$0xff] %v14676_v30  ;;  %v14679_v26 = vadd.f32 %v5256_v1, %v14425_v23  ;;  %v14697_v1 = vpop.f32.mrf.mxu0  ;;  %v16706_v30 = vld [vmem:[#allocation66_spill] sm:$0xff] }
 0x432   : > { %v5260_v56 = vpop.f32.mrf.mxu1 }
 0x433   : > { %16678 = vst [vmem:[#allocation13_spill] sm:$0xff] %v14679_v26  ;;  %v14684_v16 = vadd.f32 %v5260_v56, %v14430_v33 }
 0x434   : > { %v5262_v40 = vpop.f32.mrf.mxu1 }
 0x435   : > { %16679 = vst [vmem:[#allocation23_spill] sm:$0xff] %v14684_v16  ;;  %v14687_v8 = vadd.f32 %v5262_v40, %v14434_v25  ;;  %v14705_v40 = vpop.f32.mrf.mxu0  ;;  %v16704_v16 = vld [vmem:[#allocation54_spill] sm:$0xff] }
 0x436   : > { %v5264_v18 = vpop.f32.mrf.mxu1 }
 0x437   : > { %16680 = vst [vmem:[#allocation21_spill] sm:$0xff] %v14687_v8  ;;  %v14692_v32 = vadd.f32 %v5264_v18, %v14436_v5 }
 0x438   : > { %v5266_v45 = vpop.f32.mrf.mxu1 }
 0x439   : > { %16681 = vst [vmem:[#allocation20_spill] sm:$0xff] %v14692_v32  ;;  %v14695_v23 = vadd.f32 %v5266_v45, %v14438_v52  ;;  %v14713_v45 = vpop.f32.mrf.mxu0 }
 0x43a   : > { %v5270_v26 = vpop.f32.mrf.mxu1 }
 0x43b   : > { %16682 = vst [vmem:[#allocation19_spill] sm:$0xff] %v14695_v23  ;;  %v14700_v33 = vadd.f32 %v5270_v26, %v14445_v63 }
 0x43c   : > { %v5272_v56 = vpop.f32.mrf.mxu1 }
 0x43d   : > { %16683 = vst [vmem:[#allocation27_spill] sm:$0xff] %v14700_v33  ;;  %v14703_v25 = vadd.f32 %v5272_v56, %v14447_v17  ;;  %v11106_v17 = vld [vmem:[%s16116_s5 + $0x78] sm:$0xff]   ;;  %v6536_v33 = vlaneseq }
 0x43e   : > { %v5274_v8 = vpop.f32.mrf.mxu1  ;;  %10473 = vmatprep.subr.bf16.mxu0 %v11106_v17 }
 0x43f   : > { %16684 = vst [vmem:[#allocation26_spill] sm:$0xff] %v14703_v25  ;;  %v14708_v5 = vadd.f32 %v5274_v8, %v14452_v15  ;;  %v14724_v15 = vpop.f32.mrf.mxu0  ;;  %10474 = vmatpush3.bf16.msra.mxu0 %v11106_v17  ;;  %v6537_v32 = vshrl.u32 %v6536_v33, 7 }
 0x440   : > { %v5276_v18 = vpop.f32.mrf.mxu1 }
 0x441   : > { %16685 = vst [vmem:[#allocation25_spill] sm:$0xff] %v14708_v5  ;;  %v14711_v52 = vadd.f32 %v5276_v18, %v14456_v21 }
 0x442   : > { %v5280_v23 = vpop.f32.mrf.mxu1 }
 0x443   : > { %16686 = vst [vmem:[#allocation57_spill] sm:$0xff] %v14711_v52  ;;  %v14716_v63 = vadd.f32 %v5280_v23, %v14461_v24  ;;  %v14732_v23 = vpop.f32.mrf.mxu0 }
 0x444   : > { %v5282_v26 = vpop.f32.mrf.mxu1 }
 0x445   : > { %16687 = vst [vmem:[#allocation33_spill] sm:$0xff] %v14716_v63  ;;  %v14722_v56 = vadd.f32 %v5282_v26, %v14465_v34 }
 0x446   : > { %v5284_v8 = vpop.f32.mrf.mxu1 }
 0x447   : > { %16688 = vst [vmem:[#allocation59_spill] sm:$0xff] %v14722_v56  ;;  %v14727_v21 = vadd.f32 %v5284_v8, %v14467_v36  ;;  %v5845_v56 = vpop.f32.mrf.mxu0  ;;  %v16694_v8 = vld [vmem:[#allocation60_spill] sm:$0xff] }
 0x448   : > { %v5286_v18 = vpop.f32.mrf.mxu1 }
 0x449   : > { %16689 = vst [vmem:[#allocation32_spill] sm:$0xff] %v14727_v21  ;;  %v14730_v24 = vadd.f32 %v5286_v18, %v14469_v58  ;;  %v5847_v58 = vpop.f32.mrf.mxu0 }
 0x44a   : > { %v5290_v63 = vpop.f32.mrf.mxu1 }
 0x44b   : > { %16690 = vst [vmem:[#allocation31_spill] sm:$0xff] %v14730_v24  ;;  %v14735_v52 = vadd.f32 %v5290_v63, %v14476_v3  ;;  %v16696_v24 = vld [vmem:[#allocation52_spill] sm:$0xff]  ;;  %v11214_v63 = vmov 1983009808  }
 0x44c   : > { %v5292_v34 = vpop.f32.mrf.mxu1 }
 0x44d   : > { %16691 = vst [vmem:[#allocation62_spill] sm:$0xff] %v14735_v52  ;;  %v14738_v26 = vadd.f32 %v5292_v34, %v14478_v4  ;;  %v6534_v52 = vunpack.c.l.s4 %v11214_v63  ;;  %v5851_v34 = vpop.f32.mrf.mxu0 }
 0x44e   : > { %v5294_v5 = vpop.f32.mrf.mxu1 }
 0x44f   : > { %16692 = vst [vmem:[#allocation65_spill] sm:$0xff] %v14738_v26  ;;  %v14741_v17 = vadd.f32 %v5294_v5, %v14481_v37  ;;  %v16700_v5 = vld [vmem:[#allocation63_spill] sm:$0xff]  ;;  %v5853_v28 = vpop.f32.mrf.mxu0 }
 0x450   : > { %v5296_v36 = vpop.f32.mrf.mxu1 }
 0x451   : > { %16693 = vst [vmem:[#allocation41_spill] sm:$0xff] %v14741_v17  ;;  %v14744_v21 = vadd.f32 %v5296_v36, %v16694_v8  ;;  %v16701_v36 = vld [vmem:[#allocation58_spill] sm:$0xff]  ;;  %v6535_v17 = vunpack.c.0.s8 %v6534_v52  ;;  %v16711_v52 = vld [vmem:[#allocation55_spill] sm:$0xff] }
 0x452   : > { %v5300_v18 = vpop.f32.mrf.mxu1  ;;  %v4561_v8 = vadd.f32 %v16701_v36, %v16700_v5  ;;  %v5970_v33 = vadd.f32 %v14624_v49, %v16711_v52  ;;  %v16712_v36 = vld [vmem:[#allocation51_spill] sm:$0xff] }
 0x453   : > { %16695 = vst [vmem:[#allocation39_spill] sm:$0xff] %v14744_v21  ;;  %v14747_v25 = vadd.f32 %v5300_v18, %v16696_v24  ;;  %v16702_v24 = vld [vmem:[#allocation68_spill] sm:$0xff] }
 0x454   : > { %v5302_v3 = vpop.f32.mrf.mxu1  ;;  %v16703_v18 = vld [vmem:[#allocation64_spill] sm:$0xff] }
 0x455   : > { %16697 = vst [vmem:[#allocation56_spill] sm:$0xff] %v14747_v25  ;;  %v14750_v4 = vadd.f32 %v5302_v3, %v14494_v60  ;;  %v4571_v25 = vadd.f32 %v16703_v18, %v16702_v24  ;;  %v16707_v60 = vld [vmem:[#allocation69_spill] sm:$0xff]  ;;  %v5971_v24 = vadd.f32 %v14633_v59, %v16712_v36  ;;  %v16716_v36 = vld [vmem:[#allocation76_spill] sm:$0xff] }
 0x456   : > { %v5304_v26 = vpop.f32.mrf.mxu1  ;;  %v4581_v3 = vadd.f32 %v16707_v60, %v16706_v30 }
 0x457   : > { %16698 = vst [vmem:[#allocation38_spill] sm:$0xff] %v14750_v4  ;;  %v14753_v37 = vadd.f32 %v5304_v26, %v14498_v38  ;;  %v16708_v4 = vld [vmem:[#allocation77_spill] sm:$0xff]  ;;  %v16709_v26 = vld [vmem:[#allocation79_spill] sm:$0xff]  ;;  %v5316_v5 = vadd.f32 %v14532_v29, %v4571_v25  ;;  %v5855_v25 = vpop.f32.mrf.mxu0 }
 0x458   : > { %v5306_v21 = vpop.f32.mrf.mxu1  ;;  %v5312_v62 = vadd.f32 %v16708_v4, %v4561_v8  ;;  %v5320_v30 = vadd.f32 %v14548_v13, %v4581_v3  ;;  %v14775_v4 = vsub.s32 %v6535_v17, %v6537_v32  ;;  %v16717_v13 = vld [vmem:[#allocation75_spill] sm:$0xff]  ;;  %v16719_v3 = vld [vmem:[#allocation81_spill] sm:$0xff] }
 0x459   : > { %16699 = vst [vmem:[#allocation37_spill] sm:$0xff] %v14753_v37  ;;  %v14760_v63 = vadd.f32 %v5306_v21, %v16704_v16  ;;  %v16710_v37 = vld [vmem:[#allocation73_spill] sm:$0xff]  ;;  %v16713_v16 = vld [vmem:[#allocation18_spill] sm:$0xff]  ;;  %v16714_v21 = vld [vmem:[#allocation16_spill] sm:$0xff]  ;;  %v5975_v32 = vadd.f32 %v14665_v12, %v16717_v13  ;;  %v14805_v12 = vadd.f32 %v14705_v40, %v14546_v44  ;;  %v14822_v44 = vadd.f32 %v5845_v56, %v14562_v54 }
 0x45a   : > { %v6245_v38 = vpop.f32.mrf.mxu1  ;;  %v4591_v2 = vadd.f32 %v16710_v37, %v16709_v26  ;;  %v4601_v18 = vadd.f32 %v16714_v21, %v16713_v16  ;;  %v16715_v26 = vld [vmem:[#allocation78_spill] sm:$0xff]  ;;  %v5973_v59 = vadd.f32 %v14649_v51, %v5312_v62  ;;  %v14784_v16 = vadd.f32 %v14657_v55, %v16716_v36  ;;  %v16720_v40 = vld [vmem:[#allocation80_spill] sm:$0xff] }
 0x45b   : > { %16705 = vst [vmem:[#allocation67_spill] sm:$0xff] %v14760_v63  ;;  %v6404_v63 = vadd.f32 %v6245_v38, %v5970_v33  ;;  %v5972_v29 = vadd.f32 %v14641_v35, %v16715_v26  ;;  %v14793_v35 = vadd.f32 %v14681_v6, %v5316_v5  ;;  %v14801_v55 = vadd.f32 %v14697_v1, %v14541_v43  ;;  %v5857_v5 = vpop.f32.mrf.mxu0 }
 0x45c   : > { %v6247_v60 = vpop.f32.mrf.mxu1  ;;  %v5324_v8 = vadd.f32 %v14564_v41, %v4591_v2  ;;  %v5328_v49 = vadd.f32 %v14580_v53, %v4601_v18  ;;  %v16718_v41 = vld [vmem:[#allocation83_spill] sm:$0xff]  ;;  %v14797_v53 = vadd.f32 %v14689_v57, %v16719_v3  ;;  %v14808_v62 = vadd.f32 %v14713_v45, %v5320_v30 }
 0x45d   : > { %v6405_v37 = vadd.f32 %v6247_v60, %v5971_v24  ;;  %v14790_v2 = vadd.f32 %v14673_v27, %v16718_v41  ;;  %v14812_v27 = vadd.f32 %v14724_v15, %v14551_v9  ;;  %v14819_v43 = vadd.f32 %v14732_v23, %v14557_v19  ;;  %v16721_v19 = vld [vmem:[#allocation86_spill] sm:$0xff] }
 0x45e   : > { %v6249_v52 = vpop.f32.mrf.mxu1  ;;  %v14824_v1 = vadd.f32 %v5847_v58, %v5324_v8  ;;  %v14827_v9 = vadd.f32 %v5851_v34, %v16720_v40  ;;  %v14832_v60 = vadd.f32 %v5853_v28, %v14573_v47  ;;  %v14835_v23 = vadd.f32 %v5855_v25, %v16721_v19 }
 0x45f   : > { %v6468_v17 = vmax.f32 %v6404_v63, %v6405_v37  ;;  %v6406_v63 = vadd.f32 %v6249_v52, %v5972_v29  ;;  %v14837_v54 = vadd.f32 %v5857_v5, %v5328_v49  ;;  %v5861_v37 = vpop.f32.mrf.mxu0  ;;  %v16722_v49 = vld [vmem:[#allocation85_spill] sm:$0xff] }
 0x460   : > { %v6251_v51 = vpop.f32.mrf.mxu1  ;;  %v14847_v36 = vadd.f32 %v5861_v37, %v16722_v49 }
 0x461   : > { %v6532_v6 = vcombine.high %v6468_v17, %v6468_v17  ;;  %v6539_v57 = vrot.slane %v6468_v17, %v14775_v4  ;;  %v6407_v38 = vadd.f32 %v6251_v51, %v5973_v59 }
 0x462   : > { %v14815_v33 = vpop.f32.mrf.mxu1 }
 0x463   : > { %v6546_v45 = vrot.slane %v6532_v6, %v14775_v4  ;;  %v6547_v15 = vcombine.high %v6539_v57, %v6539_v57  ;;  %v7204_v24 = vsel %vm1680_vm1, %v6539_v57, -inf  ;;  %v6469_v21 = vmax.f32 %v6406_v63, %v6407_v38 }
 0x464   : > { %v7205_v18 = vrot.slane %v7204_v24, 4  ;;  %v6257_v30 = vpop.f32.mrf.mxu1 }
 0x465   : > { %v6548_v56 = vcombine.high %v6546_v45, %v6546_v45  ;;  %v7211_v58 = vsel %vm1680_vm1, %v6547_v15, -inf  ;;  %v7218_v34 = vsel %vm1680_vm1, %v6546_v45, -inf  ;;  %v6549_v8 = vcombine.high %v6469_v21, %v6469_v21 }
 0x466   : > { %v7206_v26 = vmax.f32 %v7204_v24, %v7205_v18  ;;  %v7212_v29 = vrot.slane %v7211_v58, 4  ;;  %v7219_v52 = vrot.slane %v7218_v34, 4  ;;  %v6556_v59 = vrot.slane %v6469_v21, %v14775_v4 }
 0x467   : > { %v7225_v47 = vsel %vm1680_vm1, %v6548_v56, -inf  ;;  %v6563_v28 = vrot.slane %v6549_v8, %v14775_v4  ;;  %v14844_v25 = vadd.f32 %v6257_v30, %v5975_v32 }
 0x468   : > { %v7207_v13 = vrot.slane %v7206_v26, 2  ;;  %v7213_v17 = vmax.f32 %v7211_v58, %v7212_v29  ;;  %v7220_v41 = vmax.f32 %v7218_v34, %v7219_v52  ;;  %v7226_v3 = vrot.slane %v7225_v47, 4  ;;  %v14856_v58 = vld [vmem:[%s16115_s4] ss:$0 sm:$0xff] }
 0x469   : > { %v6564_v51 = vcombine.high %v6556_v59, %v6556_v59  ;;  %v6565_v6 = vcombine.high %v6563_v28, %v6563_v28  ;;  %v7232_v57 = vsel %vm1680_vm1, %v6556_v59, -inf  ;;  %v7246_v63 = vsel %vm1680_vm1, %v6563_v28, -inf }
 0x46a   : > { %v7208_v38 = vmax.f32 %v7206_v26, %v7207_v13  ;;  %v7214_v5 = vrot.slane %v7213_v17, 2  ;;  %v7221_v40 = vrot.slane %v7220_v41, 2  ;;  %v7227_v45 = vmax.f32 %v7225_v47, %v7226_v3 }
 0x46b   : > { %v7233_v15 = vrot.slane %v7232_v57, 4  ;;  %v7239_v32 = vsel %vm1680_vm1, %v6564_v51, -inf  ;;  %v7247_v24 = vrot.slane %v7246_v63, 4  ;;  %v7253_v21 = vsel %vm1680_vm1, %v6565_v6, -inf }
 0x46c   : > { %v7209_v18 = vrot.slane %v7208_v38, 1  ;;  %v7215_v30 = vmax.f32 %v7213_v17, %v7214_v5  ;;  %v7222_v19 = vmax.f32 %v7220_v41, %v7221_v40  ;;  %v7228_v56 = vrot.slane %v7227_v45, 2 }
 0x46d   : > { %v7234_v34 = vmax.f32 %v7232_v57, %v7233_v15  ;;  %v7240_v8 = vrot.slane %v7239_v32, 4  ;;  %v7248_v37 = vmax.f32 %v7246_v63, %v7247_v24  ;;  %v7254_v26 = vrot.slane %v7253_v21, 4 }
 0x46e   : > { %v7210_v29 = vmax.f32 %v7208_v38, %v7209_v18  ;;  %v7216_v52 = vrot.slane %v7215_v30, 1  ;;  %v7223_v59 = vrot.slane %v7222_v19, 1  ;;  %v7229_v47 = vmax.f32 %v7227_v45, %v7228_v56 }
 0x46f   : > { %v7235_v28 = vrot.slane %v7234_v34, 2  ;;  %v7241_v49 = vmax.f32 %v7239_v32, %v7240_v8  ;;  %v7249_v13 = vrot.slane %v7248_v37, 2  ;;  %v7255_v3 = vmax.f32 %v7253_v21, %v7254_v26  ;;  %v6259_v21 = vpop.f32.mrf.mxu1 }
 0x470   : > { %v7217_v17 = vmax.f32 %v7215_v30, %v7216_v52  ;;  %v7224_v41 = vmax.f32 %v7222_v19, %v7223_v59  ;;  %v7230_v51 = vrot.slane %v7229_v47, 1  ;;  %v8107_v6 = vadd.f32 %v14856_v58, %v7210_v29 }
 0x471   : > { %v7236_v5 = vmax.f32 %v7234_v34, %v7235_v28  ;;  %v7242_v40 = vrot.slane %v7241_v49, 2  ;;  %v7250_v0 = vmax.f32 %v7248_v37, %v7249_v13  ;;  %v7256_v57 = vrot.slane %v7255_v3, 2  ;;  %v5863_v34 = vpop.f32.mrf.mxu0 }
 0x472   : > { %v7231_v15 = vmax.f32 %v7229_v47, %v7230_v51  ;;  %v8108_v63 = vadd.f32 %v14856_v58, %v7217_v17  ;;  %v8109_v38 = vadd.f32 %v14856_v58, %v7224_v41  ;;  %v8235_v24 = vmax.f32 %v8107_v6, 0.0  ;;  %v6261_v6 = vpop.f32.mrf.mxu1 }
 0x473   : > { %v7237_v45 = vrot.slane %v7236_v5, 1  ;;  %v7243_v18 = vmax.f32 %v7241_v49, %v7242_v40  ;;  %v7251_v32 = vrot.slane %v7250_v0, 1  ;;  %v7257_v56 = vmax.f32 %v7255_v3, %v7256_v57 }
 0x474   : > { %v8110_v30 = vadd.f32 %v14856_v58, %v7231_v15  ;;  %v8236_v19 = vmax.f32 %v8108_v63, 0.0  ;;  %v8237_v8 = vmax.f32 %v8109_v38, 0.0  ;;  %v14862_v26 = vpack.c.bf16 %v8235_v24, %v8235_v24 }
 0x475   : > { %v7238_v37 = vmax.f32 %v7236_v5, %v7237_v45  ;;  %v7244_v29 = vrot.slane %v7243_v18, 1  ;;  %v7252_v52 = vmax.f32 %v7250_v0, %v7251_v32  ;;  %v7258_v59 = vrot.slane %v7257_v56, 1 }
 0x476   : > { %v8238_v47 = vmax.f32 %v8110_v30, 0.0  ;;  %v6408_v28 = vadd.f32 %v14815_v33, %v14784_v16  ;;  %v6410_v49 = vadd.f32 %v6259_v21, %v14790_v2  ;;  %v14868_v13 = vadd.f32 %v5863_v34, %v14589_v39 }
 0x477   : > { %v7245_v3 = vmax.f32 %v7243_v18, %v7244_v29  ;;  %v7259_v17 = vmax.f32 %v7257_v56, %v7258_v59  ;;  %v8111_v41 = vadd.f32 %v14856_v58, %v7238_v37  ;;  %v8113_v51 = vadd.f32 %v14856_v58, %v7252_v52 }
 0x478   : > { %v14872_v5 = vpack.c.bf16 %v8236_v19, %v8236_v19  ;;  %v14875_v40 = vpack.c.bf16 %v8237_v8, %v8237_v8  ;;  %v6470_v16 = vmax.f32 %v6408_v28, %v14844_v25  ;;  %v14880_v15 = vpack.c.bf16 %v8238_v47, %v8238_v47  ;;  %v14886_v8 = vpop.f32.mrf.mxu1 }
 0x479   : > { %v8112_v2 = vadd.f32 %v14856_v58, %v7245_v3  ;;  %v8114_v39 = vadd.f32 %v14856_v58, %v7259_v17  ;;  %v8239_v33 = vmax.f32 %v8111_v41, 0.0  ;;  %v8241_v57 = vmax.f32 %v8113_v51, 0.0 }
 0x47a   : > { %16723 = vst [vmem:[#allocation70_spill] sm:$0xff] %v14875_v40  ;;  %16724 = vst [vmem:[#allocation47_spill] sm:$0xff] %v14880_v15  ;;  %v6566_v63 = vcombine.high %v6470_v16, %v6470_v16  ;;  %v6573_v38 = vrot.slane %v6470_v16, %v14775_v4  ;;  %v6411_v24 = vadd.f32 %v6261_v6, %v14793_v35 }
 0x47b   : > { %v8240_v45 = vmax.f32 %v8112_v2, 0.0  ;;  %v8242_v18 = vmax.f32 %v8114_v39, 0.0  ;;  %v8364_v32 = vpack.c.bf16 %v8239_v33, %v8239_v33  ;;  %v8909_v56 = vpack.c.bf16 %v8241_v57, %v8241_v57  ;;  %v6267_v39 = vpop.f32.mrf.mxu1 }
 0x47c   : > { %v6580_v21 = vrot.slane %v6566_v63, %v14775_v4  ;;  %v6581_v25 = vcombine.high %v6573_v38, %v6573_v38  ;;  %v7260_v30 = vsel %vm1680_vm1, %v6573_v38, -inf  ;;  %v6471_v19 = vmax.f32 %v6410_v49, %v6411_v24  ;;  %v11107_v24 = vld [vmem:[%s16116_s5 + $0x70] sm:$0xff]  }
 0x47d   : > { %v14889_v37 = vpack.c.bf16 %v8240_v45, %v8240_v45  ;;  %v8720_v29 = vunpack.c.l.b16 %v8364_v32  ;;  %v8990_v52 = vunpack.c.l.b16 %v8909_v56  ;;  %v7261_v35 = vrot.slane %v7260_v30, 4  ;;  %10475 = vmatprep.subr.bf16.mxu0 %v11107_v24 }
 0x47e   : > { %v6582_v59 = vcombine.high %v6580_v21, %v6580_v21  ;;  %v7267_v47 = vsel %vm1680_vm1, %v6581_v25, -inf  ;;  %v7274_v28 = vsel %vm1680_vm1, %v6580_v21, -inf  ;;  %v14896_v41 = vpack.c.bf16 %v8242_v18, %v8242_v18  ;;  %10476 = vmatpush3.bf16.msra.mxu0 %v11107_v24 }
 0x47f   : > { %v7262_v51 = vmax.f32 %v7260_v30, %v7261_v35  ;;  %v7268_v6 = vrot.slane %v7267_v47, 4  ;;  %v7275_v16 = vrot.slane %v7274_v28, 4  ;;  %v14899_v33 = vrot.slane %v8720_v29, 7 }
 0x480   : > { %v7281_v2 = vsel %vm1680_vm1, %v6582_v59, -inf  ;;  %v14901_v57 = vrot.slane %v8990_v52, 7  ;;  %v6583_v38 = vcombine.high %v6471_v19, %v6471_v19  ;;  %v6590_v56 = vrot.slane %v6471_v19, %v14775_v4 }
 0x481   : > { %v7282_v63 = vrot.slane %v7281_v2, 4  ;;  %v7263_v45 = vrot.slane %v7262_v51, 2  ;;  %v7269_v32 = vmax.f32 %v7267_v47, %v7268_v6  ;;  %v7276_v18 = vmax.f32 %v7274_v28, %v7275_v16 }
 0x482   : > { %16725 = vst [vmem:[#allocation45_spill] sm:$0xff] %v14901_v57  ;;  %v6597_v30 = vrot.slane %v6583_v38, %v14775_v4  ;;  %v14910_v29 = vadd.f32 %v6267_v39, %v14801_v55  ;;  %v6598_v17 = vcombine.high %v6590_v56, %v6590_v56  ;;  %v7288_v47 = vsel %vm1680_vm1, %v6590_v56, -inf }
 0x483   : > { %v7283_v25 = vmax.f32 %v7281_v2, %v7282_v63  ;;  %v7264_v52 = vmax.f32 %v7262_v51, %v7263_v45  ;;  %v7270_v59 = vrot.slane %v7269_v32, 2  ;;  %v7277_v35 = vrot.slane %v7276_v18, 2 }
 0x484   : > { %v6599_v0 = vcombine.high %v6597_v30, %v6597_v30  ;;  %v7302_v19 = vsel %vm1680_vm1, %v6597_v30, -inf  ;;  %v7289_v2 = vrot.slane %v7288_v47, 4  ;;  %v7295_v55 = vsel %vm1680_vm1, %v6598_v17, -inf }
 0x485   : > { %v7284_v3 = vrot.slane %v7283_v25, 2  ;;  %v7265_v28 = vrot.slane %v7264_v52, 1  ;;  %v7271_v6 = vmax.f32 %v7269_v32, %v7270_v59  ;;  %v7278_v16 = vmax.f32 %v7276_v18, %v7277_v35 }
 0x486   : > { %v7303_v39 = vrot.slane %v7302_v19, 4  ;;  %v7309_v51 = vsel %vm1680_vm1, %v6599_v0, -inf  ;;  %v7290_v24 = vmax.f32 %v7288_v47, %v7289_v2  ;;  %v7296_v49 = vrot.slane %v7295_v55, 4 }
 0x487   : > { %v7285_v63 = vmax.f32 %v7283_v25, %v7284_v3  ;;  %v7266_v38 = vmax.f32 %v7264_v52, %v7265_v28  ;;  %v7272_v45 = vrot.slane %v7271_v6, 1  ;;  %v7279_v34 = vrot.slane %v7278_v16, 1 }
 0x488   : > { %v7304_v15 = vmax.f32 %v7302_v19, %v7303_v39  ;;  %v7310_v56 = vrot.slane %v7309_v51, 4  ;;  %v7291_v18 = vrot.slane %v7290_v24, 2  ;;  %v7297_v3 = vmax.f32 %v7295_v55, %v7296_v49 }
 0x489   : > { %v7286_v21 = vrot.slane %v7285_v63, 1  ;;  %v7273_v57 = vmax.f32 %v7271_v6, %v7272_v45  ;;  %v7280_v30 = vmax.f32 %v7278_v16, %v7279_v34  ;;  %v8115_v32 = vadd.f32 %v14856_v58, %v7266_v38 }
 0x48a   : > { %v7305_v25 = vrot.slane %v7304_v15, 2  ;;  %v7311_v17 = vmax.f32 %v7309_v51, %v7310_v56  ;;  %v7292_v28 = vmax.f32 %v7290_v24, %v7291_v18  ;;  %v7298_v2 = vrot.slane %v7297_v3, 2 }
 0x48b   : > { %v7287_v59 = vmax.f32 %v7285_v63, %v7286_v21  ;;  %v8116_v35 = vadd.f32 %v14856_v58, %v7273_v57  ;;  %v8117_v0 = vadd.f32 %v14856_v58, %v7280_v30  ;;  %v8243_v52 = vmax.f32 %v8115_v32, 0.0  ;;  %v6269_v30 = vpop.f32.mrf.mxu1 }
 0x48c   : > { %v7306_v19 = vmax.f32 %v7304_v15, %v7305_v25  ;;  %v7312_v39 = vrot.slane %v7311_v17, 2  ;;  %v7293_v38 = vrot.slane %v7292_v28, 1  ;;  %v7299_v21 = vmax.f32 %v7297_v3, %v7298_v2 }
 0x48d   : > { %v8118_v47 = vadd.f32 %v14856_v58, %v7287_v59  ;;  %v8244_v6 = vmax.f32 %v8116_v35, 0.0  ;;  %v8245_v34 = vmax.f32 %v8117_v0, 0.0  ;;  %v8365_v16 = vpack.c.bf16 %v8243_v52, %v8243_v52 }
 0x48e   : > { %v7307_v49 = vrot.slane %v7306_v19, 1  ;;  %v7313_v63 = vmax.f32 %v7311_v17, %v7312_v39  ;;  %v7294_v56 = vmax.f32 %v7292_v28, %v7293_v38  ;;  %v7300_v24 = vrot.slane %v7299_v21, 1 }
 0x48f   : > { %v8246_v45 = vmax.f32 %v8118_v47, 0.0  ;;  %v8413_v55 = vpack.c.bf16 %v8244_v6, %v8244_v6  ;;  %v8721_v51 = vunpack.c.l.b16 %v8365_v16  ;;  %v8910_v57 = vpack.c.bf16 %v8245_v34, %v8245_v34  ;;  %v6271_v34 = vpop.f32.mrf.mxu1 }
 0x490   : > { %v7308_v18 = vmax.f32 %v7306_v19, %v7307_v49  ;;  %v7314_v59 = vrot.slane %v7313_v63, 1  ;;  %v16726_v15 = vunpack.c.l.b16 %v14889_v37  ;;  %v8119_v0 = vadd.f32 %v14856_v58, %v7294_v56 }
 0x491   : > { %v9184_v32 = vpack.c.bf16 %v8246_v45, %v8246_v45  ;;  %v8494_v35 = vunpack.c.l.b16 %v8413_v55  ;;  %v6412_v3 = vadd.f32 %v14886_v8, %v14797_v53  ;;  %v16727_v17 = vunpack.c.l.b16 %v14896_v41 }
 0x492   : > { %v14922_v25 = vrot.slane %v16726_v15, 7  ;;  %v7301_v28 = vmax.f32 %v7299_v21, %v7300_v24  ;;  %v7315_v47 = vmax.f32 %v7313_v63, %v7314_v59  ;;  %v8121_v2 = vadd.f32 %v14856_v58, %v7308_v18 }
 0x493   : > { %v14929_v52 = vrot.slane %v16727_v17, 7  ;;  %v14932_v19 = vrot.slane %v8721_v51, 6  ;;  %v8991_v39 = vunpack.c.l.b16 %v8910_v57  ;;  %v8247_v37 = vmax.f32 %v8119_v0, 0.0 }
 0x494   : > { %v6472_v6 = vmax.f32 %v6412_v3, %v14910_v29  ;;  %v9265_v16 = vunpack.c.l.b16 %v9184_v32  ;;  %v8120_v38 = vadd.f32 %v14856_v58, %v7301_v28  ;;  %v8122_v53 = vadd.f32 %v14856_v58, %v7315_v47 }
 0x495   : > { %16728 = vst [vmem:[#allocation61_spill] sm:$0xff] %v14929_v52  ;;  %16729 = vst [vmem:[#allocation44_spill] sm:$0xff] %v14932_v19  ;;  %v8249_v8 = vmax.f32 %v8121_v2, 0.0  ;;  %v14937_v41 = vrot.slane %v8494_v35, 6  ;;  %v8366_v45 = vpack.c.bf16 %v8247_v37, %v8247_v37  ;;  %v6415_v57 = vadd.f32 %v6271_v34, %v14808_v62 }
 0x496   : > { %v6600_v21 = vcombine.high %v6472_v6, %v6472_v6  ;;  %v6607_v49 = vrot.slane %v6472_v6, %v14775_v4  ;;  %v8248_v63 = vmax.f32 %v8120_v38, 0.0  ;;  %v8250_v55 = vmax.f32 %v8122_v53, 0.0  ;;  %v6275_v53 = vpop.f32.mrf.mxu1 }
 0x497   : > { %v8911_v51 = vpack.c.bf16 %v8249_v8, %v8249_v8  ;;  %v8722_v56 = vunpack.c.l.b16 %v8366_v45  ;;  %v14943_v18 = vrot.slane %v8991_v39, 6  ;;  %v6414_v35 = vadd.f32 %v6269_v30, %v14805_v12 }
 0x498   : > { %v6614_v29 = vrot.slane %v6600_v21, %v14775_v4  ;;  %v6615_v32 = vcombine.high %v6607_v49, %v6607_v49  ;;  %v7316_v24 = vsel %vm1680_vm1, %v6607_v49, -inf  ;;  %v14945_v59 = vpack.c.bf16 %v8248_v63, %v8248_v63 }
 0x499   : > { %16730 = vst [vmem:[#allocation43_spill] sm:$0xff] %v14943_v18  ;;  %v7317_v15 = vrot.slane %v7316_v24, 4  ;;  %v8992_v0 = vunpack.c.l.b16 %v8911_v51  ;;  %v14950_v62 = vrot.slane %v9265_v16, 6  ;;  %v14952_v47 = vpack.c.bf16 %v8250_v55, %v8250_v55 }
 0x49a   : > { %v6616_v3 = vcombine.high %v6614_v29, %v6614_v29  ;;  %v7323_v17 = vsel %vm1680_vm1, %v6615_v32, -inf  ;;  %v7330_v28 = vsel %vm1680_vm1, %v6614_v29, -inf  ;;  %v14954_v6 = vrot.slane %v8722_v56, 5 }
 0x49b   : > { %16731 = vst [vmem:[#allocation74_spill] sm:$0xff] %v14950_v62  ;;  %16732 = vst [vmem:[#allocation71_spill] sm:$0xff] %v14952_v47  ;;  %v7318_v2 = vmax.f32 %v7316_v24, %v7317_v15  ;;  %v7324_v37 = vrot.slane %v7323_v17, 4  ;;  %v7331_v39 = vrot.slane %v7330_v28, 4  ;;  %v6473_v38 = vmax.f32 %v6414_v35, %v6415_v57  ;;  %v6277_v15 = vpop.f32.mrf.mxu1 }
 0x49c   : > { %16733 = vst [vmem:[#allocation72_spill] sm:$0xff] %v14954_v6  ;;  %v7337_v34 = vsel %vm1680_vm1, %v6616_v3, -inf  ;;  %v8495_v12 = vunpack.c.l.b16 %v14945_v59  ;;  %v14958_v21 = vrot.slane %v8992_v0, 5  ;;  %v6416_v29 = vadd.f32 %v6275_v53, %v14812_v27 }
 0x49d   : > { %v7319_v30 = vrot.slane %v7318_v2, 2  ;;  %v7325_v8 = vmax.f32 %v7323_v17, %v7324_v37  ;;  %v7338_v45 = vrot.slane %v7337_v34, 4  ;;  %v7332_v16 = vmax.f32 %v7330_v28, %v7331_v39  ;;  %v6279_v62 = vpop.f32.mrf.mxu1 }
 0x49e   : > { %16734 = vst [vmem:[#allocation82_spill] sm:$0xff] %v14958_v21  ;;  %v6617_v49 = vcombine.high %v6473_v38, %v6473_v38  ;;  %v6624_v63 = vrot.slane %v6473_v38, %v14775_v4 }
 0x49f   : > { %v7320_v55 = vmax.f32 %v7318_v2, %v7319_v30  ;;  %v7326_v51 = vrot.slane %v7325_v8, 2  ;;  %v7339_v56 = vmax.f32 %v7337_v34, %v7338_v45  ;;  %v7333_v32 = vrot.slane %v7332_v16, 2  ;;  %v6281_v21 = vpop.f32.mrf.mxu1 }
 0x4a0   : > { %v6631_v57 = vrot.slane %v6617_v49, %v14775_v4  ;;  %v6632_v24 = vcombine.high %v6624_v63, %v6624_v63  ;;  %v7344_v59 = vsel %vm1680_vm1, %v6624_v63, -inf }
 0x4a1   : > { %v7321_v35 = vrot.slane %v7320_v55, 1  ;;  %v7327_v3 = vmax.f32 %v7325_v8, %v7326_v51  ;;  %v7340_v0 = vrot.slane %v7339_v56, 2  ;;  %v7345_v17 = vrot.slane %v7344_v59, 4  ;;  %v11108_v8 = vld [vmem:[%s16116_s5 + $0x68] sm:$0xff]  }
 0x4a2   : > { %v7334_v28 = vmax.f32 %v7332_v16, %v7333_v32  ;;  %v6633_v37 = vcombine.high %v6631_v57, %v6631_v57  ;;  %v7351_v39 = vsel %vm1680_vm1, %v6632_v24, -inf  ;;  %v7358_v2 = vsel %vm1680_vm1, %v6631_v57, -inf  ;;  %10477 = vmatprep.subr.bf16.mxu0 %v11108_v8 }
 0x4a3   : > { %v7322_v34 = vmax.f32 %v7320_v55, %v7321_v35  ;;  %v7328_v38 = vrot.slane %v7327_v3, 1  ;;  %v7341_v27 = vmax.f32 %v7339_v56, %v7340_v0  ;;  %v7346_v53 = vmax.f32 %v7344_v59, %v7345_v17  ;;  %10478 = vmatpush3.bf16.msra.mxu0 %v11108_v8 }
 0x4a4   : > { %v7335_v30 = vrot.slane %v7334_v28, 1  ;;  %v7352_v45 = vrot.slane %v7351_v39, 4  ;;  %v7359_v49 = vrot.slane %v7358_v2, 4  ;;  %v7365_v63 = vsel %vm1680_vm1, %v6633_v37, -inf }
 0x4a5   : > { %v7329_v16 = vmax.f32 %v7327_v3, %v7328_v38  ;;  %v7342_v51 = vrot.slane %v7341_v27, 1  ;;  %v8123_v32 = vadd.f32 %v14856_v58, %v7322_v34  ;;  %v7347_v24 = vrot.slane %v7346_v53, 2 }
 0x4a6   : > { %v7336_v57 = vmax.f32 %v7334_v28, %v7335_v30  ;;  %v7353_v55 = vmax.f32 %v7351_v39, %v7352_v45  ;;  %v7360_v35 = vmax.f32 %v7358_v2, %v7359_v49  ;;  %v7366_v56 = vrot.slane %v7365_v63, 4 }
 0x4a7   : > { %v8124_v59 = vadd.f32 %v14856_v58, %v7329_v16  ;;  %v8251_v0 = vmax.f32 %v8123_v32, 0.0  ;;  %v7348_v17 = vmax.f32 %v7346_v53, %v7347_v24  ;;  %v6417_v37 = vadd.f32 %v6277_v15, %v14819_v43 }
 0x4a8   : > { %v8125_v52 = vadd.f32 %v14856_v58, %v7336_v57  ;;  %v7354_v47 = vrot.slane %v7353_v55, 2  ;;  %v7361_v3 = vrot.slane %v7360_v35, 2  ;;  %v7367_v38 = vmax.f32 %v7365_v63, %v7366_v56  ;;  %v6285_v63 = vpop.f32.mrf.mxu1 }
 0x4a9   : > { %v7343_v34 = vmax.f32 %v7341_v27, %v7342_v51  ;;  %v8252_v18 = vmax.f32 %v8124_v59, 0.0  ;;  %v8367_v28 = vpack.c.bf16 %v8251_v0, %v8251_v0  ;;  %v7349_v39 = vrot.slane %v7348_v17, 1 }
 0x4aa   : > { %v8253_v2 = vmax.f32 %v8125_v52, 0.0  ;;  %v7355_v30 = vmax.f32 %v7353_v55, %v7354_v47  ;;  %v7362_v45 = vmax.f32 %v7360_v35, %v7361_v3  ;;  %v7368_v49 = vrot.slane %v7367_v38, 2 }
 0x4ab   : > { %v14974_v16 = vrot.slane %v8495_v12, 5  ;;  %v7350_v53 = vmax.f32 %v7348_v17, %v7349_v39  ;;  %v6474_v32 = vmax.f32 %v6416_v29, %v6417_v37  ;;  %v6418_v43 = vadd.f32 %v6279_v62, %v14822_v44 }
 0x4ac   : > { %v8723_v15 = vunpack.c.l.b16 %v8367_v28  ;;  %v7356_v8 = vrot.slane %v7355_v30, 1  ;;  %v7363_v24 = vrot.slane %v7362_v45, 1  ;;  %v7369_v57 = vmax.f32 %v7367_v38, %v7368_v49  ;;  %v6287_v38 = vpop.f32.mrf.mxu1 }
 0x4ad   : > { %v14978_v27 = vadd.f32 %v14856_v58, %v7343_v34  ;;  %v8127_v51 = vadd.f32 %v14856_v58, %v7350_v53  ;;  %v6634_v52 = vcombine.high %v6474_v32, %v6474_v32  ;;  %v6641_v47 = vrot.slane %v6474_v32, %v14775_v4 }
 0x4ae   : > { %v14982_v55 = vpack.c.bf16 %v8252_v18, %v8252_v18  ;;  %v14984_v12 = vpack.c.bf16 %v8253_v2, %v8253_v2  ;;  %v7370_v29 = vrot.slane %v7369_v57, 1  ;;  %v6419_v44 = vadd.f32 %v6281_v21, %v14824_v1 }
 0x4af   : > { %16735 = vst [vmem:[#allocation6_spill] sm:$0xff] %v14978_v27  ;;  %v7357_v62 = vmax.f32 %v7355_v30, %v7356_v8  ;;  %v6648_v35 = vrot.slane %v6634_v52, %v14775_v4  ;;  %v6649_v56 = vcombine.high %v6641_v47, %v6641_v47  ;;  %v7372_v59 = vsel %vm1680_vm1, %v6641_v47, -inf }
 0x4b0   : > { %16736 = vst [vmem:[#allocation10_spill] sm:$0xff] %v14984_v12  ;;  %v14989_v0 = vrot.slane %v8723_v15, 4  ;;  %v7364_v17 = vmax.f32 %v7362_v45, %v7363_v24  ;;  %v8255_v37 = vmax.f32 %v8127_v51, 0.0  ;;  %v7373_v3 = vrot.slane %v7372_v59, 4 }
 0x4b1   : > { %v14991_v34 = vmax.f32 %v7369_v57, %v7370_v29  ;;  %v6650_v18 = vcombine.high %v6648_v35, %v6648_v35  ;;  %v7379_v28 = vsel %vm1680_vm1, %v6649_v56, -inf  ;;  %v7386_v39 = vsel %vm1680_vm1, %v6648_v35, -inf  ;;  %v6289_v29 = vpop.f32.mrf.mxu1 }
 0x4b2   : > { %16737 = vst [vmem:[#allocation53_spill] sm:$0xff] %v14989_v0  ;;  %v7374_v1 = vmax.f32 %v7372_v59, %v7373_v3  ;;  %v7380_v21 = vrot.slane %v7379_v28, 4  ;;  %v7387_v2 = vrot.slane %v7386_v39, 4  ;;  %v6475_v30 = vmax.f32 %v6418_v43, %v6419_v44 }
 0x4b3   : > { %16738 = vst [vmem:[#allocation12_spill] sm:$0xff] %v14991_v34  ;;  %v14996_v49 = vadd.f32 %v14856_v58, %v7357_v62  ;;  %v7393_v53 = vsel %vm1680_vm1, %v6650_v18, -inf  ;;  %v6420_v45 = vadd.f32 %v6285_v63, %v14827_v9  ;;  %v6421_v32 = vadd.f32 %v6287_v38, %v14832_v60 }
 0x4b4   : > { %v7375_v15 = vrot.slane %v7374_v1, 2  ;;  %v7381_v8 = vmax.f32 %v7379_v28, %v7380_v21  ;;  %v7388_v24 = vmax.f32 %v7386_v39, %v7387_v2  ;;  %v7394_v57 = vrot.slane %v7393_v53, 4  ;;  %v6291_v2 = vpop.f32.mrf.mxu1 }
 0x4b5   : > { %v15002_v51 = vadd.f32 %v14856_v58, %v7364_v17  ;;  %v6651_v52 = vcombine.high %v6475_v30, %v6475_v30  ;;  %v6658_v47 = vrot.slane %v6475_v30, %v14775_v4  ;;  %v6476_v43 = vmax.f32 %v6420_v45, %v6421_v32 }
 0x4b6   : > { %v7376_v44 = vmax.f32 %v7374_v1, %v7375_v15  ;;  %v7382_v62 = vrot.slane %v7381_v8, 2  ;;  %v7389_v35 = vrot.slane %v7388_v24, 2  ;;  %v7395_v56 = vmax.f32 %v7393_v53, %v7394_v57 }
 0x4b7   : > { %16739 = vst [vmem:[#allocation22_spill] sm:$0xff] %v15002_v51  ;;  %v15005_v59 = vpack.c.bf16 %v8255_v37, %v8255_v37  ;;  %v6665_v9 = vrot.slane %v6651_v52, %v14775_v4  ;;  %v6666_v60 = vcombine.high %v6658_v47, %v6658_v47  ;;  %v7400_v63 = vsel %vm1680_vm1, %v6658_v47, -inf }
 0x4b8   : > { %v7377_v3 = vrot.slane %v7376_v44, 1  ;;  %v7383_v38 = vmax.f32 %v7381_v8, %v7382_v62  ;;  %v7390_v17 = vmax.f32 %v7388_v24, %v7389_v35  ;;  %v7396_v18 = vrot.slane %v7395_v56, 2 }
 0x4b9   : > { %v6667_v28 = vcombine.high %v6665_v9, %v6665_v9  ;;  %v7401_v39 = vrot.slane %v7400_v63, 4  ;;  %v7407_v21 = vsel %vm1680_vm1, %v6666_v60, -inf  ;;  %v7414_v1 = vsel %vm1680_vm1, %v6665_v9, -inf }
 0x4ba   : > { %v7384_v30 = vrot.slane %v7383_v38, 1  ;;  %v7391_v53 = vrot.slane %v7390_v17, 1  ;;  %v7397_v37 = vmax.f32 %v7395_v56, %v7396_v18  ;;  %v6668_v45 = vcombine.high %v6476_v43, %v6476_v43  ;;  %v6295_v18 = vpop.f32.mrf.mxu1 }
 0x4bb   : > { %v7402_v32 = vmax.f32 %v7400_v63, %v7401_v39  ;;  %v7408_v15 = vrot.slane %v7407_v21, 4  ;;  %v7415_v57 = vrot.slane %v7414_v1, 4  ;;  %v7421_v52 = vsel %vm1680_vm1, %v6667_v28, -inf }
 0x4bc   : > { %v7378_v47 = vmax.f32 %v7376_v44, %v7377_v3  ;;  %v7398_v8 = vrot.slane %v7397_v37, 1  ;;  %v6422_v24 = vadd.f32 %v6289_v29, %v14835_v23  ;;  %v6423_v62 = vadd.f32 %v6291_v2, %v14837_v54 }
 0x4bd   : > { %v7403_v35 = vrot.slane %v7402_v32, 2  ;;  %v7409_v60 = vmax.f32 %v7407_v21, %v7408_v15  ;;  %v7416_v27 = vmax.f32 %v7414_v1, %v7415_v57  ;;  %v7422_v9 = vrot.slane %v7421_v52, 4 }
 0x4be   : > { %v15014_v34 = vmax.f32 %v7383_v38, %v7384_v30  ;;  %v15016_v40 = vmax.f32 %v7390_v17, %v7391_v53  ;;  %v6675_v56 = vrot.slane %v6476_v43, %v14775_v4  ;;  %v6682_v63 = vrot.slane %v6668_v45, %v14775_v4 }
 0x4bf   : > { %v7404_v28 = vmax.f32 %v7402_v32, %v7403_v35  ;;  %v7410_v44 = vrot.slane %v7409_v60, 2  ;;  %v7417_v3 = vrot.slane %v7416_v27, 2  ;;  %v15020_v39 = vmax.f32 %v7421_v52, %v7422_v9  ;;  %v6297_v32 = vpop.f32.mrf.mxu1 }
 0x4c0   : > { %16740 = vst [vmem:[#allocation29_spill] sm:$0xff] %v15016_v40  ;;  %v6683_v23 = vcombine.high %v6675_v56, %v6675_v56  ;;  %v6684_v54 = vcombine.high %v6682_v63, %v6682_v63  ;;  %v7428_v29 = vsel %vm1680_vm1, %v6675_v56, -inf  ;;  %v7442_v21 = vsel %vm1680_vm1, %v6682_v63, -inf }
 0x4c1   : > { %v15024_v38 = vmax.f32 %v7397_v37, %v7398_v8  ;;  %v15027_v17 = vadd.f32 %v14856_v58, %v7378_v47  ;;  %v7405_v43 = vrot.slane %v7404_v28, 1  ;;  %v6477_v1 = vmax.f32 %v6422_v24, %v6423_v62 }
 0x4c2   : > { %v7429_v2 = vrot.slane %v7428_v29, 4  ;;  %v7435_v30 = vsel %vm1680_vm1, %v6683_v23, -inf  ;;  %v7443_v53 = vrot.slane %v7442_v21, 4  ;;  %v7449_v45 = vsel %vm1680_vm1, %v6684_v54, -inf }
 0x4c3   : > { %16741 = vst [vmem:[#allocation35_spill] sm:$0xff] %v15024_v38  ;;  %v15031_v15 = vmax.f32 %v7404_v28, %v7405_v43  ;;  %v15033_v57 = vmax.f32 %v7409_v60, %v7410_v44  ;;  %v15035_v52 = vmax.f32 %v7416_v27, %v7417_v3  ;;  %v7436_v47 = vrot.slane %v7435_v30, 4 }
 0x4c4   : > { %v7430_v8 = vmax.f32 %v7428_v29, %v7429_v2  ;;  %v7444_v35 = vmax.f32 %v7442_v21, %v7443_v53  ;;  %v7450_v9 = vrot.slane %v7449_v45, 4  ;;  %v6685_v24 = vcombine.high %v6477_v1, %v6477_v1 }
 0x4c5   : > { %16742 = vst [vmem:[#allocation24_spill] sm:$0xff] %v15035_v52  ;;  %v6692_v62 = vrot.slane %v6477_v1, %v14775_v4  ;;  %v6424_v56 = vadd.f32 %v6295_v18, %v14847_v36  ;;  %v6425_v63 = vadd.f32 %v6297_v32, %v14868_v13  ;;  %v7437_v28 = vmax.f32 %v7435_v30, %v7436_v47 }
 0x4c6   : > { %v7431_v23 = vrot.slane %v7430_v8, 2  ;;  %v7445_v54 = vrot.slane %v7444_v35, 2  ;;  %v7451_v60 = vmax.f32 %v7449_v45, %v7450_v9  ;;  %v6699_v27 = vrot.slane %v6685_v24, %v14775_v4 }
 0x4c7   : > { %v6700_v44 = vcombine.high %v6692_v62, %v6692_v62  ;;  %v7456_v3 = vsel %vm1680_vm1, %v6692_v62, -inf  ;;  %v15043_v29 = vmax.f32 %v6424_v56, %v6425_v63  ;;  %v7438_v43 = vrot.slane %v7437_v28, 2 }
 0x4c8   : > { %v7432_v21 = vmax.f32 %v7430_v8, %v7431_v23  ;;  %v7446_v2 = vmax.f32 %v7444_v35, %v7445_v54  ;;  %v7452_v53 = vrot.slane %v7451_v60, 2  ;;  %v6701_v1 = vcombine.high %v6699_v27, %v6699_v27 }
 0x4c9   : > { %v7457_v37 = vrot.slane %v7456_v3, 4  ;;  %v7463_v36 = vsel %vm1680_vm1, %v6700_v44, -inf  ;;  %v7470_v13 = vsel %vm1680_vm1, %v6699_v27, -inf  ;;  %v7439_v30 = vmax.f32 %v7437_v28, %v7438_v43 }
 0x4ca   : > { %v7433_v18 = vrot.slane %v7432_v21, 1  ;;  %v7447_v45 = vrot.slane %v7446_v2, 1  ;;  %v7453_v32 = vmax.f32 %v7451_v60, %v7452_v53  ;;  %v7464_v9 = vrot.slane %v7463_v36, 4 }
 0x4cb   : > { %v7458_v47 = vmax.f32 %v7456_v3, %v7457_v37  ;;  %v7471_v24 = vrot.slane %v7470_v13, 4  ;;  %v7477_v62 = vsel %vm1680_vm1, %v6701_v1, -inf  ;;  %v7440_v8 = vrot.slane %v7439_v30, 1 }
 0x4cc   : > { %v7434_v56 = vmax.f32 %v7432_v21, %v7433_v18  ;;  %v7448_v63 = vmax.f32 %v7446_v2, %v7447_v45  ;;  %v7454_v35 = vrot.slane %v7453_v32, 1  ;;  %v7465_v54 = vmax.f32 %v7463_v36, %v7464_v9 }
 0x4cd   : > { %v7459_v23 = vrot.slane %v7458_v47, 2  ;;  %v7472_v38 = vmax.f32 %v7470_v13, %v7471_v24  ;;  %v7478_v12 = vrot.slane %v7477_v62, 4  ;;  %v7441_v44 = vmax.f32 %v7439_v30, %v7440_v8  ;;  %v5865_v8 = vpop.f32.mrf.mxu0 }
 0x4ce   : > { %v7455_v51 = vmax.f32 %v7453_v32, %v7454_v35  ;;  %v8139_v27 = vadd.f32 %v14856_v58, %v7434_v56  ;;  %v8141_v28 = vadd.f32 %v14856_v58, %v7448_v63  ;;  %v7466_v37 = vrot.slane %v7465_v54, 2 }
 0x4cf   : > { %v7460_v60 = vmax.f32 %v7458_v47, %v7459_v23  ;;  %v7473_v3 = vrot.slane %v7472_v38, 2  ;;  %v7479_v43 = vmax.f32 %v7477_v62, %v7478_v12  ;;  %v8140_v53 = vadd.f32 %v14856_v58, %v7441_v44 }
 0x4d0   : > { %v8142_v21 = vadd.f32 %v14856_v58, %v7455_v51  ;;  %v8267_v2 = vmax.f32 %v8139_v27, 0.0  ;;  %v8269_v1 = vmax.f32 %v8141_v28, 0.0  ;;  %v7467_v36 = vmax.f32 %v7465_v54, %v7466_v37  ;;  %v15065_v54 = vpop.f32.mrf.mxu1 }
 0x4d1   : > { %v7461_v18 = vrot.slane %v7460_v60, 1  ;;  %v7474_v13 = vmax.f32 %v7472_v38, %v7473_v3  ;;  %v7480_v45 = vrot.slane %v7479_v43, 2  ;;  %v8268_v32 = vmax.f32 %v8140_v53, 0.0 }
 0x4d2   : > { %v15053_v9 = vpack.c.bf16 %v8267_v2, %v8267_v2  ;;  %v15055_v24 = vpack.c.bf16 %v8269_v1, %v8269_v1  ;;  %v7468_v56 = vrot.slane %v7467_v36, 1  ;;  %v16745_v63 = vrot.slane %v15020_v39, 2 }
 0x4d3   : > { %v7462_v47 = vmax.f32 %v7460_v60, %v7461_v18  ;;  %v7475_v12 = vrot.slane %v7474_v13, 1  ;;  %v7481_v62 = vmax.f32 %v7479_v43, %v7480_v45  ;;  %v8270_v38 = vmax.f32 %v8142_v21, 0.0  ;;  %v5867_v18 = vpop.f32.mrf.mxu0 }
 0x4d4   : > { %16743 = vst [vmem:[#allocation28_spill] sm:$0xff] %v15053_v9  ;;  %16744 = vst [vmem:[#allocation30_spill] sm:$0xff] %v15055_v24  ;;  %v15061_v35 = vmax.f32 %v15020_v39, %v16745_v63  ;;  %v15063_v23 = vpack.c.bf16 %v8268_v32, %v8268_v32  ;;  %v7469_v44 = vmax.f32 %v7467_v36, %v7468_v56 }
 0x4d5   : > { %v7476_v27 = vmax.f32 %v7474_v13, %v7475_v12  ;;  %v7482_v28 = vrot.slane %v7481_v62, 1  ;;  %v8143_v60 = vadd.f32 %v14856_v58, %v7462_v47  ;;  %v6702_v43 = vcombine.high %v15043_v29, %v15043_v29  ;;  %v6301_v47 = vpop.f32.mrf.mxu1 }
 0x4d6   : > { %16746 = vst [vmem:[#allocation34_spill] sm:$0xff] %v15061_v35  ;;  %v6709_v39 = vrot.slane %v15043_v29, %v14775_v4  ;;  %v8144_v21 = vadd.f32 %v14856_v58, %v7469_v44  ;;  %v15076_v36 = vpack.c.bf16 %v8270_v38, %v8270_v38 }
 0x4d7   : > { %v7483_v53 = vmax.f32 %v7481_v62, %v7482_v28  ;;  %v8145_v2 = vadd.f32 %v14856_v58, %v7476_v27  ;;  %v8271_v1 = vmax.f32 %v8143_v60, 0.0  ;;  %v6716_v13 = vrot.slane %v6702_v43, %v14775_v4  ;;  %v5871_v43 = vpop.f32.mrf.mxu0 }
 0x4d8   : > { %16747 = vst [vmem:[#allocation42_spill] sm:$0xff] %v15076_v36  ;;  %v6717_v45 = vcombine.high %v6709_v39, %v6709_v39  ;;  %v7484_v32 = vsel %vm1680_vm1, %v6709_v39, -inf  ;;  %v8272_v12 = vmax.f32 %v8144_v21, 0.0 }
 0x4d9   : > { %v8146_v56 = vadd.f32 %v14856_v58, %v7483_v53  ;;  %v8273_v63 = vmax.f32 %v8145_v2, 0.0  ;;  %v8372_v29 = vpack.c.bf16 %v8271_v1, %v8271_v1  ;;  %v6718_v62 = vcombine.high %v6716_v13, %v6716_v13  ;;  %v6305_v58 = vpop.f32.mrf.mxu1 }
 0x4da   : > { %v7485_v28 = vrot.slane %v7484_v32, 4  ;;  %v7491_v44 = vsel %vm1680_vm1, %v6717_v45, -inf  ;;  %v7498_v27 = vsel %vm1680_vm1, %v6716_v13, -inf  ;;  %v8420_v38 = vpack.c.bf16 %v8272_v12, %v8272_v12 }
 0x4db   : > { %v8274_v60 = vmax.f32 %v8146_v56, 0.0  ;;  %v8728_v3 = vunpack.c.l.b16 %v8372_v29  ;;  %v8917_v51 = vpack.c.bf16 %v8273_v63, %v8273_v63  ;;  %v7492_v30 = vrot.slane %v7491_v44, 4  ;;  %v6307_v9 = vpop.f32.mrf.mxu1 }
 0x4dc   : > { %v7486_v37 = vmax.f32 %v7484_v32, %v7485_v28  ;;  %v7499_v39 = vrot.slane %v7498_v27, 4  ;;  %v7505_v35 = vsel %vm1680_vm1, %v6718_v62, -inf  ;;  %v8501_v2 = vunpack.c.l.b16 %v8420_v38  ;;  %v5873_v28 = vpop.f32.mrf.mxu0 }
 0x4dd   : > { %v9191_v1 = vpack.c.bf16 %v8274_v60, %v8274_v60  ;;  %v7493_v24 = vmax.f32 %v7491_v44, %v7492_v30  ;;  %v7506_v56 = vrot.slane %v7505_v35, 4  ;;  %v15088_v63 = vrot.slane %v8728_v3, 7  ;;  %v11109_v3 = vld [vmem:[%s16116_s5 + $0x60] sm:$0xff]  }
 0x4de   : > { %v7487_v45 = vrot.slane %v7486_v37, 2  ;;  %v7500_v13 = vmax.f32 %v7498_v27, %v7499_v39  ;;  %v15086_v12 = vrot.slane %v8501_v2, 7  ;;  %v8998_v32 = vunpack.c.l.b16 %v8917_v51  ;;  %10479 = vmatprep.subr.bf16.mxu0 %v11109_v3 }
 0x4df   : > { %16748 = vst [vmem:[#allocation36_spill] sm:$0xff] %v15088_v63  ;;  %v5992_v29 = vadd.f32 %v5865_v8, %v14596_v7  ;;  %v7494_v40 = vrot.slane %v7493_v24, 2  ;;  %v7507_v53 = vmax.f32 %v7505_v35, %v7506_v56  ;;  %v9272_v21 = vunpack.c.l.b16 %v9191_v1  ;;  %10480 = vmatpush3.bf16.msra.mxu0 %v11109_v3 }
 0x4e0   : > { %v7488_v62 = vmax.f32 %v7486_v37, %v7487_v45  ;;  %v7501_v52 = vrot.slane %v7500_v13, 2  ;;  %v5993_v60 = vadd.f32 %v5867_v18, %v14598_v20  ;;  %v5994_v30 = vadd.f32 %v5871_v43, %v14601_v31 }
 0x4e1   : > { %v5995_v44 = vadd.f32 %v5873_v28, %v14607_v22  ;;  %v7495_v27 = vmax.f32 %v7493_v24, %v7494_v40  ;;  %v7508_v8 = vrot.slane %v7507_v53, 2  ;;  %v6426_v37 = vadd.f32 %v15065_v54, %v5992_v29  ;;  %v5875_v40 = vpop.f32.mrf.mxu0 }
 0x4e2   : > { %v7489_v51 = vrot.slane %v7488_v62, 1  ;;  %v7502_v7 = vmax.f32 %v7500_v13, %v7501_v52  ;;  %v6427_v38 = vadd.f32 %v6301_v47, %v5993_v60  ;;  %v6428_v35 = vadd.f32 %v6305_v58, %v5994_v30 }
 0x4e3   : > { %v6429_v39 = vadd.f32 %v6307_v9, %v5995_v44  ;;  %v7496_v20 = vrot.slane %v7495_v27, 1  ;;  %v7509_v31 = vmax.f32 %v7507_v53, %v7508_v8  ;;  %v15098_v22 = vrot.slane %v8998_v32, 7  ;;  %v15105_v9 = vld [vmem:[%s16115_s4] ss:$0 sm:$0xff] }
 0x4e4   : > { %v7490_v2 = vmax.f32 %v7488_v62, %v7489_v51  ;;  %v7503_v18 = vrot.slane %v7502_v7, 1  ;;  %v15100_v43 = vrot.slane %v9272_v21, 7  ;;  %v6479_v1 = vmax.f32 %v6426_v37, %v6427_v38 }
 0x4e5   : > { %16749 = vst [vmem:[#allocation40_spill] sm:$0xff] %v15098_v22  ;;  %v6480_v45 = vmax.f32 %v6428_v35, %v6429_v39  ;;  %v7497_v52 = vmax.f32 %v7495_v27, %v7496_v20  ;;  %v7510_v13 = vrot.slane %v7509_v31, 1  ;;  %v5996_v21 = vadd.f32 %v5875_v40, %v14614_v42  ;;  %v6309_v35 = vpop.f32.mrf.mxu1 }
 0x4e6   : > { %16750 = vst [vmem:[#allocation46_spill] sm:$0xff] %v15100_v43  ;;  %v7504_v24 = vmax.f32 %v7502_v7, %v7503_v18  ;;  %v8147_v54 = vadd.f32 %v15105_v9, %v7490_v2  ;;  %v6719_v47 = vcombine.high %v6479_v1, %v6479_v1  ;;  %v6726_v58 = vrot.slane %v6479_v1, %v14775_v4 }
 0x4e7   : > { %v6736_v53 = vcombine.high %v6480_v45, %v6480_v45  ;;  %v7511_v56 = vmax.f32 %v7509_v31, %v7510_v13  ;;  %v8148_v32 = vadd.f32 %v15105_v9, %v7497_v52  ;;  %v6743_v44 = vrot.slane %v6480_v45, %v14775_v4  ;;  %v5877_v31 = vpop.f32.mrf.mxu0 }
 0x4e8   : > { %v8149_v29 = vadd.f32 %v15105_v9, %v7504_v24  ;;  %v8275_v28 = vmax.f32 %v8147_v54, 0.0  ;;  %v6733_v62 = vrot.slane %v6719_v47, %v14775_v4  ;;  %v6734_v60 = vcombine.high %v6726_v58, %v6726_v58 }
 0x4e9   : > { %v7512_v30 = vsel %vm1680_vm1, %v6726_v58, -inf  ;;  %v8150_v3 = vadd.f32 %v15105_v9, %v7511_v56  ;;  %v8276_v51 = vmax.f32 %v8148_v32, 0.0  ;;  %v6750_v13 = vrot.slane %v6736_v53, %v14775_v4 }
 0x4ea   : > { %v8277_v27 = vmax.f32 %v8149_v29, 0.0  ;;  %v8373_v7 = vpack.c.bf16 %v8275_v28, %v8275_v28  ;;  %v6735_v8 = vcombine.high %v6733_v62, %v6733_v62  ;;  %v7513_v42 = vrot.slane %v7512_v30, 4 }
 0x4eb   : > { %v7519_v37 = vsel %vm1680_vm1, %v6734_v60, -inf  ;;  %v7526_v38 = vsel %vm1680_vm1, %v6733_v62, -inf  ;;  %v8278_v39 = vmax.f32 %v8150_v3, 0.0  ;;  %v15118_v2 = vpack.c.bf16 %v8276_v51, %v8276_v51 }
 0x4ec   : > { %v8729_v20 = vunpack.c.l.b16 %v8373_v7  ;;  %v15120_v18 = vpack.c.bf16 %v8277_v27, %v8277_v27  ;;  %v7514_v1 = vmax.f32 %v7512_v30, %v7513_v42  ;;  %v7520_v45 = vrot.slane %v7519_v37, 4 }
 0x4ed   : > { %v7527_v40 = vrot.slane %v7526_v38, 4  ;;  %v7533_v52 = vsel %vm1680_vm1, %v6735_v8, -inf  ;;  %v15123_v24 = vpack.c.bf16 %v8278_v39, %v8278_v39  ;;  %v15126_v54 = vadd.f32 %v6309_v35, %v5996_v21  ;;  %v6311_v39 = vpop.f32.mrf.mxu1 }
 0x4ee   : > { %v15129_v47 = vadd.f32 %v5877_v31, %v14616_v11  ;;  %v7515_v58 = vrot.slane %v7514_v1, 2  ;;  %v7521_v56 = vmax.f32 %v7519_v37, %v7520_v45  ;;  %v7534_v29 = vrot.slane %v7533_v52, 4 }
 0x4ef   : > { %v7528_v32 = vmax.f32 %v7526_v38, %v7527_v40  ;;  %v15132_v62 = vrot.slane %v8729_v20, 6  ;;  %v6751_v30 = vcombine.high %v6743_v44, %v6743_v44  ;;  %v6752_v7 = vcombine.high %v6750_v13, %v6750_v13 }
 0x4f0   : > { %v7516_v3 = vmax.f32 %v7514_v1, %v7515_v58  ;;  %v7522_v51 = vrot.slane %v7521_v56, 2  ;;  %v7535_v53 = vmax.f32 %v7533_v52, %v7534_v29  ;;  %v7540_v11 = vsel %vm1680_vm1, %v6743_v44, -inf }
 0x4f1   : > { %16751 = vst [vmem:[#allocation48_spill] sm:$0xff] %v15132_v62  ;;  %v7529_v27 = vrot.slane %v7528_v32, 2  ;;  %v7547_v8 = vsel %vm1680_vm1, %v6751_v30, -inf  ;;  %v7541_v20 = vrot.slane %v7540_v11, 4  ;;  %v7554_v45 = vsel %vm1680_vm1, %v6750_v13, -inf  ;;  %v5881_v30 = vpop.f32.mrf.mxu0 }
 0x4f2   : > { %v7517_v42 = vrot.slane %v7516_v3, 1  ;;  %v7523_v37 = vmax.f32 %v7521_v56, %v7522_v51  ;;  %v7536_v35 = vrot.slane %v7535_v53, 2  ;;  %v7548_v31 = vrot.slane %v7547_v8, 4 }
 0x4f3   : > { %v7530_v38 = vmax.f32 %v7528_v32, %v7529_v27  ;;  %v7561_v1 = vsel %vm1680_vm1, %v6752_v7, -inf  ;;  %v7542_v21 = vmax.f32 %v7540_v11, %v7541_v20  ;;  %v7555_v44 = vrot.slane %v7554_v45, 4  ;;  %v6315_v27 = vpop.f32.mrf.mxu1 }
 0x4f4   : > { %v7518_v40 = vmax.f32 %v7516_v3, %v7517_v42  ;;  %v7524_v52 = vrot.slane %v7523_v37, 1  ;;  %v7537_v29 = vmax.f32 %v7535_v53, %v7536_v35  ;;  %v7549_v60 = vmax.f32 %v7547_v8, %v7548_v31 }
 0x4f5   : > { %v7531_v58 = vrot.slane %v7530_v38, 1  ;;  %v7562_v28 = vrot.slane %v7561_v1, 4  ;;  %v7543_v36 = vrot.slane %v7542_v21, 2  ;;  %v7556_v13 = vmax.f32 %v7554_v45, %v7555_v44 }
 0x4f6   : > { %v7525_v43 = vmax.f32 %v7523_v37, %v7524_v52  ;;  %v7538_v32 = vrot.slane %v7537_v29, 1  ;;  %v8151_v51 = vadd.f32 %v15105_v9, %v7518_v40  ;;  %v7550_v22 = vrot.slane %v7549_v60, 2  ;;  %v5883_v37 = vpop.f32.mrf.mxu0 }
 0x4f7   : > { %v7532_v56 = vmax.f32 %v7530_v38, %v7531_v58  ;;  %v7563_v62 = vmax.f32 %v7561_v1, %v7562_v28  ;;  %v7544_v8 = vmax.f32 %v7542_v21, %v7543_v36  ;;  %v7557_v35 = vrot.slane %v7556_v13, 2  ;;  %v6317_v58 = vpop.f32.mrf.mxu1 }
 0x4f8   : > { %v7539_v7 = vmax.f32 %v7537_v29, %v7538_v32  ;;  %v8152_v3 = vadd.f32 %v15105_v9, %v7525_v43  ;;  %v8279_v11 = vmax.f32 %v8151_v51, 0.0  ;;  %v7551_v42 = vmax.f32 %v7549_v60, %v7550_v22  ;;  %v5885_v21 = vpop.f32.mrf.mxu0 }
 0x4f9   : > { %v8153_v53 = vadd.f32 %v15105_v9, %v7532_v56  ;;  %v7564_v20 = vrot.slane %v7563_v62, 2  ;;  %v7545_v63 = vrot.slane %v7544_v8, 1  ;;  %v7558_v28 = vmax.f32 %v7556_v13, %v7557_v35 }
 0x4fa   : > { %v8154_v38 = vadd.f32 %v15105_v9, %v7539_v7  ;;  %v8280_v31 = vmax.f32 %v8152_v3, 0.0  ;;  %v8374_v52 = vpack.c.bf16 %v8279_v11, %v8279_v11  ;;  %v7552_v45 = vrot.slane %v7551_v42, 1 }
 0x4fb   : > { %v8281_v40 = vmax.f32 %v8153_v53, 0.0  ;;  %v7565_v1 = vmax.f32 %v7563_v62, %v7564_v20  ;;  %v7546_v32 = vmax.f32 %v7544_v8, %v7545_v63  ;;  %v7559_v22 = vrot.slane %v7558_v28, 1  ;;  %v6319_v62 = vpop.f32.mrf.mxu1 }
 0x4fc   : > { %v8282_v29 = vmax.f32 %v8154_v38, 0.0  ;;  %v8422_v43 = vpack.c.bf16 %v8280_v31, %v8280_v31  ;;  %v8730_v44 = vunpack.c.l.b16 %v8374_v52  ;;  %v7553_v36 = vmax.f32 %v7551_v42, %v7552_v45 }
 0x4fd   : > { %v8919_v56 = vpack.c.bf16 %v8281_v40, %v8281_v40  ;;  %v7566_v60 = vrot.slane %v7565_v1, 1  ;;  %v16752_v51 = vunpack.c.l.b16 %v15118_v2  ;;  %v16753_v3 = vunpack.c.l.b16 %v15120_v18 }
 0x4fe   : > { %v8503_v11 = vunpack.c.l.b16 %v8422_v43  ;;  %v7560_v35 = vmax.f32 %v7558_v28, %v7559_v22  ;;  %v8155_v38 = vadd.f32 %v15105_v9, %v7546_v32  ;;  %v8156_v63 = vadd.f32 %v15105_v9, %v7553_v36 }
 0x4ff   : > { %v15146_v7 = vrot.slane %v16752_v51, 6  ;;  %v15150_v53 = vrot.slane %v16753_v3, 6  ;;  %v9000_v13 = vunpack.c.l.b16 %v8919_v56  ;;  %v7567_v20 = vmax.f32 %v7565_v1, %v7566_v60  ;;  %v5887_v1 = vpop.f32.mrf.mxu0 }
 0x500   : > { %v16755_v8 = vunpack.c.l.b16 %v15123_v24  ;;  %v15158_v2 = vrot.slane %v8730_v44, 5  ;;  %v15160_v31 = vpack.c.bf16 %v8282_v29, %v8282_v29  ;;  %v6431_v18 = vadd.f32 %v6311_v39, %v15129_v47  ;;  %v6321_v29 = vpop.f32.mrf.mxu1 }
 0x501   : > { %16754 = vst [vmem:[#allocation49_spill] sm:$0xff] %v15150_v53  ;;  %v15163_v40 = vrot.slane %v8503_v11, 5  ;;  %v15166_v52 = vadd.f32 %v15105_v9, %v7560_v35  ;;  %v8283_v45 = vmax.f32 %v8155_v38, 0.0  ;;  %v8284_v28 = vmax.f32 %v8156_v63, 0.0 }
 0x502   : > { %v15156_v42 = vrot.slane %v16755_v8, 6  ;;  %16757 = vst [vmem:[#allocation60_spill] sm:$0xff] %v15158_v2  ;;  %16758 = vst [vmem:[#allocation52_spill] sm:$0xff] %v15160_v31  ;;  %v15168_v43 = vrot.slane %v9000_v13, 5  ;;  %v6481_v24 = vmax.f32 %v15126_v54, %v6431_v18  ;;  %v5998_v56 = vadd.f32 %v5881_v30, %v14619_v46 }
 0x503   : > { %v5999_v44 = vadd.f32 %v5883_v37, %v14622_v14  ;;  %v15174_v32 = vadd.f32 %v15105_v9, %v7567_v20  ;;  %v15176_v47 = vpack.c.bf16 %v8283_v45, %v8283_v45  ;;  %v6000_v39 = vadd.f32 %v5885_v21, %v14629_v48  ;;  %v5891_v37 = vpop.f32.mrf.mxu0 }
 0x504   : > { %16756 = vst [vmem:[#allocation50_spill] sm:$0xff] %v15156_v42  ;;  %16759 = vst [vmem:[#allocation63_spill] sm:$0xff] %v15168_v43  ;;  %v6001_v36 = vadd.f32 %v5887_v1, %v14631_v61  ;;  %v6753_v22 = vcombine.high %v6481_v24, %v6481_v24  ;;  %v6760_v60 = vrot.slane %v6481_v24, %v14775_v4 }
 0x505   : > { %16760 = vst [vmem:[#allocation58_spill] sm:$0xff] %v15174_v32  ;;  %v6432_v51 = vadd.f32 %v6315_v27, %v5998_v56  ;;  %v6433_v3 = vadd.f32 %v6317_v58, %v5999_v44  ;;  %v15182_v46 = vpack.c.bf16 %v8284_v28, %v8284_v28  ;;  %v6434_v14 = vadd.f32 %v6319_v62, %v6000_v39 }
 0x506   : > { %v6435_v30 = vadd.f32 %v6321_v29, %v6001_v36  ;;  %v6767_v11 = vrot.slane %v6753_v22, %v14775_v4  ;;  %v6768_v13 = vcombine.high %v6760_v60, %v6760_v60  ;;  %v7568_v35 = vsel %vm1680_vm1, %v6760_v60, -inf }
 0x507   : > { %v6482_v48 = vmax.f32 %v6432_v51, %v6433_v3  ;;  %v8731_v61 = vunpack.c.l.b16 %v15176_v47  ;;  %v7569_v21 = vrot.slane %v7568_v35, 4  ;;  %v6002_v27 = vadd.f32 %v5891_v37, %v14636_v10 }
 0x508   : > { %v15187_v20 = vmax.f32 %v6434_v14, %v6435_v30  ;;  %v6769_v58 = vcombine.high %v6767_v11, %v6767_v11  ;;  %v7575_v38 = vsel %vm1680_vm1, %v6768_v13, -inf  ;;  %v7582_v62 = vsel %vm1680_vm1, %v6767_v11, -inf }
 0x509   : > { %v6770_v63 = vcombine.high %v6482_v48, %v6482_v48  ;;  %v7570_v8 = vmax.f32 %v7568_v35, %v7569_v21  ;;  %v7576_v18 = vrot.slane %v7575_v38, 4  ;;  %v7583_v45 = vrot.slane %v7582_v62, 4 }
 0x50a   : > { %v6777_v28 = vrot.slane %v6482_v48, %v14775_v4  ;;  %v7589_v1 = vsel %vm1680_vm1, %v6769_v58, -inf  ;;  %v6787_v56 = vcombine.high %v15187_v20, %v15187_v20  ;;  %v15199_v10 = vrot.slane %v15187_v20, %v14775_v4 }
 0x50b   : > { %v6784_v24 = vrot.slane %v6770_v63, %v14775_v4  ;;  %v7571_v44 = vrot.slane %v7570_v8, 2  ;;  %v7577_v29 = vmax.f32 %v7575_v38, %v7576_v18  ;;  %v7584_v47 = vmax.f32 %v7582_v62, %v7583_v45  ;;  %v6325_v62 = vpop.f32.mrf.mxu1  ;;  %v5893_v63 = vpop.f32.mrf.mxu0 }
 0x50c   : > { %v7590_v39 = vrot.slane %v7589_v1, 4  ;;  %v6785_v36 = vcombine.high %v6777_v28, %v6777_v28  ;;  %v7596_v60 = vsel %vm1680_vm1, %v6777_v28, -inf }
 0x50d   : > { %v6786_v22 = vcombine.high %v6784_v24, %v6784_v24  ;;  %v7610_v51 = vsel %vm1680_vm1, %v6784_v24, -inf  ;;  %v7572_v3 = vmax.f32 %v7570_v8, %v7571_v44  ;;  %v7578_v14 = vrot.slane %v7577_v29, 2 }
 0x50e   : > { %v7585_v30 = vrot.slane %v7584_v47, 2  ;;  %v7591_v37 = vmax.f32 %v7589_v1, %v7590_v39  ;;  %v7597_v11 = vrot.slane %v7596_v60, 4  ;;  %v7603_v13 = vsel %vm1680_vm1, %v6785_v36, -inf }
 0x50f   : > { %v7611_v35 = vrot.slane %v7610_v51, 4  ;;  %v7617_v48 = vsel %vm1680_vm1, %v6786_v22, -inf  ;;  %v7573_v21 = vrot.slane %v7572_v3, 1  ;;  %v7579_v20 = vmax.f32 %v7577_v29, %v7578_v14  ;;  %v5895_v14 = vpop.f32.mrf.mxu0 }
 0x510   : > { %v7586_v58 = vmax.f32 %v7584_v47, %v7585_v30  ;;  %v7592_v38 = vrot.slane %v7591_v37, 2  ;;  %v7598_v18 = vmax.f32 %v7596_v60, %v7597_v11  ;;  %v7604_v45 = vrot.slane %v7603_v13, 4  ;;  %v6327_v47 = vpop.f32.mrf.mxu1 }
 0x511   : > { %v7612_v28 = vmax.f32 %v7610_v51, %v7611_v35  ;;  %v7618_v24 = vrot.slane %v7617_v48, 4  ;;  %v7574_v8 = vmax.f32 %v7572_v3, %v7573_v21  ;;  %v7580_v44 = vrot.slane %v7579_v20, 1 }
 0x512   : > { %v7587_v54 = vrot.slane %v7586_v58, 1  ;;  %v7593_v1 = vmax.f32 %v7591_v37, %v7592_v38  ;;  %v7599_v39 = vrot.slane %v7598_v18, 2  ;;  %v7605_v42 = vmax.f32 %v7603_v13, %v7604_v45 }
 0x513   : > { %v7613_v36 = vrot.slane %v7612_v28, 2  ;;  %v7619_v31 = vmax.f32 %v7617_v48, %v7618_v24  ;;  %v7581_v32 = vmax.f32 %v7579_v20, %v7580_v44  ;;  %v8159_v29 = vadd.f32 %v15105_v9, %v7574_v8 }
 0x514   : > { %v7588_v22 = vmax.f32 %v7586_v58, %v7587_v54  ;;  %v7594_v43 = vrot.slane %v7593_v1, 1  ;;  %v7600_v30 = vmax.f32 %v7598_v18, %v7599_v39  ;;  %v7606_v60 = vrot.slane %v7605_v42, 2 }
 0x515   : > { %v7614_v11 = vmax.f32 %v7612_v28, %v7613_v36  ;;  %v7620_v51 = vrot.slane %v7619_v31, 2  ;;  %v15206_v35 = vrot.slane %v8731_v61, 4  ;;  %v16762_v3 = vmax.f32 %v15166_v52, 0.0  ;;  %v6329_v52 = vpop.f32.mrf.mxu1  ;;  %v5897_v28 = vpop.f32.mrf.mxu0 }
 0x516   : > { %v8287_v13 = vmax.f32 %v8159_v29, 0.0  ;;  %v6436_v48 = vadd.f32 %v6325_v62, %v6002_v27  ;;  %v7601_v21 = vrot.slane %v7600_v30, 1  ;;  %v7607_v54 = vmax.f32 %v7605_v42, %v7606_v60 }
 0x517   : > { %16761 = vst [vmem:[#allocation68_spill] sm:$0xff] %v15206_v35  ;;  %v15211_v37 = vpack.c.bf16 %v16762_v3, %v16762_v3  ;;  %v7615_v20 = vrot.slane %v7614_v11, 1  ;;  %v7621_v58 = vmax.f32 %v7619_v31, %v7620_v51  ;;  %v15213_v38 = vmax.f32 %v7593_v1, %v7594_v43  ;;  %v6331_v60 = vpop.f32.mrf.mxu1  ;;  %v5901_v51 = vpop.f32.mrf.mxu0 }
 0x518   : > { %v6801_v18 = vrot.slane %v6787_v56, %v14775_v4  ;;  %v6802_v45 = vcombine.high %v15199_v10, %v15199_v10  ;;  %v7624_v61 = vsel %vm1680_vm1, %v15199_v10, -inf  ;;  %v15221_v24 = vadd.f32 %v15105_v9, %v7581_v32 }
 0x519   : > { %16763 = vst [vmem:[#allocation64_spill] sm:$0xff] %v15211_v37  ;;  %16764 = vst [vmem:[#allocation54_spill] sm:$0xff] %v15213_v38  ;;  %v15224_v27 = vadd.f32 %v15105_v9, %v7588_v22  ;;  %v15226_v42 = vpack.c.bf16 %v8287_v13, %v8287_v13  ;;  %v7608_v31 = vrot.slane %v7607_v54, 1  ;;  %v7625_v62 = vrot.slane %v7624_v61, 4  ;;  %v16767_v38 = vld [vmem:[#allocation84_spill] sm:$0xff] }
 0x51a   : > { %v6803_v43 = vcombine.high %v6801_v18, %v6801_v18  ;;  %v7631_v56 = vsel %vm1680_vm1, %v6802_v45, -inf  ;;  %v7638_v8 = vsel %vm1680_vm1, %v6801_v18, -inf  ;;  %v7602_v44 = vmax.f32 %v7600_v30, %v7601_v21  ;;  %v16768_v45 = vld [vmem:[#allocation87_spill] sm:$0xff]  ;;  %v11110_v30 = vld [vmem:[%s16116_s5 + $0x58] sm:$0xff]  }
 0x51b   : > { %16765 = vst [vmem:[#allocation66_spill] sm:$0xff] %v15224_v27  ;;  %v15230_v1 = vmax.f32 %v7614_v11, %v7615_v20  ;;  %v7622_v10 = vrot.slane %v7621_v58, 1  ;;  %v7632_v39 = vrot.slane %v7631_v56, 4  ;;  %v7626_v36 = vmax.f32 %v7624_v61, %v7625_v62  ;;  %10481 = vmatprep.subr.bf16.mxu0 %v11110_v30 }
 0x51c   : > { %v7639_v32 = vrot.slane %v7638_v8, 4  ;;  %v7645_v29 = vsel %vm1680_vm1, %v6803_v43, -inf  ;;  %v6003_v22 = vadd.f32 %v5893_v63, %v14639_v50  ;;  %v6004_v53 = vadd.f32 %v5895_v14, %v16767_v38  ;;  %10482 = vmatpush3.bf16.msra.mxu0 %v11110_v30 }
 0x51d   : > { %16766 = vst [vmem:[#allocation69_spill] sm:$0xff] %v15230_v1  ;;  %v7633_v3 = vmax.f32 %v7631_v56, %v7632_v39  ;;  %v7646_v13 = vrot.slane %v7645_v29, 4  ;;  %v6005_v37 = vadd.f32 %v5897_v28, %v16768_v45  ;;  %v15239_v11 = vmax.f32 %v7607_v54, %v7608_v31  ;;  %v5903_v28 = vpop.f32.mrf.mxu0 }
 0x51e   : > { %v7627_v21 = vrot.slane %v7626_v36, 2  ;;  %v7640_v20 = vmax.f32 %v7638_v8, %v7639_v32  ;;  %v6437_v18 = vadd.f32 %v6327_v47, %v6003_v22  ;;  %v6438_v50 = vadd.f32 %v6329_v52, %v6004_v53 }
 0x51f   : > { %v7634_v61 = vrot.slane %v7633_v3, 2  ;;  %v7647_v43 = vmax.f32 %v7645_v29, %v7646_v13  ;;  %v6439_v63 = vadd.f32 %v6331_v60, %v6005_v37  ;;  %v15241_v62 = vmax.f32 %v7621_v58, %v7622_v10  ;;  %v16770_v37 = vld [vmem:[#allocation11_spill] sm:$0xff]  ;;  %v16771_v58 = vld [vmem:[#allocation9_spill] sm:$0xff] }
 0x520   : > { %v15243_v56 = vmax.f32 %v7626_v36, %v7627_v21  ;;  %v7641_v14 = vrot.slane %v7640_v20, 2  ;;  %v6484_v38 = vmax.f32 %v6436_v48, %v6437_v18  ;;  %v15246_v39 = vadd.f32 %v15105_v9, %v7602_v44 }
 0x521   : > { %16769 = vst [vmem:[#allocation77_spill] sm:$0xff] %v15241_v62  ;;  %v15248_v54 = vmax.f32 %v7633_v3, %v7634_v61  ;;  %v7648_v31 = vrot.slane %v7647_v43, 2  ;;  %v6485_v47 = vmax.f32 %v6438_v50, %v6439_v63  ;;  %v15252_v52 = vadd.f32 %v5901_v51, %v16770_v37 }
 0x522   : > { %v6804_v8 = vcombine.high %v6484_v38, %v6484_v38  ;;  %v6811_v53 = vrot.slane %v6484_v38, %v14775_v4  ;;  %v15255_v10 = vadd.f32 %v5903_v28, %v16771_v58  ;;  %v15258_v36 = vmax.f32 %v7640_v20, %v7641_v14 }
 0x523   : > { %v6821_v32 = vcombine.high %v6485_v47, %v6485_v47  ;;  %v6828_v44 = vrot.slane %v6485_v47, %v14775_v4  ;;  %v15262_v22 = vmax.f32 %v7647_v43, %v7648_v31 }
 0x524   : > { %16772 = vst [vmem:[#allocation79_spill] sm:$0xff] %v15258_v36  ;;  %v6818_v60 = vrot.slane %v6804_v8, %v14775_v4  ;;  %v6819_v3 = vcombine.high %v6811_v53, %v6811_v53  ;;  %v7652_v51 = vsel %vm1680_vm1, %v6811_v53, -inf }
 0x525   : > { %16773 = vst [vmem:[#allocation73_spill] sm:$0xff] %v15262_v22  ;;  %v6835_v13 = vrot.slane %v6821_v32, %v14775_v4  ;;  %v6836_v45 = vcombine.high %v6828_v44, %v6828_v44  ;;  %v7680_v30 = vsel %vm1680_vm1, %v6828_v44, -inf  ;;  %v7653_v20 = vrot.slane %v7652_v51, 4 }
 0x526   : > { %v6820_v21 = vcombine.high %v6818_v60, %v6818_v60  ;;  %v7659_v18 = vsel %vm1680_vm1, %v6819_v3, -inf  ;;  %v7666_v61 = vsel %vm1680_vm1, %v6818_v60, -inf  ;;  %v7681_v14 = vrot.slane %v7680_v30, 4 }
 0x527   : > { %v7660_v50 = vrot.slane %v7659_v18, 4  ;;  %v7667_v63 = vrot.slane %v7666_v61, 4  ;;  %v6837_v43 = vcombine.high %v6835_v13, %v6835_v13  ;;  %v7654_v38 = vmax.f32 %v7652_v51, %v7653_v20  ;;  %v15274_v51 = vpop.f32.mrf.mxu1 }
 0x528   : > { %v7673_v28 = vsel %vm1680_vm1, %v6820_v21, -inf  ;;  %v7687_v31 = vsel %vm1680_vm1, %v6836_v45, -inf  ;;  %v7694_v47 = vsel %vm1680_vm1, %v6835_v13, -inf  ;;  %v7682_v58 = vmax.f32 %v7680_v30, %v7681_v14 }
 0x529   : > { %v7661_v8 = vmax.f32 %v7659_v18, %v7660_v50  ;;  %v7668_v53 = vmax.f32 %v7666_v61, %v7667_v63  ;;  %v7674_v37 = vrot.slane %v7673_v28, 4  ;;  %v7655_v32 = vrot.slane %v7654_v38, 2 }
 0x52a   : > { %v7688_v44 = vrot.slane %v7687_v31, 4  ;;  %v7695_v3 = vrot.slane %v7694_v47, 4  ;;  %v7701_v60 = vsel %vm1680_vm1, %v6837_v43, -inf  ;;  %v7683_v22 = vrot.slane %v7682_v58, 2 }
 0x52b   : > { %v7662_v29 = vrot.slane %v7661_v8, 2  ;;  %v7669_v48 = vrot.slane %v7668_v53, 2  ;;  %v7675_v62 = vmax.f32 %v7673_v28, %v7674_v37  ;;  %v7656_v21 = vmax.f32 %v7654_v38, %v7655_v32  ;;  %v6337_v28 = vpop.f32.mrf.mxu1 }
 0x52c   : > { %v7689_v20 = vmax.f32 %v7687_v31, %v7688_v44  ;;  %v7696_v45 = vmax.f32 %v7694_v47, %v7695_v3  ;;  %v7702_v27 = vrot.slane %v7701_v60, 4  ;;  %v7684_v50 = vmax.f32 %v7682_v58, %v7683_v22  ;;  %v5905_v58 = vpop.f32.mrf.mxu0 }
 0x52d   : > { %v7663_v13 = vmax.f32 %v7661_v8, %v7662_v29  ;;  %v7670_v18 = vmax.f32 %v7668_v53, %v7669_v48  ;;  %v7676_v61 = vrot.slane %v7675_v62, 2  ;;  %v7657_v30 = vrot.slane %v7656_v21, 1 }
 0x52e   : > { %v7690_v63 = vrot.slane %v7689_v20, 2  ;;  %v7697_v14 = vrot.slane %v7696_v45, 2  ;;  %v7703_v1 = vmax.f32 %v7701_v60, %v7702_v27  ;;  %v7685_v0 = vrot.slane %v7684_v50, 1  ;;  %v6339_v60 = vpop.f32.mrf.mxu1 }
 0x52f   : > { %v7664_v35 = vrot.slane %v7663_v13, 1  ;;  %v7671_v43 = vrot.slane %v7670_v18, 1  ;;  %v7677_v2 = vmax.f32 %v7675_v62, %v7676_v61  ;;  %v7658_v37 = vmax.f32 %v7656_v21, %v7657_v30 }
 0x530   : > { %v7691_v6 = vmax.f32 %v7689_v20, %v7690_v63  ;;  %v7698_v19 = vmax.f32 %v7696_v45, %v7697_v14  ;;  %v7704_v38 = vrot.slane %v7703_v1, 2  ;;  %v7686_v29 = vmax.f32 %v7684_v50, %v7685_v0  ;;  %v5907_v63 = vpop.f32.mrf.mxu0 }
 0x531   : > { %v7665_v31 = vmax.f32 %v7663_v13, %v7664_v35  ;;  %v7672_v47 = vmax.f32 %v7670_v18, %v7671_v43  ;;  %v7678_v32 = vrot.slane %v7677_v2, 1  ;;  %v8171_v48 = vadd.f32 %v15105_v9, %v7658_v37 }
 0x532   : > { %v7692_v22 = vrot.slane %v7691_v6, 1  ;;  %v7699_v8 = vrot.slane %v7698_v19, 1  ;;  %v7705_v53 = vmax.f32 %v7703_v1, %v7704_v38  ;;  %v8175_v3 = vadd.f32 %v15105_v9, %v7686_v29 }
 0x533   : > { %v7679_v27 = vmax.f32 %v7677_v2, %v7678_v32  ;;  %v8172_v44 = vadd.f32 %v15105_v9, %v7665_v31  ;;  %v8173_v62 = vadd.f32 %v15105_v9, %v7672_v47  ;;  %v8299_v21 = vmax.f32 %v8171_v48, 0.0 }
 0x534   : > { %v7693_v20 = vmax.f32 %v7691_v6, %v7692_v22  ;;  %v7700_v35 = vmax.f32 %v7698_v19, %v7699_v8  ;;  %v7706_v45 = vrot.slane %v7705_v53, 1  ;;  %v8303_v61 = vmax.f32 %v8175_v3, 0.0  ;;  %v6341_v6 = vpop.f32.mrf.mxu1 }
 0x535   : > { %v8174_v0 = vadd.f32 %v15105_v9, %v7679_v27  ;;  %v8300_v13 = vmax.f32 %v8172_v44, 0.0  ;;  %v8301_v18 = vmax.f32 %v8173_v62, 0.0  ;;  %v8379_v1 = vpack.c.bf16 %v8299_v21, %v8299_v21  ;;  %v5911_v21 = vpop.f32.mrf.mxu0 }
 0x536   : > { %v7707_v50 = vmax.f32 %v7705_v53, %v7706_v45  ;;  %v8176_v2 = vadd.f32 %v15105_v9, %v7693_v20  ;;  %v8177_v30 = vadd.f32 %v15105_v9, %v7700_v35  ;;  %v8380_v38 = vpack.c.bf16 %v8303_v61, %v8303_v61 }
 0x537   : > { %v8302_v14 = vmax.f32 %v8174_v0, 0.0  ;;  %v8427_v43 = vpack.c.bf16 %v8300_v13, %v8300_v13  ;;  %v8924_v37 = vpack.c.bf16 %v8301_v18, %v8301_v18  ;;  %v16774_v19 = vrot.slane %v15243_v56, 1  ;;  %v6345_v0 = vpop.f32.mrf.mxu1 }
 0x538   : > { %v8178_v47 = vadd.f32 %v15105_v9, %v7707_v50  ;;  %v8304_v32 = vmax.f32 %v8176_v2, 0.0  ;;  %v8305_v29 = vmax.f32 %v8177_v30, 0.0  ;;  %v8735_v22 = vunpack.c.l.b16 %v8379_v1  ;;  %v16775_v50 = vld [vmem:[#allocation8_spill] sm:$0xff] }
 0x539   : > { %v15286_v31 = vmax.f32 %v15243_v56, %v16774_v19  ;;  %v9198_v8 = vpack.c.bf16 %v8302_v14, %v8302_v14  ;;  %v8736_v53 = vunpack.c.l.b16 %v8380_v38  ;;  %v8508_v27 = vunpack.c.l.b16 %v8427_v43  ;;  %v16776_v43 = vld [vmem:[#allocation7_spill] sm:$0xff] }
 0x53a   : > { %v8306_v44 = vmax.f32 %v8178_v47, 0.0  ;;  %v8428_v62 = vpack.c.bf16 %v8304_v32, %v8304_v32  ;;  %v8925_v3 = vpack.c.bf16 %v8305_v29, %v8305_v29  ;;  %v9005_v20 = vunpack.c.l.b16 %v8924_v37  ;;  %v16777_v29 = vld [vmem:[#allocation17_spill] sm:$0xff] }
 0x53b   : > { %v8779_v35 = vrot.slane %v8736_v53, 7  ;;  %v6440_v56 = vadd.f32 %v15274_v51, %v15252_v52  ;;  %v6441_v45 = vadd.f32 %v6337_v28, %v15255_v10  ;;  %v6008_v1 = vadd.f32 %v5905_v58, %v16775_v50  ;;  %v5913_v52 = vpop.f32.mrf.mxu0 }
 0x53c   : > { %v8509_v13 = vunpack.c.l.b16 %v8428_v62  ;;  %v9006_v18 = vunpack.c.l.b16 %v8925_v3  ;;  %v9199_v61 = vpack.c.bf16 %v8306_v44, %v8306_v44  ;;  %v9279_v2 = vunpack.c.l.b16 %v9198_v8  ;;  %v6347_v44 = vpop.f32.mrf.mxu1 }
 0x53d   : > { %v15295_v30 = vsel %vm8525_vm10, %v8779_v35, %v8735_v22  ;;  %v6486_v14 = vmax.f32 %v6440_v56, %v6441_v45  ;;  %v6009_v38 = vadd.f32 %v5907_v63, %v16776_v43  ;;  %v6442_v32 = vadd.f32 %v6339_v60, %v6008_v1  ;;  %v16778_v63 = vld [vmem:[#allocation15_spill] sm:$0xff]  ;;  %v5915_v50 = vpop.f32.mrf.mxu0 }
 0x53e   : > { %v8558_v37 = vrot.slane %v8509_v13, 7  ;;  %v9049_v19 = vrot.slane %v9006_v18, 7  ;;  %v9280_v47 = vunpack.c.l.b16 %v9199_v61  ;;  %v6010_v53 = vadd.f32 %v5911_v21, %v16777_v29 }
 0x53f   : > { %v6838_v51 = vcombine.high %v6486_v14, %v6486_v14  ;;  %v6845_v10 = vrot.slane %v6486_v14, %v14775_v4  ;;  %v6443_v28 = vadd.f32 %v6341_v6, %v6009_v38  ;;  %v6011_v62 = vadd.f32 %v5913_v52, %v16778_v63 }
 0x540   : > { %v15301_v58 = vsel %vm8525_vm10, %v8558_v37, %v8508_v27  ;;  %v15304_v22 = vsel %vm8525_vm10, %v9049_v19, %v9005_v20  ;;  %v9323_v8 = vrot.slane %v9280_v47, 7  ;;  %v6444_v45 = vadd.f32 %v6345_v0, %v6010_v53  ;;  %v16779_v0 = vld [vmem:[#allocation14_spill] sm:$0xff] }
 0x541   : > { %v6852_v3 = vrot.slane %v6838_v51, %v14775_v4  ;;  %v6853_v60 = vcombine.high %v6845_v10, %v6845_v10  ;;  %v7708_v35 = vsel %vm1680_vm1, %v6845_v10, -inf  ;;  %v6487_v56 = vmax.f32 %v6442_v32, %v6443_v28 }
 0x542   : > { %v15310_v6 = vsel %vm8525_vm10, %v9323_v8, %v9279_v2  ;;  %v7709_v21 = vrot.slane %v7708_v35, 4  ;;  %v6445_v13 = vadd.f32 %v6347_v44, %v6011_v62  ;;  %v15320_v47 = vadd.f32 %v5915_v50, %v16779_v0 }
 0x543   : > { %v6854_v27 = vcombine.high %v6852_v3, %v6852_v3  ;;  %v7715_v18 = vsel %vm1680_vm1, %v6853_v60, -inf  ;;  %v7722_v20 = vsel %vm1680_vm1, %v6852_v3, -inf  ;;  %v6855_v61 = vcombine.high %v6487_v56, %v6487_v56 }
 0x544   : > { %v7710_v1 = vmax.f32 %v7708_v35, %v7709_v21  ;;  %v7716_v14 = vrot.slane %v7715_v18, 4  ;;  %v7723_v43 = vrot.slane %v7722_v20, 4  ;;  %v6862_v38 = vrot.slane %v6487_v56, %v14775_v4 }
 0x545   : > { %v7729_v37 = vsel %vm1680_vm1, %v6854_v27, -inf  ;;  %v6869_v2 = vrot.slane %v6855_v61, %v14775_v4  ;;  %v15317_v19 = vmax.f32 %v6444_v45, %v6445_v13 }
 0x546   : > { %v7711_v32 = vrot.slane %v7710_v1, 2  ;;  %v7717_v52 = vmax.f32 %v7715_v18, %v7716_v14  ;;  %v7724_v51 = vmax.f32 %v7722_v20, %v7723_v43  ;;  %v7730_v10 = vrot.slane %v7729_v37, 4 }
 0x547   : > { %v6870_v28 = vcombine.high %v6862_v38, %v6862_v38  ;;  %v6871_v29 = vcombine.high %v6869_v2, %v6869_v2  ;;  %v7736_v53 = vsel %vm1680_vm1, %v6862_v38, -inf  ;;  %v7750_v44 = vsel %vm1680_vm1, %v6869_v2, -inf }
 0x548   : > { %v7712_v8 = vmax.f32 %v7710_v1, %v7711_v32  ;;  %v7718_v63 = vrot.slane %v7717_v52, 2  ;;  %v7725_v62 = vrot.slane %v7724_v51, 2  ;;  %v7731_v3 = vmax.f32 %v7729_v37, %v7730_v10 }
 0x549   : > { %v7737_v60 = vrot.slane %v7736_v53, 4  ;;  %v7743_v35 = vsel %vm1680_vm1, %v6870_v28, -inf  ;;  %v7751_v56 = vrot.slane %v7750_v44, 4  ;;  %v7757_v21 = vsel %vm1680_vm1, %v6871_v29, -inf }
 0x54a   : > { %v7713_v45 = vrot.slane %v7712_v8, 1  ;;  %v7719_v13 = vmax.f32 %v7717_v52, %v7718_v63  ;;  %v7726_v27 = vmax.f32 %v7724_v51, %v7725_v62  ;;  %v7732_v18 = vrot.slane %v7731_v3, 2 }
 0x54b   : > { %v7738_v20 = vmax.f32 %v7736_v53, %v7737_v60  ;;  %v7744_v61 = vrot.slane %v7743_v35, 4  ;;  %v7752_v50 = vmax.f32 %v7750_v44, %v7751_v56  ;;  %v7758_v14 = vrot.slane %v7757_v21, 4 }
 0x54c   : > { %v7714_v43 = vmax.f32 %v7712_v8, %v7713_v45  ;;  %v7720_v38 = vrot.slane %v7719_v13, 1  ;;  %v7727_v1 = vrot.slane %v7726_v27, 1  ;;  %v7733_v2 = vmax.f32 %v7731_v3, %v7732_v18 }
 0x54d   : > { %v7739_v0 = vrot.slane %v7738_v20, 2  ;;  %v7745_v37 = vmax.f32 %v7743_v35, %v7744_v61  ;;  %v7753_v32 = vrot.slane %v7752_v50, 2  ;;  %v7759_v10 = vmax.f32 %v7757_v21, %v7758_v14 }
 0x54e   : > { %v7721_v28 = vmax.f32 %v7719_v13, %v7720_v38  ;;  %v7728_v48 = vmax.f32 %v7726_v27, %v7727_v1  ;;  %v7734_v36 = vrot.slane %v7733_v2, 1  ;;  %v8179_v29 = vadd.f32 %v15105_v9, %v7714_v43  ;;  %v6349_v43 = vpop.f32.mrf.mxu1 }
 0x54f   : > { %v7740_v52 = vmax.f32 %v7738_v20, %v7739_v0  ;;  %v7746_v51 = vrot.slane %v7745_v37, 2  ;;  %v7754_v53 = vmax.f32 %v7752_v50, %v7753_v32  ;;  %v7760_v63 = vrot.slane %v7759_v10, 2 }
 0x550   : > { %v7735_v44 = vmax.f32 %v7733_v2, %v7734_v36  ;;  %v8180_v8 = vadd.f32 %v15105_v9, %v7721_v28  ;;  %v8181_v62 = vadd.f32 %v15105_v9, %v7728_v48  ;;  %v8307_v3 = vmax.f32 %v8179_v29, 0.0 }
 0x551   : > { %v7741_v60 = vrot.slane %v7740_v52, 1  ;;  %v7747_v35 = vmax.f32 %v7745_v37, %v7746_v51  ;;  %v7755_v56 = vrot.slane %v7754_v53, 1  ;;  %v7761_v21 = vmax.f32 %v7759_v10, %v7760_v63  ;;  %v5917_v63 = vpop.f32.mrf.mxu0 }
 0x552   : > { %v8182_v45 = vadd.f32 %v15105_v9, %v7735_v44  ;;  %v8308_v13 = vmax.f32 %v8180_v8, 0.0  ;;  %v8309_v27 = vmax.f32 %v8181_v62, 0.0  ;;  %v8381_v18 = vpack.c.bf16 %v8307_v3, %v8307_v3  ;;  %v6351_v62 = vpop.f32.mrf.mxu1 }
 0x553   : > { %v7742_v61 = vmax.f32 %v7740_v52, %v7741_v60  ;;  %v7748_v20 = vrot.slane %v7747_v35, 1  ;;  %v7756_v14 = vmax.f32 %v7754_v53, %v7755_v56  ;;  %v7762_v50 = vrot.slane %v7761_v21, 1 }
 0x554   : > { %v8310_v36 = vmax.f32 %v8182_v45, 0.0  ;;  %v8429_v38 = vpack.c.bf16 %v8308_v13, %v8308_v13  ;;  %v8737_v1 = vunpack.c.l.b16 %v8381_v18  ;;  %v8926_v2 = vpack.c.bf16 %v8309_v27, %v8309_v27 }
 0x555   : > { %v7749_v48 = vmax.f32 %v7747_v35, %v7748_v20  ;;  %v7763_v0 = vmax.f32 %v7761_v21, %v7762_v50  ;;  %v8183_v37 = vadd.f32 %v15105_v9, %v7742_v61  ;;  %v8185_v32 = vadd.f32 %v15105_v9, %v7756_v14  ;;  %v5921_v14 = vpop.f32.mrf.mxu0 }
 0x556   : > { %v8510_v10 = vunpack.c.l.b16 %v8429_v38  ;;  %v8781_v28 = vrot.slane %v8737_v1, 6  ;;  %v9007_v29 = vunpack.c.l.b16 %v8926_v2  ;;  %v9200_v51 = vpack.c.bf16 %v8310_v36, %v8310_v36  ;;  %v6355_v1 = vpop.f32.mrf.mxu1 }
 0x557   : > { %v8184_v52 = vadd.f32 %v15105_v9, %v7749_v48  ;;  %v8186_v53 = vadd.f32 %v15105_v9, %v7763_v0  ;;  %v8311_v44 = vmax.f32 %v8183_v37, 0.0  ;;  %v8313_v8 = vmax.f32 %v8185_v32, 0.0 }
 0x558   : > { %v8560_v3 = vrot.slane %v8510_v10, 6  ;;  %v8782_v60 = vsel %vm8528_vm11, %v8781_v28, %v15295_v30  ;;  %v9051_v35 = vrot.slane %v9007_v29, 6  ;;  %v9281_v56 = vunpack.c.l.b16 %v9200_v51 }
 0x559   : > { %v8312_v21 = vmax.f32 %v8184_v52, 0.0  ;;  %v8314_v45 = vmax.f32 %v8186_v53, 0.0  ;;  %v8382_v13 = vpack.c.bf16 %v8311_v44, %v8311_v44  ;;  %v8927_v27 = vpack.c.bf16 %v8313_v8, %v8313_v8  ;;  %v5923_v52 = vpop.f32.mrf.mxu0  ;;  %v6357_v8 = vpop.f32.mrf.mxu1 }
 0x55a   : > { %v8561_v18 = vsel %vm8528_vm11, %v8560_v3, %v15301_v58  ;;  %v15340_v61 = vsel %vm8528_vm11, %v9051_v35, %v15304_v22  ;;  %v9325_v9 = vrot.slane %v9281_v56, 6  ;;  %v6872_v20 = vcombine.high %v15317_v19, %v15317_v19 }
 0x55b   : > { %v8430_v50 = vpack.c.bf16 %v8312_v21, %v8312_v21  ;;  %v8738_v30 = vunpack.c.l.b16 %v8382_v13  ;;  %v9008_v36 = vunpack.c.l.b16 %v8927_v27  ;;  %v9201_v38 = vpack.c.bf16 %v8314_v45, %v8314_v45 }
 0x55c   : > { %v15346_v2 = vsel %vm8528_vm11, %v9325_v9, %v15310_v6  ;;  %v6879_v58 = vrot.slane %v15317_v19, %v14775_v4  ;;  %v6886_v22 = vrot.slane %v6872_v20, %v14775_v4  ;;  %v6446_v32 = vadd.f32 %v6349_v43, %v15320_v47  ;;  %v16781_v43 = vld [vmem:[#allocation13_spill] sm:$0xff] }
 0x55d   : > { %16780 = vst [vmem:[#allocation55_spill] sm:$0xff] %v15346_v2  ;;  %v8511_v48 = vunpack.c.l.b16 %v8430_v50  ;;  %v8783_v0 = vrot.slane %v8738_v30, 5  ;;  %v9282_v37 = vunpack.c.l.b16 %v9201_v38  ;;  %v15357_v44 = vrot.slane %v9008_v36, 5  ;;  %v16783_v50 = vld [vmem:[#allocation23_spill] sm:$0xff]  ;;  %v5925_v36 = vpop.f32.mrf.mxu0 }
 0x55e   : > { %v6887_v10 = vcombine.high %v6879_v58, %v6879_v58  ;;  %v6888_v28 = vcombine.high %v6886_v22, %v6886_v22  ;;  %v7764_v29 = vsel %vm1680_vm1, %v6879_v58, -inf  ;;  %v7778_v51 = vsel %vm1680_vm1, %v6886_v22, -inf }
 0x55f   : > { %v8562_v6 = vrot.slane %v8511_v48, 5  ;;  %v15355_v53 = vsel %vm8531_vm12, %v8783_v0, %v8782_v60  ;;  %v7765_v19 = vrot.slane %v7764_v29, 4  ;;  %v7779_v35 = vrot.slane %v7778_v51, 4  ;;  %v16784_v48 = vld [vmem:[#allocation21_spill] sm:$0xff] }
 0x560   : > { %v7771_v3 = vsel %vm1680_vm1, %v6887_v10, -inf  ;;  %v7785_v47 = vsel %vm1680_vm1, %v6888_v28, -inf  ;;  %v6013_v56 = vadd.f32 %v5917_v63, %v16781_v43  ;;  %v15365_v9 = vrot.slane %v9282_v37, 5  ;;  %v6359_v10 = vpop.f32.mrf.mxu1  ;;  %v11111_v63 = vld [vmem:[%s16116_s5 + $0x50] sm:$0xff]  }
 0x561   : > { %v15363_v21 = vsel %vm8531_vm12, %v8562_v6, %v8561_v18  ;;  %v7766_v45 = vmax.f32 %v7764_v29, %v7765_v19  ;;  %v7772_v13 = vrot.slane %v7771_v3, 4  ;;  %v7786_v27 = vrot.slane %v7785_v47, 4  ;;  %v16785_v37 = vld [vmem:[#allocation20_spill] sm:$0xff]  ;;  %10483 = vmatprep.subr.bf16.mxu0 %v11111_v63 }
 0x562   : > { %16782 = vst [vmem:[#allocation51_spill] sm:$0xff] %v15365_v9  ;;  %v7780_v60 = vmax.f32 %v7778_v51, %v7779_v35  ;;  %v6447_v20 = vadd.f32 %v6351_v62, %v6013_v56  ;;  %v6014_v30 = vadd.f32 %v5921_v14, %v16783_v50  ;;  %v6015_v0 = vadd.f32 %v5923_v52, %v16784_v48 }
 0x563   : > { %v7767_v38 = vrot.slane %v7766_v45, 2  ;;  %v7773_v58 = vmax.f32 %v7771_v3, %v7772_v13  ;;  %v7787_v22 = vmax.f32 %v7785_v47, %v7786_v27  ;;  %v6016_v6 = vadd.f32 %v5925_v36, %v16785_v37  ;;  %10484 = vmatpush3.bf16.msra.mxu0 %v11111_v63 }
 0x564   : > { %v7781_v18 = vrot.slane %v7780_v60, 2  ;;  %v6489_v28 = vmax.f32 %v6446_v32, %v6447_v20  ;;  %v6448_v29 = vadd.f32 %v6355_v1, %v6014_v30  ;;  %v6449_v14 = vadd.f32 %v6357_v8, %v6015_v0 }
 0x565   : > { %v7768_v51 = vmax.f32 %v7766_v45, %v7767_v38  ;;  %v7774_v62 = vrot.slane %v7773_v58, 2  ;;  %v7788_v19 = vrot.slane %v7787_v22, 2  ;;  %v15374_v52 = vadd.f32 %v6359_v10, %v6016_v6  ;;  %v15385_v10 = vld [vmem:[%s16115_s4] ss:$0 sm:$0xff] }
 0x566   : > { %v7782_v35 = vmax.f32 %v7780_v60, %v7781_v18  ;;  %v6889_v3 = vcombine.high %v6489_v28, %v6489_v28  ;;  %v6896_v47 = vrot.slane %v6489_v28, %v14775_v4  ;;  %v15376_v27 = vmax.f32 %v6448_v29, %v6449_v14 }
 0x567   : > { %v7769_v43 = vrot.slane %v7768_v51, 1  ;;  %v7775_v56 = vmax.f32 %v7773_v58, %v7774_v62  ;;  %v7789_v13 = vmax.f32 %v7787_v22, %v7788_v19 }
 0x568   : > { %v7783_v1 = vrot.slane %v7782_v35, 1  ;;  %v6903_v32 = vrot.slane %v6889_v3, %v14775_v4  ;;  %v6904_v45 = vcombine.high %v6896_v47, %v6896_v47  ;;  %v7792_v20 = vsel %vm1680_vm1, %v6896_v47, -inf }
 0x569   : > { %v7770_v8 = vmax.f32 %v7768_v51, %v7769_v43  ;;  %v7776_v50 = vrot.slane %v7775_v56, 1  ;;  %v7790_v60 = vrot.slane %v7789_v13, 1  ;;  %v7793_v30 = vrot.slane %v7792_v20, 4 }
 0x56a   : > { %v7784_v36 = vmax.f32 %v7782_v35, %v7783_v1  ;;  %v6905_v38 = vcombine.high %v6903_v32, %v6903_v32  ;;  %v7799_v48 = vsel %vm1680_vm1, %v6904_v45, -inf  ;;  %v7806_v0 = vsel %vm1680_vm1, %v6903_v32, -inf }
 0x56b   : > { %v7777_v58 = vmax.f32 %v7775_v56, %v7776_v50  ;;  %v7791_v22 = vmax.f32 %v7789_v13, %v7790_v60  ;;  %v8187_v63 = vadd.f32 %v15385_v10, %v7770_v8  ;;  %v7794_v18 = vmax.f32 %v7792_v20, %v7793_v30 }
 0x56c   : > { %v8189_v28 = vadd.f32 %v15385_v10, %v7784_v36  ;;  %v7800_v29 = vrot.slane %v7799_v48, 4  ;;  %v7807_v37 = vrot.slane %v7806_v0, 4  ;;  %v7813_v6 = vsel %vm1680_vm1, %v6905_v38, -inf }
 0x56d   : > { %v8188_v51 = vadd.f32 %v15385_v10, %v7777_v58  ;;  %v8190_v62 = vadd.f32 %v15385_v10, %v7791_v22  ;;  %v8315_v19 = vmax.f32 %v8187_v63, 0.0  ;;  %v7795_v14 = vrot.slane %v7794_v18, 2 }
 0x56e   : > { %v8317_v35 = vmax.f32 %v8189_v28, 0.0  ;;  %v7801_v3 = vmax.f32 %v7799_v48, %v7800_v29  ;;  %v7808_v47 = vmax.f32 %v7806_v0, %v7807_v37  ;;  %v7814_v43 = vrot.slane %v7813_v6, 4 }
 0x56f   : > { %v8316_v56 = vmax.f32 %v8188_v51, 0.0  ;;  %v8318_v13 = vmax.f32 %v8190_v62, 0.0  ;;  %v8383_v1 = vpack.c.bf16 %v8315_v19, %v8315_v19  ;;  %v7796_v32 = vmax.f32 %v7794_v18, %v7795_v14 }
 0x570   : > { %v8928_v45 = vpack.c.bf16 %v8317_v35, %v8317_v35  ;;  %v7802_v20 = vrot.slane %v7801_v3, 2  ;;  %v7809_v8 = vrot.slane %v7808_v47, 2  ;;  %v7815_v50 = vmax.f32 %v7813_v6, %v7814_v43 }
 0x571   : > { %v8431_v60 = vpack.c.bf16 %v8316_v56, %v8316_v56  ;;  %v8739_v30 = vunpack.c.l.b16 %v8383_v1  ;;  %v9202_v36 = vpack.c.bf16 %v8318_v13, %v8318_v13  ;;  %v7797_v38 = vrot.slane %v7796_v32, 1 }
 0x572   : > { %v9009_v58 = vunpack.c.l.b16 %v8928_v45  ;;  %v7803_v22 = vmax.f32 %v7801_v3, %v7802_v20  ;;  %v7810_v63 = vmax.f32 %v7808_v47, %v7809_v8  ;;  %v7816_v9 = vrot.slane %v7815_v50, 2  ;;  %v5927_v3 = vpop.f32.mrf.mxu0  ;;  %v16787_v45 = vld [vmem:[#allocation19_spill] sm:$0xff] }
 0x573   : > { %v8512_v28 = vunpack.c.l.b16 %v8431_v60  ;;  %v15392_v48 = vrot.slane %v8739_v30, 4  ;;  %v9283_v0 = vunpack.c.l.b16 %v9202_v36  ;;  %v7798_v29 = vmax.f32 %v7796_v32, %v7797_v38 }
 0x574   : > { %v15394_v37 = vrot.slane %v9009_v58, 4  ;;  %v7804_v18 = vrot.slane %v7803_v22, 1  ;;  %v7811_v51 = vrot.slane %v7810_v63, 1  ;;  %v7817_v62 = vmax.f32 %v7815_v50, %v7816_v9 }
 0x575   : > { %v8564_v19 = vrot.slane %v8512_v28, 4  ;;  %v15396_v6 = vrot.slane %v9283_v0, 4  ;;  %v8191_v14 = vadd.f32 %v15385_v10, %v7798_v29  ;;  %v6906_v35 = vcombine.high %v15376_v27, %v15376_v27 }
 0x576   : > { %v7805_v47 = vmax.f32 %v7803_v22, %v7804_v18  ;;  %v7812_v43 = vmax.f32 %v7810_v63, %v7811_v51  ;;  %v7818_v56 = vrot.slane %v7817_v62, 1  ;;  %v6913_v13 = vrot.slane %v15376_v27, %v14775_v4 }
 0x577   : > { %16786 = vst [vmem:[#allocation18_spill] sm:$0xff] %v15396_v6  ;;  %v8565_v1 = vsel %vm5374_vm5, %v8564_v19, %v15363_v21  ;;  %v8319_v32 = vmax.f32 %v8191_v14, 0.0  ;;  %v6920_v9 = vrot.slane %v6906_v35, %v14775_v4  ;;  %v6017_v20 = vadd.f32 %v5927_v3, %v16787_v45  ;;  %v6361_v3 = vpop.f32.mrf.mxu1 }
 0x578   : > { %v7819_v8 = vmax.f32 %v7817_v62, %v7818_v56  ;;  %v8192_v50 = vadd.f32 %v15385_v10, %v7805_v47  ;;  %v8193_v60 = vadd.f32 %v15385_v10, %v7812_v43  ;;  %v6921_v30 = vcombine.high %v6913_v13, %v6913_v13 }
 0x579   : > { %v8384_v36 = vpack.c.bf16 %v8319_v32, %v8319_v32  ;;  %v6922_v38 = vcombine.high %v6920_v9, %v6920_v9  ;;  %v7820_v58 = vsel %vm1680_vm1, %v6913_v13, -inf  ;;  %v7834_v27 = vsel %vm1680_vm1, %v6920_v9, -inf }
 0x57a   : > { %v8194_v21 = vadd.f32 %v15385_v10, %v7819_v8  ;;  %v8320_v22 = vmax.f32 %v8192_v50, 0.0  ;;  %v8321_v63 = vmax.f32 %v8193_v60, 0.0  ;;  %v7821_v28 = vrot.slane %v7820_v58, 4 }
 0x57b   : > { %v8740_v0 = vunpack.c.l.b16 %v8384_v36  ;;  %v7827_v29 = vsel %vm1680_vm1, %v6921_v30, -inf  ;;  %v7835_v18 = vrot.slane %v7834_v27, 4  ;;  %v7841_v51 = vsel %vm1680_vm1, %v6922_v38, -inf }
 0x57c   : > { %v8322_v62 = vmax.f32 %v8194_v21, 0.0  ;;  %v8432_v19 = vpack.c.bf16 %v8320_v22, %v8320_v22  ;;  %v8929_v14 = vpack.c.bf16 %v8321_v63, %v8321_v63  ;;  %v7822_v35 = vmax.f32 %v7820_v58, %v7821_v28  ;;  %v5931_v58 = vpop.f32.mrf.mxu0 }
 0x57d   : > { %v15414_v47 = vrot.slane %v8740_v0, 3  ;;  %v7828_v43 = vrot.slane %v7827_v29, 4  ;;  %v7836_v56 = vmax.f32 %v7834_v27, %v7835_v18  ;;  %v7842_v13 = vrot.slane %v7841_v51, 4  ;;  %v6365_v18 = vpop.f32.mrf.mxu1 }
 0x57e   : > { %v8513_v32 = vunpack.c.l.b16 %v8432_v19  ;;  %v9010_v9 = vunpack.c.l.b16 %v8929_v14  ;;  %v9203_v45 = vpack.c.bf16 %v8322_v62, %v8322_v62  ;;  %v7823_v8 = vrot.slane %v7822_v35, 2 }
 0x57f   : > { %v7829_v50 = vmax.f32 %v7827_v29, %v7828_v43  ;;  %v7837_v60 = vrot.slane %v7836_v56, 2  ;;  %v7843_v30 = vmax.f32 %v7841_v51, %v7842_v13  ;;  %v6451_v36 = vadd.f32 %v6361_v3, %v6017_v20  ;;  %v16790_v51 = vld [vmem:[#allocation27_spill] sm:$0xff] }
 0x580   : > { %v8566_v6 = vrot.slane %v8513_v32, 3  ;;  %v15416_v38 = vrot.slane %v9010_v9, 3  ;;  %v9284_v21 = vunpack.c.l.b16 %v9203_v45  ;;  %v7824_v22 = vmax.f32 %v7822_v35, %v7823_v8 }
 0x581   : > { %v7830_v63 = vrot.slane %v7829_v50, 2  ;;  %v7838_v28 = vmax.f32 %v7836_v56, %v7837_v60  ;;  %v7844_v0 = vrot.slane %v7843_v30, 2  ;;  %v6491_v27 = vmax.f32 %v15374_v52, %v6451_v36 }
 0x582   : > { %16788 = vst [vmem:[#allocation16_spill] sm:$0xff] %v15416_v38  ;;  %v15420_v19 = vsel %vm8536_vm13, %v8566_v6, %v8565_v1  ;;  %v15422_v62 = vrot.slane %v9284_v21, 3  ;;  %v7825_v29 = vrot.slane %v7824_v22, 1  ;;  %v6018_v20 = vadd.f32 %v5931_v58, %v16790_v51 }
 0x583   : > { %v7831_v14 = vmax.f32 %v7829_v50, %v7830_v63  ;;  %v7839_v3 = vrot.slane %v7838_v28, 1  ;;  %v7845_v43 = vmax.f32 %v7843_v30, %v7844_v0  ;;  %v6923_v13 = vcombine.high %v6491_v27, %v6491_v27 }
 0x584   : > { %16789 = vst [vmem:[#allocation78_spill] sm:$0xff] %v15422_v62  ;;  %v7826_v35 = vmax.f32 %v7824_v22, %v7825_v29  ;;  %v6930_v32 = vrot.slane %v6491_v27, %v14775_v4  ;;  %v15426_v56 = vadd.f32 %v6365_v18, %v6018_v20  ;;  %v16791_v52 = vrot.slane %v15033_v57, 1 }
 0x585   : > { %v7832_v6 = vrot.slane %v7831_v14, 1  ;;  %v7840_v1 = vmax.f32 %v7838_v28, %v7839_v3  ;;  %v7846_v45 = vrot.slane %v7845_v43, 1  ;;  %v6937_v8 = vrot.slane %v6923_v13, %v14775_v4  ;;  %v15442_v13 = vpop.f32.mrf.mxu0 }
 0x586   : > { %v7413_v9 = vmax.f32 %v15033_v57, %v16791_v52  ;;  %v8195_v60 = vadd.f32 %v15385_v10, %v7826_v35  ;;  %v6938_v50 = vcombine.high %v6930_v32, %v6930_v32  ;;  %v7848_v30 = vsel %vm1680_vm1, %v6930_v32, -inf  ;;  %v15445_v32 = vpop.f32.mrf.mxu1 }
 0x587   : > { %v16792_v36 = vrot.slane %v15248_v54, 1  ;;  %v7833_v22 = vmax.f32 %v7831_v14, %v7832_v6  ;;  %v7847_v58 = vmax.f32 %v7845_v43, %v7846_v45  ;;  %v8197_v63 = vadd.f32 %v15385_v10, %v7840_v1  ;;  %v15447_v2 = vpop.f32.mrf.mxu0 }
 0x588   : > { %v6939_v0 = vcombine.high %v6937_v8, %v6937_v8  ;;  %v8323_v57 = vmax.f32 %v8195_v60, 0.0  ;;  %v7849_v27 = vrot.slane %v7848_v30, 4  ;;  %v7855_v28 = vsel %vm1680_vm1, %v6938_v50, -inf  ;;  %v15451_v38 = vpop.f32.mrf.mxu1 }
 0x589   : > { %v7637_v21 = vmax.f32 %v15248_v54, %v16792_v36  ;;  %v7862_v18 = vsel %vm1680_vm1, %v6937_v8, -inf  ;;  %v8196_v29 = vadd.f32 %v15385_v10, %v7833_v22  ;;  %v8198_v51 = vadd.f32 %v15385_v10, %v7847_v58 }
 0x58a   : > { %v8325_v20 = vmax.f32 %v8197_v63, 0.0  ;;  %v7856_v3 = vrot.slane %v7855_v28, 4  ;;  %v8385_v54 = vpack.c.bf16 %v8323_v57, %v8323_v57  ;;  %v7850_v14 = vmax.f32 %v7848_v30, %v7849_v27 }
 0x58b   : > { %v7863_v43 = vrot.slane %v7862_v18, 4  ;;  %v7869_v35 = vsel %vm1680_vm1, %v6939_v0, -inf  ;;  %v8324_v52 = vmax.f32 %v8196_v29, 0.0  ;;  %v8326_v6 = vmax.f32 %v8198_v51, 0.0 }
 0x58c   : > { %v8930_v1 = vpack.c.bf16 %v8325_v20, %v8325_v20  ;;  %v7857_v45 = vmax.f32 %v7855_v28, %v7856_v3  ;;  %v8741_v8 = vunpack.c.l.b16 %v8385_v54  ;;  %v7851_v60 = vrot.slane %v7850_v14, 2 }
 0x58d   : > { %v7864_v50 = vmax.f32 %v7862_v18, %v7863_v43  ;;  %v7870_v36 = vrot.slane %v7869_v35, 4  ;;  %v8433_v22 = vpack.c.bf16 %v8324_v52, %v8324_v52  ;;  %v9204_v63 = vpack.c.bf16 %v8326_v6, %v8326_v6 }
 0x58e   : > { %v9011_v58 = vunpack.c.l.b16 %v8930_v1  ;;  %v7858_v62 = vrot.slane %v7857_v45, 2  ;;  %v15449_v30 = vrot.slane %v8741_v8, 2  ;;  %v7852_v57 = vmax.f32 %v7850_v14, %v7851_v60  ;;  %v15462_v1 = vpop.f32.mrf.mxu0 }
 0x58f   : > { %v7865_v0 = vrot.slane %v7864_v50, 2  ;;  %v7871_v27 = vmax.f32 %v7869_v35, %v7870_v36  ;;  %v8514_v29 = vunpack.c.l.b16 %v8433_v22  ;;  %v9285_v28 = vunpack.c.l.b16 %v9204_v63 }
 0x590   : > { %v15453_v51 = vrot.slane %v9011_v58, 2  ;;  %v7859_v20 = vmax.f32 %v7857_v45, %v7858_v62  ;;  %v7853_v18 = vrot.slane %v7852_v57, 1  ;;  %v8132_v43 = vadd.f32 %v15385_v10, %v15014_v34  ;;  %v15466_v45 = vpop.f32.mrf.mxu1 }
 0x591   : > { %v7866_v3 = vmax.f32 %v7864_v50, %v7865_v0  ;;  %v7872_v54 = vrot.slane %v7871_v27, 2  ;;  %v15457_v52 = vrot.slane %v8514_v29, 2  ;;  %v15459_v6 = vrot.slane %v9285_v28, 2 }
 0x592   : > { %16793 = vst [vmem:[#allocation76_spill] sm:$0xff] %v15453_v51  ;;  %v7860_v14 = vrot.slane %v7859_v20, 1  ;;  %v8136_v35 = vadd.f32 %v15385_v10, %v7413_v9  ;;  %v7854_v8 = vmax.f32 %v7852_v57, %v7853_v18  ;;  %v8164_v62 = vadd.f32 %v15385_v10, %v15239_v11  ;;  %v15473_v11 = vpop.f32.mrf.mxu0 }
 0x593   : > { %16794 = vst [vmem:[#allocation75_spill] sm:$0xff] %v15459_v6  ;;  %v7867_v60 = vrot.slane %v7866_v3, 1  ;;  %v7873_v36 = vmax.f32 %v7871_v27, %v7872_v54  ;;  %v8168_v34 = vadd.f32 %v15385_v10, %v7637_v21  ;;  %v8256_v22 = vmax.f32 %v14996_v49, 0.0  ;;  %v15476_v49 = vpop.f32.mrf.mxu1 }
 0x594   : > { %v7861_v50 = vmax.f32 %v7859_v20, %v7860_v14  ;;  %v8260_v58 = vmax.f32 %v8132_v43, 0.0  ;;  %v8199_v9 = vadd.f32 %v15385_v10, %v7854_v8  ;;  %v8264_v29 = vmax.f32 %v8136_v35, 0.0 }
 0x595   : > { %v7868_v63 = vmax.f32 %v7866_v3, %v7867_v60  ;;  %v7874_v0 = vrot.slane %v7873_v36, 1  ;;  %v8288_v27 = vmax.f32 %v15221_v24, 0.0  ;;  %v8292_v28 = vmax.f32 %v8164_v62, 0.0 }
 0x596   : > { %v8200_v57 = vadd.f32 %v15385_v10, %v7861_v50  ;;  %v8296_v18 = vmax.f32 %v8168_v34, 0.0  ;;  %v8327_v21 = vmax.f32 %v8199_v9, 0.0  ;;  %v8416_v14 = vpack.c.bf16 %v8256_v22, %v8256_v22 }
 0x597   : > { %v7875_v54 = vmax.f32 %v7873_v36, %v7874_v0  ;;  %v8201_v20 = vadd.f32 %v15385_v10, %v7868_v63  ;;  %v8417_v43 = vpack.c.bf16 %v8260_v58, %v8260_v58  ;;  %v8418_v60 = vpack.c.bf16 %v8264_v29, %v8264_v29  ;;  %v5943_v63 = vpop.f32.mrf.mxu0  ;;  %v6377_v29 = vpop.f32.mrf.mxu1 }
 0x598   : > { %v8328_v3 = vmax.f32 %v8200_v57, 0.0  ;;  %v8424_v8 = vpack.c.bf16 %v8288_v27, %v8288_v27  ;;  %v8386_v24 = vpack.c.bf16 %v8327_v21, %v8327_v21  ;;  %v8425_v62 = vpack.c.bf16 %v8292_v28, %v8292_v28 }
 0x599   : > { %v15479_v35 = vadd.f32 %v15385_v10, %v7875_v54  ;;  %v8329_v50 = vmax.f32 %v8201_v20, 0.0  ;;  %v8426_v6 = vpack.c.bf16 %v8296_v18, %v8296_v18  ;;  %v8496_v36 = vunpack.c.l.b16 %v14982_v55 }
 0x59a   : > { %v8434_v34 = vpack.c.bf16 %v8328_v3, %v8328_v3  ;;  %v8497_v0 = vunpack.c.l.b16 %v8416_v14  ;;  %v8742_v9 = vunpack.c.l.b16 %v8386_v24  ;;  %v8498_v58 = vunpack.c.l.b16 %v8417_v43 }
 0x59b   : > { %v15483_v51 = vpack.c.bf16 %v8329_v50, %v8329_v50  ;;  %v8499_v27 = vunpack.c.l.b16 %v8418_v60  ;;  %v8504_v54 = vunpack.c.l.b16 %v15182_v46  ;;  %v8505_v20 = vunpack.c.l.b16 %v8424_v8 }
 0x59c   : > { %v8515_v57 = vunpack.c.l.b16 %v8434_v34  ;;  %v15486_v21 = vrot.slane %v8742_v9, 1  ;;  %v8506_v18 = vunpack.c.l.b16 %v8425_v62  ;;  %v8507_v55 = vunpack.c.l.b16 %v8426_v6  ;;  %v5945_v34 = vpop.f32.mrf.mxu0  ;;  %v6379_v9 = vpop.f32.mrf.mxu1 }
 0x59d   : > { %v16795_v3 = vunpack.c.l.b16 %v14872_v5  ;;  %v8533_v43 = vrot.slane %v8496_v36, 4  ;;  %v8535_v24 = vrot.slane %v8497_v0, 3  ;;  %v8538_v60 = vrot.slane %v8498_v58, 2 }
 0x59e   : > { %v15489_v14 = vrot.slane %v8515_v57, 1  ;;  %v8541_v8 = vrot.slane %v8499_v27, 1  ;;  %v16796_v62 = vunpack.c.l.b16 %v15063_v23  ;;  %v8554_v58 = vrot.slane %v8506_v18, 2  ;;  %v11112_v57 = vld [vmem:[%s16116_s5 + $0x48] sm:$0xff]  }
 0x59f   : > { %v8526_v50 = vsel %vm8525_vm10, %v14922_v25, %v16795_v3  ;;  %v8550_v25 = vrot.slane %v8504_v54, 4  ;;  %v8556_v27 = vrot.slane %v8507_v55, 1  ;;  %v16797_v54 = vld [vmem:[#allocation26_spill] sm:$0xff]  ;;  %10485 = vmatprep.subr.bf16.mxu0 %v11112_v57 }
 0x5a0   : > { %v8529_v46 = vsel %vm8528_vm11, %v14937_v41, %v8526_v50  ;;  %v8545_v5 = vsel %vm8525_vm10, %v15086_v12, %v16796_v62  ;;  %v8552_v41 = vrot.slane %v8505_v20, 3  ;;  %v6019_v3 = vadd.f32 %v15442_v13, %v16797_v54  ;;  %v16798_v50 = vld [vmem:[#allocation25_spill] sm:$0xff]  ;;  %v6381_v62 = vpop.f32.mrf.mxu1  ;;  %10486 = vmatpush3.bf16.msra.mxu0 %v11112_v57 }
 0x5a1   : > { %v8532_v6 = vsel %vm8531_vm12, %v14974_v16, %v8529_v46  ;;  %v8547_v0 = vsel %vm8528_vm11, %v15146_v7, %v8545_v5  ;;  %v11113_v16 = vld [vmem:[%s16116_s5 + $0x40] sm:$0xff]   ;;  %v5947_v7 = vpop.f32.mrf.mxu0  ;;  %v16799_v46 = vld [vmem:[#allocation57_spill] sm:$0xff] }
 0x5a2   : > { %v8534_v36 = vsel %vm5374_vm5, %v8533_v43, %v8532_v6  ;;  %v8549_v12 = vsel %vm8531_vm12, %v15163_v40, %v8547_v0  ;;  %v6020_v43 = vadd.f32 %v15447_v2, %v16798_v50  ;;  %v6021_v6 = vadd.f32 %v15462_v1, %v16799_v46  ;;  %v16800_v13 = vld [vmem:[#allocation33_spill] sm:$0xff]  ;;  %10487 = vmatprep.subr.bf16.mxu0 %v11113_v16 }
 0x5a3   : > { %v8537_v23 = vsel %vm8536_vm13, %v8535_v24, %v8534_v36  ;;  %v8551_v18 = vsel %vm5374_vm5, %v8550_v25, %v8549_v12  ;;  %v6453_v55 = vadd.f32 %v15445_v32, %v6019_v3  ;;  %v6022_v5 = vadd.f32 %v15473_v11, %v16800_v13  ;;  %v16801_v36 = vld [vmem:[#allocation59_spill] sm:$0xff]  ;;  %v16802_v32 = vld [vmem:[#allocation32_spill] sm:$0xff]  ;;  %v11114_v11 = vld [vmem:[%s16116_s5 + $0x38] sm:$0xff]  }
 0x5a4   : > { %v8540_v20 = vsel %vm8539_vm14, %v8538_v60, %v8537_v23  ;;  %v8553_v40 = vsel %vm8536_vm13, %v8552_v41, %v8551_v18  ;;  %v6454_v25 = vadd.f32 %v15451_v38, %v6020_v43  ;;  %v6455_v2 = vadd.f32 %v15466_v45, %v6021_v6  ;;  %v16803_v45 = vld [vmem:[#allocation31_spill] sm:$0xff]  ;;  %10488 = vmatpush3.bf16.msra.mxu0 %v11113_v16 }
 0x5a5   : > { %v8543_v24 = vsel %vm8542_vm15, %v8541_v8, %v8540_v20  ;;  %v8555_v60 = vsel %vm8539_vm14, %v8554_v58, %v8553_v40  ;;  %v6023_v1 = vadd.f32 %v5943_v63, %v16801_v36  ;;  %v6492_v8 = vmax.f32 %v15426_v56, %v6453_v55  ;;  %v5951_v58 = vpop.f32.mrf.mxu0  ;;  %v6385_v63 = vpop.f32.mrf.mxu1  ;;  %v16804_v56 = vld [vmem:[#allocation62_spill] sm:$0xff]  ;;  %10493 = vmatprep.subr.bf16.mxu0 %v11114_v11 }
 0x5a6   : > { %v8557_v0 = vsel %vm8542_vm15, %v8556_v27, %v8555_v60  ;;  %v6456_v41 = vadd.f32 %v15476_v49, %v6022_v5  ;;  %v6024_v23 = vadd.f32 %v5945_v34, %v16802_v32  ;;  %v6493_v38 = vmax.f32 %v6454_v25, %v6455_v2 }
 0x5a7   : > { %v8586_v57 = vpack.c.b16 %v8557_v0, %v8543_v24  ;;  %v6457_v12 = vadd.f32 %v6377_v29, %v6023_v1  ;;  %v6025_v54 = vadd.f32 %v5947_v7, %v16803_v45  ;;  %v6940_v3 = vcombine.high %v6492_v8, %v6492_v8 }
 0x5a8   : > { %v6947_v27 = vrot.slane %v6492_v8, %v14775_v4  ;;  %v15541_v20 = vadd.f32 %v6379_v9, %v6024_v23  ;;  %v6026_v49 = vadd.f32 %v5951_v58, %v16804_v56  ;;  %v6957_v34 = vcombine.high %v6493_v38, %v6493_v38 }
 0x5a9   : > { %10489 = vmatprep.mubr.bf16.mxu0 %v8586_v57  ;;  %v6964_v18 = vrot.slane %v6493_v38, %v14775_v4  ;;  %v15545_v50 = vmax.f32 %v6456_v41, %v6457_v12  ;;  %v15547_v43 = vadd.f32 %v6381_v62, %v6025_v54  ;;  %v6954_v29 = vrot.slane %v6940_v3, %v14775_v4 }
 0x5aa   : > { %v6955_v7 = vcombine.high %v6947_v27, %v6947_v27  ;;  %v7876_v46 = vsel %vm1680_vm1, %v6947_v27, -inf  ;;  %v15551_v6 = vadd.f32 %v6385_v63, %v6026_v49  ;;  %v6971_v24 = vrot.slane %v6957_v34, %v14775_v4 }
 0x5ab   : > { %v7877_v9 = vrot.slane %v7876_v46, 4  ;;  %v6972_v16 = vcombine.high %v6964_v18, %v6964_v18  ;;  %v7904_v40 = vsel %vm1680_vm1, %v6964_v18, -inf  ;;  %v6956_v55 = vcombine.high %v6954_v29, %v6954_v29 }
 0x5ac   : > { %v7883_v13 = vsel %vm1680_vm1, %v6955_v7, -inf  ;;  %v7890_v62 = vsel %vm1680_vm1, %v6954_v29, -inf  ;;  %v7905_v5 = vrot.slane %v7904_v40, 4  ;;  %v6973_v36 = vcombine.high %v6971_v24, %v6971_v24 }
 0x5ad   : > { %v7878_v60 = vmax.f32 %v7876_v46, %v7877_v9  ;;  %v7884_v25 = vrot.slane %v7883_v13, 4  ;;  %v7891_v2 = vrot.slane %v7890_v62, 4  ;;  %v7897_v1 = vsel %vm1680_vm1, %v6956_v55, -inf }
 0x5ae   : > { %v7906_v0 = vmax.f32 %v7904_v40, %v7905_v5  ;;  %v7911_v8 = vsel %vm1680_vm1, %v6972_v16, -inf  ;;  %v7918_v41 = vsel %vm1680_vm1, %v6971_v24, -inf  ;;  %v7898_v58 = vrot.slane %v7897_v1, 4 }
 0x5af   : > { %v7879_v32 = vrot.slane %v7878_v60, 2  ;;  %v7885_v23 = vmax.f32 %v7883_v13, %v7884_v25  ;;  %v7892_v11 = vmax.f32 %v7890_v62, %v7891_v2  ;;  %v7912_v38 = vrot.slane %v7911_v8, 4 }
 0x5b0   : > { %v7907_v57 = vrot.slane %v7906_v0, 2  ;;  %v7919_v12 = vrot.slane %v7918_v41, 4  ;;  %v7925_v45 = vsel %vm1680_vm1, %v6973_v36, -inf  ;;  %v7899_v27 = vmax.f32 %v7897_v1, %v7898_v58 }
 0x5b1   : > { %v7880_v54 = vmax.f32 %v7878_v60, %v7879_v32  ;;  %v7886_v63 = vrot.slane %v7885_v23, 2  ;;  %v7893_v3 = vrot.slane %v7892_v11, 2  ;;  %v7913_v49 = vmax.f32 %v7911_v8, %v7912_v38 }
 0x5b2   : > { %v7908_v56 = vmax.f32 %v7906_v0, %v7907_v57  ;;  %v7920_v34 = vmax.f32 %v7918_v41, %v7919_v12  ;;  %v7926_v18 = vrot.slane %v7925_v45, 4  ;;  %v7900_v9 = vrot.slane %v7899_v27, 2 }
 0x5b3   : > { %v7881_v29 = vrot.slane %v7880_v54, 1  ;;  %v7887_v7 = vmax.f32 %v7885_v23, %v7886_v63  ;;  %v7894_v46 = vmax.f32 %v7892_v11, %v7893_v3  ;;  %v7914_v16 = vrot.slane %v7913_v49, 2 }
 0x5b4   : > { %v7909_v24 = vrot.slane %v7908_v56, 1  ;;  %v7921_v40 = vrot.slane %v7920_v34, 2  ;;  %v7927_v55 = vmax.f32 %v7925_v45, %v7926_v18  ;;  %v7901_v25 = vmax.f32 %v7899_v27, %v7900_v9 }
 0x5b5   : > { %v7882_v13 = vmax.f32 %v7880_v54, %v7881_v29  ;;  %v7888_v62 = vrot.slane %v7887_v7, 1  ;;  %v7895_v5 = vrot.slane %v7894_v46, 1  ;;  %v7915_v2 = vmax.f32 %v7913_v49, %v7914_v16 }
 0x5b6   : > { %v7910_v60 = vmax.f32 %v7908_v56, %v7909_v24  ;;  %v7922_v36 = vmax.f32 %v7920_v34, %v7921_v40  ;;  %v7928_v1 = vrot.slane %v7927_v55, 2  ;;  %v7902_v41 = vrot.slane %v7901_v25, 1 }
 0x5b7   : > { %v7889_v0 = vmax.f32 %v7887_v7, %v7888_v62  ;;  %v7896_v8 = vmax.f32 %v7894_v46, %v7895_v5  ;;  %v8203_v32 = vadd.f32 %v15385_v10, %v7882_v13  ;;  %v7916_v23 = vrot.slane %v7915_v2, 1 }
 0x5b8   : > { %v7923_v11 = vrot.slane %v7922_v36, 1  ;;  %v7929_v58 = vmax.f32 %v7927_v55, %v7928_v1  ;;  %v8207_v57 = vadd.f32 %v15385_v10, %v7910_v60  ;;  %v7903_v38 = vmax.f32 %v7901_v25, %v7902_v41 }
 0x5b9   : > { %v8204_v12 = vadd.f32 %v15385_v10, %v7889_v0  ;;  %v8205_v45 = vadd.f32 %v15385_v10, %v7896_v8  ;;  %v8331_v54 = vmax.f32 %v8203_v32, 0.0  ;;  %v7917_v63 = vmax.f32 %v7915_v2, %v7916_v23 }
 0x5ba   : > { %v7924_v3 = vmax.f32 %v7922_v36, %v7923_v11  ;;  %v7930_v27 = vrot.slane %v7929_v58, 1  ;;  %v8335_v56 = vmax.f32 %v8207_v57, 0.0  ;;  %v8206_v49 = vadd.f32 %v15385_v10, %v7903_v38 }
 0x5bb   : > { %v8332_v34 = vmax.f32 %v8204_v12, 0.0  ;;  %v8333_v18 = vmax.f32 %v8205_v45, 0.0  ;;  %v8387_v29 = vpack.c.bf16 %v8331_v54, %v8331_v54  ;;  %v8208_v46 = vadd.f32 %v15385_v10, %v7917_v63 }
 0x5bc   : > { %v7931_v7 = vmax.f32 %v7929_v58, %v7930_v27  ;;  %v8209_v9 = vadd.f32 %v15385_v10, %v7924_v3  ;;  %v8388_v24 = vpack.c.bf16 %v8335_v56, %v8335_v56  ;;  %v8334_v16 = vmax.f32 %v8206_v49, 0.0 }
 0x5bd   : > { %v8435_v40 = vpack.c.bf16 %v8332_v34, %v8332_v34  ;;  %v8743_v55 = vunpack.c.l.b16 %v8387_v29  ;;  %v8932_v13 = vpack.c.bf16 %v8333_v18, %v8333_v18  ;;  %v8336_v5 = vmax.f32 %v8208_v46, 0.0 }
 0x5be   : > { %v8210_v62 = vadd.f32 %v15385_v10, %v7931_v7  ;;  %v8337_v25 = vmax.f32 %v8209_v9, 0.0  ;;  %v8744_v60 = vunpack.c.l.b16 %v8388_v24  ;;  %v9206_v1 = vpack.c.bf16 %v8334_v16, %v8334_v16 }
 0x5bf   : > { %v8516_v2 = vunpack.c.l.b16 %v8435_v40  ;;  %v9013_v36 = vunpack.c.l.b16 %v8932_v13  ;;  %v6974_v0 = vcombine.high %v15545_v50, %v15545_v50  ;;  %v8436_v41 = vpack.c.bf16 %v8336_v5, %v8336_v5 }
 0x5c0   : > { %v8338_v8 = vmax.f32 %v8210_v62, 0.0  ;;  %v8793_v32 = vrot.slane %v8744_v60, 7  ;;  %v8933_v23 = vpack.c.bf16 %v8337_v25, %v8337_v25  ;;  %v9287_v11 = vunpack.c.l.b16 %v9206_v1 }
 0x5c1   : > { %v6981_v58 = vrot.slane %v15545_v50, %v14775_v4  ;;  %v6988_v57 = vrot.slane %v6974_v0, %v14775_v4  ;;  %v6495_v38 = vmax.f32 %v15541_v20, %v15547_v43  ;;  %v8517_v12 = vunpack.c.l.b16 %v8436_v41 }
 0x5c2   : > { %v15577_v45 = vsel %vm8525_vm10, %v8793_v32, %v8743_v55  ;;  %v9014_v54 = vunpack.c.l.b16 %v8933_v23  ;;  %v9207_v63 = vpack.c.bf16 %v8338_v8, %v8338_v8  ;;  %v5953_v55 = vpop.f32.mrf.mxu0  ;;  %v16805_v8 = vld [vmem:[#allocation65_spill] sm:$0xff] }
 0x5c3   : > { %v6989_v3 = vcombine.high %v6981_v58, %v6981_v58  ;;  %v6990_v27 = vcombine.high %v6988_v57, %v6988_v57  ;;  %v7932_v56 = vsel %vm1680_vm1, %v6981_v58, -inf  ;;  %v7946_v49 = vsel %vm1680_vm1, %v6988_v57, -inf }
 0x5c4   : > { %v8572_v34 = vrot.slane %v8517_v12, 7  ;;  %v9063_v18 = vrot.slane %v9014_v54, 7  ;;  %v9288_v50 = vunpack.c.l.b16 %v9207_v63  ;;  %v7933_v29 = vrot.slane %v7932_v56, 4 }
 0x5c5   : > { %v7939_v7 = vsel %vm1680_vm1, %v6989_v3, -inf  ;;  %v7947_v46 = vrot.slane %v7946_v49, 4  ;;  %v7953_v20 = vsel %vm1680_vm1, %v6990_v27, -inf  ;;  %v6991_v43 = vcombine.high %v6495_v38, %v6495_v38 }
 0x5c6   : > { %v15584_v9 = vsel %vm8525_vm10, %v8572_v34, %v8516_v2  ;;  %v15587_v24 = vsel %vm8525_vm10, %v9063_v18, %v9013_v36  ;;  %v9337_v16 = vrot.slane %v9288_v50, 7  ;;  %v7934_v40 = vmax.f32 %v7932_v56, %v7933_v29 }
 0x5c7   : > { %v7940_v13 = vrot.slane %v7939_v7, 4  ;;  %v7948_v62 = vmax.f32 %v7946_v49, %v7947_v46  ;;  %v7954_v5 = vrot.slane %v7953_v20, 4  ;;  %v6998_v25 = vrot.slane %v6495_v38, %v14775_v4 }
 0x5c8   : > { %v15591_v60 = vsel %vm8525_vm10, %v9337_v16, %v9287_v11  ;;  %v7935_v1 = vrot.slane %v7934_v40, 2  ;;  %v7005_v0 = vrot.slane %v6991_v43, %v14775_v4  ;;  %v15595_v2 = vadd.f32 %v5953_v55, %v16805_v8 }
 0x5c9   : > { %v7941_v41 = vmax.f32 %v7939_v7, %v7940_v13  ;;  %v7949_v36 = vrot.slane %v7948_v62, 2  ;;  %v7955_v32 = vmax.f32 %v7953_v20, %v7954_v5  ;;  %v7006_v23 = vcombine.high %v6998_v25, %v6998_v25 }
 0x5ca   : > { %v7936_v58 = vmax.f32 %v7934_v40, %v7935_v1  ;;  %v7007_v57 = vcombine.high %v7005_v0, %v7005_v0  ;;  %v7960_v12 = vsel %vm1680_vm1, %v6998_v25, -inf  ;;  %v7974_v54 = vsel %vm1680_vm1, %v7005_v0, -inf }
 0x5cb   : > { %v7942_v38 = vrot.slane %v7941_v41, 2  ;;  %v7950_v63 = vmax.f32 %v7948_v62, %v7949_v36  ;;  %v7956_v11 = vrot.slane %v7955_v32, 2  ;;  %v7961_v3 = vrot.slane %v7960_v12, 4 }
 0x5cc   : > { %v7937_v27 = vrot.slane %v7936_v58, 1  ;;  %v7967_v56 = vsel %vm1680_vm1, %v7006_v23, -inf  ;;  %v7975_v49 = vrot.slane %v7974_v54, 4  ;;  %v7981_v34 = vsel %vm1680_vm1, %v7007_v57, -inf }
 0x5cd   : > { %v7943_v18 = vmax.f32 %v7941_v41, %v7942_v38  ;;  %v7951_v50 = vrot.slane %v7950_v63, 1  ;;  %v7957_v29 = vmax.f32 %v7955_v32, %v7956_v11  ;;  %v7962_v7 = vmax.f32 %v7960_v12, %v7961_v3  ;;  %v5955_v32 = vpop.f32.mrf.mxu0  ;;  %v6387_v38 = vpop.f32.mrf.mxu1 }
 0x5ce   : > { %v7938_v46 = vmax.f32 %v7936_v58, %v7937_v27  ;;  %v7968_v20 = vrot.slane %v7967_v56, 4  ;;  %v7976_v43 = vmax.f32 %v7974_v54, %v7975_v49  ;;  %v7982_v16 = vrot.slane %v7981_v34, 4 }
 0x5cf   : > { %v7944_v40 = vrot.slane %v7943_v18, 1  ;;  %v7952_v55 = vmax.f32 %v7950_v63, %v7951_v50  ;;  %v7958_v13 = vrot.slane %v7957_v29, 1  ;;  %v7963_v62 = vrot.slane %v7962_v7, 2 }
 0x5d0   : > { %v8211_v5 = vadd.f32 %v15385_v10, %v7938_v46  ;;  %v7969_v25 = vmax.f32 %v7967_v56, %v7968_v20  ;;  %v7977_v1 = vrot.slane %v7976_v43, 2  ;;  %v7983_v0 = vmax.f32 %v7981_v34, %v7982_v16  ;;  %v5957_v20 = vpop.f32.mrf.mxu0 }
 0x5d1   : > { %v7945_v8 = vmax.f32 %v7943_v18, %v7944_v40  ;;  %v7959_v36 = vmax.f32 %v7957_v29, %v7958_v13  ;;  %v8213_v41 = vadd.f32 %v15385_v10, %v7952_v55  ;;  %v7964_v23 = vmax.f32 %v7962_v7, %v7963_v62  ;;  %v6389_v13 = vpop.f32.mrf.mxu1 }
 0x5d2   : > { %v8339_v57 = vmax.f32 %v8211_v5, 0.0  ;;  %v7970_v58 = vrot.slane %v7969_v25, 2  ;;  %v7978_v12 = vmax.f32 %v7976_v43, %v7977_v1  ;;  %v7984_v54 = vrot.slane %v7983_v0, 2 }
 0x5d3   : > { %v8212_v63 = vadd.f32 %v15385_v10, %v7945_v8  ;;  %v8214_v11 = vadd.f32 %v15385_v10, %v7959_v36  ;;  %v8341_v3 = vmax.f32 %v8213_v41, 0.0  ;;  %v7965_v27 = vrot.slane %v7964_v23, 1 }
 0x5d4   : > { %v8389_v56 = vpack.c.bf16 %v8339_v57, %v8339_v57  ;;  %v7971_v49 = vmax.f32 %v7969_v25, %v7970_v58  ;;  %v7979_v34 = vrot.slane %v7978_v12, 1  ;;  %v7985_v18 = vmax.f32 %v7983_v0, %v7984_v54 }
 0x5d5   : > { %v8340_v50 = vmax.f32 %v8212_v63, 0.0  ;;  %v8342_v29 = vmax.f32 %v8214_v11, 0.0  ;;  %v8934_v46 = vpack.c.bf16 %v8341_v3, %v8341_v3  ;;  %v7966_v7 = vmax.f32 %v7964_v23, %v7965_v27  ;;  %v5961_v63 = vpop.f32.mrf.mxu0 }
 0x5d6   : > { %v8745_v16 = vunpack.c.l.b16 %v8389_v56  ;;  %v7972_v40 = vrot.slane %v7971_v49, 1  ;;  %v7980_v43 = vmax.f32 %v7978_v12, %v7979_v34  ;;  %v7986_v55 = vrot.slane %v7985_v18, 1  ;;  %v6391_v56 = vpop.f32.mrf.mxu1 }
 0x5d7   : > { %v8437_v62 = vpack.c.bf16 %v8340_v50, %v8340_v50  ;;  %v9015_v5 = vunpack.c.l.b16 %v8934_v46  ;;  %v9208_v1 = vpack.c.bf16 %v8342_v29, %v8342_v29  ;;  %v8215_v8 = vadd.f32 %v15385_v10, %v7966_v7 }
 0x5d8   : > { %v8795_v36 = vrot.slane %v8745_v16, 6  ;;  %v7973_v41 = vmax.f32 %v7971_v49, %v7972_v40  ;;  %v7987_v25 = vmax.f32 %v7985_v18, %v7986_v55  ;;  %v8217_v0 = vadd.f32 %v15385_v10, %v7980_v43  ;;  %v16806_v43 = vld [vmem:[#allocation41_spill] sm:$0xff] }
 0x5d9   : > { %v8518_v57 = vunpack.c.l.b16 %v8437_v62  ;;  %v9065_v58 = vrot.slane %v9015_v5, 6  ;;  %v9289_v54 = vunpack.c.l.b16 %v9208_v1  ;;  %v8343_v23 = vmax.f32 %v8215_v8, 0.0  ;;  %v5963_v62 = vpop.f32.mrf.mxu0 }
 0x5da   : > { %v8796_v12 = vsel %vm8528_vm11, %v8795_v36, %v15577_v45  ;;  %v8216_v11 = vadd.f32 %v15385_v10, %v7973_v41  ;;  %v8218_v3 = vadd.f32 %v15385_v10, %v7987_v25  ;;  %v8345_v27 = vmax.f32 %v8217_v0, 0.0  ;;  %v6395_v36 = vpop.f32.mrf.mxu1  ;;  %v16808_v0 = vld [vmem:[#allocation56_spill] sm:$0xff] }
 0x5db   : > { %v8574_v34 = vrot.slane %v8518_v57, 6  ;;  %v15613_v49 = vsel %vm8528_vm11, %v9065_v58, %v15587_v24  ;;  %v9339_v18 = vrot.slane %v9289_v54, 6  ;;  %v8390_v50 = vpack.c.bf16 %v8343_v23, %v8343_v23 }
 0x5dc   : > { %v8344_v29 = vmax.f32 %v8216_v11, 0.0  ;;  %v8346_v46 = vmax.f32 %v8218_v3, 0.0  ;;  %v8935_v7 = vpack.c.bf16 %v8345_v27, %v8345_v27  ;;  %v6461_v16 = vadd.f32 %v6387_v38, %v15595_v2  ;;  %v16807_v2 = vld [vmem:[#allocation39_spill] sm:$0xff] }
 0x5dd   : > { %v8575_v45 = vsel %vm8528_vm11, %v8574_v34, %v15584_v9  ;;  %v15620_v10 = vsel %vm8528_vm11, %v9339_v18, %v15591_v60  ;;  %v8746_v40 = vunpack.c.l.b16 %v8390_v50  ;;  %v6028_v55 = vadd.f32 %v5955_v32, %v16806_v43 }
 0x5de   : > { %v8438_v24 = vpack.c.bf16 %v8344_v29, %v8344_v29  ;;  %v9016_v5 = vunpack.c.l.b16 %v8935_v7  ;;  %v9209_v1 = vpack.c.bf16 %v8346_v46, %v8346_v46  ;;  %v6496_v8 = vmax.f32 %v15551_v6, %v6461_v16  ;;  %v5965_v6 = vpop.f32.mrf.mxu0  ;;  %v6397_v46 = vpop.f32.mrf.mxu1  ;;  %v16810_v7 = vld [vmem:[#allocation37_spill] sm:$0xff] }
 0x5df   : > { %v8797_v41 = vrot.slane %v8746_v40, 5  ;;  %v6462_v25 = vadd.f32 %v6389_v13, %v6028_v55  ;;  %v6029_v38 = vadd.f32 %v5957_v20, %v16807_v2  ;;  %v6030_v9 = vadd.f32 %v5961_v63, %v16808_v0  ;;  %v16809_v13 = vld [vmem:[#allocation38_spill] sm:$0xff] }
 0x5e0   : > { %v8519_v57 = vunpack.c.l.b16 %v8438_v24  ;;  %v15626_v58 = vrot.slane %v9016_v5, 5  ;;  %v9290_v60 = vunpack.c.l.b16 %v9209_v1  ;;  %v7008_v54 = vcombine.high %v6496_v8, %v6496_v8 }
 0x5e1   : > { %v15629_v32 = vsel %vm8531_vm12, %v8797_v41, %v8796_v12  ;;  %v7015_v23 = vrot.slane %v6496_v8, %v14775_v4  ;;  %v6463_v11 = vadd.f32 %v6391_v56, %v6029_v38  ;;  %v6464_v3 = vadd.f32 %v6395_v36, %v6030_v9 }
 0x5e2   : > { %v8576_v27 = vrot.slane %v8519_v57, 5  ;;  %v15632_v34 = vrot.slane %v9290_v60, 5  ;;  %v7022_v20 = vrot.slane %v7008_v54, %v14775_v4  ;;  %v6031_v63 = vadd.f32 %v5963_v62, %v16809_v13 }
 0x5e3   : > { %v7023_v18 = vcombine.high %v7015_v23, %v7015_v23  ;;  %v7988_v50 = vsel %vm1680_vm1, %v7015_v23, -inf  ;;  %v6497_v29 = vmax.f32 %v6462_v25, %v6463_v11  ;;  %v15638_v12 = vadd.f32 %v5965_v6, %v16810_v7 }
 0x5e4   : > { %v15641_v16 = vsel %vm8531_vm12, %v8576_v27, %v8575_v45  ;;  %v7024_v56 = vcombine.high %v7022_v20, %v7022_v20  ;;  %v7989_v40 = vrot.slane %v7988_v50, 4  ;;  %v8002_v43 = vsel %vm1680_vm1, %v7022_v20, -inf }
 0x5e5   : > { %v7995_v55 = vsel %vm1680_vm1, %v7023_v18, -inf  ;;  %v8003_v24 = vrot.slane %v8002_v43, 4  ;;  %v7025_v5 = vcombine.high %v6497_v29, %v6497_v29  ;;  %v7032_v62 = vrot.slane %v6497_v29, %v14775_v4 }
 0x5e6   : > { %v7990_v1 = vmax.f32 %v7988_v50, %v7989_v40  ;;  %v7996_v8 = vrot.slane %v7995_v55, 4  ;;  %v8009_v36 = vsel %vm1680_vm1, %v7024_v56, -inf  ;;  %v6465_v41 = vadd.f32 %v6397_v46, %v6031_v63 }
 0x5e7   : > { %v8004_v25 = vmax.f32 %v8002_v43, %v8003_v24  ;;  %v8010_v2 = vrot.slane %v8009_v36, 4  ;;  %v7039_v45 = vrot.slane %v7025_v5, %v14775_v4  ;;  %v7040_v38 = vcombine.high %v7032_v62, %v7032_v62 }
 0x5e8   : > { %v7991_v0 = vrot.slane %v7990_v1, 2  ;;  %v7997_v9 = vmax.f32 %v7995_v55, %v7996_v8  ;;  %v8016_v57 = vsel %vm1680_vm1, %v7032_v62, -inf  ;;  %v15649_v60 = vmax.f32 %v6464_v3, %v6465_v41 }
 0x5e9   : > { %v8005_v54 = vrot.slane %v8004_v25, 2  ;;  %v8011_v23 = vmax.f32 %v8009_v36, %v8010_v2  ;;  %v7041_v11 = vcombine.high %v7039_v45, %v7039_v45  ;;  %v8017_v6 = vrot.slane %v8016_v57, 4 }
 0x5ea   : > { %v7992_v27 = vmax.f32 %v7990_v1, %v7991_v0  ;;  %v7998_v20 = vrot.slane %v7997_v9, 2  ;;  %v8023_v13 = vsel %vm1680_vm1, %v7040_v38, -inf  ;;  %v8030_v63 = vsel %vm1680_vm1, %v7039_v45, -inf  ;;  %v15657_v0 = vld [vmem:[%s16115_s4] ss:$0 sm:$0xff] }
 0x5eb   : > { %v8006_v18 = vmax.f32 %v8004_v25, %v8005_v54  ;;  %v8012_v50 = vrot.slane %v8011_v23, 2  ;;  %v8018_v29 = vmax.f32 %v8016_v57, %v8017_v6  ;;  %v8024_v46 = vrot.slane %v8023_v13, 4 }
 0x5ec   : > { %v7993_v7 = vrot.slane %v7992_v27, 1  ;;  %v7999_v56 = vmax.f32 %v7997_v9, %v7998_v20  ;;  %v8031_v40 = vrot.slane %v8030_v63, 4  ;;  %v8037_v3 = vsel %vm1680_vm1, %v7041_v11, -inf }
 0x5ed   : > { %v8007_v43 = vrot.slane %v8006_v18, 1  ;;  %v8013_v55 = vmax.f32 %v8011_v23, %v8012_v50  ;;  %v8019_v24 = vrot.slane %v8018_v29, 2  ;;  %v8025_v5 = vmax.f32 %v8023_v13, %v8024_v46 }
 0x5ee   : > { %v7994_v62 = vmax.f32 %v7992_v27, %v7993_v7  ;;  %v8000_v1 = vrot.slane %v7999_v56, 1  ;;  %v8032_v8 = vmax.f32 %v8030_v63, %v8031_v40  ;;  %v8038_v36 = vrot.slane %v8037_v3, 4 }
 0x5ef   : > { %v8008_v41 = vmax.f32 %v8006_v18, %v8007_v43  ;;  %v8014_v2 = vrot.slane %v8013_v55, 1  ;;  %v8020_v45 = vmax.f32 %v8018_v29, %v8019_v24  ;;  %v8026_v25 = vrot.slane %v8025_v5, 2 }
 0x5f0   : > { %v8001_v38 = vmax.f32 %v7999_v56, %v8000_v1  ;;  %v8219_v9 = vadd.f32 %v15657_v0, %v7994_v62  ;;  %v8033_v57 = vrot.slane %v8032_v8, 2  ;;  %v8039_v54 = vmax.f32 %v8037_v3, %v8038_v36 }
 0x5f1   : > { %v8015_v23 = vmax.f32 %v8013_v55, %v8014_v2  ;;  %v8221_v11 = vadd.f32 %v15657_v0, %v8008_v41  ;;  %v8021_v6 = vrot.slane %v8020_v45, 1  ;;  %v8027_v27 = vmax.f32 %v8025_v5, %v8026_v25 }
 0x5f2   : > { %v8220_v20 = vadd.f32 %v15657_v0, %v8001_v38  ;;  %v8347_v13 = vmax.f32 %v8219_v9, 0.0  ;;  %v8034_v63 = vmax.f32 %v8032_v8, %v8033_v57  ;;  %v8040_v18 = vrot.slane %v8039_v54, 2 }
 0x5f3   : > { %v8222_v50 = vadd.f32 %v15657_v0, %v8015_v23  ;;  %v8349_v29 = vmax.f32 %v8221_v11, 0.0  ;;  %v8022_v46 = vmax.f32 %v8020_v45, %v8021_v6  ;;  %v8028_v7 = vrot.slane %v8027_v27, 1 }
 0x5f4   : > { %v8348_v56 = vmax.f32 %v8220_v20, 0.0  ;;  %v8391_v40 = vpack.c.bf16 %v8347_v13, %v8347_v13  ;;  %v8035_v43 = vrot.slane %v8034_v63, 1  ;;  %v8041_v24 = vmax.f32 %v8039_v54, %v8040_v18 }
 0x5f5   : > { %v8350_v3 = vmax.f32 %v8222_v50, 0.0  ;;  %v8936_v55 = vpack.c.bf16 %v8349_v29, %v8349_v29  ;;  %v8029_v62 = vmax.f32 %v8027_v27, %v8028_v7  ;;  %v8223_v1 = vadd.f32 %v15657_v0, %v8022_v46 }
 0x5f6   : > { %v8439_v5 = vpack.c.bf16 %v8348_v56, %v8348_v56  ;;  %v8747_v36 = vunpack.c.l.b16 %v8391_v40  ;;  %v8036_v41 = vmax.f32 %v8034_v63, %v8035_v43  ;;  %v8042_v2 = vrot.slane %v8041_v24, 1 }
 0x5f7   : > { %v9017_v8 = vunpack.c.l.b16 %v8936_v55  ;;  %v9210_v25 = vpack.c.bf16 %v8350_v3, %v8350_v3  ;;  %v8224_v38 = vadd.f32 %v15657_v0, %v8029_v62  ;;  %v8351_v9 = vmax.f32 %v8223_v1, 0.0  ;;  %v6399_v55 = vpop.f32.mrf.mxu1 }
 0x5f8   : > { %v8520_v45 = vunpack.c.l.b16 %v8439_v5  ;;  %v15665_v57 = vrot.slane %v8747_v36, 4  ;;  %v8043_v23 = vmax.f32 %v8041_v24, %v8042_v2  ;;  %v8225_v54 = vadd.f32 %v15657_v0, %v8036_v41 }
 0x5f9   : > { %v15668_v11 = vrot.slane %v9017_v8, 4  ;;  %v9291_v6 = vunpack.c.l.b16 %v9210_v25  ;;  %v8352_v27 = vmax.f32 %v8224_v38, 0.0  ;;  %v8392_v20 = vpack.c.bf16 %v8351_v9, %v8351_v9 }
 0x5fa   : > { %v8578_v13 = vrot.slane %v8520_v45, 4  ;;  %v8226_v63 = vadd.f32 %v15657_v0, %v8043_v23  ;;  %v8353_v18 = vmax.f32 %v8225_v54, 0.0  ;;  %v7042_v50 = vcombine.high %v15649_v60, %v15649_v60  ;;  %v5967_v45 = vpop.f32.mrf.mxu0 }
 0x5fb   : > { %v15673_v29 = vrot.slane %v9291_v6, 4  ;;  %v8440_v46 = vpack.c.bf16 %v8352_v27, %v8352_v27  ;;  %v8748_v7 = vunpack.c.l.b16 %v8392_v20  ;;  %v7049_v56 = vrot.slane %v15649_v60, %v14775_v4  ;;  %v6401_v20 = vpop.f32.mrf.mxu1 }
 0x5fc   : > { %v8579_v40 = vsel %vm5374_vm5, %v8578_v13, %v15641_v16  ;;  %v8354_v43 = vmax.f32 %v8226_v63, 0.0  ;;  %v8937_v24 = vpack.c.bf16 %v8353_v18, %v8353_v18  ;;  %v7056_v3 = vrot.slane %v7042_v50, %v14775_v4  ;;  %v16811_v50 = vld [vmem:[#allocation67_spill] sm:$0xff] }
 0x5fd   : > { %v8521_v62 = vunpack.c.l.b16 %v8440_v46  ;;  %v15680_v1 = vrot.slane %v8748_v7, 3  ;;  %v7057_v5 = vcombine.high %v7049_v56, %v7049_v56  ;;  %v8044_v36 = vsel %vm1680_vm1, %v7049_v56, -inf }
 0x5fe   : > { %v9018_v41 = vunpack.c.l.b16 %v8937_v24  ;;  %v9211_v2 = vpack.c.bf16 %v8354_v43, %v8354_v43  ;;  %v7058_v8 = vcombine.high %v7056_v3, %v7056_v3  ;;  %v8045_v25 = vrot.slane %v8044_v36, 4 }
 0x5ff   : > { %v8580_v38 = vrot.slane %v8521_v62, 3  ;;  %v8051_v60 = vsel %vm1680_vm1, %v7057_v5, -inf  ;;  %v8058_v16 = vsel %vm1680_vm1, %v7056_v3, -inf  ;;  %v6466_v9 = vadd.f32 %v6399_v55, %v15638_v12 }
 0x600   : > { %v15686_v23 = vrot.slane %v9018_v41, 3  ;;  %v9292_v54 = vunpack.c.l.b16 %v9211_v2  ;;  %v8046_v6 = vmax.f32 %v8044_v36, %v8045_v25  ;;  %v8052_v27 = vrot.slane %v8051_v60, 4 }
 0x601   : > { %v15689_v13 = vsel %vm8536_vm13, %v8580_v38, %v8579_v40  ;;  %v8059_v63 = vrot.slane %v8058_v16, 4  ;;  %v8065_v18 = vsel %vm1680_vm1, %v7058_v8, -inf  ;;  %v6033_v46 = vadd.f32 %v5967_v45, %v16811_v50 }
 0x602   : > { %v15693_v7 = vrot.slane %v9292_v54, 3  ;;  %v8047_v56 = vrot.slane %v8046_v6, 2  ;;  %v8053_v43 = vmax.f32 %v8051_v60, %v8052_v27  ;;  %v8066_v12 = vrot.slane %v8065_v18, 4 }
 0x603   : > { %v8060_v24 = vmax.f32 %v8058_v16, %v8059_v63  ;;  %v6467_v3 = vadd.f32 %v6401_v20, %v6033_v46  ;;  %v8569_v55 = vsel %vm8539_vm14, %v15457_v52, %v15420_v19  ;;  %v15700_v40 = vadd.f32 %v15657_v0, %v15031_v15  ;;  %v11138_v16 = vld [vmem:[%s16118_s7 + $0x38] sm:$0xff]  }
 0x604   : > { %v8048_v62 = vmax.f32 %v8046_v6, %v8047_v56  ;;  %v8054_v5 = vrot.slane %v8053_v43, 2  ;;  %v8067_v36 = vmax.f32 %v8065_v18, %v8066_v12  ;;  %v15704_v41 = vsel %vm8542_vm15, %v15489_v14, %v8569_v55  ;;  %v11139_v14 = vld [vmem:[%s16118_s7 + $0x30] sm:$0xff]   ;;  %10553 = vmatprep.subr.bf16.mxu1 %v11138_v16 }
 0x605   : > { %v8061_v2 = vrot.slane %v8060_v24, 2  ;;  %v6499_v8 = vmax.f32 %v6466_v9, %v6467_v3  ;;  %v15708_v25 = vadd.f32 %v15657_v0, %v15286_v31  ;;  %v8259_v38 = vmax.f32 %v15027_v17, 0.0  ;;  %10554 = vmatpush3.bf16.msra.mxu1 %v11138_v16 }
 0x606   : > { %v8049_v19 = vrot.slane %v8048_v62, 1  ;;  %v8055_v52 = vmax.f32 %v8053_v43, %v8054_v5  ;;  %v8068_v60 = vrot.slane %v8067_v36, 2  ;;  %v8263_v15 = vmax.f32 %v15700_v40, 0.0  ;;  %10555 = vmatprep.subr.bf16.mxu1 %v11139_v14 }
 0x607   : > { %v8062_v9 = vmax.f32 %v8060_v24, %v8061_v2  ;;  %v7059_v45 = vcombine.high %v6499_v8, %v6499_v8  ;;  %v7066_v31 = vrot.slane %v6499_v8, %v14775_v4 }
 0x608   : > { %v8050_v6 = vmax.f32 %v8048_v62, %v8049_v19  ;;  %v8056_v27 = vrot.slane %v8055_v52, 1  ;;  %v8069_v20 = vmax.f32 %v8067_v36, %v8068_v60 }
 0x609   : > { %v8063_v18 = vrot.slane %v8062_v9, 1  ;;  %v7073_v50 = vrot.slane %v7059_v45, %v14775_v4  ;;  %v7074_v46 = vcombine.high %v7066_v31, %v7066_v31  ;;  %v8072_v56 = vsel %vm1680_vm1, %v7066_v31, -inf  ;;  %10556 = vmatpush3.bf16.msra.mxu1 %v11139_v14 }
 0x60a   : > { %v8057_v43 = vmax.f32 %v8055_v52, %v8056_v27  ;;  %v8070_v12 = vrot.slane %v8069_v20, 1  ;;  %v8227_v24 = vadd.f32 %v15657_v0, %v8050_v6  ;;  %v8073_v3 = vrot.slane %v8072_v56, 4 }
 0x60b   : > { %v8064_v55 = vmax.f32 %v8062_v9, %v8063_v18  ;;  %v7075_v62 = vcombine.high %v7073_v50, %v7073_v50  ;;  %v8079_v5 = vsel %vm1680_vm1, %v7074_v46, -inf  ;;  %v8086_v36 = vsel %vm1680_vm1, %v7073_v50, -inf }
 0x60c   : > { %v8071_v2 = vmax.f32 %v8069_v20, %v8070_v12  ;;  %v8228_v8 = vadd.f32 %v15657_v0, %v8057_v43  ;;  %v8355_v4 = vmax.f32 %v8227_v24, 0.0  ;;  %v8074_v19 = vmax.f32 %v8072_v56, %v8073_v3 }
 0x60d   : > { %v8229_v60 = vadd.f32 %v15657_v0, %v8064_v55  ;;  %v8080_v16 = vrot.slane %v8079_v5, 4  ;;  %v8087_v52 = vrot.slane %v8086_v36, 4  ;;  %v8093_v45 = vsel %vm1680_vm1, %v7075_v62, -inf }
 0x60e   : > { %v8230_v31 = vadd.f32 %v15657_v0, %v8071_v2  ;;  %v8356_v9 = vmax.f32 %v8228_v8, 0.0  ;;  %v8393_v6 = vpack.c.bf16 %v8355_v4, %v8355_v4  ;;  %v8075_v27 = vrot.slane %v8074_v19, 2 }
 0x60f   : > { %v8357_v18 = vmax.f32 %v8229_v60, 0.0  ;;  %v8081_v46 = vmax.f32 %v8079_v5, %v8080_v16  ;;  %v8088_v50 = vmax.f32 %v8086_v36, %v8087_v52  ;;  %v8094_v20 = vrot.slane %v8093_v45, 4 }
 0x610   : > { %v8358_v12 = vmax.f32 %v8230_v31, 0.0  ;;  %v8441_v43 = vpack.c.bf16 %v8356_v9, %v8356_v9  ;;  %v8749_v24 = vunpack.c.l.b16 %v8393_v6  ;;  %v8076_v56 = vmax.f32 %v8074_v19, %v8075_v27 }
 0x611   : > { %v8938_v3 = vpack.c.bf16 %v8357_v18, %v8357_v18  ;;  %v8082_v55 = vrot.slane %v8081_v46, 2  ;;  %v8089_v22 = vrot.slane %v8088_v50, 2  ;;  %v8095_v28 = vmax.f32 %v8093_v45, %v8094_v20 }
 0x612   : > { %v8522_v63 = vunpack.c.l.b16 %v8441_v43  ;;  %v15730_v62 = vrot.slane %v8749_v24, 2  ;;  %v9212_v14 = vpack.c.bf16 %v8358_v12, %v8358_v12  ;;  %v8077_v2 = vrot.slane %v8076_v56, 1 }
 0x613   : > { %v9019_v8 = vunpack.c.l.b16 %v8938_v3  ;;  %v8083_v4 = vmax.f32 %v8081_v46, %v8082_v55  ;;  %v8090_v54 = vmax.f32 %v8088_v50, %v8089_v22  ;;  %v8096_v60 = vrot.slane %v8095_v28, 2 }
 0x614   : > { %v8582_v5 = vrot.slane %v8522_v63, 2  ;;  %v9293_v36 = vunpack.c.l.b16 %v9212_v14  ;;  %v8078_v16 = vmax.f32 %v8076_v56, %v8077_v2  ;;  %v8369_v19 = vpack.c.bf16 %v8259_v38, %v8259_v38 }
 0x615   : > { %v15735_v52 = vrot.slane %v9019_v8, 2  ;;  %v8084_v31 = vrot.slane %v8083_v4, 1  ;;  %v8091_v45 = vrot.slane %v8090_v54, 1  ;;  %v8097_v9 = vmax.f32 %v8095_v28, %v8096_v60  ;;  %v16815_v60 = vld [vmem:[#allocation44_spill] sm:$0xff] }
 0x616   : > { %v15737_v6 = vrot.slane %v9293_v36, 2  ;;  %v8231_v27 = vadd.f32 %v15657_v0, %v8078_v16  ;;  %v8583_v22 = vsel %vm8539_vm14, %v8582_v5, %v15689_v13  ;;  %v8370_v63 = vpack.c.bf16 %v8263_v15, %v8263_v15 }
 0x617   : > { %v8085_v18 = vmax.f32 %v8083_v4, %v8084_v31  ;;  %v8092_v17 = vmax.f32 %v8090_v54, %v8091_v45  ;;  %v8098_v46 = vrot.slane %v8097_v9, 1  ;;  %v16812_v38 = vmax.f32 %v15246_v39, 0.0  ;;  %v16816_v45 = vld [vmem:[#allocation72_spill] sm:$0xff] }
 0x618   : > { %v8359_v20 = vmax.f32 %v8231_v27, 0.0  ;;  %v16813_v28 = vmax.f32 %v15708_v25, 0.0  ;;  %v8724_v43 = vunpack.c.l.b16 %v15005_v59  ;;  %v8725_v24 = vunpack.c.l.b16 %v8369_v19 }
 0x619   : > { %v8377_v50 = vpack.c.bf16 %v16812_v38, %v16812_v38  ;;  %v8099_v13 = vmax.f32 %v8097_v9, %v8098_v46  ;;  %v8232_v40 = vadd.f32 %v15657_v0, %v8085_v18  ;;  %v8233_v15 = vadd.f32 %v15657_v0, %v8092_v17  ;;  %v16820_v46 = vld [vmem:[#allocation36_spill] sm:$0xff] }
 0x61a   : > { %v8378_v12 = vpack.c.bf16 %v16813_v28, %v16813_v28  ;;  %v8726_v56 = vunpack.c.l.b16 %v8370_v63  ;;  %v8394_v54 = vpack.c.bf16 %v8359_v20, %v8359_v20  ;;  %v8732_v3 = vunpack.c.l.b16 %v15226_v42  ;;  %v16817_v63 = vld [vmem:[#allocation53_spill] sm:$0xff] }
 0x61b   : > { %v8733_v39 = vunpack.c.l.b16 %v8377_v50  ;;  %v15756_v14 = vadd.f32 %v15657_v0, %v8099_v13  ;;  %v8360_v25 = vmax.f32 %v8232_v40, 0.0  ;;  %v8361_v2 = vmax.f32 %v8233_v15, 0.0  ;;  %v16822_v13 = vld [vmem:[#allocation60_spill] sm:$0xff] }
 0x61c   : > { %v8734_v55 = vunpack.c.l.b16 %v8378_v12  ;;  %v16814_v8 = vunpack.c.l.b16 %v14862_v26  ;;  %v8750_v4 = vunpack.c.l.b16 %v8394_v54  ;;  %v8759_v36 = vrot.slane %v8724_v43, 3  ;;  %v16821_v12 = vld [vmem:[#allocation48_spill] sm:$0xff] }
 0x61d   : > { %v8761_v16 = vrot.slane %v8725_v24, 2  ;;  %v8362_v42 = vmax.f32 %v15756_v14, 0.0  ;;  %v8442_v19 = vpack.c.bf16 %v8360_v25, %v8360_v25  ;;  %v15765_v31 = vpack.c.bf16 %v8361_v2, %v8361_v2  ;;  %v16823_v2 = vld [vmem:[#allocation68_spill] sm:$0xff] }
 0x61e   : > { %v8752_v59 = vsel %vm8525_vm10, %v14899_v33, %v16814_v8  ;;  %v8805_v27 = vrot.slane %v8750_v4, 1  ;;  %v8763_v18 = vrot.slane %v8726_v56, 1  ;;  %v16818_v33 = vld [vmem:[#allocation28_spill] sm:$0xff]  ;;  %v8773_v15 = vrot.slane %v8732_v3, 3 }
 0x61f   : > { %v8754_v5 = vsel %vm8528_vm11, %v16815_v60, %v8752_v59  ;;  %v16819_v17 = vunpack.c.l.b16 %v16818_v33  ;;  %v8523_v50 = vunpack.c.l.b16 %v8442_v19  ;;  %v9020_v20 = vunpack.c.l.b16 %v15765_v31 }
 0x620   : > { %v8756_v9 = vsel %vm8531_vm12, %v16816_v45, %v8754_v5  ;;  %v8775_v56 = vrot.slane %v8733_v39, 2  ;;  %v8777_v59 = vrot.slane %v8734_v55, 1  ;;  %v8786_v60 = vsel %vm5374_vm5, %v15392_v48, %v15355_v53 }
 0x621   : > { %v8758_v26 = vsel %vm5374_vm5, %v16817_v63, %v8756_v9  ;;  %v8766_v38 = vsel %vm8525_vm10, %v16820_v46, %v16819_v17  ;;  %v8584_v54 = vrot.slane %v8523_v50, 1  ;;  %v8800_v5 = vsel %vm5374_vm5, %v15665_v57, %v15629_v32  ;;  %v11115_v32 = vld [vmem:[%s16116_s5 + $0x30] sm:$0xff]   ;;  %v16829_v17 = vld [vmem:[#allocation69_spill] sm:$0xff] }
 0x622   : > { %v8760_v28 = vsel %vm8536_vm13, %v8759_v36, %v8758_v26  ;;  %v8768_v43 = vsel %vm8528_vm11, %v16821_v12, %v8766_v38  ;;  %v16824_v36 = vld [vmem:[#allocation24_spill] sm:$0xff]  ;;  %v8788_v55 = vsel %vm8536_vm13, %v15414_v47, %v8786_v60  ;;  %v8802_v45 = vsel %vm8536_vm13, %v15680_v1, %v8800_v5  ;;  %v16830_v38 = vld [vmem:[#allocation22_spill] sm:$0xff]  ;;  %v16836_v5 = vld [vmem:[#allocation45_spill] sm:$0xff] }
 0x623   : > { %v8762_v24 = vsel %vm8539_vm14, %v8761_v16, %v8760_v28  ;;  %v8770_v40 = vsel %vm8531_vm12, %v16822_v13, %v8768_v43  ;;  %v16825_v3 = vrot.slane %v16824_v36, 1  ;;  %v8585_v16 = vsel %vm8542_vm15, %v8584_v54, %v8583_v22  ;;  %v16831_v28 = vld [vmem:[#allocation66_spill] sm:$0xff]  ;;  %v11116_v13 = vld [vmem:[%s16116_s5 + $0x28] sm:$0xff]   ;;  %v16833_v54 = vld [vmem:[#allocation64_spill] sm:$0xff] }
 0x624   : > { %v8764_v25 = vsel %vm8542_vm15, %v8763_v18, %v8762_v24  ;;  %v8772_v8 = vsel %vm5374_vm5, %v16823_v2, %v8770_v40  ;;  %v8587_v53 = vpack.c.b16 %v8585_v16, %v15704_v41  ;;  %v8790_v57 = vsel %vm8539_vm14, %v15449_v30, %v8788_v55  ;;  %v16826_v41 = vld [vmem:[#allocation79_spill] sm:$0xff]  ;;  %v16828_v30 = vld [vmem:[#allocation29_spill] sm:$0xff]  ;;  %v16832_v43 = vld [vmem:[#allocation10_spill] sm:$0xff] }
 0x625   : > { %v8774_v4 = vsel %vm8536_vm13, %v8773_v15, %v8772_v8  ;;  %v7420_v39 = vmax.f32 %v16824_v36, %v16825_v3  ;;  %v8804_v22 = vsel %vm8539_vm14, %v15730_v62, %v8802_v45  ;;  %v15812_v47 = vsel %vm8542_vm15, %v15486_v21, %v8790_v57  ;;  %v16838_v57 = vld [vmem:[#allocation82_spill] sm:$0xff] }
 0x626   : > { %v8776_v19 = vsel %vm8539_vm14, %v8775_v56, %v8774_v4  ;;  %v15815_v1 = vsel %vm8542_vm15, %v8805_v27, %v8804_v22  ;;  %v16827_v63 = vrot.slane %v16826_v41, 1  ;;  %10490 = vmatmul.mubr.bf16.vlgmr.msra.gmra.mxu0 %v8587_v53  ;;  %v8133_v33 = vadd.f32 %v15657_v0, %v16828_v30  ;;  %v11150_v27 = vld [vmem:[%s16116_s5 + $0x38] sm:$0xff]   ;;  %v16834_v4 = vld [vmem:[#allocation70_spill] sm:$0xff] }
 0x627   : > { %v8778_v48 = vsel %vm8542_vm15, %v8777_v59, %v8776_v19  ;;  %v8808_v18 = vpack.c.b16 %v15815_v1, %v15812_v47  ;;  %v8137_v62 = vadd.f32 %v15657_v0, %v7420_v39  ;;  %v8165_v21 = vadd.f32 %v15657_v0, %v16829_v17  ;;  %10494 = vmatpush3.bf16.msra.mxu0 %v11150_v27  ;;  %v16837_v19 = vld [vmem:[#allocation43_spill] sm:$0xff]  ;;  %v16839_v17 = vld [vmem:[#allocation30_spill] sm:$0xff] }
 0x628   : > { %v8807_v9 = vpack.c.b16 %v8778_v48, %v8764_v25  ;;  %v7644_v26 = vmax.f32 %v16826_v41, %v16827_v63  ;;  %v8257_v50 = vmax.f32 %v16830_v38, 0.0  ;;  %v8289_v12 = vmax.f32 %v16831_v28, 0.0  ;;  %10495 = vmatprep.subr.bf16.mxu0 %v11115_v32  ;;  %v11124_v47 = vld [vmem:[%s16116_s5 + $0xa8] sm:$0xff]  }
 0x629   : > { %v8993_v24 = vunpack.c.l.b16 %v16832_v43  ;;  %v8261_v40 = vmax.f32 %v8133_v33, 0.0  ;;  %v8265_v15 = vmax.f32 %v8137_v62, 0.0  ;;  %v8293_v56 = vmax.f32 %v8165_v21, 0.0 }
 0x62a   : > { %10509 = vmatprep.mubr.bf16.mxu0 %v8807_v9  ;;  %v8169_v46 = vadd.f32 %v15657_v0, %v7644_v26  ;;  %v9001_v25 = vunpack.c.l.b16 %v16833_v54  ;;  %v8913_v8 = vpack.c.bf16 %v8257_v50, %v8257_v50  ;;  %v8921_v59 = vpack.c.bf16 %v8289_v12, %v8289_v12  ;;  %v11117_v9 = vld [vmem:[%s16116_s5 + $0x20] sm:$0xff]   ;;  %v16842_v12 = vld [vmem:[#allocation49_spill] sm:$0xff] }
 0x62b   : > { %v16835_v60 = vunpack.c.l.b16 %v16834_v4  ;;  %v8914_v3 = vpack.c.bf16 %v8261_v40, %v8261_v40  ;;  %v8915_v39 = vpack.c.bf16 %v8265_v15, %v8265_v15  ;;  %v8922_v16 = vpack.c.bf16 %v8293_v56, %v8293_v56  ;;  %10496 = vmatpush3.bf16.msra.mxu0 %v11115_v32  ;;  %v16841_v32 = vld [vmem:[#allocation40_spill] sm:$0xff]  ;;  %v16843_v15 = vld [vmem:[#allocation63_spill] sm:$0xff] }
 0x62c   : > { %v8297_v2 = vmax.f32 %v8169_v46, 0.0  ;;  %v8994_v53 = vunpack.c.l.b16 %v8913_v8  ;;  %v9002_v48 = vunpack.c.l.b16 %v8921_v59  ;;  %10497 = vmatprep.subr.bf16.mxu0 %v11116_v13  ;;  %v9027_v30 = vrot.slane %v8993_v24, 4 }
 0x62d   : > { %v9022_v36 = vsel %vm8525_vm10, %v16836_v5, %v16835_v60  ;;  %v8995_v41 = vunpack.c.l.b16 %v8914_v3  ;;  %v8996_v63 = vunpack.c.l.b16 %v8915_v39  ;;  %v9003_v26 = vunpack.c.l.b16 %v8922_v16  ;;  %v16845_v16 = vld [vmem:[#allocation16_spill] sm:$0xff] }
 0x62e   : > { %v9024_v55 = vsel %vm8528_vm11, %v16837_v19, %v9022_v36  ;;  %v8923_v45 = vpack.c.bf16 %v8297_v2, %v8297_v2  ;;  %v9029_v62 = vrot.slane %v8994_v53, 3  ;;  %v16840_v21 = vunpack.c.l.b16 %v16839_v17  ;;  %v16847_v53 = vld [vmem:[#allocation34_spill] sm:$0xff] }
 0x62f   : > { %v9026_v22 = vsel %vm8531_vm12, %v16838_v57, %v9024_v55  ;;  %v9041_v46 = vrot.slane %v9001_v25, 4  ;;  %v9031_v50 = vrot.slane %v8995_v41, 2  ;;  %v9033_v28 = vrot.slane %v8996_v63, 1  ;;  %10498 = vmatpush3.bf16.msra.mxu0 %v11116_v13  ;;  %v11118_v25 = vld [vmem:[%s16116_s5 + $0x18] sm:$0xff]   ;;  %v16849_v41 = vld [vmem:[#allocation12_spill] sm:$0xff]  ;;  %v16851_v17 = vld [vmem:[#allocation54_spill] sm:$0xff] }
 0x630   : > { %v9004_v33 = vunpack.c.l.b16 %v8923_v45  ;;  %v9036_v27 = vsel %vm8525_vm10, %v16841_v32, %v16840_v21  ;;  %v9028_v38 = vsel %vm5374_vm5, %v9027_v30, %v9026_v22  ;;  %v9043_v56 = vrot.slane %v9002_v48, 3  ;;  %10499 = vmatprep.subr.bf16.mxu0 %v11117_v9  ;;  %v16848_v57 = vld [vmem:[#allocation73_spill] sm:$0xff] }
 0x631   : > { %v9038_v43 = vsel %vm8528_vm11, %v16842_v12, %v9036_v27  ;;  %v9030_v40 = vsel %vm8536_vm13, %v9029_v62, %v9028_v38  ;;  %v9045_v54 = vrot.slane %v9003_v26, 2  ;;  %v9054_v13 = vsel %vm8531_vm12, %v15357_v44, %v15340_v61  ;;  %v16850_v26 = vld [vmem:[#allocation35_spill] sm:$0xff]  ;;  %v16852_v21 = vld [vmem:[#allocation77_spill] sm:$0xff] }
 0x632   : > { %v9040_v24 = vsel %vm8531_vm12, %v16843_v15, %v9038_v43  ;;  %v9032_v2 = vsel %vm8539_vm14, %v9031_v50, %v9030_v40  ;;  %v9047_v59 = vrot.slane %v9004_v33, 1  ;;  %v9056_v5 = vsel %vm5374_vm5, %v15394_v37, %v9054_v13  ;;  %v16846_v37 = vld [vmem:[#allocation76_spill] sm:$0xff]  ;;  %v16854_v40 = vld [vmem:[#allocation58_spill] sm:$0xff] }
 0x633   : > { %v9042_v8 = vsel %vm5374_vm5, %v9041_v46, %v9040_v24  ;;  %v15868_v4 = vsel %vm8542_vm15, %v9033_v28, %v9032_v2  ;;  %v16844_v36 = vunpack.c.l.b16 %v15483_v51  ;;  %v9058_v19 = vsel %vm8536_vm13, %v16845_v16, %v9056_v5  ;;  %10500 = vmatpush3.bf16.msra.mxu0 %v11117_v9  ;;  %v16853_v46 = vld [vmem:[#allocation6_spill] sm:$0xff]  ;;  %v11120_v28 = vld [vmem:[%s16116_s5 + $0x8] sm:$0xff]  }
 0x634   : > { %v9044_v60 = vsel %vm8536_vm13, %v9043_v56, %v9042_v8  ;;  %v9068_v61 = vsel %vm8531_vm12, %v15626_v58, %v15613_v49  ;;  %v9075_v44 = vrot.slane %v9020_v20, 1  ;;  %v9060_v51 = vsel %vm8539_vm14, %v16846_v37, %v9058_v19  ;;  %10501 = vmatprep.subr.bf16.mxu0 %v11118_v25  ;;  %v11119_v49 = vld [vmem:[%s16116_s5 + $0x10] sm:$0xff]  }
 0x635   : > { %v9061_v3 = vrot.slane %v16844_v36, 1  ;;  %v9046_v39 = vsel %vm8539_vm14, %v9045_v54, %v9044_v60  ;;  %v9070_v45 = vsel %vm5374_vm5, %v15668_v11, %v9068_v61  ;;  %v7426_v48 = vrot.slane %v16847_v53, 1  ;;  %v16856_v37 = vld [vmem:[#allocation52_spill] sm:$0xff] }
 0x636   : > { %v15884_v55 = vsel %vm8542_vm15, %v9047_v59, %v9046_v39  ;;  %v9072_v20 = vsel %vm8536_vm13, %v15686_v23, %v9070_v45  ;;  %v7650_v22 = vrot.slane %v16848_v57, 1  ;;  %v8130_v63 = vadd.f32 %v15657_v0, %v16849_v41 }
 0x637   : > { %v9077_v58 = vpack.c.b16 %v15884_v55, %v15868_v4  ;;  %v15897_v31 = vsel %vm8542_vm15, %v9061_v3, %v9060_v51  ;;  %v9074_v11 = vsel %vm8539_vm14, %v15735_v52, %v9072_v20  ;;  %v7427_v9 = vmax.f32 %v16847_v53, %v7426_v48  ;;  %10502 = vmatpush3.bf16.msra.mxu0 %v11118_v25  ;;  %v16855_v3 = vld [vmem:[#allocation71_spill] sm:$0xff]  ;;  %v11126_v4 = vld [vmem:[%s16116_s5 + $0x98] sm:$0xff]  }
 0x638   : > { %v8134_v30 = vadd.f32 %v15657_v0, %v16850_v26  ;;  %v15910_v33 = vsel %vm8542_vm15, %v9075_v44, %v9074_v11  ;;  %v7651_v62 = vmax.f32 %v16848_v57, %v7650_v22  ;;  %v8162_v23 = vadd.f32 %v15657_v0, %v16851_v17  ;;  %10503 = vmatprep.subr.bf16.mxu0 %v11119_v49  ;;  %v16857_v57 = vld [vmem:[#allocation47_spill] sm:$0xff]  ;;  %v16859_v11 = vld [vmem:[#allocation61_spill] sm:$0xff]  ;;  %v16860_v26 = vld [vmem:[#allocation74_spill] sm:$0xff] }
 0x639   : > { %v8166_v32 = vadd.f32 %v15657_v0, %v16852_v21  ;;  %v9078_v52 = vpack.c.b16 %v15910_v33, %v15897_v31  ;;  %v8138_v27 = vadd.f32 %v15657_v0, %v7427_v9  ;;  %v8254_v38 = vmax.f32 %v16853_v46, 0.0  ;;  %v11122_v21 = vld [vmem:[%s16116_s5 + $0xb8] sm:$0xff]   ;;  %v11128_v55 = vld [vmem:[%s16116_s5 + $0x88] sm:$0xff]   ;;  %v11135_v33 = vld [vmem:[%s16116_s5 + $0xd0] sm:$0xff]  }
 0x63a   : > { %v8258_v50 = vmax.f32 %v8130_v63, 0.0  ;;  %v8170_v12 = vadd.f32 %v15657_v0, %v7651_v62  ;;  %v8262_v43 = vmax.f32 %v8134_v30, 0.0  ;;  %v8286_v15 = vmax.f32 %v16854_v40, 0.0  ;;  %v11121_v0 = vld [vmem:[%s16116_s5] sm:$0xff]   ;;  %v11134_v31 = vld [vmem:[%s16116_s5 + $0xd8] sm:$0xff]  }
 0x63b   : > { %v8290_v24 = vmax.f32 %v8162_v23, 0.0  ;;  %v8266_v56 = vmax.f32 %v8138_v27, 0.0  ;;  %v8294_v54 = vmax.f32 %v8166_v32, 0.0  ;;  %v9186_v25 = vpack.c.bf16 %v8254_v38, %v8254_v38  ;;  %10504 = vmatpush3.bf16.msra.mxu0 %v11119_v49  ;;  %v16861_v27 = vld [vmem:[#allocation42_spill] sm:$0xff] }
 0x63c   : > { %v9187_v2 = vpack.c.bf16 %v8258_v50, %v8258_v50  ;;  %v8298_v8 = vmax.f32 %v8170_v12, 0.0  ;;  %v9188_v59 = vpack.c.bf16 %v8262_v43, %v8262_v43  ;;  %v9194_v13 = vpack.c.bf16 %v8286_v15, %v8286_v15  ;;  %10505 = vmatprep.subr.bf16.mxu0 %v11120_v28  ;;  %v16863_v38 = vld [vmem:[#allocation46_spill] sm:$0xff] }
 0x63d   : > { %v9195_v60 = vpack.c.bf16 %v8290_v24, %v8290_v24  ;;  %v9189_v5 = vpack.c.bf16 %v8266_v56, %v8266_v56  ;;  %v9196_v36 = vpack.c.bf16 %v8294_v54, %v8294_v54  ;;  %v9266_v39 = vunpack.c.l.b16 %v16855_v3  ;;  %v16864_v40 = vld [vmem:[#allocation50_spill] sm:$0xff]  ;;  %v16867_v3 = vld [vmem:[#allocation51_spill] sm:$0xff] }
 0x63e   : > { %v9267_v16 = vunpack.c.l.b16 %v9186_v25  ;;  %v9197_v19 = vpack.c.bf16 %v8298_v8, %v8298_v8  ;;  %v9268_v61 = vunpack.c.l.b16 %v9187_v2  ;;  %v9269_v44 = vunpack.c.l.b16 %v9188_v59 }
 0x63f   : > { %v9274_v51 = vunpack.c.l.b16 %v16856_v37  ;;  %v9270_v45 = vunpack.c.l.b16 %v9189_v5  ;;  %v9275_v53 = vunpack.c.l.b16 %v9194_v13  ;;  %v9276_v48 = vunpack.c.l.b16 %v9195_v60  ;;  %10506 = vmatpush3.bf16.msra.mxu0 %v11120_v28  ;;  %v16869_v37 = vld [vmem:[#allocation78_spill] sm:$0xff] }
 0x640   : > { %v9277_v20 = vunpack.c.l.b16 %v9196_v36  ;;  %v9278_v49 = vunpack.c.l.b16 %v9197_v19  ;;  %v16858_v22 = vunpack.c.l.b16 %v16857_v57  ;;  %v9299_v41 = vrot.slane %v9266_v39, 5  ;;  %10507 = vmatprep.subr.bf16.mxu0 %v11121_v0  ;;  %v16866_v36 = vld [vmem:[#allocation55_spill] sm:$0xff] }
 0x641   : > { %v9301_v63 = vrot.slane %v9267_v16, 4  ;;  %v9303_v62 = vrot.slane %v9268_v61, 3  ;;  %v9305_v17 = vrot.slane %v9269_v44, 2  ;;  %v9307_v23 = vrot.slane %v9270_v45, 1  ;;  %v16868_v61 = vld [vmem:[#allocation18_spill] sm:$0xff] }
 0x642   : > { %v9296_v9 = vsel %vm8525_vm10, %v16859_v11, %v16858_v22  ;;  %v16862_v46 = vunpack.c.l.b16 %v16861_v27  ;;  %v9313_v12 = vrot.slane %v9274_v51, 5  ;;  %v9315_v28 = vrot.slane %v9275_v53, 4  ;;  %v11145_v27 = vld [vmem:[%s16118_s7] sm:$0xff]  }
 0x643   : > { %v9298_v30 = vsel %vm8528_vm11, %v16860_v26, %v9296_v9  ;;  %v9317_v24 = vrot.slane %v9276_v48, 3  ;;  %v9319_v56 = vrot.slane %v9277_v20, 2  ;;  %v9321_v2 = vrot.slane %v9278_v49, 1  ;;  %10508 = vmatpush3.bf16.msra.mxu0 %v11121_v0  ;;  %v16870_v48 = vld [vmem:[#allocation75_spill] sm:$0xff]  ;;  %v11130_v9 = vld [vmem:[%s16116_s5 + $0xf8] sm:$0xff]   ;;  %v11133_v26 = vld [vmem:[%s16116_s5 + $0xe0] sm:$0xff]  }
 0x644   : > { %v9300_v32 = vsel %vm8531_vm12, %v9299_v41, %v9298_v30  ;;  %v9310_v50 = vsel %vm8525_vm10, %v16863_v38, %v16862_v46  ;;  %v16865_v8 = vmax.f32 %v15479_v35, 0.0  ;;  %v9213_v5 = vpack.c.bf16 %v8362_v42, %v8362_v42  ;;  %10513 = vmatprep.subr.bf16.mxu0 %v11122_v21  ;;  %v11123_v35 = vld [vmem:[%s16116_s5 + $0xb0] sm:$0xff]   ;;  %v11140_v30 = vld [vmem:[%s16118_s7 + $0x28] sm:$0xff]  }
 0x645   : > { %v9302_v43 = vsel %vm5374_vm5, %v9301_v63, %v9300_v32  ;;  %v9312_v15 = vsel %vm8528_vm11, %v16864_v40, %v9310_v50  ;;  %v9328_v39 = vsel %vm8531_vm12, %v16867_v3, %v16866_v36  ;;  %v9342_v45 = vsel %vm8531_vm12, %v15632_v34, %v15620_v10  ;;  %v11131_v41 = vld [vmem:[%s16116_s5 + $0xf0] sm:$0xff]   ;;  %v11132_v63 = vld [vmem:[%s16116_s5 + $0xe8] sm:$0xff]   ;;  %10557 = vmatprep.subr.bf16.mxu1 %v11140_v30 }
 0x646   : > { %v9304_v54 = vsel %vm8536_vm13, %v9303_v62, %v9302_v43  ;;  %v9314_v25 = vsel %vm8531_vm12, %v9313_v12, %v9312_v15  ;;  %v9205_v59 = vpack.c.bf16 %v16865_v8, %v16865_v8  ;;  %v9330_v44 = vsel %vm5374_vm5, %v16868_v61, %v9328_v39  ;;  %10510 = vmatmul.mubr.bf16.vlgmr.msra.gmra.mxu0 %v8808_v18  ;;  %v11137_v62 = vld [vmem:[%s16116_s5 + $0xc0] sm:$0xff]   ;;  %v11144_v32 = vld [vmem:[%s16118_s7 + $0x8] sm:$0xff]  }
 0x647   : > { %v9306_v13 = vsel %vm8539_vm14, %v9305_v17, %v9304_v54  ;;  %v9316_v60 = vsel %vm5374_vm5, %v9315_v28, %v9314_v25  ;;  %v9294_v42 = vunpack.c.l.b16 %v9213_v5  ;;  %v9332_v51 = vsel %vm8536_vm13, %v16869_v37, %v9330_v44  ;;  %10514 = vmatpush3.bf16.msra.mxu0 %v11122_v21  ;;  %10529 = vmatprep.mubr.bf16.mxu0 %v9077_v58  ;;  %v11129_v58 = vld [vmem:[%s16116_s5 + $0x80] sm:$0xff]   ;;  %v11143_v21 = vld [vmem:[%s16118_s7 + $0x10] sm:$0xff]  }
 0x648   : > { %v9308_v16 = vsel %vm8542_vm15, %v9307_v23, %v9306_v13  ;;  %v9318_v0 = vsel %vm8536_vm13, %v9317_v24, %v9316_v60  ;;  %v9286_v19 = vunpack.c.l.b16 %v9205_v59  ;;  %v9334_v20 = vsel %vm8539_vm14, %v16870_v48, %v9332_v51  ;;  %10515 = vmatprep.subr.bf16.mxu0 %v11123_v35  ;;  %10558 = vmatpush3.bf16.msra.mxu1 %v11140_v30  ;;  %v11141_v17 = vld [vmem:[%s16118_s7 + $0x20] sm:$0xff]   ;;  %v11142_v23 = vld [vmem:[%s16118_s7 + $0x18] sm:$0xff]  }
 0x649   : > { %v9320_v14 = vsel %vm8539_vm14, %v9319_v56, %v9318_v0  ;;  %v9344_v57 = vsel %vm5374_vm5, %v15673_v29, %v9342_v45  ;;  %v9349_v34 = vrot.slane %v9294_v42, 1  ;;  %10559 = vmatprep.subr.bf16.mxu1 %v11141_v17  ;;  %v10404_v61 = vld [vmem:[%s16117_s6] ss:$0 sm:$0xff] }
 0x64a   : > { %v9322_v53 = vsel %vm8542_vm15, %v9321_v2, %v9320_v14  ;;  %v9335_v49 = vrot.slane %v9286_v19, 1  ;;  %v9346_v10 = vsel %vm8536_vm13, %v15693_v7, %v9344_v57  ;;  %v11125_v7 = vld [vmem:[%s16116_s5 + $0xa0] sm:$0xff]  }
 0x64b   : > { %v9351_v22 = vpack.c.b16 %v9322_v53, %v9308_v16  ;;  %v9348_v29 = vsel %vm8539_vm14, %v15737_v6, %v9346_v10  ;;  %10516 = vmatpush3.bf16.msra.mxu0 %v11123_v35  ;;  %v11127_v6 = vld [vmem:[%s16116_s5 + $0x90] sm:$0xff]  }
 0x64c   : > { %v9336_v1 = vsel %vm8542_vm15, %v9335_v49, %v9334_v20  ;;  %v9350_v18 = vsel %vm8542_vm15, %v9349_v34, %v9348_v29  ;;  %10517 = vmatprep.subr.bf16.mxu0 %v11124_v47  ;;  %10560 = vmatpush3.bf16.msra.mxu1 %v11141_v17  ;;  %v10405_v34 = vld [vmem:[%s16119_s8] ss:$0 sm:$0xff] }
 0x64d   : > { %v9352_v11 = vpack.c.b16 %v9350_v18, %v9336_v1  ;;  %10561 = vmatprep.subr.bf16.mxu1 %v11142_v23 }
 0x64f   : > { %10518 = vmatpush3.bf16.msra.mxu0 %v11124_v47 }
 0x650   : > { %10519 = vmatprep.subr.bf16.mxu0 %v11125_v7  ;;  %10562 = vmatpush3.bf16.msra.mxu1 %v11142_v23 }
 0x651   : > { %10563 = vmatprep.subr.bf16.mxu1 %v11143_v21 }
 0x653   : > { %10520 = vmatpush3.bf16.msra.mxu0 %v11125_v7 }
 0x654   : > { %10521 = vmatprep.subr.bf16.mxu0 %v11126_v4  ;;  %10564 = vmatpush3.bf16.msra.mxu1 %v11143_v21 }
 0x655   : > { %10565 = vmatprep.subr.bf16.mxu1 %v11144_v32 }
 0x657   : > { %10522 = vmatpush3.bf16.msra.mxu0 %v11126_v4 }
 0x658   : > { %10523 = vmatprep.subr.bf16.mxu0 %v11127_v6  ;;  %10566 = vmatpush3.bf16.msra.mxu1 %v11144_v32 }
 0x659   : > { %10567 = vmatprep.subr.bf16.mxu1 %v11145_v27 }
 0x65b   : > { %10524 = vmatpush3.bf16.msra.mxu0 %v11127_v6 }
 0x65c   : > { %10525 = vmatprep.subr.bf16.mxu0 %v11128_v55  ;;  %10568 = vmatpush3.bf16.msra.mxu1 %v11145_v27 }
 0x65f   : > { %10526 = vmatpush3.bf16.msra.mxu0 %v11128_v55 }
 0x660   : > { %10527 = vmatprep.subr.bf16.mxu0 %v11129_v58 }
 0x663   : > { %10528 = vmatpush3.bf16.msra.mxu0 %v11129_v58 }
 0x664   : > { %10533 = vmatprep.subr.bf16.mxu0 %v11130_v9 }
 0x666   : > { %10530 = vmatmul.mubr.bf16.vlgmr.msra.gmra.mxu0 %v9078_v52  ;;  %v11136_v52 = vld [vmem:[%s16116_s5 + $0xc8] sm:$0xff]  }
 0x667   : > { %10534 = vmatpush3.bf16.msra.mxu0 %v11130_v9  ;;  %10549 = vmatprep.mubr.bf16.mxu0 %v9351_v22 }
 0x668   : > { %10535 = vmatprep.subr.bf16.mxu0 %v11131_v41 }
 0x66b   : > { %10536 = vmatpush3.bf16.msra.mxu0 %v11131_v41 }
 0x66c   : > { %10537 = vmatprep.subr.bf16.mxu0 %v11132_v63 }
 0x66f   : > { %10538 = vmatpush3.bf16.msra.mxu0 %v11132_v63 }
 0x670   : > { %10539 = vmatprep.subr.bf16.mxu0 %v11133_v26 }
 0x673   : > { %10540 = vmatpush3.bf16.msra.mxu0 %v11133_v26 }
 0x674   : > { %10541 = vmatprep.subr.bf16.mxu0 %v11134_v31 }
 0x677   : > { %10542 = vmatpush3.bf16.msra.mxu0 %v11134_v31 }
 0x678   : > { %10543 = vmatprep.subr.bf16.mxu0 %v11135_v33 }
 0x67b   : > { %10544 = vmatpush3.bf16.msra.mxu0 %v11135_v33 }
 0x67c   : > { %10545 = vmatprep.subr.bf16.mxu0 %v11136_v52 }
 0x67f   : > { %10546 = vmatpush3.bf16.msra.mxu0 %v11136_v52 }
 0x680   : > { %10547 = vmatprep.subr.bf16.mxu0 %v11137_v62 }
 0x683   : > { %10548 = vmatpush3.bf16.msra.mxu0 %v11137_v62 }
 0x686   : > { %10550 = vmatmul.mubr.bf16.vlgmr.msra.gmra.mxu0 %v9352_v11 }
 0x6e6   : > { %v10491_v46 = vpop.f32.mrf.mxu0 }
 0x6e8   : > { %v8672_v38 = vpop.f32.mrf.mxu0 }
 0x6ea   : > { %v10492_v50 = vpop.f32.mrf.mxu0 }
 0x6ec   : > { %v8675_v12 = vpop.f32.mrf.mxu0 }
 0x706   : > { %v10511_v28 = vpop.f32.mrf.mxu0 }
 0x707   : > { %v8902_v8 = vadd.f32 %v10511_v28, %v10491_v46 }
 0x708   : > { %v8893_v43 = vpop.f32.mrf.mxu0 }
 0x709   : > { %v8894_v2 = vadd.f32 %v8893_v43, %v8672_v38 }
 0x70a   : > { %v10512_v40 = vpop.f32.mrf.mxu0 }
 0x70b   : > { %v8905_v13 = vadd.f32 %v10512_v40, %v10492_v50 }
 0x70c   : > { %v8896_v15 = vpop.f32.mrf.mxu0 }
 0x70d   : > { %v8897_v3 = vadd.f32 %v8896_v15, %v8675_v12 }
 0x726   : > { %v10531_v24 = vpop.f32.mrf.mxu0 }
 0x727   : > { %v9180_v5 = vadd.f32 %v10531_v24, %v8902_v8 }
 0x728   : > { %v9163_v56 = vpop.f32.mrf.mxu0 }
 0x729   : > { %v9178_v60 = vadd.f32 %v9163_v56, %v8894_v2 }
 0x72a   : > { %v10532_v54 = vpop.f32.mrf.mxu0 }
 0x72b   : > { %v9181_v39 = vadd.f32 %v10532_v54, %v8905_v13 }
 0x72c   : > { %v9166_v25 = vpop.f32.mrf.mxu0 }
 0x72d   : > { %v9179_v19 = vadd.f32 %v9166_v25, %v8897_v3 }
 0x746   : > { %v10551_v59 = vpop.f32.mrf.mxu0 }
 0x747   : > { %v9454_v16 = vadd.f32 %v10551_v59, %v9180_v5 }
 0x748   : > { %v9437_v36 = vpop.f32.mrf.mxu0 }
 0x749   : > { %v9452_v35 = vadd.f32 %v9437_v36, %v9178_v60  ;;  %v9465_v45 = vadd.f32 %v10404_v61, %v9454_v16 }
 0x74a   : > { %v10552_v0 = vpop.f32.mrf.mxu0 }
 0x74b   : > { %v9455_v44 = vadd.f32 %v10552_v0, %v9181_v39  ;;  %v9463_v42 = vadd.f32 %v10404_v61, %v9452_v35  ;;  %v9469_v57 = vmax.f32 %v9465_v45, 0.0 }
 0x74c   : > { %v9440_v14 = vpop.f32.mrf.mxu0 }
 0x74d   : > { %v9466_v37 = vadd.f32 %v10404_v61, %v9455_v44  ;;  %v9453_v51 = vadd.f32 %v9440_v14, %v9179_v19  ;;  %v9467_v20 = vmax.f32 %v9463_v42, 0.0 }
 0x74f   : > { %v9464_v53 = vadd.f32 %v10404_v61, %v9453_v51  ;;  %v9470_v48 = vmax.f32 %v9466_v37, 0.0 }
 0x751   : > { %v9468_v49 = vmax.f32 %v9464_v53, 0.0  ;;  %v9472_v10 = vpack.c.bf16 %v9470_v48, %v9469_v57 }
 0x753   : > { %v9471_v22 = vpack.c.bf16 %v9468_v49, %v9467_v20 }
 0x755   : > { %10569 = vmatprep.mubr.bf16.mxu1 %v9471_v22 }
 0x756   : > { %10570 = vmatmul.mubr.bf16.vlgmr.msra.gmra.mxu1 %v9472_v10 }
 0x816   : > { %v10571_v47 = vpop.f32.mrf.mxu1 }
 0x817   : > { %v9587_v1 = vadd.f32 %v10571_v47, %v10405_v34 }
 0x818   : > { %v9578_v29 = vpop.f32.mrf.mxu1 }
 0x819   : > { %v9595_v18 = vmax.f32 %v9587_v1, 0.0  ;;  %v9579_v11 = vadd.f32 %v10405_v34, %v9578_v29 }
 0x81a   : > { %v10572_v7 = vpop.f32.mrf.mxu1 }
 0x81b   : > { %9599 = vst [vmem:[%s733_s26 + $0x10] sm:$0xff] %v9595_v18  ;;  %v9593_v4 = vmax.f32 %v9579_v11, 0.0  ;;  %v9590_v6 = vadd.f32 %v10572_v7, %v10405_v34 }
 0x81c   : > { %v9581_v55 = vpop.f32.mrf.mxu1 }
 0x81d   : > { %9597 = vst [vmem:[%s733_s26] sm:$0xff] %v9593_v4  ;;  %v9596_v58 = vmax.f32 %v9590_v6, 0.0  ;;  %v9582_v9 = vadd.f32 %v10405_v34, %v9581_v55 }
 0x81f   : > { %9600 = vst [vmem:[%s733_s26 + $0x18] sm:$0xff] %v9596_v58  ;;  %v9594_v41 = vmax.f32 %v9582_v9, 0.0 }
 0x821   : > { %9598 = vst [vmem:[%s733_s26 + $0x8] sm:$0xff] %v9594_v41 }
 0x822   : > { %11164 = shalt.err (!%p11161_p5)
}
 0x823   : > { %s11165_s25 = scalar_lea.hbm %s16068_s21, 512  ;;  %s11169_s14 = scalar_lea.hbm %s16120_s9, 1024 }
 0x824   : > { %p11166_p7 = scmp.ne.s32.totalorder %s16068_s21, %s11165_s25  ;;  %p11170_p12 = scmp.lt.s32.totalorder %s16068_s21, %s16120_s9 }
 0x825   : > { %p11171_p13 = scmp.lt.s32.totalorder %s11169_s14, %s11165_s25 }
 0x826   : > { %p11167_p10 = pnand %p11166_p7, %p11306_p6 }
 0x827   : > { %p11172_p0 = por %p11171_p13, %p11170_p12 }
 0x828   : > { %p11168_p11 = pneg %p11167_p10 }
 0x82a   : > { %p11173_p1 = pnand %p11172_p0, %p11168_p11 }
 0x82c   : > { %11176 = shalt.err (!%p11173_p1)
}
 0x82d   : > { %s11216_s23 = smov 128   ;;  %s11217_s27 = smov 8  }
 0x82e   : > { %10575 = dma.vmem_to_hbm [thread:$0]  (%p11306_p6), %s16063_s28, 512, %s16068_s21, %s9602_s22, %s11216_s23, %s11216_s23, %s11217_s27  }
 0x82f PF: > { %s9630_s24 = sand.u32 1, %s11199_s30   ;;  %p10578_p2 = pnand %p9685_p9, %p11310_p8 }
 0x830   : > { %s9631_s25 = scalar_lea.sflag [#allocation4], %s9630_s24 }
 0x831   : > { %p10579_p3 = pneg %p10578_p2 }
 0x833   : > { %11194 = dma.done.wait (%p10579_p3), %s9631_s25, 512  }
 0x834   : > { %11196 = vsyncadd (%p10579_p3), %s9631_s25, 4294966784  ;;  %p19_p4 = scmp.ge.s32.totalorder %s11291_s15, 4   ;;  %s16871_s30 = smov %s11203_s10 }
 0x835   : > { %s16872_s10 = smov %s11207_s11  ;;  %s16873_s11 = smov %s11304_s18 }
 0x836   : > { %s16874_s12 = smov %s11291_s15  ;;  %21 = sbr.rel (!%p19_p4) target bundleno = 3 (0x3), region = 127 }
 0x83b   :  { %9636 = vsyncpa [#allocation4], 1 }
 0x83c   :  { %9638 = vsyncpa [#allocation4 + $0x1], 1 }

</bundles_post_ra>
